<compile_context>
chip_gen: v6e
topology: v6e:2x2x1
jax: 0.10.0
libtpu: 0.0.40
codegen_flags: <defaults>
</compile_context>

<pallas_src>
import jax
import jax.numpy as jnp
from jax.experimental import pallas as pl
from jax.experimental.pallas import tpu as pltpu

D_MODEL = 50
NHEAD = 10
HEAD_DIM = D_MODEL // NHEAD          # 5
HEAD_PAD = 8                         # head_dim padded to 8 -> aligned lane slices
CTX_COLS = NHEAD * HEAD_PAD          # 80  (concatenated per-head outputs)
E_PAD = 128                          # embed dim padded to one full lane tile
QKV_W = 3 * E_PAD                    # 384: q/k/v each on a 128-aligned lane slab
DIM_FF = 2048
LN_EPS = 1e-5
_TARGET_ROWS = 512                   # ~512 matmul rows per grid step (fits default VMEM)


def encoder_layer_kernel(
    x_ref,      # (B, L, E_PAD) f32   padded input slab (cols >= 50 are zero)
    wqkv_ref,   # (E_PAD, QKV_W) bf16 fused Q|K|V projection, head-major, Q pre-scaled
    bqkv_ref,   # (1, QKV_W) f32
    wo_ref,     # (CTX_COLS, E_PAD) bf16  out projection, head-major rows
    bo_ref,     # (1, E_PAD) f32
    w1_ref,     # (E_PAD, DIM_FF) bf16
    b1_ref,     # (1, DIM_FF) f32
    w2_ref,     # (DIM_FF, E_PAD) bf16
    b2_ref,     # (1, E_PAD) f32
    g1_ref,     # (1, E_PAD) f32  norm1.weight (zero in padded cols)
    be1_ref,    # (1, E_PAD) f32  norm1.bias
    g2_ref,     # (1, E_PAD) f32  norm2.weight
    be2_ref,    # (1, E_PAD) f32  norm2.bias
    o_ref,      # (B, L, E_PAD) f32
    ctx_ref,    # (B, L, CTX_COLS) f32  VMEM scratch: packed per-head attention outputs
):
    B, L, Ep = x_ref.shape
    R = B * L

    x = x_ref[...].reshape(R, Ep)                       # (R, 128) f32; padded cols are 0
    xb = x.astype(jnp.bfloat16)

    # ---- fused QKV projection: one bf16 MXU dot, f32 accumulation -------------------
    qkv = jnp.dot(xb, wqkv_ref[...], preferred_element_type=jnp.float32) + bqkv_ref[...]
    q = qkv[:, 0:E_PAD].astype(jnp.bfloat16).reshape(B, L, E_PAD)          # tile-aligned
    k = qkv[:, E_PAD:2 * E_PAD].astype(jnp.bfloat16).reshape(B, L, E_PAD)
    v = qkv[:, 2 * E_PAD:3 * E_PAD].astype(jnp.bfloat16).reshape(B, L, E_PAD)

    # ---- per-head attention, batched over B; outputs packed into a dense (R,80) slab
    for h in range(NHEAD):                              # static unroll, NHEAD = 10
        lo = h * HEAD_PAD
        qh = q[:, :, lo:lo + HEAD_PAD]                  # (B, L, 8) aligned lane slice
        kh = k[:, :, lo:lo + HEAD_PAD]
        vh = v[:, :, lo:lo + HEAD_PAD]
        s = jnp.einsum("bqd,bkd->bqk", qh, kh,
                       preferred_element_type=jnp.float32)                # (B, L, L)
        s = s - jnp.max(s, axis=-1, keepdims=True)
        p = jnp.exp(s)
        p = p * pl.reciprocal(jnp.sum(p, axis=-1, keepdims=True), approx=True)
        oh = jnp.einsum("bqk,bkd->bqd", p.astype(jnp.bfloat16), vh,
                        preferred_element_type=jnp.float32)               # (B, L, 8)
        ctx_ref[:, :, lo:lo + HEAD_PAD] = oh            # masked store at 8-lane offset

    # ---- single K=80 out-projection dot ---------------------------------------------
    ctx = ctx_ref[...].reshape(R, CTX_COLS).astype(jnp.bfloat16)
    attn = jnp.dot(ctx, wo_ref[...], preferred_element_type=jnp.float32) + bo_ref[...]

    # ---- LayerNorm over the 50 real features (padded cols stay exactly zero) --------
    col = jax.lax.broadcasted_iota(jnp.int32, (1, Ep), 1)
    mask = (col < D_MODEL).astype(jnp.float32)
    inv_n = 1.0 / D_MODEL

    def layer_norm(y, g, b):
        mu = jnp.sum(y, axis=-1, keepdims=True) * inv_n     # padded cols contribute 0
        yc = (y - mu) * mask
        var = jnp.sum(yc * yc, axis=-1, keepdims=True) * inv_n
        return yc * jax.lax.rsqrt(var + LN_EPS) * g + b

    x1 = layer_norm(x + attn, g1_ref[...], be1_ref[...])                  # (R, 128)

    # ---- feedforward: Linear -> ReLU -> Linear (bf16 weights, f32 accumulation) -----
    h1 = jnp.dot(x1.astype(jnp.bfloat16), w1_ref[...],
                 preferred_element_type=jnp.float32) + b1_ref[...]        # (R, 2048)
    h1 = jnp.maximum(h1, 0.0)
    ff = jnp.dot(h1.astype(jnp.bfloat16), w2_ref[...],
                 preferred_element_type=jnp.float32) + b2_ref[...]        # (R, 128)

    x2 = layer_norm(x1 + ff, g2_ref[...], be2_ref[...])
    o_ref[...] = x2.reshape(B, L, Ep)


def _prepare_params(params):
    """Transpose / head-reorder / zero-pad / bf16-cast all weights once (plain XLA)."""
    (w_in, b_in, w_out, b_out, w1, b1, w2, b2, g1, be1, g2, be2) = params
    E, H, Dh, Dp = D_MODEL, NHEAD, HEAD_DIM, HEAD_PAD
    f32, bf16 = jnp.float32, jnp.bfloat16

    b_in = b_in.reshape(3 * E)
    scale = 1.0 / float(Dh) ** 0.5

    def head_major(w, b, scl):
        # w: (H*Dh, E) out-major, b: (H*Dh,)  ->  (E_PAD, E_PAD) weight slab, (1, E_PAD) bias
        w = (w.astype(f32) * scl).reshape(H, Dh, E)
        w = jnp.pad(w, ((0, 0), (0, Dp - Dh), (0, E_PAD - E)))         # (H, 8, 128)
        wt = w.reshape(H * Dp, E_PAD).T                                # (128, 80)
        wt = jnp.pad(wt, ((0, 0), (0, E_PAD - H * Dp)))                # (128, 128)
        b = (b.astype(f32) * scl).reshape(H, Dh)
        b = jnp.pad(b, ((0, 0), (0, Dp - Dh))).reshape(1, H * Dp)
        b = jnp.pad(b, ((0, 0), (0, E_PAD - H * Dp)))                  # (1, 128)
        return wt, b

    wq_t, bq = head_major(w_in[:E], b_in[:E], scale)                   # scale folded into Q
    wk_t, bk = head_major(w_in[E:2 * E], b_in[E:2 * E], 1.0)
    wv_t, bv = head_major(w_in[2 * E:], b_in[2 * E:], 1.0)
    wqkv = jnp.concatenate([wq_t, wk_t, wv_t], axis=1).astype(bf16)    # (128, 384)
    bqkv = jnp.concatenate([bq, bk, bv], axis=1)                       # (1, 384) f32

    # out projection: rows head-major (head_dim padded), cols padded to E_PAD
    wo = w_out.T.astype(f32).reshape(H, Dh, E)                         # [h, d, out_feature]
    wo = jnp.pad(wo, ((0, 0), (0, Dp - Dh), (0, E_PAD - E)))
    wo = wo.reshape(H * Dp, E_PAD).astype(bf16)                        # (80, 128)
    bo = jnp.pad(b_out.reshape(1, E).astype(f32), ((0, 0), (0, E_PAD - E)))

    # feedforward weights: pre-transposed, zero-padded, bf16 (f32 accumulation in-kernel)
    w1_t = jnp.pad(w1.T.astype(f32), ((0, E_PAD - E), (0, 0))).astype(bf16)   # (128, 2048)
    b1_p = b1.reshape(1, DIM_FF).astype(f32)
    w2_t = jnp.pad(w2.T.astype(f32), ((0, 0), (0, E_PAD - E))).astype(bf16)   # (2048, 128)
    b2_p = jnp.pad(b2.reshape(1, E).astype(f32), ((0, 0), (0, E_PAD - E)))

    pad_vec = lambda a: jnp.pad(a.reshape(1, E).astype(f32), ((0, 0), (0, E_PAD - E)))
    return (wqkv, bqkv, wo, bo, w1_t, b1_p, w2_t, b2_p,
            pad_vec(g1), pad_vec(be1), pad_vec(g2), pad_vec(be2))


def transformer_encoder_layer(src, params, block_batch=None):
    """src: (L, N, E) float32, matching torch nn.MultiheadAttention (seq, batch, embed)."""
    L, N, E = src.shape
    assert E == D_MODEL

    if block_batch is None:
        rows = max(1, _TARGET_ROWS // L)
        if N <= rows:
            block_batch = N                      # single (or few) fat blocks
        else:
            # prefer a block size that divides N (no fully-padded batch rows computed)
            div = max(d for d in range(1, rows + 1) if N % d == 0)
            block_batch = div if div >= max(1, rows // 2) else rows
    B = block_batch
    n_blocks = pl.cdiv(N, B)
    N_pad = n_blocks * B

    # TODO(synk): the (L,N,E)->(N,L,E) transpose + pad here (and the inverse after the
    # kernel) are extra HBM passes for very large N; kept host-side because the in-kernel
    # alternative needs a middle-dim transpose Mosaic handles poorly.
    x = jnp.transpose(src, (1, 0, 2))                            # (N, L, E)
    x = jnp.pad(x, ((0, N_pad - N), (0, 0), (0, E_PAD - E)))     # (N_pad, L, 128)

    prep = _prepare_params(params)

    def full_spec(a):
        nd = a.ndim
        return pl.BlockSpec(a.shape, lambda n: (0,) * nd)        # grid-invariant block

    in_specs = ([pl.BlockSpec((B, L, E_PAD), lambda n: (n, 0, 0))]
                + [full_spec(a) for a in prep])
    out_specs = pl.BlockSpec((B, L, E_PAD), lambda n: (n, 0, 0))

    out = pl.pallas_call(
        encoder_layer_kernel,
        out_shape=jax.ShapeDtypeStruct((N_pad, L, E_PAD), jnp.float32),
        grid=(n_blocks,),
        in_specs=in_specs,
        out_specs=out_specs,
        scratch_shapes=[pltpu.VMEM((B, L, CTX_COLS), jnp.float32)],
        compiler_params=pltpu.CompilerParams(dimension_semantics=("parallel",)),
    )(x, *prep)

    out = out[:N, :, :E]
    return jnp.transpose(out, (1, 0, 2))                         # back to (L, N, E)


# ---------------- pure-JAX reference (for sanity check) ----------------
def reference(src, params):
    (w_in, b_in, w_out, b_out, w1, b1, w2, b2, g1, be1, g2, be2) = params
    L, N, E = src.shape
    x = jnp.transpose(src, (1, 0, 2))              # (N, L, E)

    def ln(y, g, b):
        mu = jnp.mean(y, axis=-1, keepdims=True)
        var = jnp.mean((y - mu) ** 2, axis=-1, keepdims=True)
        return (y - mu) * jax.lax.rsqrt(var + LN_EPS) * g + b

    qkv = jnp.einsum("nle,fe->nlf", x, w_in) + b_in           # (N, L, 3E)
    q, k, v = jnp.split(qkv, 3, axis=-1)
    q = q.reshape(N, L, NHEAD, HEAD_DIM) / (HEAD_DIM ** 0.5)
    k = k.reshape(N, L, NHEAD, HEAD_DIM)
    v = v.reshape(N, L, NHEAD, HEAD_DIM)
    s = jnp.einsum("nqhd,nkhd->nhqk", q, k)
    p = jax.nn.softmax(s, axis=-1)
    a = jnp.einsum("nhqk,nkhd->nqhd", p, v).reshape(N, L, E)
    a = jnp.einsum("nle,fe->nlf", a, w_out) + b_out
    x1 = ln(x + a, g1, be1)
    h = jax.nn.relu(jnp.einsum("nle,fe->nlf", x1, w1) + b1)
    ff = jnp.einsum("nlf,ef->nle", h, w2) + b2
    x2 = ln(x1 + ff, g2, be2)
    return jnp.transpose(x2, (1, 0, 2))


def init_params(key):
    ks = jax.random.split(key, 6)
    f32 = jnp.float32
    w_in = 0.05 * jax.random.normal(ks[0], (3 * D_MODEL, D_MODEL), f32)
    b_in = jnp.zeros((1, 3 * D_MODEL), f32)
    w_out = 0.05 * jax.random.normal(ks[1], (D_MODEL, D_MODEL), f32)
    b_out = 0.01 * jax.random.normal(ks[2], (1, D_MODEL), f32)
    w1 = 0.05 * jax.random.normal(ks[3], (DIM_FF, D_MODEL), f32)
    b1 = jnp.zeros((1, DIM_FF), f32)
    w2 = 0.05 * jax.random.normal(ks[4], (D_MODEL, DIM_FF), f32)
    b2 = 0.01 * jax.random.normal(ks[5], (1, D_MODEL), f32)
    g1 = jnp.ones((1, D_MODEL), f32)
    be1 = jnp.zeros((1, D_MODEL), f32)
    g2 = jnp.ones((1, D_MODEL), f32)
    be2 = jnp.zeros((1, D_MODEL), f32)
    return (w_in, b_in, w_out, b_out, w1, b1, w2, b2, g1, be1, g2, be2)


if __name__ == "__main__":
    key = jax.random.PRNGKey(0)
    k_x, k_p = jax.random.split(key)

    L, N = 8, 8                                    # seq=8, batch=8, embed=d_model=50
    src = jax.random.normal(k_x, (L, N, D_MODEL), jnp.float32)
    params = init_params(k_p)

    fwd = jax.jit(transformer_encoder_layer)
    out = jax.block_until_ready(fwd(src, params))

    with jax.default_matmul_precision("highest"):
        ref = jax.block_until_ready(reference(src, params))

    assert out.shape == (L, N, D_MODEL)
    max_err = float(jnp.max(jnp.abs(out - ref)))
    # bf16 MXU weights/activations (f32 accumulation) vs. an f32 "highest" reference:
    # errors are in the low-1e-2 range at worst — documented accuracy tradeoff.
    assert bool(jnp.allclose(out, ref, atol=2e-2, rtol=2e-2)), (
        f"mismatch vs reference, max abs err {max_err}")

    print("KERNEL_OK")
</pallas_src>

<mosaic_0001>
module attributes {stable_mosaic.version = 11 : i64} {
  func.func @encoder_layer_kernel(%arg0: i32, %arg1: memref<8x8x128xf32, #tpu.memory_space<vmem>>, %arg2: memref<128x384xbf16, #tpu.memory_space<vmem>>, %arg3: memref<1x384xf32, #tpu.memory_space<vmem>>, %arg4: memref<80x128xbf16, #tpu.memory_space<vmem>>, %arg5: memref<1x128xf32, #tpu.memory_space<vmem>>, %arg6: memref<128x2048xbf16, #tpu.memory_space<vmem>>, %arg7: memref<1x2048xf32, #tpu.memory_space<vmem>>, %arg8: memref<2048x128xbf16, #tpu.memory_space<vmem>>, %arg9: memref<1x128xf32, #tpu.memory_space<vmem>>, %arg10: memref<1x128xf32, #tpu.memory_space<vmem>>, %arg11: memref<1x128xf32, #tpu.memory_space<vmem>>, %arg12: memref<1x128xf32, #tpu.memory_space<vmem>>, %arg13: memref<1x128xf32, #tpu.memory_space<vmem>>, %arg14: memref<8x8x128xf32, #tpu.memory_space<vmem>>, %arg15: memref<8x8x80xf32, #tpu.memory_space<vmem>>) attributes {dimension_semantics = [#tpu.dimension_semantics<parallel>], iteration_bounds = array<i64: 1>, scalar_prefetch = 0 : i64, scratch_operands = 1 : i64, tpu.core_type = #tpu.core_type<tc>, window_params = [{transform_indices = @transform_0, window_bounds = array<i64: 8, 8, 128>}, {pipeline_mode = #tpu.pipeline_mode<synchronous>, transform_indices = @transform_1, window_bounds = array<i64: 128, 384>}, {pipeline_mode = #tpu.pipeline_mode<synchronous>, transform_indices = @transform_2, window_bounds = array<i64: 1, 384>}, {pipeline_mode = #tpu.pipeline_mode<synchronous>, transform_indices = @transform_3, window_bounds = array<i64: 80, 128>}, {pipeline_mode = #tpu.pipeline_mode<synchronous>, transform_indices = @transform_4, window_bounds = array<i64: 1, 128>}, {pipeline_mode = #tpu.pipeline_mode<synchronous>, transform_indices = @transform_5, window_bounds = array<i64: 128, 2048>}, {pipeline_mode = #tpu.pipeline_mode<synchronous>, transform_indices = @transform_6, window_bounds = array<i64: 1, 2048>}, {pipeline_mode = #tpu.pipeline_mode<synchronous>, transform_indices = @transform_7, window_bounds = array<i64: 2048, 128>}, {pipeline_mode = #tpu.pipeline_mode<synchronous>, transform_indices = @transform_8, window_bounds = array<i64: 1, 128>}, {pipeline_mode = #tpu.pipeline_mode<synchronous>, transform_indices = @transform_9, window_bounds = array<i64: 1, 128>}, {pipeline_mode = #tpu.pipeline_mode<synchronous>, transform_indices = @transform_10, window_bounds = array<i64: 1, 128>}, {pipeline_mode = #tpu.pipeline_mode<synchronous>, transform_indices = @transform_11, window_bounds = array<i64: 1, 128>}, {pipeline_mode = #tpu.pipeline_mode<synchronous>, transform_indices = @transform_12, window_bounds = array<i64: 1, 128>}, {transform_indices = @transform_13, window_bounds = array<i64: 8, 8, 128>}]} {
    %c0 = arith.constant 0 : index
    %c0_0 = arith.constant 0 : index
    %c0_1 = arith.constant 0 : index
    %0 = vector.load %arg1[%c0, %c0_0, %c0_1] : memref<8x8x128xf32, #tpu.memory_space<vmem>>, vector<8x8x128xf32>
    %1 = vector.shape_cast %0 : vector<8x8x128xf32> to vector<64x128xf32>
    %2 = arith.truncf %1 : vector<64x128xf32> to vector<64x128xbf16>
    %c0_2 = arith.constant 0 : index
    %c0_3 = arith.constant 0 : index
    %3 = vector.load %arg2[%c0_2, %c0_3] : memref<128x384xbf16, #tpu.memory_space<vmem>>, vector<128x384xbf16>
    %cst = arith.constant dense<0.000000e+00> : vector<64x384xf32>
    %4 = tpu.matmul %2, %3, %cst {dimension_numbers = #tpu.dot_dimension_numbers<[1], [0], [0], [1], [0, 0, 1, 1], [], []>} : vector<64x128xbf16>, vector<128x384xbf16>, vector<64x384xf32> -> vector<64x384xf32>
    %c0_4 = arith.constant 0 : index
    %c0_5 = arith.constant 0 : index
    %5 = vector.load %arg3[%c0_4, %c0_5] : memref<1x384xf32, #tpu.memory_space<vmem>>, vector<1x384xf32>
    %6 = vector.broadcast %5 : vector<1x384xf32> to vector<64x384xf32>
    %7 = arith.addf %4, %6 : vector<64x384xf32>
    %8 = vector.extract_strided_slice %7 {offsets = [0, 0], sizes = [64, 128], strides = [1, 1]} : vector<64x384xf32> to vector<64x128xf32>
    %9 = arith.truncf %8 : vector<64x128xf32> to vector<64x128xbf16>
    %10 = vector.shape_cast %9 : vector<64x128xbf16> to vector<8x8x128xbf16>
    %11 = vector.extract_strided_slice %7 {offsets = [0, 128], sizes = [64, 128], strides = [1, 1]} : vector<64x384xf32> to vector<64x128xf32>
    %12 = arith.truncf %11 : vector<64x128xf32> to vector<64x128xbf16>
    %13 = vector.shape_cast %12 : vector<64x128xbf16> to vector<8x8x128xbf16>
    %14 = vector.extract_strided_slice %7 {offsets = [0, 256], sizes = [64, 128], strides = [1, 1]} : vector<64x384xf32> to vector<64x128xf32>
    %15 = arith.truncf %14 : vector<64x128xf32> to vector<64x128xbf16>
    %16 = vector.shape_cast %15 : vector<64x128xbf16> to vector<8x8x128xbf16>
    %17 = vector.extract_strided_slice %10 {offsets = [0, 0, 0], sizes = [8, 8, 8], strides = [1, 1, 1]} : vector<8x8x128xbf16> to vector<8x8x8xbf16>
    %18 = vector.extract_strided_slice %13 {offsets = [0, 0, 0], sizes = [8, 8, 8], strides = [1, 1, 1]} : vector<8x8x128xbf16> to vector<8x8x8xbf16>
    %19 = vector.extract_strided_slice %16 {offsets = [0, 0, 0], sizes = [8, 8, 8], strides = [1, 1, 1]} : vector<8x8x128xbf16> to vector<8x8x8xbf16>
    "tpu.trace_start"() <{level = 10 : i32, message = "bqd,bkd->bqk"}> : () -> ()
    %cst_6 = arith.constant dense<0.000000e+00> : vector<8x8x8xf32>
    %20 = tpu.matmul %17, %18, %cst_6 {dimension_numbers = #tpu.dot_dimension_numbers<[2], [2], [1], [1], [0, 0, 0, 1, 1, 1], [0], [0]>} : vector<8x8x8xbf16>, vector<8x8x8xbf16>, vector<8x8x8xf32> -> vector<8x8x8xf32>
    "tpu.trace_stop"() : () -> ()
    %cst_7 = arith.constant dense<0xFF800000> : vector<8x8xf32>
    %21 = vector.multi_reduction <maximumf>, %20, %cst_7 [2] : vector<8x8x8xf32> to vector<8x8xf32>
    %22 = vector.shape_cast %21 : vector<8x8xf32> to vector<8x8x1xf32>
    %23 = vector.broadcast %22 : vector<8x8x1xf32> to vector<8x8x8xf32>
    %24 = arith.subf %20, %23 : vector<8x8x8xf32>
    %25 = math.exp %24 : vector<8x8x8xf32>
    %cst_8 = arith.constant dense<0.000000e+00> : vector<8x8xf32>
    %26 = vector.multi_reduction <add>, %25, %cst_8 [2] : vector<8x8x8xf32> to vector<8x8xf32>
    %27 = vector.shape_cast %26 : vector<8x8xf32> to vector<8x8x1xf32>
    %28 = tpu.reciprocal %27 {approx = true} : vector<8x8x1xf32> -> vector<8x8x1xf32>
    %29 = vector.broadcast %28 : vector<8x8x1xf32> to vector<8x8x8xf32>
    %30 = arith.mulf %25, %29 : vector<8x8x8xf32>
    %31 = arith.truncf %30 : vector<8x8x8xf32> to vector<8x8x8xbf16>
    "tpu.trace_start"() <{level = 10 : i32, message = "bqk,bkd->bqd"}> : () -> ()
    %cst_9 = arith.constant dense<0.000000e+00> : vector<8x8x8xf32>
    %32 = tpu.matmul %31, %19, %cst_9 {dimension_numbers = #tpu.dot_dimension_numbers<[2], [1], [1], [2], [0, 0, 0, 1, 1, 2], [0], [0]>} : vector<8x8x8xbf16>, vector<8x8x8xbf16>, vector<8x8x8xf32> -> vector<8x8x8xf32>
    "tpu.trace_stop"() : () -> ()
    %c0_10 = arith.constant 0 : index
    %c0_11 = arith.constant 0 : index
    %c0_12 = arith.constant 0 : index
    %33 = vector.load %arg15[%c0_10, %c0_11, %c0_12] : memref<8x8x80xf32, #tpu.memory_space<vmem>>, vector<8x8x8xf32>
    tpu.vector_store %arg15[%c0_10, %c0_11, %c0_12], %32 {strides = array<i32>} : memref<8x8x80xf32, #tpu.memory_space<vmem>>, vector<8x8x8xf32>,
    %34 = vector.extract_strided_slice %10 {offsets = [0, 0, 8], sizes = [8, 8, 8], strides = [1, 1, 1]} : vector<8x8x128xbf16> to vector<8x8x8xbf16>
    %35 = vector.extract_strided_slice %13 {offsets = [0, 0, 8], sizes = [8, 8, 8], strides = [1, 1, 1]} : vector<8x8x128xbf16> to vector<8x8x8xbf16>
    %36 = vector.extract_strided_slice %16 {offsets = [0, 0, 8], sizes = [8, 8, 8], strides = [1, 1, 1]} : vector<8x8x128xbf16> to vector<8x8x8xbf16>
    "tpu.trace_start"() <{level = 10 : i32, message = "bqd,bkd->bqk"}> : () -> ()
    %cst_13 = arith.constant dense<0.000000e+00> : vector<8x8x8xf32>
    %37 = tpu.matmul %34, %35, %cst_13 {dimension_numbers = #tpu.dot_dimension_numbers<[2], [2], [1], [1], [0, 0, 0, 1, 1, 1], [0], [0]>} : vector<8x8x8xbf16>, vector<8x8x8xbf16>, vector<8x8x8xf32> -> vector<8x8x8xf32>
    "tpu.trace_stop"() : () -> ()
    %cst_14 = arith.constant dense<0xFF800000> : vector<8x8xf32>
    %38 = vector.multi_reduction <maximumf>, %37, %cst_14 [2] : vector<8x8x8xf32> to vector<8x8xf32>
    %39 = vector.shape_cast %38 : vector<8x8xf32> to vector<8x8x1xf32>
    %40 = vector.broadcast %39 : vector<8x8x1xf32> to vector<8x8x8xf32>
    %41 = arith.subf %37, %40 : vector<8x8x8xf32>
    %42 = math.exp %41 : vector<8x8x8xf32>
    %cst_15 = arith.constant dense<0.000000e+00> : vector<8x8xf32>
    %43 = vector.multi_reduction <add>, %42, %cst_15 [2] : vector<8x8x8xf32> to vector<8x8xf32>
    %44 = vector.shape_cast %43 : vector<8x8xf32> to vector<8x8x1xf32>
    %45 = tpu.reciprocal %44 {approx = true} : vector<8x8x1xf32> -> vector<8x8x1xf32>
    %46 = vector.broadcast %45 : vector<8x8x1xf32> to vector<8x8x8xf32>
    %47 = arith.mulf %42, %46 : vector<8x8x8xf32>
    %48 = arith.truncf %47 : vector<8x8x8xf32> to vector<8x8x8xbf16>
    "tpu.trace_start"() <{level = 10 : i32, message = "bqk,bkd->bqd"}> : () -> ()
    %cst_16 = arith.constant dense<0.000000e+00> : vector<8x8x8xf32>
    %49 = tpu.matmul %48, %36, %cst_16 {dimension_numbers = #tpu.dot_dimension_numbers<[2], [1], [1], [2], [0, 0, 0, 1, 1, 2], [0], [0]>} : vector<8x8x8xbf16>, vector<8x8x8xbf16>, vector<8x8x8xf32> -> vector<8x8x8xf32>
    "tpu.trace_stop"() : () -> ()
    %c0_17 = arith.constant 0 : index
    %c0_18 = arith.constant 0 : index
    %c8 = arith.constant 8 : index
    %50 = vector.load %arg15[%c0_17, %c0_18, %c8] : memref<8x8x80xf32, #tpu.memory_space<vmem>>, vector<8x8x8xf32>
    tpu.vector_store %arg15[%c0_17, %c0_18, %c8], %49 {strides = array<i32>} : memref<8x8x80xf32, #tpu.memory_space<vmem>>, vector<8x8x8xf32>,
    %51 = vector.extract_strided_slice %10 {offsets = [0, 0, 16], sizes = [8, 8, 8], strides = [1, 1, 1]} : vector<8x8x128xbf16> to vector<8x8x8xbf16>
    %52 = vector.extract_strided_slice %13 {offsets = [0, 0, 16], sizes = [8, 8, 8], strides = [1, 1, 1]} : vector<8x8x128xbf16> to vector<8x8x8xbf16>
    %53 = vector.extract_strided_slice %16 {offsets = [0, 0, 16], sizes = [8, 8, 8], strides = [1, 1, 1]} : vector<8x8x128xbf16> to vector<8x8x8xbf16>
    "tpu.trace_start"() <{level = 10 : i32, message = "bqd,bkd->bqk"}> : () -> ()
    %cst_19 = arith.constant dense<0.000000e+00> : vector<8x8x8xf32>
    %54 = tpu.matmul %51, %52, %cst_19 {dimension_numbers = #tpu.dot_dimension_numbers<[2], [2], [1], [1], [0, 0, 0, 1, 1, 1], [0], [0]>} : vector<8x8x8xbf16>, vector<8x8x8xbf16>, vector<8x8x8xf32> -> vector<8x8x8xf32>
    "tpu.trace_stop"() : () -> ()
    %cst_20 = arith.constant dense<0xFF800000> : vector<8x8xf32>
    %55 = vector.multi_reduction <maximumf>, %54, %cst_20 [2] : vector<8x8x8xf32> to vector<8x8xf32>
    %56 = vector.shape_cast %55 : vector<8x8xf32> to vector<8x8x1xf32>
    %57 = vector.broadcast %56 : vector<8x8x1xf32> to vector<8x8x8xf32>
    %58 = arith.subf %54, %57 : vector<8x8x8xf32>
    %59 = math.exp %58 : vector<8x8x8xf32>
    %cst_21 = arith.constant dense<0.000000e+00> : vector<8x8xf32>
    %60 = vector.multi_reduction <add>, %59, %cst_21 [2] : vector<8x8x8xf32> to vector<8x8xf32>
    %61 = vector.shape_cast %60 : vector<8x8xf32> to vector<8x8x1xf32>
    %62 = tpu.reciprocal %61 {approx = true} : vector<8x8x1xf32> -> vector<8x8x1xf32>
    %63 = vector.broadcast %62 : vector<8x8x1xf32> to vector<8x8x8xf32>
    %64 = arith.mulf %59, %63 : vector<8x8x8xf32>
    %65 = arith.truncf %64 : vector<8x8x8xf32> to vector<8x8x8xbf16>
    "tpu.trace_start"() <{level = 10 : i32, message = "bqk,bkd->bqd"}> : () -> ()
    %cst_22 = arith.constant dense<0.000000e+00> : vector<8x8x8xf32>
    %66 = tpu.matmul %65, %53, %cst_22 {dimension_numbers = #tpu.dot_dimension_numbers<[2], [1], [1], [2], [0, 0, 0, 1, 1, 2], [0], [0]>} : vector<8x8x8xbf16>, vector<8x8x8xbf16>, vector<8x8x8xf32> -> vector<8x8x8xf32>
    "tpu.trace_stop"() : () -> ()
    %c0_23 = arith.constant 0 : index
    %c0_24 = arith.constant 0 : index
    %c16 = arith.constant 16 : index
    %67 = vector.load %arg15[%c0_23, %c0_24, %c16] : memref<8x8x80xf32, #tpu.memory_space<vmem>>, vector<8x8x8xf32>
    tpu.vector_store %arg15[%c0_23, %c0_24, %c16], %66 {strides = array<i32>} : memref<8x8x80xf32, #tpu.memory_space<vmem>>, vector<8x8x8xf32>,
    %68 = vector.extract_strided_slice %10 {offsets = [0, 0, 24], sizes = [8, 8, 8], strides = [1, 1, 1]} : vector<8x8x128xbf16> to vector<8x8x8xbf16>
    %69 = vector.extract_strided_slice %13 {offsets = [0, 0, 24], sizes = [8, 8, 8], strides = [1, 1, 1]} : vector<8x8x128xbf16> to vector<8x8x8xbf16>
    %70 = vector.extract_strided_slice %16 {offsets = [0, 0, 24], sizes = [8, 8, 8], strides = [1, 1, 1]} : vector<8x8x128xbf16> to vector<8x8x8xbf16>
    "tpu.trace_start"() <{level = 10 : i32, message = "bqd,bkd->bqk"}> : () -> ()
    %cst_25 = arith.constant dense<0.000000e+00> : vector<8x8x8xf32>
    %71 = tpu.matmul %68, %69, %cst_25 {dimension_numbers = #tpu.dot_dimension_numbers<[2], [2], [1], [1], [0, 0, 0, 1, 1, 1], [0], [0]>} : vector<8x8x8xbf16>, vector<8x8x8xbf16>, vector<8x8x8xf32> -> vector<8x8x8xf32>
    "tpu.trace_stop"() : () -> ()
    %cst_26 = arith.constant dense<0xFF800000> : vector<8x8xf32>
    %72 = vector.multi_reduction <maximumf>, %71, %cst_26 [2] : vector<8x8x8xf32> to vector<8x8xf32>
    %73 = vector.shape_cast %72 : vector<8x8xf32> to vector<8x8x1xf32>
    %74 = vector.broadcast %73 : vector<8x8x1xf32> to vector<8x8x8xf32>
    %75 = arith.subf %71, %74 : vector<8x8x8xf32>
    %76 = math.exp %75 : vector<8x8x8xf32>
    %cst_27 = arith.constant dense<0.000000e+00> : vector<8x8xf32>
    %77 = vector.multi_reduction <add>, %76, %cst_27 [2] : vector<8x8x8xf32> to vector<8x8xf32>
    %78 = vector.shape_cast %77 : vector<8x8xf32> to vector<8x8x1xf32>
    %79 = tpu.reciprocal %78 {approx = true} : vector<8x8x1xf32> -> vector<8x8x1xf32>
    %80 = vector.broadcast %79 : vector<8x8x1xf32> to vector<8x8x8xf32>
    %81 = arith.mulf %76, %80 : vector<8x8x8xf32>
    %82 = arith.truncf %81 : vector<8x8x8xf32> to vector<8x8x8xbf16>
    "tpu.trace_start"() <{level = 10 : i32, message = "bqk,bkd->bqd"}> : () -> ()
    %cst_28 = arith.constant dense<0.000000e+00> : vector<8x8x8xf32>
    %83 = tpu.matmul %82, %70, %cst_28 {dimension_numbers = #tpu.dot_dimension_numbers<[2], [1], [1], [2], [0, 0, 0, 1, 1, 2], [0], [0]>} : vector<8x8x8xbf16>, vector<8x8x8xbf16>, vector<8x8x8xf32> -> vector<8x8x8xf32>
    "tpu.trace_stop"() : () -> ()
    %c0_29 = arith.constant 0 : index
    %c0_30 = arith.constant 0 : index
    %c24 = arith.constant 24 : index
    %84 = vector.load %arg15[%c0_29, %c0_30, %c24] : memref<8x8x80xf32, #tpu.memory_space<vmem>>, vector<8x8x8xf32>
    tpu.vector_store %arg15[%c0_29, %c0_30, %c24], %83 {strides = array<i32>} : memref<8x8x80xf32, #tpu.memory_space<vmem>>, vector<8x8x8xf32>,
    %85 = vector.extract_strided_slice %10 {offsets = [0, 0, 32], sizes = [8, 8, 8], strides = [1, 1, 1]} : vector<8x8x128xbf16> to vector<8x8x8xbf16>
    %86 = vector.extract_strided_slice %13 {offsets = [0, 0, 32], sizes = [8, 8, 8], strides = [1, 1, 1]} : vector<8x8x128xbf16> to vector<8x8x8xbf16>
    %87 = vector.extract_strided_slice %16 {offsets = [0, 0, 32], sizes = [8, 8, 8], strides = [1, 1, 1]} : vector<8x8x128xbf16> to vector<8x8x8xbf16>
    "tpu.trace_start"() <{level = 10 : i32, message = "bqd,bkd->bqk"}> : () -> ()
    %cst_31 = arith.constant dense<0.000000e+00> : vector<8x8x8xf32>
    %88 = tpu.matmul %85, %86, %cst_31 {dimension_numbers = #tpu.dot_dimension_numbers<[2], [2], [1], [1], [0, 0, 0, 1, 1, 1], [0], [0]>} : vector<8x8x8xbf16>, vector<8x8x8xbf16>, vector<8x8x8xf32> -> vector<8x8x8xf32>
    "tpu.trace_stop"() : () -> ()
    %cst_32 = arith.constant dense<0xFF800000> : vector<8x8xf32>
    %89 = vector.multi_reduction <maximumf>, %88, %cst_32 [2] : vector<8x8x8xf32> to vector<8x8xf32>
    %90 = vector.shape_cast %89 : vector<8x8xf32> to vector<8x8x1xf32>
    %91 = vector.broadcast %90 : vector<8x8x1xf32> to vector<8x8x8xf32>
    %92 = arith.subf %88, %91 : vector<8x8x8xf32>
    %93 = math.exp %92 : vector<8x8x8xf32>
    %cst_33 = arith.constant dense<0.000000e+00> : vector<8x8xf32>
    %94 = vector.multi_reduction <add>, %93, %cst_33 [2] : vector<8x8x8xf32> to vector<8x8xf32>
    %95 = vector.shape_cast %94 : vector<8x8xf32> to vector<8x8x1xf32>
    %96 = tpu.reciprocal %95 {approx = true} : vector<8x8x1xf32> -> vector<8x8x1xf32>
    %97 = vector.broadcast %96 : vector<8x8x1xf32> to vector<8x8x8xf32>
    %98 = arith.mulf %93, %97 : vector<8x8x8xf32>
    %99 = arith.truncf %98 : vector<8x8x8xf32> to vector<8x8x8xbf16>
    "tpu.trace_start"() <{level = 10 : i32, message = "bqk,bkd->bqd"}> : () -> ()
    %cst_34 = arith.constant dense<0.000000e+00> : vector<8x8x8xf32>
    %100 = tpu.matmul %99, %87, %cst_34 {dimension_numbers = #tpu.dot_dimension_numbers<[2], [1], [1], [2], [0, 0, 0, 1, 1, 2], [0], [0]>} : vector<8x8x8xbf16>, vector<8x8x8xbf16>, vector<8x8x8xf32> -> vector<8x8x8xf32>
    "tpu.trace_stop"() : () -> ()
    %c0_35 = arith.constant 0 : index
    %c0_36 = arith.constant 0 : index
    %c32 = arith.constant 32 : index
    %101 = vector.load %arg15[%c0_35, %c0_36, %c32] : memref<8x8x80xf32, #tpu.memory_space<vmem>>, vector<8x8x8xf32>
    tpu.vector_store %arg15[%c0_35, %c0_36, %c32], %100 {strides = array<i32>} : memref<8x8x80xf32, #tpu.memory_space<vmem>>, vector<8x8x8xf32>,
    %102 = vector.extract_strided_slice %10 {offsets = [0, 0, 40], sizes = [8, 8, 8], strides = [1, 1, 1]} : vector<8x8x128xbf16> to vector<8x8x8xbf16>
    %103 = vector.extract_strided_slice %13 {offsets = [0, 0, 40], sizes = [8, 8, 8], strides = [1, 1, 1]} : vector<8x8x128xbf16> to vector<8x8x8xbf16>
    %104 = vector.extract_strided_slice %16 {offsets = [0, 0, 40], sizes = [8, 8, 8], strides = [1, 1, 1]} : vector<8x8x128xbf16> to vector<8x8x8xbf16>
    "tpu.trace_start"() <{level = 10 : i32, message = "bqd,bkd->bqk"}> : () -> ()
    %cst_37 = arith.constant dense<0.000000e+00> : vector<8x8x8xf32>
    %105 = tpu.matmul %102, %103, %cst_37 {dimension_numbers = #tpu.dot_dimension_numbers<[2], [2], [1], [1], [0, 0, 0, 1, 1, 1], [0], [0]>} : vector<8x8x8xbf16>, vector<8x8x8xbf16>, vector<8x8x8xf32> -> vector<8x8x8xf32>
    "tpu.trace_stop"() : () -> ()
    %cst_38 = arith.constant dense<0xFF800000> : vector<8x8xf32>
    %106 = vector.multi_reduction <maximumf>, %105, %cst_38 [2] : vector<8x8x8xf32> to vector<8x8xf32>
    %107 = vector.shape_cast %106 : vector<8x8xf32> to vector<8x8x1xf32>
    %108 = vector.broadcast %107 : vector<8x8x1xf32> to vector<8x8x8xf32>
    %109 = arith.subf %105, %108 : vector<8x8x8xf32>
    %110 = math.exp %109 : vector<8x8x8xf32>
    %cst_39 = arith.constant dense<0.000000e+00> : vector<8x8xf32>
    %111 = vector.multi_reduction <add>, %110, %cst_39 [2] : vector<8x8x8xf32> to vector<8x8xf32>
    %112 = vector.shape_cast %111 : vector<8x8xf32> to vector<8x8x1xf32>
    %113 = tpu.reciprocal %112 {approx = true} : vector<8x8x1xf32> -> vector<8x8x1xf32>
    %114 = vector.broadcast %113 : vector<8x8x1xf32> to vector<8x8x8xf32>
    %115 = arith.mulf %110, %114 : vector<8x8x8xf32>
    %116 = arith.truncf %115 : vector<8x8x8xf32> to vector<8x8x8xbf16>
    "tpu.trace_start"() <{level = 10 : i32, message = "bqk,bkd->bqd"}> : () -> ()
    %cst_40 = arith.constant dense<0.000000e+00> : vector<8x8x8xf32>
    %117 = tpu.matmul %116, %104, %cst_40 {dimension_numbers = #tpu.dot_dimension_numbers<[2], [1], [1], [2], [0, 0, 0, 1, 1, 2], [0], [0]>} : vector<8x8x8xbf16>, vector<8x8x8xbf16>, vector<8x8x8xf32> -> vector<8x8x8xf32>
    "tpu.trace_stop"() : () -> ()
    %c0_41 = arith.constant 0 : index
    %c0_42 = arith.constant 0 : index
    %c40 = arith.constant 40 : index
    %118 = vector.load %arg15[%c0_41, %c0_42, %c40] : memref<8x8x80xf32, #tpu.memory_space<vmem>>, vector<8x8x8xf32>
    tpu.vector_store %arg15[%c0_41, %c0_42, %c40], %117 {strides = array<i32>} : memref<8x8x80xf32, #tpu.memory_space<vmem>>, vector<8x8x8xf32>,
    %119 = vector.extract_strided_slice %10 {offsets = [0, 0, 48], sizes = [8, 8, 8], strides = [1, 1, 1]} : vector<8x8x128xbf16> to vector<8x8x8xbf16>
    %120 = vector.extract_strided_slice %13 {offsets = [0, 0, 48], sizes = [8, 8, 8], strides = [1, 1, 1]} : vector<8x8x128xbf16> to vector<8x8x8xbf16>
    %121 = vector.extract_strided_slice %16 {offsets = [0, 0, 48], sizes = [8, 8, 8], strides = [1, 1, 1]} : vector<8x8x128xbf16> to vector<8x8x8xbf16>
    "tpu.trace_start"() <{level = 10 : i32, message = "bqd,bkd->bqk"}> : () -> ()
    %cst_43 = arith.constant dense<0.000000e+00> : vector<8x8x8xf32>
    %122 = tpu.matmul %119, %120, %cst_43 {dimension_numbers = #tpu.dot_dimension_numbers<[2], [2], [1], [1], [0, 0, 0, 1, 1, 1], [0], [0]>} : vector<8x8x8xbf16>, vector<8x8x8xbf16>, vector<8x8x8xf32> -> vector<8x8x8xf32>
    "tpu.trace_stop"() : () -> ()
    %cst_44 = arith.constant dense<0xFF800000> : vector<8x8xf32>
    %123 = vector.multi_reduction <maximumf>, %122, %cst_44 [2] : vector<8x8x8xf32> to vector<8x8xf32>
    %124 = vector.shape_cast %123 : vector<8x8xf32> to vector<8x8x1xf32>
    %125 = vector.broadcast %124 : vector<8x8x1xf32> to vector<8x8x8xf32>
    %126 = arith.subf %122, %125 : vector<8x8x8xf32>
    %127 = math.exp %126 : vector<8x8x8xf32>
    %cst_45 = arith.constant dense<0.000000e+00> : vector<8x8xf32>
    %128 = vector.multi_reduction <add>, %127, %cst_45 [2] : vector<8x8x8xf32> to vector<8x8xf32>
    %129 = vector.shape_cast %128 : vector<8x8xf32> to vector<8x8x1xf32>
    %130 = tpu.reciprocal %129 {approx = true} : vector<8x8x1xf32> -> vector<8x8x1xf32>
    %131 = vector.broadcast %130 : vector<8x8x1xf32> to vector<8x8x8xf32>
    %132 = arith.mulf %127, %131 : vector<8x8x8xf32>
    %133 = arith.truncf %132 : vector<8x8x8xf32> to vector<8x8x8xbf16>
    "tpu.trace_start"() <{level = 10 : i32, message = "bqk,bkd->bqd"}> : () -> ()
    %cst_46 = arith.constant dense<0.000000e+00> : vector<8x8x8xf32>
    %134 = tpu.matmul %133, %121, %cst_46 {dimension_numbers = #tpu.dot_dimension_numbers<[2], [1], [1], [2], [0, 0, 0, 1, 1, 2], [0], [0]>} : vector<8x8x8xbf16>, vector<8x8x8xbf16>, vector<8x8x8xf32> -> vector<8x8x8xf32>
    "tpu.trace_stop"() : () -> ()
    %c0_47 = arith.constant 0 : index
    %c0_48 = arith.constant 0 : index
    %c48 = arith.constant 48 : index
    %135 = vector.load %arg15[%c0_47, %c0_48, %c48] : memref<8x8x80xf32, #tpu.memory_space<vmem>>, vector<8x8x8xf32>
    tpu.vector_store %arg15[%c0_47, %c0_48, %c48], %134 {strides = array<i32>} : memref<8x8x80xf32, #tpu.memory_space<vmem>>, vector<8x8x8xf32>,
    %136 = vector.extract_strided_slice %10 {offsets = [0, 0, 56], sizes = [8, 8, 8], strides = [1, 1, 1]} : vector<8x8x128xbf16> to vector<8x8x8xbf16>
    %137 = vector.extract_strided_slice %13 {offsets = [0, 0, 56], sizes = [8, 8, 8], strides = [1, 1, 1]} : vector<8x8x128xbf16> to vector<8x8x8xbf16>
    %138 = vector.extract_strided_slice %16 {offsets = [0, 0, 56], sizes = [8, 8, 8], strides = [1, 1, 1]} : vector<8x8x128xbf16> to vector<8x8x8xbf16>
    "tpu.trace_start"() <{level = 10 : i32, message = "bqd,bkd->bqk"}> : () -> ()
    %cst_49 = arith.constant dense<0.000000e+00> : vector<8x8x8xf32>
    %139 = tpu.matmul %136, %137, %cst_49 {dimension_numbers = #tpu.dot_dimension_numbers<[2], [2], [1], [1], [0, 0, 0, 1, 1, 1], [0], [0]>} : vector<8x8x8xbf16>, vector<8x8x8xbf16>, vector<8x8x8xf32> -> vector<8x8x8xf32>
    "tpu.trace_stop"() : () -> ()
    %cst_50 = arith.constant dense<0xFF800000> : vector<8x8xf32>
    %140 = vector.multi_reduction <maximumf>, %139, %cst_50 [2] : vector<8x8x8xf32> to vector<8x8xf32>
    %141 = vector.shape_cast %140 : vector<8x8xf32> to vector<8x8x1xf32>
    %142 = vector.broadcast %141 : vector<8x8x1xf32> to vector<8x8x8xf32>
    %143 = arith.subf %139, %142 : vector<8x8x8xf32>
    %144 = math.exp %143 : vector<8x8x8xf32>
    %cst_51 = arith.constant dense<0.000000e+00> : vector<8x8xf32>
    %145 = vector.multi_reduction <add>, %144, %cst_51 [2] : vector<8x8x8xf32> to vector<8x8xf32>
    %146 = vector.shape_cast %145 : vector<8x8xf32> to vector<8x8x1xf32>
    %147 = tpu.reciprocal %146 {approx = true} : vector<8x8x1xf32> -> vector<8x8x1xf32>
    %148 = vector.broadcast %147 : vector<8x8x1xf32> to vector<8x8x8xf32>
    %149 = arith.mulf %144, %148 : vector<8x8x8xf32>
    %150 = arith.truncf %149 : vector<8x8x8xf32> to vector<8x8x8xbf16>
    "tpu.trace_start"() <{level = 10 : i32, message = "bqk,bkd->bqd"}> : () -> ()
    %cst_52 = arith.constant dense<0.000000e+00> : vector<8x8x8xf32>
    %151 = tpu.matmul %150, %138, %cst_52 {dimension_numbers = #tpu.dot_dimension_numbers<[2], [1], [1], [2], [0, 0, 0, 1, 1, 2], [0], [0]>} : vector<8x8x8xbf16>, vector<8x8x8xbf16>, vector<8x8x8xf32> -> vector<8x8x8xf32>
    "tpu.trace_stop"() : () -> ()
    %c0_53 = arith.constant 0 : index
    %c0_54 = arith.constant 0 : index
    %c56 = arith.constant 56 : index
    %152 = vector.load %arg15[%c0_53, %c0_54, %c56] : memref<8x8x80xf32, #tpu.memory_space<vmem>>, vector<8x8x8xf32>
    tpu.vector_store %arg15[%c0_53, %c0_54, %c56], %151 {strides = array<i32>} : memref<8x8x80xf32, #tpu.memory_space<vmem>>, vector<8x8x8xf32>,
    %153 = vector.extract_strided_slice %10 {offsets = [0, 0, 64], sizes = [8, 8, 8], strides = [1, 1, 1]} : vector<8x8x128xbf16> to vector<8x8x8xbf16>
    %154 = vector.extract_strided_slice %13 {offsets = [0, 0, 64], sizes = [8, 8, 8], strides = [1, 1, 1]} : vector<8x8x128xbf16> to vector<8x8x8xbf16>
    %155 = vector.extract_strided_slice %16 {offsets = [0, 0, 64], sizes = [8, 8, 8], strides = [1, 1, 1]} : vector<8x8x128xbf16> to vector<8x8x8xbf16>
    "tpu.trace_start"() <{level = 10 : i32, message = "bqd,bkd->bqk"}> : () -> ()
    %cst_55 = arith.constant dense<0.000000e+00> : vector<8x8x8xf32>
    %156 = tpu.matmul %153, %154, %cst_55 {dimension_numbers = #tpu.dot_dimension_numbers<[2], [2], [1], [1], [0, 0, 0, 1, 1, 1], [0], [0]>} : vector<8x8x8xbf16>, vector<8x8x8xbf16>, vector<8x8x8xf32> -> vector<8x8x8xf32>
    "tpu.trace_stop"() : () -> ()
    %cst_56 = arith.constant dense<0xFF800000> : vector<8x8xf32>
    %157 = vector.multi_reduction <maximumf>, %156, %cst_56 [2] : vector<8x8x8xf32> to vector<8x8xf32>
    %158 = vector.shape_cast %157 : vector<8x8xf32> to vector<8x8x1xf32>
    %159 = vector.broadcast %158 : vector<8x8x1xf32> to vector<8x8x8xf32>
    %160 = arith.subf %156, %159 : vector<8x8x8xf32>
    %161 = math.exp %160 : vector<8x8x8xf32>
    %cst_57 = arith.constant dense<0.000000e+00> : vector<8x8xf32>
    %162 = vector.multi_reduction <add>, %161, %cst_57 [2] : vector<8x8x8xf32> to vector<8x8xf32>
    %163 = vector.shape_cast %162 : vector<8x8xf32> to vector<8x8x1xf32>
    %164 = tpu.reciprocal %163 {approx = true} : vector<8x8x1xf32> -> vector<8x8x1xf32>
    %165 = vector.broadcast %164 : vector<8x8x1xf32> to vector<8x8x8xf32>
    %166 = arith.mulf %161, %165 : vector<8x8x8xf32>
    %167 = arith.truncf %166 : vector<8x8x8xf32> to vector<8x8x8xbf16>
    "tpu.trace_start"() <{level = 10 : i32, message = "bqk,bkd->bqd"}> : () -> ()
    %cst_58 = arith.constant dense<0.000000e+00> : vector<8x8x8xf32>
    %168 = tpu.matmul %167, %155, %cst_58 {dimension_numbers = #tpu.dot_dimension_numbers<[2], [1], [1], [2], [0, 0, 0, 1, 1, 2], [0], [0]>} : vector<8x8x8xbf16>, vector<8x8x8xbf16>, vector<8x8x8xf32> -> vector<8x8x8xf32>
    "tpu.trace_stop"() : () -> ()
    %c0_59 = arith.constant 0 : index
    %c0_60 = arith.constant 0 : index
    %c64 = arith.constant 64 : index
    %169 = vector.load %arg15[%c0_59, %c0_60, %c64] : memref<8x8x80xf32, #tpu.memory_space<vmem>>, vector<8x8x8xf32>
    tpu.vector_store %arg15[%c0_59, %c0_60, %c64], %168 {strides = array<i32>} : memref<8x8x80xf32, #tpu.memory_space<vmem>>, vector<8x8x8xf32>,
    %170 = vector.extract_strided_slice %10 {offsets = [0, 0, 72], sizes = [8, 8, 8], strides = [1, 1, 1]} : vector<8x8x128xbf16> to vector<8x8x8xbf16>
    %171 = vector.extract_strided_slice %13 {offsets = [0, 0, 72], sizes = [8, 8, 8], strides = [1, 1, 1]} : vector<8x8x128xbf16> to vector<8x8x8xbf16>
    %172 = vector.extract_strided_slice %16 {offsets = [0, 0, 72], sizes = [8, 8, 8], strides = [1, 1, 1]} : vector<8x8x128xbf16> to vector<8x8x8xbf16>
    "tpu.trace_start"() <{level = 10 : i32, message = "bqd,bkd->bqk"}> : () -> ()
    %cst_61 = arith.constant dense<0.000000e+00> : vector<8x8x8xf32>
    %173 = tpu.matmul %170, %171, %cst_61 {dimension_numbers = #tpu.dot_dimension_numbers<[2], [2], [1], [1], [0, 0, 0, 1, 1, 1], [0], [0]>} : vector<8x8x8xbf16>, vector<8x8x8xbf16>, vector<8x8x8xf32> -> vector<8x8x8xf32>
    "tpu.trace_stop"() : () -> ()
    %cst_62 = arith.constant dense<0xFF800000> : vector<8x8xf32>
    %174 = vector.multi_reduction <maximumf>, %173, %cst_62 [2] : vector<8x8x8xf32> to vector<8x8xf32>
    %175 = vector.shape_cast %174 : vector<8x8xf32> to vector<8x8x1xf32>
    %176 = vector.broadcast %175 : vector<8x8x1xf32> to vector<8x8x8xf32>
    %177 = arith.subf %173, %176 : vector<8x8x8xf32>
    %178 = math.exp %177 : vector<8x8x8xf32>
    %cst_63 = arith.constant dense<0.000000e+00> : vector<8x8xf32>
    %179 = vector.multi_reduction <add>, %178, %cst_63 [2] : vector<8x8x8xf32> to vector<8x8xf32>
    %180 = vector.shape_cast %179 : vector<8x8xf32> to vector<8x8x1xf32>
    %181 = tpu.reciprocal %180 {approx = true} : vector<8x8x1xf32> -> vector<8x8x1xf32>
    %182 = vector.broadcast %181 : vector<8x8x1xf32> to vector<8x8x8xf32>
    %183 = arith.mulf %178, %182 : vector<8x8x8xf32>
    %184 = arith.truncf %183 : vector<8x8x8xf32> to vector<8x8x8xbf16>
    "tpu.trace_start"() <{level = 10 : i32, message = "bqk,bkd->bqd"}> : () -> ()
    %cst_64 = arith.constant dense<0.000000e+00> : vector<8x8x8xf32>
    %185 = tpu.matmul %184, %172, %cst_64 {dimension_numbers = #tpu.dot_dimension_numbers<[2], [1], [1], [2], [0, 0, 0, 1, 1, 2], [0], [0]>} : vector<8x8x8xbf16>, vector<8x8x8xbf16>, vector<8x8x8xf32> -> vector<8x8x8xf32>
    "tpu.trace_stop"() : () -> ()
    %c0_65 = arith.constant 0 : index
    %c0_66 = arith.constant 0 : index
    %c72 = arith.constant 72 : index
    %186 = vector.load %arg15[%c0_65, %c0_66, %c72] : memref<8x8x80xf32, #tpu.memory_space<vmem>>, vector<8x8x8xf32>
    tpu.vector_store %arg15[%c0_65, %c0_66, %c72], %185 {strides = array<i32>} : memref<8x8x80xf32, #tpu.memory_space<vmem>>, vector<8x8x8xf32>,
    %c0_67 = arith.constant 0 : index
    %c0_68 = arith.constant 0 : index
    %c0_69 = arith.constant 0 : index
    %187 = vector.load %arg15[%c0_67, %c0_68, %c0_69] : memref<8x8x80xf32, #tpu.memory_space<vmem>>, vector<8x8x80xf32>
    %188 = vector.shape_cast %187 : vector<8x8x80xf32> to vector<64x80xf32>
    %189 = arith.truncf %188 : vector<64x80xf32> to vector<64x80xbf16>
    %c0_70 = arith.constant 0 : index
    %c0_71 = arith.constant 0 : index
    %190 = vector.load %arg4[%c0_70, %c0_71] : memref<80x128xbf16, #tpu.memory_space<vmem>>, vector<80x128xbf16>
    %cst_72 = arith.constant dense<0.000000e+00> : vector<64x128xf32>
    %191 = tpu.matmul %189, %190, %cst_72 {dimension_numbers = #tpu.dot_dimension_numbers<[1], [0], [0], [1], [0, 0, 1, 1], [], []>} : vector<64x80xbf16>, vector<80x128xbf16>, vector<64x128xf32> -> vector<64x128xf32>
    %c0_73 = arith.constant 0 : index
    %c0_74 = arith.constant 0 : index
    %192 = vector.load %arg5[%c0_73, %c0_74] : memref<1x128xf32, #tpu.memory_space<vmem>>, vector<1x128xf32>
    %193 = vector.broadcast %192 : vector<1x128xf32> to vector<64x128xf32>
    %194 = arith.addf %191, %193 : vector<64x128xf32>
    %195 = tpu.iota {dimensions = array<i32: 1>} : vector<1x128xi32>
    %c50_i32 = arith.constant 50 : i32
    %196 = vector.broadcast %c50_i32 : i32 to vector<1x128xi32>
    %197 = arith.cmpi slt, %195, %196 : vector<1x128xi32>
    %198 = arith.extui %197 : vector<1x128xi1> to vector<1x128xi32>
    %199 = arith.sitofp %198 : vector<1x128xi32> to vector<1x128xf32>
    %200 = arith.addf %1, %194 : vector<64x128xf32>
    %c0_75 = arith.constant 0 : index
    %c0_76 = arith.constant 0 : index
    %201 = vector.load %arg10[%c0_75, %c0_76] : memref<1x128xf32, #tpu.memory_space<vmem>>, vector<1x128xf32>
    %c0_77 = arith.constant 0 : index
    %c0_78 = arith.constant 0 : index
    %202 = vector.load %arg11[%c0_77, %c0_78] : memref<1x128xf32, #tpu.memory_space<vmem>>, vector<1x128xf32>
    %cst_79 = arith.constant dense<0.000000e+00> : vector<64xf32>
    %203 = vector.multi_reduction <add>, %200, %cst_79 [1] : vector<64x128xf32> to vector<64xf32>
    %204 = vector.shape_cast %203 : vector<64xf32> to vector<64x1xf32>
    %cst_80 = arith.constant 2.000000e-02 : f32
    %205 = vector.broadcast %cst_80 : f32 to vector<64x1xf32>
    %206 = arith.mulf %204, %205 : vector<64x1xf32>
    %207 = vector.broadcast %206 : vector<64x1xf32> to vector<64x128xf32>
    %208 = arith.subf %200, %207 : vector<64x128xf32>
    %209 = vector.broadcast %199 : vector<1x128xf32> to vector<64x128xf32>
    %210 = arith.mulf %208, %209 : vector<64x128xf32>
    %211 = arith.mulf %210, %210 : vector<64x128xf32>
    %cst_81 = arith.constant dense<0.000000e+00> : vector<64xf32>
    %212 = vector.multi_reduction <add>, %211, %cst_81 [1] : vector<64x128xf32> to vector<64xf32>
    %213 = vector.shape_cast %212 : vector<64xf32> to vector<64x1xf32>
    %cst_82 = arith.constant 2.000000e-02 : f32
    %214 = vector.broadcast %cst_82 : f32 to vector<64x1xf32>
    %215 = arith.mulf %213, %214 : vector<64x1xf32>
    %cst_83 = arith.constant 9.99999974E-6 : f32
    %216 = vector.broadcast %cst_83 : f32 to vector<64x1xf32>
    %217 = arith.addf %215, %216 : vector<64x1xf32>
    %218 = math.rsqrt %217 : vector<64x1xf32>
    %219 = vector.broadcast %218 : vector<64x1xf32> to vector<64x128xf32>
    %220 = arith.mulf %210, %219 : vector<64x128xf32>
    %221 = vector.broadcast %201 : vector<1x128xf32> to vector<64x128xf32>
    %222 = arith.mulf %220, %221 : vector<64x128xf32>
    %223 = vector.broadcast %202 : vector<1x128xf32> to vector<64x128xf32>
    %224 = arith.addf %222, %223 : vector<64x128xf32>
    %225 = arith.truncf %224 : vector<64x128xf32> to vector<64x128xbf16>
    %c0_84 = arith.constant 0 : index
    %c0_85 = arith.constant 0 : index
    %226 = vector.load %arg6[%c0_84, %c0_85] : memref<128x2048xbf16, #tpu.memory_space<vmem>>, vector<128x2048xbf16>
    %cst_86 = arith.constant dense<0.000000e+00> : vector<64x2048xf32>
    %227 = tpu.matmul %225, %226, %cst_86 {dimension_numbers = #tpu.dot_dimension_numbers<[1], [0], [0], [1], [0, 0, 1, 1], [], []>} : vector<64x128xbf16>, vector<128x2048xbf16>, vector<64x2048xf32> -> vector<64x2048xf32>
    %c0_87 = arith.constant 0 : index
    %c0_88 = arith.constant 0 : index
    %228 = vector.load %arg7[%c0_87, %c0_88] : memref<1x2048xf32, #tpu.memory_space<vmem>>, vector<1x2048xf32>
    %229 = vector.broadcast %228 : vector<1x2048xf32> to vector<64x2048xf32>
    %230 = arith.addf %227, %229 : vector<64x2048xf32>
    %cst_89 = arith.constant 0.000000e+00 : f32
    %231 = vector.broadcast %cst_89 : f32 to vector<64x2048xf32>
    %232 = arith.maximumf %230, %231 : vector<64x2048xf32>
    %233 = arith.truncf %232 : vector<64x2048xf32> to vector<64x2048xbf16>
    %c0_90 = arith.constant 0 : index
    %c0_91 = arith.constant 0 : index
    %234 = vector.load %arg8[%c0_90, %c0_91] : memref<2048x128xbf16, #tpu.memory_space<vmem>>, vector<2048x128xbf16>
    %cst_92 = arith.constant dense<0.000000e+00> : vector<64x128xf32>
    %235 = tpu.matmul %233, %234, %cst_92 {dimension_numbers = #tpu.dot_dimension_numbers<[1], [0], [0], [1], [0, 0, 1, 1], [], []>} : vector<64x2048xbf16>, vector<2048x128xbf16>, vector<64x128xf32> -> vector<64x128xf32>
    %c0_93 = arith.constant 0 : index
    %c0_94 = arith.constant 0 : index
    %236 = vector.load %arg9[%c0_93, %c0_94] : memref<1x128xf32, #tpu.memory_space<vmem>>, vector<1x128xf32>
    %237 = vector.broadcast %236 : vector<1x128xf32> to vector<64x128xf32>
    %238 = arith.addf %235, %237 : vector<64x128xf32>
    %239 = arith.addf %224, %238 : vector<64x128xf32>
    %c0_95 = arith.constant 0 : index
    %c0_96 = arith.constant 0 : index
    %240 = vector.load %arg12[%c0_95, %c0_96] : memref<1x128xf32, #tpu.memory_space<vmem>>, vector<1x128xf32>
    %c0_97 = arith.constant 0 : index
    %c0_98 = arith.constant 0 : index
    %241 = vector.load %arg13[%c0_97, %c0_98] : memref<1x128xf32, #tpu.memory_space<vmem>>, vector<1x128xf32>
    %cst_99 = arith.constant dense<0.000000e+00> : vector<64xf32>
    %242 = vector.multi_reduction <add>, %239, %cst_99 [1] : vector<64x128xf32> to vector<64xf32>
    %243 = vector.shape_cast %242 : vector<64xf32> to vector<64x1xf32>
    %cst_100 = arith.constant 2.000000e-02 : f32
    %244 = vector.broadcast %cst_100 : f32 to vector<64x1xf32>
    %245 = arith.mulf %243, %244 : vector<64x1xf32>
    %246 = vector.broadcast %245 : vector<64x1xf32> to vector<64x128xf32>
    %247 = arith.subf %239, %246 : vector<64x128xf32>
    %248 = vector.broadcast %199 : vector<1x128xf32> to vector<64x128xf32>
    %249 = arith.mulf %247, %248 : vector<64x128xf32>
    %250 = arith.mulf %249, %249 : vector<64x128xf32>
    %cst_101 = arith.constant dense<0.000000e+00> : vector<64xf32>
    %251 = vector.multi_reduction <add>, %250, %cst_101 [1] : vector<64x128xf32> to vector<64xf32>
    %252 = vector.shape_cast %251 : vector<64xf32> to vector<64x1xf32>
    %cst_102 = arith.constant 2.000000e-02 : f32
    %253 = vector.broadcast %cst_102 : f32 to vector<64x1xf32>
    %254 = arith.mulf %252, %253 : vector<64x1xf32>
    %cst_103 = arith.constant 9.99999974E-6 : f32
    %255 = vector.broadcast %cst_103 : f32 to vector<64x1xf32>
    %256 = arith.addf %254, %255 : vector<64x1xf32>
    %257 = math.rsqrt %256 : vector<64x1xf32>
    %258 = vector.broadcast %257 : vector<64x1xf32> to vector<64x128xf32>
    %259 = arith.mulf %249, %258 : vector<64x128xf32>
    %260 = vector.broadcast %240 : vector<1x128xf32> to vector<64x128xf32>
    %261 = arith.mulf %259, %260 : vector<64x128xf32>
    %262 = vector.broadcast %241 : vector<1x128xf32> to vector<64x128xf32>
    %263 = arith.addf %261, %262 : vector<64x128xf32>
    %264 = vector.shape_cast %263 : vector<64x128xf32> to vector<8x8x128xf32>
    %c0_104 = arith.constant 0 : index
    %c0_105 = arith.constant 0 : index
    %c0_106 = arith.constant 0 : index
    %265 = vector.load %arg14[%c0_104, %c0_105, %c0_106] : memref<8x8x128xf32, #tpu.memory_space<vmem>>, vector<8x8x128xf32>
    tpu.vector_store %arg14[%c0_104, %c0_105, %c0_106], %264 {strides = array<i32>} : memref<8x8x128xf32, #tpu.memory_space<vmem>>, vector<8x8x128xf32>,
    return
  }
  func.func @transform_0(%arg0: i32) -> (i32, i32, i32) {
    %c0_i32 = arith.constant 0 : i32
    %c0_i32_0 = arith.constant 0 : i32
    %c0_i32_1 = arith.constant 0 : i32
    return %arg0, %c0_i32, %c0_i32_0 : i32, i32, i32
  }
  func.func @transform_1(%arg0: i32) -> (i32, i32) {
    %c0_i32 = arith.constant 0 : i32
    %c0_i32_0 = arith.constant 0 : i32
    %c0_i32_1 = arith.constant 0 : i32
    return %c0_i32, %c0_i32_0 : i32, i32
  }
  func.func @transform_2(%arg0: i32) -> (i32, i32) {
    %c0_i32 = arith.constant 0 : i32
    %c0_i32_0 = arith.constant 0 : i32
    %c0_i32_1 = arith.constant 0 : i32
    return %c0_i32, %c0_i32_0 : i32, i32
  }
  func.func @transform_3(%arg0: i32) -> (i32, i32) {
    %c0_i32 = arith.constant 0 : i32
    %c0_i32_0 = arith.constant 0 : i32
    %c0_i32_1 = arith.constant 0 : i32
    return %c0_i32, %c0_i32_0 : i32, i32
  }
  func.func @transform_4(%arg0: i32) -> (i32, i32) {
    %c0_i32 = arith.constant 0 : i32
    %c0_i32_0 = arith.constant 0 : i32
    %c0_i32_1 = arith.constant 0 : i32
    return %c0_i32, %c0_i32_0 : i32, i32
  }
  func.func @transform_5(%arg0: i32) -> (i32, i32) {
    %c0_i32 = arith.constant 0 : i32
    %c0_i32_0 = arith.constant 0 : i32
    %c0_i32_1 = arith.constant 0 : i32
    return %c0_i32, %c0_i32_0 : i32, i32
  }
  func.func @transform_6(%arg0: i32) -> (i32, i32) {
    %c0_i32 = arith.constant 0 : i32
    %c0_i32_0 = arith.constant 0 : i32
    %c0_i32_1 = arith.constant 0 : i32
    return %c0_i32, %c0_i32_0 : i32, i32
  }
  func.func @transform_7(%arg0: i32) -> (i32, i32) {
    %c0_i32 = arith.constant 0 : i32
    %c0_i32_0 = arith.constant 0 : i32
    %c0_i32_1 = arith.constant 0 : i32
    return %c0_i32, %c0_i32_0 : i32, i32
  }
  func.func @transform_8(%arg0: i32) -> (i32, i32) {
    %c0_i32 = arith.constant 0 : i32
    %c0_i32_0 = arith.constant 0 : i32
    %c0_i32_1 = arith.constant 0 : i32
    return %c0_i32, %c0_i32_0 : i32, i32
  }
  func.func @transform_9(%arg0: i32) -> (i32, i32) {
    %c0_i32 = arith.constant 0 : i32
    %c0_i32_0 = arith.constant 0 : i32
    %c0_i32_1 = arith.constant 0 : i32
    return %c0_i32, %c0_i32_0 : i32, i32
  }
  func.func @transform_10(%arg0: i32) -> (i32, i32) {
    %c0_i32 = arith.constant 0 : i32
    %c0_i32_0 = arith.constant 0 : i32
    %c0_i32_1 = arith.constant 0 : i32
    return %c0_i32, %c0_i32_0 : i32, i32
  }
  func.func @transform_11(%arg0: i32) -> (i32, i32) {
    %c0_i32 = arith.constant 0 : i32
    %c0_i32_0 = arith.constant 0 : i32
    %c0_i32_1 = arith.constant 0 : i32
    return %c0_i32, %c0_i32_0 : i32, i32
  }
  func.func @transform_12(%arg0: i32) -> (i32, i32) {
    %c0_i32 = arith.constant 0 : i32
    %c0_i32_0 = arith.constant 0 : i32
    %c0_i32_1 = arith.constant 0 : i32
    return %c0_i32, %c0_i32_0 : i32, i32
  }
  func.func @transform_13(%arg0: i32) -> (i32, i32, i32) {
    %c0_i32 = arith.constant 0 : i32
    %c0_i32_0 = arith.constant 0 : i32
    %c0_i32_1 = arith.constant 0 : i32
    return %arg0, %c0_i32, %c0_i32_0 : i32, i32, i32
  }
}

</mosaic_0001>

<bundles_post_ra>
// kernel: transformer_encoder_layer.1
= control target key start
LH: loop header
LB: loop body
LE: loop exit
PB: predicated region body
PF: predicated region fallthrough
CT: control target
= control target key end

     0   :  { %v19942_v1 = vmov 0   ;;  %v19944_v37 = vmov 0.0   ;;  %vm15892_vm0 = vmmov 0   ;;  %v19941_v38 = vlaneseq  ;;  %s15894_s22 = smov 112   ;;  %s15895_s23 = smov 104   ;;  %s19927_s1 = inlined_call_operand.vmem [shape: bf16[128,384], index: 1, kind: input, shape index: {}]   ;;  %s19928_s0 = inlined_call_operand.vmem [shape: f32[8,8,128], index: 0, kind: input, shape index: {}]   ;;  %s19929_s2 = inlined_call_operand.vmem [shape: f32[1,384], index: 2, kind: input, shape index: {}]   ;;  %s19930_s3 = inlined_call_operand.vmem [shape: bf16[80,128], index: 3, kind: input, shape index: {}]   ;;  %s19931_s4 = inlined_call_operand.vmem [shape: f32[1,128], index: 4, kind: input, shape index: {}]   ;;  %s19932_s5 = inlined_call_operand.vmem [shape: bf16[128,2048], index: 5, kind: input, shape index: {}]   ;;  %s19933_s9 = inlined_call_operand.vmem [shape: f32[1,128], index: 9, kind: input, shape index: {}]   ;;  %s19934_s10 = inlined_call_operand.vmem [shape: f32[1,128], index: 10, kind: input, shape index: {}]   ;;  %s19935_s7 = inlined_call_operand.vmem [shape: bf16[2048,128], index: 7, kind: input, shape index: {}]   ;;  %s19936_s6 = inlined_call_operand.vmem [shape: f32[1,2048], index: 6, kind: input, shape index: {}]   ;;  %s19937_s8 = inlined_call_operand.vmem [shape: f32[1,128], index: 8, kind: input, shape index: {}]   ;;  %s19938_s11 = inlined_call_operand.vmem [shape: f32[1,128], index: 11, kind: input, shape index: {}]   ;;  %s19939_s12 = inlined_call_operand.vmem [shape: f32[1,128], index: 12, kind: input, shape index: {}]   ;;  %s19940_s13 = inlined_call_operand.vmem [shape: f32[8,8,128], index: 13, kind: output, shape index: {}]  }
   0x1   :  { %v15365_v0 = vld [vmem:[%s19927_s1 + $0xac] ss:$12 sps:$4 sm:$0xff]   ;;  %266 = vmatprep.mubr.bf16.mxu0 %v19942_v1  ;;  %v15367_v2 = vld [vmem:[%s19927_s1 + $0xa8] ss:$12 sps:$4 sm:$0xff]   ;;  %v15370_v4 = vld [vmem:[%s19927_s1 + $0x90] ss:$12 sps:$4 sm:$0xff]  }
   0x2   :  { %234 = vmatprep.subr.bf16.mxu0 %v15365_v0  ;;  %v15368_v3 = vld [vmem:[%s19927_s1 + $0x94] ss:$12 sps:$4 sm:$0xff]   ;;  %v15371_v5 = vld [vmem:[%s19927_s1 + $0x7c] ss:$12 sps:$4 sm:$0xff]   ;;  %v15373_v6 = vld [vmem:[%s19927_s1 + $0x78] ss:$12 sps:$4 sm:$0xff]  }
   0x3   :  { %235 = vmatpush1.bf16.msra.mxu0 %v15367_v2  ;;  %v15374_v7 = vld [vmem:[%s19927_s1 + $0x64] ss:$12 sps:$4 sm:$0xff]   ;;  %v15376_v9 = vld [vmem:[%s19927_s1 + $0x60] ss:$12 sps:$4 sm:$0xff]   ;;  %v15379_v13 = vld [vmem:[%s19927_s1 + $0x48] ss:$12 sps:$4 sm:$0xff]  }
   0x4   :  { %236 = vmatprep.subr.bf16.mxu0 %v15368_v3  ;;  %v45_v8 = vld [vmem:[%s19928_s0] sm:$0xff]  ;;  %v46_v10 = vld [vmem:[%s19928_s0 + $0x8] sm:$0xff]  ;;  %v15389_v14 = vld [vmem:[%s19927_s1 + $0xb0] ss:$12 sps:$4 sm:$0xff]   ;;  %v16085_v39 = vshrl.u32 %v19941_v38, 7  ;;  %vm444_vm1 = vcmask 64512  }
   0x5   :  { %v15377_v11 = vld [vmem:[%s19927_s1 + $0x4c] ss:$12 sps:$4 sm:$0xff]   ;;  %v53_v12 = vpack.c.bf16 %v46_v10, %v45_v8  ;;  %v15380_v16 = vld [vmem:[%s19927_s1 + $0x34] ss:$12 sps:$4 sm:$0xff]   ;;  %14345 = vmatprep.subr.bf16.mxu1 %v15389_v14  ;;  %v15382_v18 = vld [vmem:[%s19927_s1 + $0x30] ss:$12 sps:$4 sm:$0xff]  }
   0x6   :  { %v15390_v15 = vld [vmem:[%s19927_s1 + $0x98] ss:$12 sps:$4 sm:$0xff]   ;;  %14346 = vmatpush3.bf16.msra.mxu1 %v15389_v14  ;;  %v15391_v17 = vld [vmem:[%s19927_s1 + $0x80] ss:$12 sps:$4 sm:$0xff]   ;;  %v15383_v19 = vld [vmem:[%s19927_s1 + $0x1c] ss:$12 sps:$4 sm:$0xff]  }
   0x7   :  { %237 = vmatpush1.bf16.msra.mxu0 %v15370_v4  ;;  %14361 = vmatprep.mubr.bf16.mxu1 %v53_v12  ;;  %v15392_v20 = vld [vmem:[%s19927_s1 + $0x68] ss:$12 sps:$4 sm:$0xff]   ;;  %v15385_v21 = vld [vmem:[%s19927_s1 + $0x18] ss:$12 sps:$4 sm:$0xff]   ;;  %v15393_v23 = vld [vmem:[%s19927_s1 + $0x50] ss:$12 sps:$4 sm:$0xff]  }
   0x8   :  { %238 = vmatprep.subr.bf16.mxu0 %v15371_v5  ;;  %14347 = vmatprep.subr.bf16.mxu1 %v15390_v15  ;;  %v15386_v22 = vld [vmem:[%s19927_s1 + $0x4] ss:$12 sps:$4 sm:$0xff]   ;;  %v15388_v24 = vld [vmem:[%s19927_s1] ss:$12 sps:$4 sm:$0xff]   ;;  %v48_v28 = vld [vmem:[%s19928_s0 + $0x18] sm:$0xff]  ;;  %19962 = vst [vmem:[#allocation3_spill] sm:$0xff] %v16085_v39 }
   0x9   :  { %v15394_v25 = vld [vmem:[%s19927_s1 + $0x38] ss:$12 sps:$4 sm:$0xff]   ;;  %v15395_v26 = vld [vmem:[%s19927_s1 + $0x20] ss:$12 sps:$4 sm:$0xff]   ;;  %v47_v27 = vld [vmem:[%s19928_s0 + $0x10] sm:$0xff]  ;;  %v16088_v40 = vsub.s32 1, %v16085_v39 }
   0xa   :  { %14348 = vmatpush3.bf16.msra.mxu1 %v15390_v15  ;;  %v54_v29 = vpack.c.bf16 %v48_v28, %v47_v27  ;;  %v15396_v30 = vld [vmem:[%s19927_s1 + $0x8] ss:$12 sps:$4 sm:$0xff]   ;;  %v49_v31 = vld [vmem:[%s19928_s0 + $0x20] sm:$0xff]  ;;  %v52_v35 = vld [vmem:[%s19928_s0 + $0x38] sm:$0xff]  ;;  %v16097_v44 = vsub.s32 0, %v16085_v39  ;;  %v16109_v53 = vsub.s32 2, %v16085_v39 }
   0xb   :  { %239 = vmatpush1.bf16.msra.mxu0 %v15373_v6  ;;  %14349 = vmatprep.subr.bf16.mxu1 %v15391_v17  ;;  %v50_v32 = vld [vmem:[%s19928_s0 + $0x28] sm:$0xff]  ;;  %v51_v34 = vld [vmem:[%s19928_s0 + $0x30] sm:$0xff]  ;;  %19963 = vst [vmem:[#allocation4_spill] sm:$0xff] %v16088_v40  ;;  %v89_v41 = vld [vmem:[%s19929_s2] sm:$0x7]  ;;  %vm912_vm2 = vcmask 1043456  }
   0xc   :  { %240 = vmatprep.subr.bf16.mxu0 %v15374_v7  ;;  %v55_v33 = vpack.c.bf16 %v50_v32, %v49_v31  ;;  %v56_v36 = vpack.c.bf16 %v52_v35, %v51_v34  ;;  %v16094_v42 = vrot.slane %v89_v41, %v16088_v40  ;;  %19964 = vst [vmem:[#allocation5_spill] sm:$0xff] %v16097_v44  ;;  %19965 = vst [vmem:[#allocation6_spill] sm:$0xff] %v16109_v53  ;;  %s15893_s2 = smov 120   ;;  %s15896_s24 = smov 96   ;;  %vm2198_vm3 = vcmask 130112  }
   0xd   :  { %v16101_v48 = vrot.slane %v89_v41, %v16097_v44  ;;  %v16116_v58 = vrot.slane %v89_v41, %v16109_v53  ;;  %s15897_s25 = smov 88   ;;  %s15898_s26 = smov 80   ;;  %vm3119_vm4 = vcmask 195712   ;;  %vm4040_vm5 = vcmask 261312  }
   0xe   :  { %14350 = vmatpush3.bf16.msra.mxu1 %v15391_v17  ;;  %s15899_s27 = smov 72   ;;  %s15900_s28 = smov 64   ;;  %vm4961_vm6 = vcmask 326912   ;;  %vm5882_vm7 = vcmask 392512   ;;  %vm6803_vm8 = vcmask 458112   ;;  %vm7724_vm9 = vcmask 523712  }
   0xf   :  { %241 = vmatpush1.bf16.msra.mxu0 %v15376_v9  ;;  %14351 = vmatprep.subr.bf16.mxu1 %v15392_v20  ;;  %s15901_s29 = smov 56   ;;  %s15902_s30 = smov 8   ;;  %vm8645_vm10 = vcmask 589312   ;;  %vm9566_vm11 = vcmask 654912   ;;  %vm9634_vm12 = vcmask 654336  }
  0x10   :  { %242 = vmatprep.subr.bf16.mxu0 %v15377_v11  ;;  %s15903_s14 = smov 16   ;;  %s15904_s15 = smov 24  }
  0x11   :  { %s15905_s16 = smov 32   ;;  %s15906_s1 = smov 40  }
  0x12   :  { %14352 = vmatpush3.bf16.msra.mxu1 %v15392_v20  ;;  %s15907_s17 = smov 48  }
  0x13   :  { %243 = vmatpush1.bf16.msra.mxu0 %v15379_v13  ;;  %14353 = vmatprep.subr.bf16.mxu1 %v15393_v23 }
  0x14   :  { %244 = vmatprep.subr.bf16.mxu0 %v15380_v16 }
  0x16   :  { %14354 = vmatpush3.bf16.msra.mxu1 %v15393_v23 }
  0x17   :  { %245 = vmatpush1.bf16.msra.mxu0 %v15382_v18  ;;  %14355 = vmatprep.subr.bf16.mxu1 %v15394_v25 }
  0x18   :  { %246 = vmatprep.subr.bf16.mxu0 %v15383_v19 }
  0x1a   :  { %14356 = vmatpush3.bf16.msra.mxu1 %v15394_v25 }
  0x1b   :  { %247 = vmatpush1.bf16.msra.mxu0 %v15385_v21  ;;  %14357 = vmatprep.subr.bf16.mxu1 %v15395_v26 }
  0x1c   :  { %248 = vmatprep.subr.bf16.mxu0 %v15386_v22 }
  0x1e   :  { %14358 = vmatpush3.bf16.msra.mxu1 %v15395_v26 }
  0x1f   :  { %249 = vmatpush1.bf16.msra.mxu0 %v15388_v24  ;;  %14359 = vmatprep.subr.bf16.mxu1 %v15396_v30 }
  0x20   :  { %14393 = vmatprep.subr.bf16.mxu0 %v19944_v37 }
  0x22   :  { %267 = vmatmul.mubr.bf16.vlgmr.msra.gmra.mxu0 %v53_v12  ;;  %14360 = vmatpush3.bf16.msra.mxu1 %v15396_v30 }
  0x23   :  { %276 = vmatprep.mubr.bf16.mxu0 %v19942_v1  ;;  %14369 = vmatprep.subr.bf16.mxu1 %v19944_v37 }
  0x25   :  { %14362 = vmatmul.mubr.bf16.vlgmr.msra.gmra.mxu1 %v54_v29 }
  0x26   :  { %14365 = vmatprep.mubr.bf16.mxu1 %v55_v33 }
  0x2a   :  { %277 = vmatmul.mubr.bf16.gmra.mxu0 %v54_v29 }
  0x2b   :  { %286 = vmatprep.mubr.bf16.mxu0 %v19942_v1 }
  0x2d   :  { %14366 = vmatmul.mubr.bf16.gmra.mxu1 %v56_v36 }
  0x2e   :  { %14371 = vmatprep.mubr.msk.bf16.mxu1 %vm15892_vm0, %v19944_v37 }
  0x32   :  { %287 = vmatmul.mubr.bf16.gmra.mxu0 %v55_v33 }
  0x33   :  { %296 = vmatprep.mubr.bf16.mxu0 %v19942_v1 }
  0x3a   :  { %297 = vmatmul.mubr.bf16.gmra.mxu0 %v56_v36 }
  0x3b   :  { %14395 = vmatprep.mubr.msk.bf16.mxu0 %vm15892_vm0, %v19944_v37 }
  0xe2   :  { %v268_v43 = vpop.f32.mrf.mxu0 }
  0xe3   :  { %v269_v55 = vadd.f32 %v268_v43, %v16101_v48 }
  0xe4   :  { %v270_v45 = vpop.f32.mrf.mxu0 }
  0xe5   :  { %v271_v46 = vadd.f32 %v270_v45, %v16094_v42  ;;  %v16118_v60 = vpack.c.bf16 %v269_v55, %v269_v55  ;;  %v14363_v62 = vpop.f32.mrf.mxu1 }
  0xe6   :  { %v272_v47 = vpop.f32.mrf.mxu0  ;;  %v16126_v2 = vadd.f32 %v14363_v62, %v16116_v58 }
  0xe7   :  { %v16103_v49 = vpack.c.bf16 %v271_v46, %v271_v46  ;;  %v341_v4 = vpop.f32.mrf.mxu1  ;;  %v273_v5 = vadd.f32 %v272_v47, %v16101_v48 }
  0xe8   :  { %v274_v50 = vpop.f32.mrf.mxu0  ;;  %v342_v36 = vadd.f32 %v341_v4, %v16116_v58 }
  0xe9   :  { %v275_v51 = vadd.f32 %v274_v50, %v16094_v42  ;;  %v449_v52 = vsel %vm444_vm1, %v16103_v49, 0  ;;  %v14364_v7 = vpop.f32.mrf.mxu1  ;;  %v16140_v13 = vpack.c.bf16 %v273_v5, %v273_v5 }
  0xea   :  { %v278_v54 = vpop.f32.mrf.mxu0  ;;  %14370 = vmatpush3.bf16.xpose.msra.mxu1 %v449_v52  ;;  %v16136_v11 = vadd.f32 %v14364_v7, %v16116_v58 }
  0xeb   :  { %14375 = vmatprep.subr.bf16.mxu1 %v19944_v37  ;;  %v16113_v57 = vpack.c.bf16 %v275_v51, %v275_v51  ;;  %v16138_v12 = vpop.f32.mrf.mxu1  ;;  %v279_v24 = vadd.f32 %v278_v54, %v16101_v48  ;;  %v16194_v51 = vpack.c.bf16 %v342_v36, %v342_v36 }
  0xec   :  { %v280_v56 = vpop.f32.mrf.mxu0 }
  0xed   :  { %v281_v63 = vadd.f32 %v280_v56, %v16094_v42  ;;  %v495_v0 = vsel %vm444_vm1, %v16113_v57, 0  ;;  %v14367_v16 = vpop.f32.mrf.mxu1  ;;  %v16171_v32 = vpack.c.bf16 %v279_v24, %v279_v24 }
  0xee   :  { %v282_v59 = vpop.f32.mrf.mxu0  ;;  %v16153_v22 = vadd.f32 %v14367_v16, %v16116_v58 }
  0xef   :  { %v16132_v8 = vpack.c.bf16 %v281_v63, %v281_v63  ;;  %v357_v23 = vpop.f32.mrf.mxu1  ;;  %v283_v46 = vadd.f32 %v282_v59, %v16101_v48  ;;  %v914_v59 = vsel %vm912_vm2, %v16194_v51, 0 }
  0xf0   :  { %v284_v61 = vpop.f32.mrf.mxu0  ;;  %v16160_v25 = vadd.f32 %v357_v23, %v16116_v58 }
  0xf1   :  { %14372 = vmatmul.mubr.msk.bf16.vlgmr.msra.gmra.mxu1 %vm444_vm1, %v16118_v60  ;;  %v285_v17 = vadd.f32 %v284_v61, %v16094_v42  ;;  %v541_v19 = vsel %vm444_vm1, %v16132_v8, 0  ;;  %v14368_v30 = vpop.f32.mrf.mxu1  ;;  %v16199_v54 = vpack.c.bf16 %v283_v46, %v283_v46 }
  0xf2   :  { %v288_v3 = vpop.f32.mrf.mxu0  ;;  %14376 = vmatpush3.bf16.xpose.msra.mxu1 %v495_v0  ;;  %14377 = vmatprep.mubr.msk.bf16.mxu1 %vm15892_vm0, %v19944_v37  ;;  %v16169_v31 = vadd.f32 %v14368_v30, %v16116_v58  ;;  %v345_v0 = vadd.f32 %v16138_v12, %v16116_v58 }
  0xf3   :  { %14381 = vmatprep.subr.bf16.mxu1 %v19944_v37  ;;  %v289_v18 = vadd.f32 %v288_v3, %v16101_v48  ;;  %v16163_v27 = vpack.c.bf16 %v285_v17, %v285_v17 }
  0xf4   :  { %v290_v6 = vpop.f32.mrf.mxu0  ;;  %v16230_v4 = vpack.c.bf16 %v345_v0, %v345_v0 }
  0xf5   :  { %v291_v9 = vadd.f32 %v290_v6, %v16094_v42  ;;  %v16165_v28 = vpack.c.bf16 %v289_v18, %v289_v18  ;;  %v587_v43 = vsel %vm444_vm1, %v16163_v27, 0 }
  0xf6   :  { %v292_v10 = vpop.f32.mrf.mxu0  ;;  %v960_v6 = vsel %vm912_vm2, %v16230_v4, 0 }
  0xf7   :  { %v16142_v14 = vpack.c.bf16 %v291_v9, %v291_v9  ;;  %v293_v61 = vadd.f32 %v292_v10, %v16101_v48 }
  0xf8   :  { %v294_v15 = vpop.f32.mrf.mxu0 }
  0xf9   :  { %14378 = vmatmul.mubr.msk.bf16.vlgmr.msra.gmra.mxu1 %vm444_vm1, %v16140_v13  ;;  %v633_v20 = vsel %vm444_vm1, %v16142_v14, 0  ;;  %v295_v33 = vadd.f32 %v294_v15, %v16094_v42 }
  0xfa   :  { %v298_v21 = vpop.f32.mrf.mxu0  ;;  %14382 = vmatpush3.bf16.xpose.msra.mxu1 %v541_v19  ;;  %14394 = vmatpush3.bf16.xpose.msra.mxu0 %v633_v20 }
  0xfb   :  { %14383 = vmatprep.mubr.msk.bf16.mxu1 %vm15892_vm0, %v19944_v37  ;;  %14387 = vmatprep.subr.bf16.mxu1 %v19944_v37  ;;  %v299_v41 = vadd.f32 %v298_v21, %v16101_v48  ;;  %v16187_v47 = vpack.c.bf16 %v295_v33, %v295_v33 }
  0xfc   :  { %v300_v26 = vpop.f32.mrf.mxu0  ;;  %14405 = vmatprep.subr.bf16.mxu0 %v19944_v37 }
  0xfd   :  { %v301_v29 = vadd.f32 %v300_v26, %v16094_v42  ;;  %v16197_v52 = vpack.c.bf16 %v299_v41, %v299_v41  ;;  %v679_v55 = vsel %vm444_vm1, %v16187_v47, 0 }
  0xfe   :  { %v302_v35 = vpop.f32.mrf.mxu0 }
  0xff   :  { %v16174_v34 = vpack.c.bf16 %v301_v29, %v301_v29  ;;  %v303_v3 = vadd.f32 %v302_v35, %v16101_v48  ;;  %v16242_v48 = vpop.f32.mrf.mxu1 }
 0x100   :  { %v304_v50 = vpop.f32.mrf.mxu0 }
 0x101   :  { %14384 = vmatmul.mubr.msk.bf16.vlgmr.msra.gmra.mxu1 %vm444_vm1, %v16171_v32  ;;  %14396 = vmatmul.mubr.msk.bf16.vlgmr.msra.gmra.mxu0 %vm444_vm1, %v16165_v28  ;;  %v725_v45 = vsel %vm444_vm1, %v16174_v34, 0  ;;  %v305_v56 = vadd.f32 %v304_v50, %v16094_v42  ;;  %v16219_v42 = vpack.c.bf16 %v293_v61, %v293_v61  ;;  %v16233_v5 = vpack.c.bf16 %v303_v3, %v303_v3 }
 0x102   :  { %14388 = vmatpush3.bf16.xpose.msra.mxu1 %v587_v43  ;;  %14406 = vmatpush3.bf16.xpose.msra.mxu0 %v725_v45 }
 0x103   :  { %14389 = vmatprep.mubr.msk.bf16.mxu1 %vm15892_vm0, %v19944_v37  ;;  %14407 = vmatprep.mubr.msk.bf16.mxu0 %vm15892_vm0, %v19944_v37  ;;  %v16213_v62 = vpack.c.bf16 %v305_v56, %v305_v56 }
 0x104   :  { %14399 = vmatprep.subr.bf16.mxu1 %v19944_v37  ;;  %14417 = vmatprep.subr.bf16.mxu0 %v19944_v37 }
 0x105   :  { %v771_v63 = vsel %vm444_vm1, %v16213_v62, 0 }
 0x109   :  { %14390 = vmatmul.mubr.msk.bf16.vlgmr.msra.gmra.mxu1 %vm444_vm1, %v16199_v54  ;;  %14408 = vmatmul.mubr.msk.bf16.vlgmr.msra.gmra.mxu0 %vm444_vm1, %v16197_v52 }
 0x10a   :  { %14400 = vmatpush3.bf16.xpose.msra.mxu1 %v679_v55  ;;  %14401 = vmatprep.mubr.msk.bf16.mxu1 %vm15892_vm0, %v19944_v37 }
 0x10b   :  { %14411 = vmatprep.subr.bf16.mxu1 %v19944_v37  ;;  %14418 = vmatpush3.bf16.msra.mxu0 %v914_v59 }
 0x10c   :  { %14419 = vmatprep.mubr.msk.bf16.mxu0 %vm15892_vm0, %v19944_v37  ;;  %14429 = vmatprep.subr.bf16.mxu0 %v19944_v37 }
 0x111   :  { %14402 = vmatmul.mubr.msk.bf16.vlgmr.msra.gmra.mxu1 %vm444_vm1, %v16219_v42 }
 0x112   :  { %14412 = vmatpush3.bf16.xpose.msra.mxu1 %v771_v63  ;;  %14413 = vmatprep.mubr.msk.bf16.mxu1 %vm15892_vm0, %v19944_v37 }
 0x113   :  { %14423 = vmatprep.subr.bf16.mxu1 %v19944_v37 }
 0x119   :  { %14414 = vmatmul.mubr.msk.bf16.vlgmr.msra.gmra.mxu1 %vm444_vm1, %v16233_v5 }
 0x11a   :  { %14424 = vmatpush3.bf16.msra.mxu1 %v960_v6  ;;  %14425 = vmatprep.mubr.msk.bf16.mxu1 %vm15892_vm0, %v19944_v37 }
 0x11b   :  { %14435 = vmatprep.subr.bf16.mxu1 %v19944_v37 }
 0x1b1   :  { %v485_v7 = vpop.f32.mrf.mxu1 }
 0x1b2   :  { %v813_v9 = vsel %vm444_vm1, %v485_v7, -inf }
 0x1b3   :  { %814 = vmax.xlane.f32.xlu0 %v813_v9  ;;  %v14373_v10 = vpop.f32.mrf.mxu1 }
 0x1b5   :  { %v488_v12 = vpop.f32.mrf.mxu1 }
 0x1b7   :  { %v14374_v15 = vpop.f32.mrf.mxu1 }
 0x1b9   :  { %v531_v16 = vpop.f32.mrf.mxu1 }
 0x1ba   :  { %v816_v17 = vsel %vm444_vm1, %v531_v16, -inf }
 0x1bb   :  { %817 = vmax.xlane.f32.xlu0 %v816_v17  ;;  %v14379_v18 = vpop.f32.mrf.mxu1 }
 0x1bd   :  { %v534_v19 = vpop.f32.mrf.mxu1 }
 0x1bf   :  { %v14380_v20 = vpop.f32.mrf.mxu1 }
 0x1c1   :  { %v577_v21 = vpop.f32.mrf.mxu1  ;;  %v669_v23 = vpop.f32.mrf.mxu0 }
 0x1c2   :  { %v825_v24 = vsel %vm444_vm1, %v669_v23, -inf  ;;  %v819_v26 = vsel %vm444_vm1, %v577_v21, -inf }
 0x1c3   :  { %v14397_v29 = vpop.f32.mrf.mxu0  ;;  %826 = vmax.xlane.f32.xlu0 %v825_v24  ;;  %820 = vmax.xlane.f32.xlu1 %v819_v26  ;;  %v14385_v30 = vpop.f32.mrf.mxu1 }
 0x1c5   :  { %v580_v33 = vpop.f32.mrf.mxu1  ;;  %v672_v35 = vpop.f32.mrf.mxu0 }
 0x1c7   :  { %v14386_v36 = vpop.f32.mrf.mxu1  ;;  %v14398_v41 = vpop.f32.mrf.mxu0 }
 0x1c9   :  { %v623_v43 = vpop.f32.mrf.mxu1  ;;  %v761_v45 = vpop.f32.mrf.mxu0 }
 0x1ca   :  { %v831_v46 = vsel %vm444_vm1, %v761_v45, -inf  ;;  %v822_v50 = vsel %vm444_vm1, %v623_v43, -inf }
 0x1cb   :  { %832 = vmax.xlane.f32.xlu0 %v831_v46  ;;  %823 = vmax.xlane.f32.xlu1 %v822_v50  ;;  %v14391_v55 = vpop.f32.mrf.mxu1  ;;  %v14409_v56 = vpop.f32.mrf.mxu0 }
 0x1cd   :  { %v626_v59 = vpop.f32.mrf.mxu1  ;;  %v764_v61 = vpop.f32.mrf.mxu0 }
 0x1cf   :  { %v14392_v63 = vpop.f32.mrf.mxu1  ;;  %v14410_v0 = vpop.f32.mrf.mxu0 }
 0x1d1   :  { %v715_v3 = vpop.f32.mrf.mxu1 }
 0x1d2   :  { %v828_v6 = vsel %vm444_vm1, %v715_v3, -inf }
 0x1d3   :  { %829 = vmax.xlane.f32.xlu1 %v828_v6  ;;  %v14403_v9 = vpop.f32.mrf.mxu1 }
 0x1d5   :  { %v718_v10 = vpop.f32.mrf.mxu1 }
 0x1d7   :  { %v14404_v12 = vpop.f32.mrf.mxu1 }
 0x1d9   :  { %v16251_v15 = vpop.f32.mrf.mxu1 }
 0x1da   :  { %v834_v17 = vsel %vm444_vm1, %v16251_v15, -inf }
 0x1db   :  { %835 = vmax.xlane.f32.xlu1 %v834_v17  ;;  %v14415_v18 = vpop.f32.mrf.mxu1 }
 0x1dd   :  { %v810_v19 = vpop.f32.mrf.mxu1 }
 0x1df   :  { %v14416_v20 = vpop.f32.mrf.mxu1 }
 0x23c   :  { %v815_v24 = vpop.xlane.xlu0 %814 }
 0x23d   :  { %v837_v26 = vsub.f32 %v485_v7, %v815_v24 }
 0x23f   :  { %v845_v29 = vmul.f32 1.442695, %v837_v26 }
 0x241   :  { %15530 = vpow2.f32 %v845_v29 }
 0x244   :  { %v818_v30 = vpop.xlane.xlu0 %817 }
 0x245   :  { %v838_v33 = vsub.f32 %v531_v16, %v818_v30 }
 0x247   :  { %v847_v35 = vmul.f32 1.442695, %v838_v33 }
 0x249   :  { %15532 = vpow2.f32 %v847_v35 }
 0x24c   :  { %v827_v36 = vpop.xlane.xlu0 %826  ;;  %v821_v41 = vpop.xlane.xlu1 %820 }
 0x24d   :  { %v841_v46 = vsub.f32 %v669_v23, %v827_v36  ;;  %v839_v50 = vsub.f32 %v577_v21, %v821_v41 }
 0x24e   :  { %v16255_v55 = vpop.eup %15530 }
 0x24f   :  { %v849_v56 = vmul.f32 1.442695, %v839_v50  ;;  %v861_v59 = vsel %vm444_vm1, %v16255_v55, 0.0  ;;  %v853_v61 = vmul.f32 1.442695, %v841_v46 }
 0x250   :  { %862 = vadd.xlane.f32.xlu0 %v861_v59 }
 0x251   :  { %15534 = vpow2.f32 %v849_v56 }
 0x252   :  { %15536 = vpow2.f32 %v853_v61  ;;  %v16312_v61 = vpack.c.bf16 %v16126_v2, %v16126_v2 }
 0x254   :  { %v833_v7 = vpop.xlane.xlu0 %832  ;;  %v824_v63 = vpop.xlane.xlu1 %823 }
 0x255   :  { %v843_v0 = vsub.f32 %v761_v45, %v833_v7  ;;  %v840_v16 = vsub.f32 %v623_v43, %v824_v63 }
 0x256   :  { %v16259_v6 = vpop.eup %15532 }
 0x257   :  { %v857_v9 = vmul.f32 1.442695, %v843_v0  ;;  %v851_v10 = vmul.f32 1.442695, %v840_v16  ;;  %v864_v21 = vsel %vm444_vm1, %v16259_v6, 0.0  ;;  %v1006_v0 = vsel %vm912_vm2, %v16312_v61, 0 }
 0x258   :  { %865 = vadd.xlane.f32.xlu1 %v864_v21 }
 0x259   :  { %15538 = vpow2.f32 %v857_v9 }
 0x25a   :  { %15540 = vpow2.f32 %v851_v10 }
 0x25c   :  { %v830_v24 = vpop.xlane.xlu1 %829 }
 0x25d   :  { %v842_v26 = vsub.f32 %v715_v3, %v830_v24 }
 0x25e   :  { %v16263_v23 = vpop.eup %15534 }
 0x25f   :  { %v867_v12 = vsel %vm444_vm1, %v16263_v23, 0.0  ;;  %v16267_v17 = vpop.eup %15536  ;;  %v855_v29 = vmul.f32 1.442695, %v842_v26 }
 0x260   :  { %868 = vadd.xlane.f32.xlu0 %v867_v12  ;;  %v873_v43 = vsel %vm444_vm1, %v16267_v17, 0.0 }
 0x261   :  { %15542 = vpow2.f32 %v855_v29  ;;  %v361_v29 = vadd.f32 %v16242_v48, %v16116_v58 }
 0x264   :  { %874 = vadd.xlane.f32.xlu0 %v873_v43  ;;  %v836_v33 = vpop.xlane.xlu1 %835 }
 0x265   :  { %v844_v35 = vsub.f32 %v16251_v15, %v836_v33  ;;  %v16364_v33 = vpack.c.bf16 %v361_v29, %v361_v29 }
 0x266   :  { %v16271_v45 = vpop.eup %15538 }
 0x267   :  { %v16273_v18 = vpop.eup %15540  ;;  %v879_v19 = vsel %vm444_vm1, %v16271_v45, 0.0  ;;  %v859_v36 = vmul.f32 1.442695, %v844_v35 }
 0x268   :  { %v870_v20 = vsel %vm444_vm1, %v16273_v18, 0.0  ;;  %880 = vadd.xlane.f32.xlu0 %v879_v19 }
 0x269   :  { %871 = vadd.xlane.f32.xlu1 %v870_v20  ;;  %15544 = vpow2.f32 %v859_v36 }
 0x26e   :  { %v16295_v30 = vpop.eup %15542 }
 0x26f   :  { %v876_v3 = vsel %vm444_vm1, %v16295_v30, 0.0 }
 0x276   :  { %v16304_v41 = vpop.eup %15544 }
 0x277   :  { %v882_v46 = vsel %vm444_vm1, %v16304_v41, 0.0 }
 0x27a   :  { %1338 = vrot.lane.b32.xlu1 %v16113_v57, %s15893_s2 }
 0x27e   :  { %1288 = vrot.lane.b32.xlu0 %v16103_v49, %s15893_s2 }
 0x282   :  { %1388 = vrot.lane.b32.xlu0 %v16132_v8, %s15893_s2 }
 0x286   :  { %1386 = vrot.lane.b32.xlu0 %v16171_v32, %s15893_s2 }
 0x28a   :  { %1488 = vrot.lane.b32.xlu0 %v16142_v14, %s15893_s2 }
 0x28e   :  { %1486 = vrot.lane.b32.xlu0 %v16165_v28, %s15893_s2 }
 0x292   :  { %1588 = vrot.lane.b32.xlu0 %v16174_v34, %s15893_s2 }
 0x296   :  { %1586 = vrot.lane.b32.xlu0 %v16197_v52, %s15893_s2 }
 0x29a   :  { %1782 = vrot.lane.b32.xlu0 %v16194_v51, %s15893_s2 }
 0x29e   :  { %877 = vadd.xlane.f32.xlu1 %v876_v3  ;;  %v16362_v3 = vpack.c.bf16 %v16153_v22, %v16153_v22  ;;  %v1144_v22 = vsel %vm912_vm2, %v16364_v33, 0 }
 0x2af   :  { %1286 = vrot.lane.b32.xlu1 %v16118_v60, %s15893_s2 }
 0x2d3   :  { %883 = vadd.xlane.f32.xlu1 %v882_v46 }
 0x2d9   :  { %v863_v50 = vpop.xlane.xlu0 %862 }
 0x2da   :  { %15546 = vrcp.f32 %v863_v50 }
 0x2e1   :  { %v866_v56 = vpop.xlane.xlu1 %865 }
 0x2e2   :  { %15548 = vrcp.f32 %v866_v56 }
 0x2e4   :  { %1336 = vrot.lane.b32.xlu1 %v16140_v13, %s15893_s2 }
 0x2e7   :  { %v15547_v59 = vpop.eup %15546 }
 0x2e8   :  { %1438 = vrot.lane.b32.xlu1 %v16163_v27, %s15893_s2  ;;  %v893_v15 = vmul.f32 %v15547_v59, %v16255_v55  ;;  %v16327_v55 = vpack.c.bf16 %v16136_v11, %v16136_v11 }
 0x2e9   :  { %v869_v7 = vpop.xlane.xlu0 %868 }
 0x2ea   :  { %v901_v63 = vpack.c.bf16 %v893_v15, %v893_v15  ;;  %15550 = vrcp.f32 %v869_v7  ;;  %v1052_v43 = vsel %vm912_vm2, %v16327_v55, 0 }
 0x2ec   :  { %1436 = vrot.lane.b32.xlu1 %v16199_v54, %s15893_s2  ;;  %14420 = vmatmul.mubr.msk.bf16.vlgmr.msra.gmra.mxu0 %vm444_vm1, %v901_v63 }
 0x2ed   :  { %14430 = vmatpush3.bf16.msra.mxu0 %v1006_v0  ;;  %14431 = vmatprep.mubr.msk.bf16.mxu0 %vm15892_vm0, %v19944_v37  ;;  %v875_v2 = vpop.xlane.xlu0 %874 }
 0x2ee   :  { %14441 = vmatprep.subr.bf16.mxu0 %v19944_v37  ;;  %15552 = vrcp.f32 %v875_v2 }
 0x2ef   :  { %v15549_v16 = vpop.eup %15548 }
 0x2f0   :  { %1538 = vrot.lane.b32.xlu1 %v16187_v47, %s15893_s2  ;;  %v894_v9 = vmul.f32 %v15549_v16, %v16259_v6  ;;  %v16344_v6 = vpack.c.bf16 %v16160_v25, %v16160_v25 }
 0x2f1   :  { %v881_v12 = vpop.xlane.xlu0 %880 }
 0x2f2   :  { %v872_v10 = vpop.xlane.xlu1 %871  ;;  %v902_v21 = vpack.c.bf16 %v894_v9, %v894_v9  ;;  %v1098_v26 = vsel %vm912_vm2, %v16344_v6, 0 }
 0x2f3   :  { %15554 = vrcp.f32 %v872_v10 }
 0x2f4   :  { %1536 = vrot.lane.b32.xlu1 %v16219_v42, %s15893_s2  ;;  %14426 = vmatmul.mubr.msk.bf16.vlgmr.msra.gmra.mxu1 %vm444_vm1, %v902_v21  ;;  %15556 = vrcp.f32 %v881_v12  ;;  %v16400_v12 = vpack.c.bf16 %v16169_v31, %v16169_v31 }
 0x2f5   :  { %14436 = vmatpush3.bf16.msra.mxu1 %v1052_v43  ;;  %14437 = vmatprep.mubr.msk.bf16.mxu1 %vm15892_vm0, %v19944_v37  ;;  %v1289_v46 = vpop.permute.xlu0 %1288 }
 0x2f6   :  { %14447 = vmatprep.subr.bf16.mxu1 %v19944_v37  ;;  %v1294_v56 = vsel %vm444_vm1, %v1289_v46, 0  ;;  %v1339_v59 = vpop.permute.xlu1 %1338 }
 0x2f7   :  { %v15551_v11 = vpop.eup %15550 }
 0x2f8   :  { %1638 = vrot.lane.b32.xlu1 %v16213_v62, %s15893_s2  ;;  %v895_v19 = vmul.f32 %v15551_v11, %v16263_v23 }
 0x2fa   :  { %v903_v20 = vpack.c.bf16 %v895_v19, %v895_v19  ;;  %v1236_v19 = vsel %vm912_vm2, %v16400_v12, 0 }
 0x2fb   :  { %v15553_v24 = vpop.eup %15552 }
 0x2fc   :  { %1636 = vrot.lane.b32.xlu1 %v16233_v5, %s15893_s2  ;;  %14432 = vmatmul.mubr.msk.bf16.vlgmr.msra.gmra.mxu0 %vm444_vm1, %v903_v20  ;;  %v897_v25 = vmul.f32 %v15553_v24, %v16267_v17  ;;  %v1190_v17 = vsel %vm912_vm2, %v16362_v3, 0 }
 0x2fd   :  { %14442 = vmatpush3.bf16.msra.mxu0 %v1098_v26  ;;  %14443 = vmatprep.mubr.msk.bf16.mxu0 %vm15892_vm0, %v19944_v37 }
 0x2fe   :  { %14453 = vmatprep.subr.bf16.mxu0 %v19944_v37  ;;  %v905_v48 = vpack.c.bf16 %v897_v25, %v897_v25 }
 0x300   :  { %1830 = vrot.lane.b32.xlu1 %v16230_v4, %s15893_s2  ;;  %v15555_v23 = vpop.eup %15554 }
 0x301   :  { %v896_v58 = vmul.f32 %v15555_v23, %v16273_v18  ;;  %v15557_v35 = vpop.eup %15556 }
 0x302   :  { %v899_v18 = vmul.f32 %v15557_v35, %v16271_v45  ;;  %v1389_v45 = vpop.permute.xlu0 %1388 }
 0x303   :  { %v904_v36 = vpack.c.bf16 %v896_v58, %v896_v58  ;;  %v1394_v2 = vsel %vm444_vm1, %v1389_v45, 0 }
 0x304   :  { %1878 = vrot.lane.b32.xlu1 %v16312_v61, %s15893_s2  ;;  %14444 = vmatmul.mubr.msk.bf16.vlgmr.msra.gmra.mxu0 %vm444_vm1, %v905_v48  ;;  %v907_v50 = vpack.c.bf16 %v899_v18, %v899_v18 }
 0x305   :  { %14438 = vmatmul.mubr.msk.bf16.vlgmr.msra.gmra.mxu1 %vm444_vm1, %v904_v36  ;;  %14454 = vmatpush3.bf16.msra.mxu0 %v1190_v17  ;;  %v1344_v36 = vsel %vm444_vm1, %v1339_v59, 0 }
 0x306   :  { %14448 = vmatpush3.bf16.msra.mxu1 %v1144_v22  ;;  %14455 = vmatprep.mubr.msk.bf16.mxu0 %vm15892_vm0, %v19944_v37  ;;  %v1387_v15 = vpop.permute.xlu0 %1386 }
 0x307   :  { %14465 = vmatprep.subr.bf16.mxu0 %v19944_v37  ;;  %14449 = vmatprep.mubr.msk.bf16.mxu1 %vm15892_vm0, %v19944_v37 }
 0x308   :  { %1926 = vrot.lane.b32.xlu1 %v16327_v55, %s15893_s2  ;;  %14459 = vmatprep.subr.bf16.mxu1 %v19944_v37 }
 0x30a   :  { %v1489_v63 = vpop.permute.xlu0 %1488 }
 0x30b   :  { %v1494_v9 = vsel %vm444_vm1, %v1489_v63, 0 }
 0x30c   :  { %14456 = vmatmul.mubr.msk.bf16.vlgmr.msra.gmra.mxu0 %vm444_vm1, %v907_v50 }
 0x30d   :  { %14466 = vmatpush3.bf16.xpose.msra.mxu0 %v1294_v56  ;;  %14467 = vmatprep.mubr.msk.bf16.mxu0 %vm15892_vm0, %v19944_v37 }
 0x30e   :  { %14477 = vmatprep.subr.bf16.mxu0 %v19944_v37  ;;  %v1487_v16 = vpop.permute.xlu0 %1486 }
 0x312   :  { %v1589_v21 = vpop.permute.xlu0 %1588 }
 0x313   :  { %v1594_v24 = vsel %vm444_vm1, %v1589_v21, 0 }
 0x316   :  { %v1587_v20 = vpop.permute.xlu0 %1586 }
 0x31a   :  { %v1783_v31 = vpop.permute.xlu0 %1782 }
 0x327   :  { %v878_v7 = vpop.xlane.xlu1 %877 }
 0x328   :  { %15558 = vrcp.f32 %v878_v7 }
 0x32b   :  { %v1287_v0 = vpop.permute.xlu1 %1286 }
 0x32c   :  { %14468 = vmatmul.mubr.msk.bf16.vlgmr.msra.gmra.mxu0 %vm444_vm1, %v1287_v0 }
 0x32d   :  { %14478 = vmatpush3.bf16.xpose.msra.mxu0 %v1394_v2  ;;  %14479 = vmatprep.mubr.msk.bf16.mxu0 %vm15892_vm0, %v19944_v37 }
 0x32e   :  { %14489 = vmatprep.subr.bf16.mxu0 %v19944_v37 }
 0x334   :  { %14480 = vmatmul.mubr.msk.bf16.vlgmr.msra.gmra.mxu0 %vm444_vm1, %v1387_v15 }
 0x335   :  { %v15559_v10 = vpop.eup %15558  ;;  %14490 = vmatpush3.bf16.xpose.msra.mxu0 %v1494_v9  ;;  %14491 = vmatprep.mubr.msk.bf16.mxu0 %vm15892_vm0, %v19944_v37 }
 0x336   :  { %v898_v43 = vmul.f32 %v15559_v10, %v16295_v30  ;;  %14501 = vmatprep.subr.bf16.mxu0 %v19944_v37  ;;  %v1788_v30 = vsel %vm912_vm2, %v1783_v31, 0 }
 0x338   :  { %v906_v11 = vpack.c.bf16 %v898_v43, %v898_v43 }
 0x33a   :  { %14450 = vmatmul.mubr.msk.bf16.vlgmr.msra.gmra.mxu1 %vm444_vm1, %v906_v11 }
 0x33b   :  { %14460 = vmatpush3.bf16.msra.mxu1 %v1236_v19  ;;  %14461 = vmatprep.mubr.msk.bf16.mxu1 %vm15892_vm0, %v19944_v37 }
 0x33c   :  { %14492 = vmatmul.mubr.msk.bf16.vlgmr.msra.gmra.mxu0 %vm444_vm1, %v1487_v16  ;;  %14471 = vmatprep.subr.bf16.mxu1 %v19944_v37 }
 0x33d   :  { %14502 = vmatpush3.bf16.xpose.msra.mxu0 %v1594_v24  ;;  %14503 = vmatprep.mubr.msk.bf16.mxu0 %vm15892_vm0, %v19944_v37 }
 0x33e   :  { %14513 = vmatprep.subr.bf16.mxu0 %v19944_v37 }
 0x344   :  { %14504 = vmatmul.mubr.msk.bf16.vlgmr.msra.gmra.mxu0 %vm444_vm1, %v1587_v20 }
 0x345   :  { %14514 = vmatpush3.bf16.msra.mxu0 %v1788_v30  ;;  %14515 = vmatprep.mubr.msk.bf16.mxu0 %vm15892_vm0, %v19944_v37 }
 0x346   :  { %14525 = vmatprep.subr.bf16.mxu0 %v19944_v37 }
 0x35c   :  { %v884_v26 = vpop.xlane.xlu1 %883 }
 0x35d   :  { %15560 = vrcp.f32 %v884_v26 }
 0x360   :  { %v1337_v29 = vpop.permute.xlu1 %1336 }
 0x364   :  { %v1439_v25 = vpop.permute.xlu1 %1438 }
 0x365   :  { %v1444_v22 = vsel %vm444_vm1, %v1439_v25, 0 }
 0x368   :  { %v1437_v35 = vpop.permute.xlu1 %1436 }
 0x36a   :  { %v15561_v23 = vpop.eup %15560 }
 0x36b   :  { %v900_v58 = vmul.f32 %v15561_v23, %v16304_v41 }
 0x36c   :  { %v1539_v17 = vpop.permute.xlu1 %1538 }
 0x36d   :  { %v908_v48 = vpack.c.bf16 %v900_v58, %v900_v58  ;;  %v1544_v18 = vsel %vm444_vm1, %v1539_v17, 0 }
 0x36f   :  { %14462 = vmatmul.mubr.msk.bf16.vlgmr.msra.gmra.mxu1 %vm444_vm1, %v908_v48 }
 0x370   :  { %14472 = vmatpush3.bf16.xpose.msra.mxu1 %v1344_v36  ;;  %14473 = vmatprep.mubr.msk.bf16.mxu1 %vm15892_vm0, %v19944_v37  ;;  %v1537_v41 = vpop.permute.xlu1 %1536 }
 0x371   :  { %14483 = vmatprep.subr.bf16.mxu1 %v19944_v37 }
 0x374   :  { %v1639_v46 = vpop.permute.xlu1 %1638 }
 0x375   :  { %v1644_v56 = vsel %vm444_vm1, %v1639_v46, 0 }
 0x377   :  { %14474 = vmatmul.mubr.msk.bf16.vlgmr.msra.gmra.mxu1 %vm444_vm1, %v1337_v29 }
 0x378   :  { %14484 = vmatpush3.bf16.xpose.msra.mxu1 %v1444_v22  ;;  %14485 = vmatprep.mubr.msk.bf16.mxu1 %vm15892_vm0, %v19944_v37  ;;  %v1637_v50 = vpop.permute.xlu1 %1636 }
 0x379   :  { %14495 = vmatprep.subr.bf16.mxu1 %v19944_v37 }
 0x37c   :  { %v1831_v45 = vpop.permute.xlu1 %1830 }
 0x37d   :  { %v1836_v59 = vsel %vm912_vm2, %v1831_v45, 0 }
 0x37f   :  { %14486 = vmatmul.mubr.msk.bf16.vlgmr.msra.gmra.mxu1 %vm444_vm1, %v1437_v35 }
 0x380   :  { %14496 = vmatpush3.bf16.xpose.msra.mxu1 %v1544_v18  ;;  %14497 = vmatprep.mubr.msk.bf16.mxu1 %vm15892_vm0, %v19944_v37 }
 0x381   :  { %14507 = vmatprep.subr.bf16.mxu1 %v19944_v37 }
 0x387   :  { %14498 = vmatmul.mubr.msk.bf16.vlgmr.msra.gmra.mxu1 %vm444_vm1, %v1537_v41 }
 0x388   :  { %14508 = vmatpush3.bf16.xpose.msra.mxu1 %v1644_v56  ;;  %14509 = vmatprep.mubr.msk.bf16.mxu1 %vm15892_vm0, %v19944_v37 }
 0x389   :  { %14519 = vmatprep.subr.bf16.mxu1 %v19944_v37 }
 0x38f   :  { %14510 = vmatmul.mubr.msk.bf16.vlgmr.msra.gmra.mxu1 %vm444_vm1, %v1637_v50 }
 0x390   :  { %14520 = vmatpush3.bf16.msra.mxu1 %v1836_v59  ;;  %14521 = vmatprep.mubr.msk.bf16.mxu1 %vm15892_vm0, %v19944_v37 }
 0x391   :  { %14531 = vmatprep.subr.bf16.mxu1 %v19944_v37 }
 0x3ac   :  { %v950_v15 = vpop.f32.mrf.mxu0 }
 0x3ad   :  { %1278 = vst.msk [vmem:[#allocation2] sm:$0xff] %vm444_vm1, %v950_v15 }
 0x3ae   :  { %v14421_v7 = vpop.f32.mrf.mxu0 }
 0x3b0   :  { %v953_v63 = vpop.f32.mrf.mxu0 }
 0x3b2   :  { %v14422_v0 = vpop.f32.mrf.mxu0 }
 0x3b4   :  { %v996_v2 = vpop.f32.mrf.mxu1 }
 0x3b5   :  { %1279 = vst.msk [vmem:[#allocation2 + $0x8] sm:$0xff] %vm444_vm1, %v996_v2 }
 0x3b6   :  { %v14427_v16 = vpop.f32.mrf.mxu1 }
 0x3b8   :  { %v999_v9 = vpop.f32.mrf.mxu1 }
 0x3ba   :  { %v14428_v10 = vpop.f32.mrf.mxu1 }
 0x3bc   :  { %v1042_v21 = vpop.f32.mrf.mxu0 }
 0x3bd   :  { %1280 = vst.msk [vmem:[#allocation2 + $0x10] sm:$0xff] %vm444_vm1, %v1042_v21 }
 0x3be   :  { %v14433_v43 = vpop.f32.mrf.mxu0 }
 0x3c0   :  { %v1045_v11 = vpop.f32.mrf.mxu0 }
 0x3c2   :  { %v14434_v19 = vpop.f32.mrf.mxu0 }
 0x3c4   :  { %v1134_v20 = vpop.f32.mrf.mxu0 }
 0x3c5   :  { %v1088_v24 = vpop.f32.mrf.mxu1  ;;  %1282 = vst.msk [vmem:[#allocation2 + $0x20] sm:$0xff] %vm444_vm1, %v1134_v20 }
 0x3c6   :  { %1281 = vst.msk [vmem:[#allocation2 + $0x18] sm:$0xff] %vm444_vm1, %v1088_v24  ;;  %v14445_v31 = vpop.f32.mrf.mxu0 }
 0x3c7   :  { %v14439_v30 = vpop.f32.mrf.mxu1 }
 0x3c8   :  { %v1137_v26 = vpop.f32.mrf.mxu0 }
 0x3c9   :  { %v1091_v29 = vpop.f32.mrf.mxu1 }
 0x3ca   :  { %v14446_v25 = vpop.f32.mrf.mxu0 }
 0x3cb   :  { %v14440_v23 = vpop.f32.mrf.mxu1 }
 0x3cc   :  { %v1226_v58 = vpop.f32.mrf.mxu0 }
 0x3cd   :  { %1284 = vst.msk [vmem:[#allocation2 + $0x30] sm:$0xff] %vm444_vm1, %v1226_v58 }
 0x3ce   :  { %v14457_v48 = vpop.f32.mrf.mxu0 }
 0x3d0   :  { %v1229_v35 = vpop.f32.mrf.mxu0 }
 0x3d2   :  { %v14458_v36 = vpop.f32.mrf.mxu0 }
 0x3ec   :  { %v1330_v17 = vpop.f32.mrf.mxu0 }
 0x3ed   :  { %v1686_v22 = vsel %vm444_vm1, %v1330_v17, -inf }
 0x3ee   :  { %1687 = vmax.xlane.f32.xlu0 %v1686_v22  ;;  %v14469_v41 = vpop.f32.mrf.mxu0 }
 0x3f0   :  { %v1333_v18 = vpop.f32.mrf.mxu0 }
 0x3f2   :  { %v14470_v46 = vpop.f32.mrf.mxu0 }
 0x3f4   :  { %v1430_v50 = vpop.f32.mrf.mxu0 }
 0x3f5   :  { %v1692_v56 = vsel %vm444_vm1, %v1430_v50, -inf }
 0x3f6   :  { %1693 = vmax.xlane.f32.xlu0 %v1692_v56  ;;  %v14481_v45 = vpop.f32.mrf.mxu0 }
 0x3f8   :  { %v1433_v59 = vpop.f32.mrf.mxu0 }
 0x3fa   :  { %v1180_v15 = vpop.f32.mrf.mxu1  ;;  %v14482_v7 = vpop.f32.mrf.mxu0 }
 0x3fb   :  { %1283 = vst.msk [vmem:[#allocation2 + $0x28] sm:$0xff] %vm444_vm1, %v1180_v15 }
 0x3fc   :  { %v14451_v63 = vpop.f32.mrf.mxu1  ;;  %v16455_v0 = vpop.f32.mrf.mxu0 }
 0x3fd   :  { %v1698_v18 = vsel %vm444_vm1, %v16455_v0, -inf }
 0x3fe   :  { %v1183_v2 = vpop.f32.mrf.mxu1  ;;  %v14493_v16 = vpop.f32.mrf.mxu0 }
 0x400   :  { %v14452_v9 = vpop.f32.mrf.mxu1  ;;  %v1533_v10 = vpop.f32.mrf.mxu0 }
 0x402   :  { %v14494_v21 = vpop.f32.mrf.mxu0 }
 0x404   :  { %v16457_v43 = vpop.f32.mrf.mxu0 }
 0x405   :  { %v1704_v45 = vsel %vm444_vm1, %v16457_v43, -inf }
 0x406   :  { %v14505_v11 = vpop.f32.mrf.mxu0 }
 0x408   :  { %v1633_v19 = vpop.f32.mrf.mxu0 }
 0x40a   :  { %v14506_v20 = vpop.f32.mrf.mxu0 }
 0x42f   :  { %v1272_v24 = vpop.f32.mrf.mxu1 }
 0x430   :  { %1285 = vst.msk [vmem:[#allocation2 + $0x38] sm:$0xff] %vm444_vm1, %v1272_v24 }
 0x431   :  { %v14463_v31 = vpop.f32.mrf.mxu1 }
 0x433   :  { %v1275_v30 = vpop.f32.mrf.mxu1 }
 0x435   :  { %v14464_v26 = vpop.f32.mrf.mxu1 }
 0x437   :  { %v1380_v29 = vpop.f32.mrf.mxu1 }
 0x438   :  { %v1689_v25 = vsel %vm444_vm1, %v1380_v29, -inf }
 0x439   :  { %1690 = vmax.xlane.f32.xlu1 %v1689_v25  ;;  %v14475_v23 = vpop.f32.mrf.mxu1 }
 0x43b   :  { %v1383_v58 = vpop.f32.mrf.mxu1 }
 0x43d   :  { %v14476_v48 = vpop.f32.mrf.mxu1 }
 0x43e   :  { %v1879_v48 = vpop.permute.xlu1 %1878 }
 0x43f   :  { %v1480_v35 = vpop.f32.mrf.mxu1 }
 0x440   :  { %v1695_v36 = vsel %vm444_vm1, %v1480_v35, -inf }
 0x441   :  { %1696 = vmax.xlane.f32.xlu0 %v1695_v36  ;;  %v14487_v22 = vpop.f32.mrf.mxu1 }
 0x443   :  { %v1483_v41 = vpop.f32.mrf.mxu1 }
 0x445   :  { %1699 = vmax.xlane.f32.xlu0 %v1698_v18  ;;  %v14488_v46 = vpop.f32.mrf.mxu1 }
 0x447   :  { %v1580_v56 = vpop.f32.mrf.mxu1 }
 0x448   :  { %v1701_v59 = vsel %vm444_vm1, %v1580_v56, -inf }
 0x449   :  { %1705 = vmax.xlane.f32.xlu0 %v1704_v45  ;;  %1702 = vmax.xlane.f32.xlu1 %v1701_v59  ;;  %v14499_v15 = vpop.f32.mrf.mxu1 }
 0x44b   :  { %v1583_v7 = vpop.f32.mrf.mxu1 }
 0x44d   :  { %v14500_v63 = vpop.f32.mrf.mxu1 }
 0x44f   :  { %v16467_v2 = vpop.f32.mrf.mxu1 }
 0x450   :  { %v1707_v20 = vsel %vm444_vm1, %v16467_v2, -inf }
 0x451   :  { %v14511_v16 = vpop.f32.mrf.mxu1 }
 0x453   :  { %v1683_v9 = vpop.f32.mrf.mxu1 }
 0x455   :  { %v14512_v10 = vpop.f32.mrf.mxu1 }
 0x45a   :  { %2022 = vrot.lane.b32.xlu1 %v16364_v33, %s15893_s2 }
 0x45f   :  { %1974 = vrot.lane.b32.xlu0 %v16344_v6, %s15893_s2 }
 0x477   :  { %v1688_v21 = vpop.xlane.xlu0 %1687 }
 0x478   :  { %v1710_v11 = vsub.f32 %v1330_v17, %v1688_v21  ;;  %v16477_v17 = vpop.permute.xlu1 %1926 }
 0x47a   :  { %v1718_v19 = vmul.f32 1.442695, %v1710_v11 }
 0x47c   :  { %15562 = vpow2.f32 %v1718_v19 }
 0x47e   :  { %1708 = vmax.xlane.f32.xlu1 %v1707_v20 }
 0x47f   :  { %v1694_v24 = vpop.xlane.xlu0 %1693 }
 0x480   :  { %v1712_v31 = vsub.f32 %v1430_v50, %v1694_v24 }
 0x482   :  { %v1722_v30 = vmul.f32 1.442695, %v1712_v31 }
 0x484   :  { %15564 = vpow2.f32 %v1722_v30 }
 0x489   :  { %v15563_v26 = vpop.eup %15562 }
 0x48a   :  { %v1734_v25 = vsel %vm444_vm1, %v15563_v26, 0.0 }
 0x48b   :  { %1735 = vadd.xlane.f32.xlu0 %v1734_v25 }
 0x491   :  { %v15565_v23 = vpop.eup %15564 }
 0x492   :  { %v1740_v58 = vsel %vm444_vm1, %v15565_v23, 0.0 }
 0x493   :  { %1741 = vadd.xlane.f32.xlu0 %v1740_v58 }
 0x4c2   :  { %v1691_v36 = vpop.xlane.xlu1 %1690 }
 0x4c3   :  { %v1711_v22 = vsub.f32 %v1380_v29, %v1691_v36 }
 0x4c5   :  { %v1720_v41 = vmul.f32 1.442695, %v1711_v22 }
 0x4c7   :  { %15566 = vpow2.f32 %v1720_v41 }
 0x4ca   :  { %v1697_v18 = vpop.xlane.xlu0 %1696 }
 0x4cb   :  { %v1713_v46 = vsub.f32 %v1480_v35, %v1697_v18  ;;  %v1884_v18 = vsel %vm912_vm2, %v1879_v48, 0 }
 0x4cd   :  { %v1724_v50 = vmul.f32 1.442695, %v1713_v46 }
 0x4ce   :  { %v1700_v45 = vpop.xlane.xlu0 %1699 }
 0x4cf   :  { %15568 = vpow2.f32 %v1724_v50  ;;  %v1714_v59 = vsub.f32 %v16455_v0, %v1700_v45 }
 0x4d1   :  { %v1726_v15 = vmul.f32 1.442695, %v1714_v59 }
 0x4d2   :  { %v1703_v0 = vpop.xlane.xlu1 %1702  ;;  %v1706_v21 = vpop.xlane.xlu0 %1705 }
 0x4d3   :  { %15570 = vpow2.f32 %v1726_v15  ;;  %v1715_v10 = vsub.f32 %v1580_v56, %v1703_v0  ;;  %v1716_v11 = vsub.f32 %v16457_v43, %v1706_v21 }
 0x4d4   :  { %v16480_v7 = vpop.eup %15566 }
 0x4d5   :  { %v1737_v63 = vsel %vm444_vm1, %v16480_v7, 0.0  ;;  %v1728_v19 = vmul.f32 1.442695, %v1715_v10  ;;  %v1730_v20 = vmul.f32 1.442695, %v1716_v11 }
 0x4d6   :  { %1738 = vadd.xlane.f32.xlu1 %v1737_v63  ;;  %v1975_v31 = vpop.permute.xlu0 %1974  ;;  %v2023_v46 = vpop.permute.xlu1 %2022 }
 0x4d7   :  { %15572 = vpow2.f32 %v1728_v19  ;;  %v1980_v15 = vsel %vm912_vm2, %v1975_v31, 0  ;;  %v1932_v19 = vsel %vm912_vm2, %v16477_v17, 0  ;;  %v2028_v17 = vsel %vm912_vm2, %v2023_v46, 0 }
 0x4d8   :  { %15574 = vpow2.f32 %v1730_v20 }
 0x4dc   :  { %v16484_v16 = vpop.eup %15568 }
 0x4dd   :  { %v1743_v29 = vsel %vm444_vm1, %v16484_v16, 0.0 }
 0x4de   :  { %1744 = vadd.xlane.f32.xlu1 %v1743_v29 }
 0x4e0   :  { %v16488_v35 = vpop.eup %15570 }
 0x4e1   :  { %v1746_v9 = vsel %vm444_vm1, %v16488_v35, 0.0 }
 0x4e2   :  { %1747 = vadd.xlane.f32.xlu0 %v1746_v9 }
 0x4e4   :  { %v16497_v24 = vpop.eup %15572 }
 0x4e5   :  { %v1749_v30 = vsel %vm444_vm1, %v16497_v24, 0.0  ;;  %v16501_v25 = vpop.eup %15574 }
 0x4e6   :  { %v1752_v56 = vsel %vm444_vm1, %v16501_v25, 0.0 }
 0x4ef   :  { %2118 = vrot.lane.b32.xlu1 %v16400_v12, %s15893_s2 }
 0x4f8   :  { %2070 = vrot.lane.b32.xlu0 %v16362_v3, %s15893_s2 }
 0x507   :  { %v1709_v59 = vpop.xlane.xlu1 %1708 }
 0x508   :  { %v1717_v48 = vsub.f32 %v16467_v2, %v1709_v59 }
 0x513   :  { %1750 = vadd.xlane.f32.xlu1 %v1749_v30 }
 0x514   :  { %v1736_v58 = vpop.xlane.xlu0 %1735 }
 0x515   :  { %15576 = vrcp.f32 %v1736_v58 }
 0x517   :  { %1753 = vadd.xlane.f32.xlu0 %v1752_v56 }
 0x51c   :  { %v1742_v43 = vpop.xlane.xlu0 %1741 }
 0x51d   :  { %15578 = vrcp.f32 %v1742_v43 }
 0x522   :  { %v15577_v36 = vpop.eup %15576 }
 0x523   :  { %v1766_v22 = vmul.f32 %v15577_v36, %v15563_v26 }
 0x524   :  { %2259 = vrot.lane.b32.xlu1 %v16113_v57, %s15894_s22 }
 0x525   :  { %v1774_v41 = vpack.c.bf16 %v1766_v22, %v1766_v22 }
 0x527   :  { %14516 = vmatmul.mubr.msk.bf16.vlgmr.msra.gmra.mxu0 %vm444_vm1, %v1774_v41 }
 0x528   :  { %14526 = vmatpush3.bf16.msra.mxu0 %v1884_v18  ;;  %14527 = vmatprep.mubr.msk.bf16.mxu0 %vm15892_vm0, %v19944_v37 }
 0x529   :  { %14537 = vmatprep.subr.bf16.mxu0 %v19944_v37 }
 0x52a   :  { %v15579_v50 = vpop.eup %15578 }
 0x52b   :  { %v1768_v45 = vmul.f32 %v15579_v50, %v15565_v23  ;;  %v1732_v23 = vmul.f32 1.442695, %v1717_v48 }
 0x52d   :  { %2209 = vrot.lane.b32.xlu0 %v16103_v49, %s15894_s22  ;;  %v1776_v26 = vpack.c.bf16 %v1768_v45, %v1768_v45  ;;  %15580 = vpow2.f32 %v1732_v23 }
 0x52f   :  { %14528 = vmatmul.mubr.msk.bf16.vlgmr.msra.gmra.mxu0 %vm444_vm1, %v1776_v26 }
 0x530   :  { %14538 = vmatpush3.bf16.msra.mxu0 %v1980_v15  ;;  %14539 = vmatprep.mubr.msk.bf16.mxu0 %vm15892_vm0, %v19944_v37 }
 0x531   :  { %2207 = vrot.lane.b32.xlu0 %v16118_v60, %s15894_s22  ;;  %14549 = vmatprep.subr.bf16.mxu0 %v19944_v37 }
 0x535   :  { %2309 = vrot.lane.b32.xlu0 %v16132_v8, %s15894_s22 }
 0x539   :  { %2307 = vrot.lane.b32.xlu0 %v16171_v32, %s15894_s22 }
 0x53a   :  { %v16530_v2 = vpop.eup %15580 }
 0x53b   :  { %v1755_v63 = vsel %vm444_vm1, %v16530_v2, 0.0 }
 0x53d   :  { %2409 = vrot.lane.b32.xlu0 %v16142_v14, %s15894_s22 }
 0x541   :  { %2407 = vrot.lane.b32.xlu0 %v16165_v28, %s15894_s22 }
 0x545   :  { %2509 = vrot.lane.b32.xlu0 %v16174_v34, %s15894_s22 }
 0x548   :  { %1756 = vadd.xlane.f32.xlu1 %v1755_v63 }
 0x549   :  { %2507 = vrot.lane.b32.xlu0 %v16197_v52, %s15894_s22 }
 0x54d   :  { %2703 = vrot.lane.b32.xlu0 %v16194_v51, %s15894_s22 }
 0x559   :  { %2257 = vrot.lane.b32.xlu1 %v16140_v13, %s15894_s22 }
 0x55d   :  { %2359 = vrot.lane.b32.xlu1 %v16163_v27, %s15894_s22 }
 0x55f   :  { %v1739_v29 = vpop.xlane.xlu1 %1738 }
 0x560   :  { %15582 = vrcp.f32 %v1739_v29 }
 0x561   :  { %2357 = vrot.lane.b32.xlu1 %v16199_v54, %s15894_s22 }
 0x565   :  { %2459 = vrot.lane.b32.xlu1 %v16187_v47, %s15894_s22 }
 0x567   :  { %v1745_v9 = vpop.xlane.xlu1 %1744 }
 0x568   :  { %15584 = vrcp.f32 %v1745_v9 }
 0x569   :  { %2457 = vrot.lane.b32.xlu1 %v16219_v42, %s15894_s22 }
 0x56b   :  { %v1748_v0 = vpop.xlane.xlu0 %1747 }
 0x56c   :  { %15586 = vrcp.f32 %v1748_v0 }
 0x56d   :  { %v15583_v10 = vpop.eup %15582  ;;  %2559 = vrot.lane.b32.xlu1 %v16213_v62, %s15894_s22 }
 0x56e   :  { %v1767_v21 = vmul.f32 %v15583_v10, %v16480_v7 }
 0x56f   :  { %v2071_v56 = vpop.permute.xlu0 %2070 }
 0x570   :  { %v1775_v11 = vpack.c.bf16 %v1767_v21, %v1767_v21 }
 0x571   :  { %2557 = vrot.lane.b32.xlu1 %v16233_v5, %s15894_s22 }
 0x572   :  { %14522 = vmatmul.mubr.msk.bf16.vlgmr.msra.gmra.mxu1 %vm444_vm1, %v1775_v11 }
 0x573   :  { %14532 = vmatpush3.bf16.msra.mxu1 %v1932_v19  ;;  %14533 = vmatprep.mubr.msk.bf16.mxu1 %vm15892_vm0, %v19944_v37 }
 0x574   :  { %14543 = vmatprep.subr.bf16.mxu1 %v19944_v37 }
 0x575   :  { %v15585_v20 = vpop.eup %15584  ;;  %2751 = vrot.lane.b32.xlu1 %v16230_v4, %s15894_s22 }
 0x576   :  { %v1769_v7 = vmul.f32 %v15585_v20, %v16484_v16  ;;  %v2076_v16 = vsel %vm912_vm2, %v2071_v56, 0 }
 0x578   :  { %v1777_v31 = vpack.c.bf16 %v1769_v7, %v1769_v7 }
 0x579   :  { %v15587_v30 = vpop.eup %15586  ;;  %2799 = vrot.lane.b32.xlu1 %v16312_v61, %s15894_s22 }
 0x57a   :  { %14534 = vmatmul.mubr.msk.bf16.vlgmr.msra.gmra.mxu1 %vm444_vm1, %v1777_v31  ;;  %v1770_v58 = vmul.f32 %v15587_v30, %v16488_v35  ;;  %v2119_v35 = vpop.permute.xlu1 %2118 }
 0x57b   :  { %14544 = vmatpush3.bf16.msra.mxu1 %v2028_v17  ;;  %14545 = vmatprep.mubr.msk.bf16.mxu1 %vm15892_vm0, %v19944_v37  ;;  %v2124_v15 = vsel %vm912_vm2, %v2119_v35, 0 }
 0x57c   :  { %v1778_v43 = vpack.c.bf16 %v1770_v58, %v1770_v58  ;;  %14555 = vmatprep.subr.bf16.mxu1 %v19944_v37 }
 0x57d   :  { %2847 = vrot.lane.b32.xlu1 %v16327_v55, %s15894_s22 }
 0x57e   :  { %14540 = vmatmul.mubr.msk.bf16.vlgmr.msra.gmra.mxu0 %vm444_vm1, %v1778_v43 }
 0x57f   :  { %14550 = vmatpush3.bf16.msra.mxu0 %v2076_v16  ;;  %14551 = vmatprep.mubr.msk.bf16.mxu0 %vm15892_vm0, %v19944_v37 }
 0x580   :  { %14561 = vmatprep.subr.bf16.mxu0 %v19944_v37 }
 0x59c   :  { %v1751_v36 = vpop.xlane.xlu1 %1750 }
 0x59d   :  { %15588 = vrcp.f32 %v1751_v36 }
 0x5a0   :  { %v1754_v22 = vpop.xlane.xlu0 %1753  ;;  %v2260_v19 = vpop.permute.xlu1 %2259 }
 0x5a1   :  { %15590 = vrcp.f32 %v1754_v22  ;;  %v2265_v35 = vsel %vm444_vm1, %v2260_v19, 0 }
 0x5a4   :  { %v2210_v41 = vpop.permute.xlu0 %2209 }
 0x5a5   :  { %v2215_v29 = vsel %vm444_vm1, %v2210_v41, 0 }
 0x5a8   :  { %v2208_v18 = vpop.permute.xlu0 %2207 }
 0x5aa   :  { %v15589_v46 = vpop.eup %15588 }
 0x5ab   :  { %v1771_v50 = vmul.f32 %v15589_v46, %v16497_v24 }
 0x5ac   :  { %v2310_v45 = vpop.permute.xlu0 %2309 }
 0x5ad   :  { %v1779_v59 = vpack.c.bf16 %v1771_v50, %v1771_v50 }
 0x5ae   :  { %v15591_v26 = vpop.eup %15590 }
 0x5af   :  { %14546 = vmatmul.mubr.msk.bf16.vlgmr.msra.gmra.mxu1 %vm444_vm1, %v1779_v59  ;;  %v1772_v48 = vmul.f32 %v15591_v26, %v16501_v25  ;;  %v2315_v25 = vsel %vm444_vm1, %v2310_v45, 0 }
 0x5b0   :  { %14556 = vmatpush3.bf16.msra.mxu1 %v2124_v15  ;;  %14557 = vmatprep.mubr.msk.bf16.mxu1 %vm15892_vm0, %v19944_v37  ;;  %v2308_v63 = vpop.permute.xlu0 %2307 }
 0x5b1   :  { %v1780_v23 = vpack.c.bf16 %v1772_v48, %v1772_v48  ;;  %14567 = vmatprep.subr.bf16.mxu1 %v19944_v37 }
 0x5b3   :  { %14552 = vmatmul.mubr.msk.bf16.vlgmr.msra.gmra.mxu0 %vm444_vm1, %v1780_v23 }
 0x5b4   :  { %14562 = vmatpush3.bf16.xpose.msra.mxu0 %v2215_v29  ;;  %14563 = vmatprep.mubr.msk.bf16.mxu0 %vm15892_vm0, %v19944_v37  ;;  %v2410_v24 = vpop.permute.xlu0 %2409 }
 0x5b5   :  { %14573 = vmatprep.subr.bf16.mxu0 %v19944_v37  ;;  %v2415_v0 = vsel %vm444_vm1, %v2410_v24, 0 }
 0x5b8   :  { %v2408_v9 = vpop.permute.xlu0 %2407 }
 0x5bb   :  { %14564 = vmatmul.mubr.msk.bf16.vlgmr.msra.gmra.mxu0 %vm444_vm1, %v2208_v18 }
 0x5bc   :  { %14574 = vmatpush3.bf16.xpose.msra.mxu0 %v2315_v25  ;;  %14575 = vmatprep.mubr.msk.bf16.mxu0 %vm15892_vm0, %v19944_v37  ;;  %v2510_v10 = vpop.permute.xlu0 %2509 }
 0x5bd   :  { %14585 = vmatprep.subr.bf16.mxu0 %v19944_v37  ;;  %v2515_v11 = vsel %vm444_vm1, %v2510_v10, 0 }
 0x5c0   :  { %v2508_v21 = vpop.permute.xlu0 %2507 }
 0x5c3   :  { %14576 = vmatmul.mubr.msk.bf16.vlgmr.msra.gmra.mxu0 %vm444_vm1, %v2308_v63 }
 0x5c4   :  { %14586 = vmatpush3.bf16.xpose.msra.mxu0 %v2415_v0  ;;  %14587 = vmatprep.mubr.msk.bf16.mxu0 %vm15892_vm0, %v19944_v37  ;;  %v2704_v20 = vpop.permute.xlu0 %2703 }
 0x5c5   :  { %14597 = vmatprep.subr.bf16.mxu0 %v19944_v37  ;;  %v2709_v31 = vsel %vm912_vm2, %v2704_v20, 0 }
 0x5cb   :  { %14588 = vmatmul.mubr.msk.bf16.vlgmr.msra.gmra.mxu0 %vm444_vm1, %v2408_v9 }
 0x5cc   :  { %14598 = vmatpush3.bf16.xpose.msra.mxu0 %v2515_v11  ;;  %14599 = vmatprep.mubr.msk.bf16.mxu0 %vm15892_vm0, %v19944_v37 }
 0x5cd   :  { %14609 = vmatprep.subr.bf16.mxu0 %v19944_v37 }
 0x5d1   :  { %v1757_v7 = vpop.xlane.xlu1 %1756 }
 0x5d2   :  { %15592 = vrcp.f32 %v1757_v7 }
 0x5d3   :  { %14600 = vmatmul.mubr.msk.bf16.vlgmr.msra.gmra.mxu0 %vm444_vm1, %v2508_v21 }
 0x5d4   :  { %14610 = vmatpush3.bf16.msra.mxu0 %v2709_v31  ;;  %14611 = vmatprep.mubr.msk.bf16.mxu0 %vm15892_vm0, %v19944_v37 }
 0x5d5   :  { %14621 = vmatprep.subr.bf16.mxu0 %v19944_v37  ;;  %v2258_v30 = vpop.permute.xlu1 %2257 }
 0x5d9   :  { %v2360_v17 = vpop.permute.xlu1 %2359 }
 0x5da   :  { %v2365_v46 = vsel %vm444_vm1, %v2360_v17, 0 }
 0x5dd   :  { %v2358_v16 = vpop.permute.xlu1 %2357 }
 0x5df   :  { %v15593_v58 = vpop.eup %15592 }
 0x5e0   :  { %v1773_v56 = vmul.f32 %v15593_v58, %v16530_v2 }
 0x5e1   :  { %v2460_v22 = vpop.permute.xlu1 %2459 }
 0x5e2   :  { %v1781_v43 = vpack.c.bf16 %v1773_v56, %v1773_v56  ;;  %v2465_v15 = vsel %vm444_vm1, %v2460_v22, 0 }
 0x5e4   :  { %14558 = vmatmul.mubr.msk.bf16.vlgmr.msra.gmra.mxu1 %vm444_vm1, %v1781_v43 }
 0x5e5   :  { %14568 = vmatpush3.bf16.xpose.msra.mxu1 %v2265_v35  ;;  %14569 = vmatprep.mubr.msk.bf16.mxu1 %vm15892_vm0, %v19944_v37  ;;  %v2458_v50 = vpop.permute.xlu1 %2457 }
 0x5e6   :  { %14579 = vmatprep.subr.bf16.mxu1 %v19944_v37 }
 0x5e7   :  { %v16617_v36 = vpop.f32.mrf.mxu0 }
 0x5e9   :  { %v14517_v41 = vpop.f32.mrf.mxu0  ;;  %v2560_v48 = vpop.permute.xlu1 %2559 }
 0x5ea   :  { %v2565_v29 = vsel %vm444_vm1, %v2560_v48, 0 }
 0x5eb   :  { %v1827_v18 = vpop.f32.mrf.mxu0 }
 0x5ec   :  { %14570 = vmatmul.mubr.msk.bf16.vlgmr.msra.gmra.mxu1 %vm444_vm1, %v2258_v30 }
 0x5ed   :  { %14580 = vmatpush3.bf16.xpose.msra.mxu1 %v2365_v46  ;;  %v14518_v2 = vpop.f32.mrf.mxu0  ;;  %14581 = vmatprep.mubr.msk.bf16.mxu1 %vm15892_vm0, %v19944_v37  ;;  %v2558_v63 = vpop.permute.xlu1 %2557 }
 0x5ee   :  { %14591 = vmatprep.subr.bf16.mxu1 %v19944_v37 }
 0x5ef   :  { %v16624_v45 = vpop.f32.mrf.mxu0 }
 0x5f1   :  { %v14529_v59 = vpop.f32.mrf.mxu0  ;;  %v2752_v24 = vpop.permute.xlu1 %2751 }
 0x5f2   :  { %v2757_v25 = vsel %vm912_vm2, %v2752_v24, 0 }
 0x5f3   :  { %v1923_v26 = vpop.f32.mrf.mxu0 }
 0x5f4   :  { %14582 = vmatmul.mubr.msk.bf16.vlgmr.msra.gmra.mxu1 %vm444_vm1, %v2358_v16 }
 0x5f5   :  { %14592 = vmatpush3.bf16.xpose.msra.mxu1 %v2465_v15  ;;  %v14530_v23 = vpop.f32.mrf.mxu0  ;;  %14593 = vmatprep.mubr.msk.bf16.mxu1 %vm15892_vm0, %v19944_v37 }
 0x5f6   :  { %14603 = vmatprep.subr.bf16.mxu1 %v19944_v37 }
 0x5fc   :  { %14594 = vmatmul.mubr.msk.bf16.vlgmr.msra.gmra.mxu1 %vm444_vm1, %v2458_v50 }
 0x5fd   :  { %14604 = vmatpush3.bf16.xpose.msra.mxu1 %v2565_v29  ;;  %14605 = vmatprep.mubr.msk.bf16.mxu1 %vm15892_vm0, %v19944_v37 }
 0x5fe   :  { %14615 = vmatprep.subr.bf16.mxu1 %v19944_v37 }
 0x604   :  { %14606 = vmatmul.mubr.msk.bf16.vlgmr.msra.gmra.mxu1 %vm444_vm1, %v2558_v63 }
 0x605   :  { %14616 = vmatpush3.bf16.msra.mxu1 %v2757_v25  ;;  %14617 = vmatprep.mubr.msk.bf16.mxu1 %vm15892_vm0, %v19944_v37 }
 0x606   :  { %14627 = vmatprep.subr.bf16.mxu1 %v19944_v37 }
 0x632   :  { %v16641_v9 = vpop.f32.mrf.mxu1 }
 0x634   :  { %v14523_v0 = vpop.f32.mrf.mxu1 }
 0x636   :  { %v1875_v10 = vpop.f32.mrf.mxu1 }
 0x638   :  { %v14524_v21 = vpop.f32.mrf.mxu1 }
 0x63a   :  { %v16643_v11 = vpop.f32.mrf.mxu1 }
 0x63c   :  { %v14535_v19 = vpop.f32.mrf.mxu1 }
 0x63e   :  { %v1971_v20 = vpop.f32.mrf.mxu1  ;;  %v16645_v7 = vpop.f32.mrf.mxu0 }
 0x63f   :  { %19966 = vst [vmem:[#allocation7_spill] sm:$0xff] %v16645_v7 }
 0x640   :  { %v14536_v31 = vpop.f32.mrf.mxu1  ;;  %v14541_v30 = vpop.f32.mrf.mxu0 }
 0x642   :  { %v2019_v17 = vpop.f32.mrf.mxu0 }
 0x644   :  { %v14542_v58 = vpop.f32.mrf.mxu0 }
 0x66f   :  { %v16647_v56 = vpop.f32.mrf.mxu1 }
 0x670   :  { %19967 = vst [vmem:[#allocation8_spill] sm:$0xff] %v16647_v56 }
 0x671   :  { %v14547_v43 = vpop.f32.mrf.mxu1 }
 0x673   :  { %v2067_v16 = vpop.f32.mrf.mxu1  ;;  %v16649_v35 = vpop.f32.mrf.mxu0 }
 0x674   :  { %19968 = vst [vmem:[#allocation9_spill] sm:$0xff] %v16649_v35 }
 0x675   :  { %v14548_v22 = vpop.f32.mrf.mxu1  ;;  %v14553_v41 = vpop.f32.mrf.mxu0 }
 0x677   :  { %v2115_v18 = vpop.f32.mrf.mxu0 }
 0x679   :  { %v14554_v46 = vpop.f32.mrf.mxu0 }
 0x67b   :  { %v2251_v2 = vpop.f32.mrf.mxu0 }
 0x67c   :  { %v2607_v50 = vsel %vm444_vm1, %v2251_v2, -inf }
 0x67d   :  { %2608 = vmax.xlane.f32.xlu0 %v2607_v50  ;;  %v14565_v59 = vpop.f32.mrf.mxu0 }
 0x67f   :  { %v2254_v26 = vpop.f32.mrf.mxu0 }
 0x681   :  { %v14566_v15 = vpop.f32.mrf.mxu0 }
 0x683   :  { %v2351_v48 = vpop.f32.mrf.mxu0 }
 0x684   :  { %v2613_v23 = vsel %vm444_vm1, %v2351_v48, -inf }
 0x685   :  { %2614 = vmax.xlane.f32.xlu0 %v2613_v23  ;;  %v14577_v63 = vpop.f32.mrf.mxu0 }
 0x687   :  { %v2354_v29 = vpop.f32.mrf.mxu0 }
 0x689   :  { %v14578_v24 = vpop.f32.mrf.mxu0 }
 0x68b   :  { %v16653_v25 = vpop.f32.mrf.mxu0 }
 0x68c   :  { %v2619_v63 = vsel %vm444_vm1, %v16653_v25, -inf }
 0x68d   :  { %v14589_v0 = vpop.f32.mrf.mxu0 }
 0x68f   :  { %v2454_v10 = vpop.f32.mrf.mxu0 }
 0x691   :  { %v14590_v21 = vpop.f32.mrf.mxu0 }
 0x693   :  { %v16655_v19 = vpop.f32.mrf.mxu0 }
 0x694   :  { %v2625_v0 = vsel %vm444_vm1, %v16655_v19, -inf }
 0x695   :  { %v14601_v20 = vpop.f32.mrf.mxu0 }
 0x697   :  { %v2554_v31 = vpop.f32.mrf.mxu0 }
 0x699   :  { %v14602_v30 = vpop.f32.mrf.mxu0 }
 0x6a4   :  { %v16657_v17 = vpop.f32.mrf.mxu1 }
 0x6a5   :  { %19969 = vst [vmem:[#allocation10_spill] sm:$0xff] %v16657_v17 }
 0x6a6   :  { %v14559_v58 = vpop.f32.mrf.mxu1 }
 0x6a8   :  { %v2163_v43 = vpop.f32.mrf.mxu1 }
 0x6aa   :  { %v14560_v16 = vpop.f32.mrf.mxu1 }
 0x6ac   :  { %v2301_v22 = vpop.f32.mrf.mxu1 }
 0x6ad   :  { %v2610_v41 = vsel %vm444_vm1, %v2301_v22, -inf }
 0x6ae   :  { %2611 = vmax.xlane.f32.xlu1 %v2610_v41  ;;  %v14571_v18 = vpop.f32.mrf.mxu1 }
 0x6b0   :  { %v2304_v46 = vpop.f32.mrf.mxu1 }
 0x6b2   :  { %v14572_v50 = vpop.f32.mrf.mxu1 }
 0x6b4   :  { %v2401_v59 = vpop.f32.mrf.mxu1 }
 0x6b5   :  { %v2616_v26 = vsel %vm444_vm1, %v2401_v59, -inf }
 0x6b6   :  { %2617 = vmax.xlane.f32.xlu0 %v2616_v26  ;;  %v14583_v15 = vpop.f32.mrf.mxu1 }
 0x6b8   :  { %v2404_v23 = vpop.f32.mrf.mxu1 }
 0x6ba   :  { %2620 = vmax.xlane.f32.xlu0 %v2619_v63  ;;  %v14584_v29 = vpop.f32.mrf.mxu1 }
 0x6bc   :  { %v2501_v24 = vpop.f32.mrf.mxu1 }
 0x6bd   :  { %v2622_v10 = vsel %vm444_vm1, %v2501_v24, -inf }
 0x6be   :  { %2626 = vmax.xlane.f32.xlu0 %v2625_v0  ;;  %2623 = vmax.xlane.f32.xlu1 %v2622_v10  ;;  %v14595_v21 = vpop.f32.mrf.mxu1 }
 0x6bf   :  { %v2800_v21 = vpop.permute.xlu1 %2799 }
 0x6c0   :  { %v2504_v20 = vpop.f32.mrf.mxu1 }
 0x6c2   :  { %v14596_v31 = vpop.f32.mrf.mxu1 }
 0x6c4   :  { %v16666_v30 = vpop.f32.mrf.mxu1 }
 0x6c5   :  { %v2628_v41 = vsel %vm444_vm1, %v16666_v30, -inf }
 0x6c6   :  { %v14607_v58 = vpop.f32.mrf.mxu1 }
 0x6c8   :  { %v2604_v43 = vpop.f32.mrf.mxu1 }
 0x6ca   :  { %v14608_v16 = vpop.f32.mrf.mxu1 }
 0x6cf   :  { %2943 = vrot.lane.b32.xlu1 %v16364_v33, %s15894_s22 }
 0x6d4   :  { %2895 = vrot.lane.b32.xlu0 %v16344_v6, %s15894_s22 }
 0x6f3   :  { %2629 = vmax.xlane.f32.xlu1 %v2628_v41 }
 0x706   :  { %v2609_v18 = vpop.xlane.xlu0 %2608 }
 0x707   :  { %v2631_v46 = vsub.f32 %v2251_v2, %v2609_v18  ;;  %v16682_v2 = vpop.permute.xlu1 %2847 }
 0x709   :  { %v2639_v50 = vmul.f32 1.442695, %v2631_v46 }
 0x70b   :  { %15594 = vpow2.f32 %v2639_v50 }
 0x70e   :  { %v2615_v26 = vpop.xlane.xlu0 %2614 }
 0x70f   :  { %v2633_v15 = vsub.f32 %v2351_v48, %v2615_v26 }
 0x711   :  { %v2643_v23 = vmul.f32 1.442695, %v2633_v15 }
 0x713   :  { %15596 = vpow2.f32 %v2643_v23 }
 0x718   :  { %v16674_v63 = vpop.eup %15594 }
 0x719   :  { %v2655_v29 = vsel %vm444_vm1, %v16674_v63, 0.0 }
 0x71a   :  { %2656 = vadd.xlane.f32.xlu0 %v2655_v29 }
 0x720   :  { %v16678_v0 = vpop.eup %15596 }
 0x721   :  { %v2661_v10 = vsel %vm444_vm1, %v16678_v0, 0.0 }
 0x722   :  { %2662 = vadd.xlane.f32.xlu0 %v2661_v10 }
 0x737   :  { %v2612_v20 = vpop.xlane.xlu1 %2611 }
 0x738   :  { %v2632_v31 = vsub.f32 %v2301_v22, %v2612_v20 }
 0x73a   :  { %v2641_v48 = vmul.f32 1.442695, %v2632_v31 }
 0x73c   :  { %15598 = vpow2.f32 %v2641_v48 }
 0x73f   :  { %v2618_v58 = vpop.xlane.xlu0 %2617 }
 0x740   :  { %v2634_v43 = vsub.f32 %v2401_v59, %v2618_v58 }
 0x742   :  { %v2645_v16 = vmul.f32 1.442695, %v2634_v43 }
 0x743   :  { %v2621_v41 = vpop.xlane.xlu0 %2620 }
 0x744   :  { %15600 = vpow2.f32 %v2645_v16  ;;  %v2635_v18 = vsub.f32 %v16653_v25, %v2621_v41 }
 0x746   :  { %v2647_v46 = vmul.f32 1.442695, %v2635_v18 }
 0x747   :  { %v2624_v25 = vpop.xlane.xlu1 %2623  ;;  %v2627_v10 = vpop.xlane.xlu0 %2626 }
 0x748   :  { %15602 = vpow2.f32 %v2647_v46  ;;  %v2636_v29 = vsub.f32 %v2501_v24, %v2624_v25  ;;  %v2637_v20 = vsub.f32 %v16655_v19, %v2627_v10  ;;  %v2805_v10 = vsel %vm912_vm2, %v2800_v21, 0 }
 0x749   :  { %v16685_v50 = vpop.eup %15598 }
 0x74a   :  { %v2658_v26 = vsel %vm444_vm1, %v16685_v50, 0.0  ;;  %v2649_v31 = vmul.f32 1.442695, %v2636_v29  ;;  %v2651_v48 = vmul.f32 1.442695, %v2637_v20 }
 0x74b   :  { %2659 = vadd.xlane.f32.xlu1 %v2658_v26  ;;  %v16712_v19 = vpop.permute.xlu1 %2943  ;;  %v2896_v24 = vpop.permute.xlu0 %2895 }
 0x74c   :  { %15604 = vpow2.f32 %v2649_v31 }
 0x74d   :  { %15606 = vpow2.f32 %v2651_v48 }
 0x751   :  { %v16689_v15 = vpop.eup %15600 }
 0x752   :  { %v2664_v22 = vsel %vm444_vm1, %v16689_v15, 0.0 }
 0x753   :  { %2665 = vadd.xlane.f32.xlu1 %v2664_v22 }
 0x755   :  { %v16693_v59 = vpop.eup %15602 }
 0x756   :  { %v2667_v23 = vsel %vm444_vm1, %v16693_v59, 0.0 }
 0x757   :  { %2668 = vadd.xlane.f32.xlu0 %v2667_v23 }
 0x759   :  { %v16702_v58 = vpop.eup %15604 }
 0x75a   :  { %v2670_v43 = vsel %vm444_vm1, %v16702_v58, 0.0  ;;  %v16706_v16 = vpop.eup %15606 }
 0x75b   :  { %v2673_v41 = vsel %vm444_vm1, %v16706_v16, 0.0 }
 0x764   :  { %3039 = vrot.lane.b32.xlu1 %v16400_v12, %s15894_s22 }
 0x76d   :  { %2991 = vrot.lane.b32.xlu0 %v16362_v3, %s15894_s22 }
 0x77c   :  { %v2630_v18 = vpop.xlane.xlu1 %2629 }
 0x77d   :  { %v2638_v46 = vsub.f32 %v16666_v30, %v2630_v18 }
 0x77f   :  { %v2653_v22 = vmul.f32 1.442695, %v2638_v46 }
 0x788   :  { %2671 = vadd.xlane.f32.xlu1 %v2670_v43  ;;  %v2901_v43 = vsel %vm912_vm2, %v2896_v24, 0 }
 0x78c   :  { %2674 = vadd.xlane.f32.xlu0 %v2673_v41 }
 0x799   :  { %3180 = vrot.lane.b32.xlu1 %v16113_v57, %s15895_s23 }
 0x7a2   :  { %3130 = vrot.lane.b32.xlu0 %v16103_v49, %s15895_s23 }
 0x7a3   :  { %v2657_v26 = vpop.xlane.xlu0 %2656 }
 0x7a4   :  { %15608 = vrcp.f32 %v2657_v26 }
 0x7a5   :  { %15610 = vpow2.f32 %v2653_v22  ;;  %v2853_v22 = vsel %vm912_vm2, %v16682_v2, 0  ;;  %v2949_v2 = vsel %vm912_vm2, %v16712_v19, 0 }
 0x7a6   :  { %3128 = vrot.lane.b32.xlu0 %v16118_v60, %s15895_s23 }
 0x7aa   :  { %3230 = vrot.lane.b32.xlu0 %v16132_v8, %s15895_s23 }
 0x7ab   :  { %v2663_v23 = vpop.xlane.xlu0 %2662 }
 0x7ac   :  { %15612 = vrcp.f32 %v2663_v23 }
 0x7ae   :  { %3228 = vrot.lane.b32.xlu0 %v16171_v32, %s15895_s23 }
 0x7b1   :  { %v15609_v25 = vpop.eup %15608 }
 0x7b2   :  { %3330 = vrot.lane.b32.xlu0 %v16142_v14, %s15895_s23  ;;  %v2687_v30 = vmul.f32 %v15609_v25, %v16674_v63  ;;  %v16732_v20 = vpop.eup %15610 }
 0x7b3   :  { %v2676_v21 = vsel %vm444_vm1, %v16732_v20, 0.0 }
 0x7b4   :  { %v2695_v29 = vpack.c.bf16 %v2687_v30, %v2687_v30 }
 0x7b6   :  { %3328 = vrot.lane.b32.xlu0 %v16165_v28, %s15895_s23  ;;  %14612 = vmatmul.mubr.msk.bf16.vlgmr.msra.gmra.mxu0 %vm444_vm1, %v2695_v29 }
 0x7b7   :  { %14622 = vmatpush3.bf16.msra.mxu0 %v2805_v10  ;;  %14623 = vmatprep.mubr.msk.bf16.mxu0 %vm15892_vm0, %v19944_v37 }
 0x7b8   :  { %14633 = vmatprep.subr.bf16.mxu0 %v19944_v37 }
 0x7b9   :  { %v15613_v31 = vpop.eup %15612 }
 0x7ba   :  { %3430 = vrot.lane.b32.xlu0 %v16174_v34, %s15895_s23  ;;  %v2689_v63 = vmul.f32 %v15613_v31, %v16678_v0 }
 0x7bc   :  { %v2697_v48 = vpack.c.bf16 %v2689_v63, %v2689_v63 }
 0x7bd   :  { %2677 = vadd.xlane.f32.xlu1 %v2676_v21 }
 0x7be   :  { %3428 = vrot.lane.b32.xlu0 %v16197_v52, %s15895_s23  ;;  %14624 = vmatmul.mubr.msk.bf16.vlgmr.msra.gmra.mxu0 %vm444_vm1, %v2697_v48 }
 0x7bf   :  { %14634 = vmatpush3.bf16.msra.mxu0 %v2901_v43  ;;  %14635 = vmatprep.mubr.msk.bf16.mxu0 %vm15892_vm0, %v19944_v37 }
 0x7c0   :  { %14645 = vmatprep.subr.bf16.mxu0 %v19944_v37 }
 0x7c2   :  { %3624 = vrot.lane.b32.xlu0 %v16194_v51, %s15895_s23 }
 0x7ce   :  { %3178 = vrot.lane.b32.xlu1 %v16140_v13, %s15895_s23 }
 0x7d2   :  { %3280 = vrot.lane.b32.xlu1 %v16163_v27, %s15895_s23 }
 0x7d4   :  { %v2660_v0 = vpop.xlane.xlu1 %2659 }
 0x7d5   :  { %15614 = vrcp.f32 %v2660_v0 }
 0x7d6   :  { %3278 = vrot.lane.b32.xlu1 %v16199_v54, %s15895_s23 }
 0x7da   :  { %3380 = vrot.lane.b32.xlu1 %v16187_v47, %s15895_s23 }
 0x7dc   :  { %v2666_v41 = vpop.xlane.xlu1 %2665 }
 0x7dd   :  { %15616 = vrcp.f32 %v2666_v41 }
 0x7de   :  { %3378 = vrot.lane.b32.xlu1 %v16219_v42, %s15895_s23 }
 0x7e0   :  { %v2669_v24 = vpop.xlane.xlu0 %2668 }
 0x7e1   :  { %15618 = vrcp.f32 %v2669_v24 }
 0x7e2   :  { %v15615_v18 = vpop.eup %15614  ;;  %3480 = vrot.lane.b32.xlu1 %v16213_v62, %s15895_s23 }
 0x7e3   :  { %v2688_v46 = vmul.f32 %v15615_v18, %v16685_v50 }
 0x7e4   :  { %v2992_v10 = vpop.permute.xlu0 %2991 }
 0x7e5   :  { %v2696_v26 = vpack.c.bf16 %v2688_v46, %v2688_v46 }
 0x7e6   :  { %3478 = vrot.lane.b32.xlu1 %v16233_v5, %s15895_s23 }
 0x7e7   :  { %14618 = vmatmul.mubr.msk.bf16.vlgmr.msra.gmra.mxu1 %vm444_vm1, %v2696_v26 }
 0x7e8   :  { %14628 = vmatpush3.bf16.msra.mxu1 %v2853_v22  ;;  %14629 = vmatprep.mubr.msk.bf16.mxu1 %vm15892_vm0, %v19944_v37 }
 0x7e9   :  { %14639 = vmatprep.subr.bf16.mxu1 %v19944_v37 }
 0x7ea   :  { %v15617_v23 = vpop.eup %15616  ;;  %3672 = vrot.lane.b32.xlu1 %v16230_v4, %s15895_s23 }
 0x7eb   :  { %v2690_v50 = vmul.f32 %v15617_v23, %v16689_v15  ;;  %v2997_v15 = vsel %vm912_vm2, %v2992_v10, 0 }
 0x7ed   :  { %v2698_v25 = vpack.c.bf16 %v2690_v50, %v2690_v50 }
 0x7ee   :  { %v15619_v30 = vpop.eup %15618  ;;  %3720 = vrot.lane.b32.xlu1 %v16312_v61, %s15895_s23 }
 0x7ef   :  { %14630 = vmatmul.mubr.msk.bf16.vlgmr.msra.gmra.mxu1 %vm444_vm1, %v2698_v25  ;;  %v2691_v29 = vmul.f32 %v15619_v30, %v16693_v59  ;;  %v3040_v59 = vpop.permute.xlu1 %3039 }
 0x7f0   :  { %14640 = vmatpush3.bf16.msra.mxu1 %v2949_v2  ;;  %14641 = vmatprep.mubr.msk.bf16.mxu1 %vm15892_vm0, %v19944_v37  ;;  %v3045_v46 = vsel %vm912_vm2, %v3040_v59, 0 }
 0x7f1   :  { %v2699_v31 = vpack.c.bf16 %v2691_v29, %v2691_v29  ;;  %14651 = vmatprep.subr.bf16.mxu1 %v19944_v37 }
 0x7f2   :  { %3768 = vrot.lane.b32.xlu1 %v16327_v55, %s15895_s23 }
 0x7f3   :  { %14636 = vmatmul.mubr.msk.bf16.vlgmr.msra.gmra.mxu0 %vm444_vm1, %v2699_v31 }
 0x7f4   :  { %14646 = vmatpush3.bf16.msra.mxu0 %v2997_v15  ;;  %14647 = vmatprep.mubr.msk.bf16.mxu0 %vm15892_vm0, %v19944_v37 }
 0x7f5   :  { %14657 = vmatprep.subr.bf16.mxu0 %v19944_v37 }
 0x811   :  { %v2672_v19 = vpop.xlane.xlu1 %2671 }
 0x812   :  { %15620 = vrcp.f32 %v2672_v19 }
 0x815   :  { %v2675_v63 = vpop.xlane.xlu0 %2674  ;;  %v3181_v31 = vpop.permute.xlu1 %3180 }
 0x816   :  { %15622 = vrcp.f32 %v2675_v63 }
 0x819   :  { %v3131_v21 = vpop.permute.xlu0 %3130 }
 0x81a   :  { %v3136_v50 = vsel %vm444_vm1, %v3131_v21, 0 }
 0x81d   :  { %v3129_v48 = vpop.permute.xlu0 %3128 }
 0x81f   :  { %v15621_v43 = vpop.eup %15620 }
 0x820   :  { %v2692_v0 = vmul.f32 %v15621_v43, %v16702_v58 }
 0x821   :  { %v3231_v41 = vpop.permute.xlu0 %3230 }
 0x822   :  { %v2700_v24 = vpack.c.bf16 %v2692_v0, %v2692_v0 }
 0x823   :  { %v15623_v18 = vpop.eup %15622 }
 0x824   :  { %14642 = vmatmul.mubr.msk.bf16.vlgmr.msra.gmra.mxu1 %vm444_vm1, %v2700_v24  ;;  %v2693_v26 = vmul.f32 %v15623_v18, %v16706_v16  ;;  %v3236_v16 = vsel %vm444_vm1, %v3231_v41, 0  ;;  %v3186_v24 = vsel %vm444_vm1, %v3181_v31, 0 }
 0x825   :  { %14652 = vmatpush3.bf16.msra.mxu1 %v3045_v46  ;;  %14653 = vmatprep.mubr.msk.bf16.mxu1 %vm15892_vm0, %v19944_v37  ;;  %v3229_v23 = vpop.permute.xlu0 %3228 }
 0x826   :  { %v2701_v22 = vpack.c.bf16 %v2693_v26, %v2693_v26  ;;  %14663 = vmatprep.subr.bf16.mxu1 %v19944_v37 }
 0x828   :  { %14648 = vmatmul.mubr.msk.bf16.vlgmr.msra.gmra.mxu0 %vm444_vm1, %v2701_v22 }
 0x829   :  { %14658 = vmatpush3.bf16.xpose.msra.mxu0 %v3136_v50  ;;  %14659 = vmatprep.mubr.msk.bf16.mxu0 %vm15892_vm0, %v19944_v37  ;;  %v3331_v58 = vpop.permute.xlu0 %3330 }
 0x82a   :  { %14669 = vmatprep.subr.bf16.mxu0 %v19944_v37  ;;  %v3336_v30 = vsel %vm444_vm1, %v3331_v58, 0 }
 0x82d   :  { %v3329_v25 = vpop.permute.xlu0 %3328 }
 0x830   :  { %14660 = vmatmul.mubr.msk.bf16.vlgmr.msra.gmra.mxu0 %vm444_vm1, %v3129_v48 }
 0x831   :  { %14670 = vmatpush3.bf16.xpose.msra.mxu0 %v3236_v16  ;;  %14671 = vmatprep.mubr.msk.bf16.mxu0 %vm15892_vm0, %v19944_v37  ;;  %v3431_v2 = vpop.permute.xlu0 %3430 }
 0x832   :  { %14681 = vmatprep.subr.bf16.mxu0 %v19944_v37  ;;  %v3436_v10 = vsel %vm444_vm1, %v3431_v2, 0 }
 0x835   :  { %v3429_v29 = vpop.permute.xlu0 %3428 }
 0x838   :  { %14672 = vmatmul.mubr.msk.bf16.vlgmr.msra.gmra.mxu0 %vm444_vm1, %v3229_v23 }
 0x839   :  { %14682 = vmatpush3.bf16.xpose.msra.mxu0 %v3336_v30  ;;  %14683 = vmatprep.mubr.msk.bf16.mxu0 %vm15892_vm0, %v19944_v37  ;;  %v3625_v15 = vpop.permute.xlu0 %3624 }
 0x83a   :  { %14693 = vmatprep.subr.bf16.mxu0 %v19944_v37  ;;  %v3630_v19 = vsel %vm912_vm2, %v3625_v15, 0 }
 0x840   :  { %14684 = vmatmul.mubr.msk.bf16.vlgmr.msra.gmra.mxu0 %vm444_vm1, %v3329_v25 }
 0x841   :  { %14694 = vmatpush3.bf16.xpose.msra.mxu0 %v3436_v10  ;;  %14695 = vmatprep.mubr.msk.bf16.mxu0 %vm15892_vm0, %v19944_v37 }
 0x842   :  { %14705 = vmatprep.subr.bf16.mxu0 %v19944_v37 }
 0x846   :  { %v2678_v59 = vpop.xlane.xlu1 %2677 }
 0x847   :  { %15624 = vrcp.f32 %v2678_v59 }
 0x848   :  { %14696 = vmatmul.mubr.msk.bf16.vlgmr.msra.gmra.mxu0 %vm444_vm1, %v3429_v29 }
 0x849   :  { %14706 = vmatpush3.bf16.msra.mxu0 %v3630_v19  ;;  %14707 = vmatprep.mubr.msk.bf16.mxu0 %vm15892_vm0, %v19944_v37 }
 0x84a   :  { %14717 = vmatprep.subr.bf16.mxu0 %v19944_v37  ;;  %v3179_v63 = vpop.permute.xlu1 %3178 }
 0x84e   :  { %v3281_v21 = vpop.permute.xlu1 %3280 }
 0x84f   :  { %v3286_v46 = vsel %vm444_vm1, %v3281_v21, 0 }
 0x852   :  { %v3279_v41 = vpop.permute.xlu1 %3278 }
 0x854   :  { %v15625_v48 = vpop.eup %15624 }
 0x855   :  { %v2694_v43 = vmul.f32 %v15625_v48, %v16732_v20 }
 0x856   :  { %v3381_v18 = vpop.permute.xlu1 %3380 }
 0x857   :  { %v2702_v0 = vpack.c.bf16 %v2694_v43, %v2694_v43  ;;  %v3386_v26 = vsel %vm444_vm1, %v3381_v18, 0 }
 0x859   :  { %14654 = vmatmul.mubr.msk.bf16.vlgmr.msra.gmra.mxu1 %vm444_vm1, %v2702_v0 }
 0x85a   :  { %14664 = vmatpush3.bf16.xpose.msra.mxu1 %v3186_v24  ;;  %14665 = vmatprep.mubr.msk.bf16.mxu1 %vm15892_vm0, %v19944_v37  ;;  %v3379_v20 = vpop.permute.xlu1 %3378 }
 0x85b   :  { %14675 = vmatprep.subr.bf16.mxu1 %v19944_v37 }
 0x85e   :  { %v3481_v22 = vpop.permute.xlu1 %3480 }
 0x85f   :  { %v3486_v50 = vsel %vm444_vm1, %v3481_v22, 0 }
 0x861   :  { %14666 = vmatmul.mubr.msk.bf16.vlgmr.msra.gmra.mxu1 %vm444_vm1, %v3179_v63 }
 0x862   :  { %14676 = vmatpush3.bf16.xpose.msra.mxu1 %v3286_v46  ;;  %14677 = vmatprep.mubr.msk.bf16.mxu1 %vm15892_vm0, %v19944_v37  ;;  %v3479_v23 = vpop.permute.xlu1 %3478 }
 0x863   :  { %14687 = vmatprep.subr.bf16.mxu1 %v19944_v37 }
 0x866   :  { %v3673_v58 = vpop.permute.xlu1 %3672 }
 0x867   :  { %v3678_v30 = vsel %vm912_vm2, %v3673_v58, 0 }
 0x869   :  { %14678 = vmatmul.mubr.msk.bf16.vlgmr.msra.gmra.mxu1 %vm444_vm1, %v3279_v41 }
 0x86a   :  { %14688 = vmatpush3.bf16.xpose.msra.mxu1 %v3386_v26  ;;  %14689 = vmatprep.mubr.msk.bf16.mxu1 %vm15892_vm0, %v19944_v37 }
 0x86b   :  { %14699 = vmatprep.subr.bf16.mxu1 %v19944_v37 }
 0x871   :  { %14690 = vmatmul.mubr.msk.bf16.vlgmr.msra.gmra.mxu1 %vm444_vm1, %v3379_v20 }
 0x872   :  { %14700 = vmatpush3.bf16.xpose.msra.mxu1 %v3486_v50  ;;  %14701 = vmatprep.mubr.msk.bf16.mxu1 %vm15892_vm0, %v19944_v37 }
 0x873   :  { %14711 = vmatprep.subr.bf16.mxu1 %v19944_v37 }
 0x876   :  { %v16842_v16 = vpop.f32.mrf.mxu0 }
 0x878   :  { %v14613_v25 = vpop.f32.mrf.mxu0 }
 0x879   :  { %14702 = vmatmul.mubr.msk.bf16.vlgmr.msra.gmra.mxu1 %vm444_vm1, %v3479_v23 }
 0x87a   :  { %14712 = vmatpush3.bf16.msra.mxu1 %v3678_v30  ;;  %v2748_v2 = vpop.f32.mrf.mxu0  ;;  %14713 = vmatprep.mubr.msk.bf16.mxu1 %vm15892_vm0, %v19944_v37 }
 0x87b   :  { %14723 = vmatprep.subr.bf16.mxu1 %v19944_v37  ;;  %v3721_v37 = vpop.permute.xlu1 %3720 }
 0x87c   :  { %v14614_v29 = vpop.f32.mrf.mxu0 }
 0x87e   :  { %v16849_v10 = vpop.f32.mrf.mxu0 }
 0x880   :  { %v14625_v31 = vpop.f32.mrf.mxu0 }
 0x882   :  { %v2844_v15 = vpop.f32.mrf.mxu0 }
 0x884   :  { %v14626_v59 = vpop.f32.mrf.mxu0 }
 0x8a7   :  { %v16851_v19 = vpop.f32.mrf.mxu1 }
 0x8a9   :  { %v14619_v63 = vpop.f32.mrf.mxu1 }
 0x8ab   :  { %v2796_v21 = vpop.f32.mrf.mxu1 }
 0x8ad   :  { %v14620_v48 = vpop.f32.mrf.mxu1 }
 0x8af   :  { %v16853_v43 = vpop.f32.mrf.mxu1 }
 0x8b0   :  { %19970 = vst [vmem:[#allocation11_spill] sm:$0xff] %v16853_v43 }
 0x8b1   :  { %v14631_v0 = vpop.f32.mrf.mxu1 }
 0x8b3   :  { %v2892_v41 = vpop.f32.mrf.mxu1  ;;  %v16855_v24 = vpop.f32.mrf.mxu0 }
 0x8b4   :  { %19971 = vst [vmem:[#allocation12_spill] sm:$0xff] %v16855_v24 }
 0x8b5   :  { %v14632_v18 = vpop.f32.mrf.mxu1  ;;  %v14637_v46 = vpop.f32.mrf.mxu0 }
 0x8b7   :  { %v2940_v20 = vpop.f32.mrf.mxu0 }
 0x8b9   :  { %v14638_v26 = vpop.f32.mrf.mxu0 }
 0x8e4   :  { %v16857_v22 = vpop.f32.mrf.mxu1 }
 0x8e5   :  { %19972 = vst [vmem:[#allocation13_spill] sm:$0xff] %v16857_v22 }
 0x8e6   :  { %v14643_v23 = vpop.f32.mrf.mxu1 }
 0x8e8   :  { %v2988_v50 = vpop.f32.mrf.mxu1  ;;  %v16859_v58 = vpop.f32.mrf.mxu0 }
 0x8e9   :  { %19973 = vst [vmem:[#allocation14_spill] sm:$0xff] %v16859_v58 }
 0x8ea   :  { %v14644_v25 = vpop.f32.mrf.mxu1  ;;  %v14649_v30 = vpop.f32.mrf.mxu0 }
 0x8ec   :  { %v3036_v2 = vpop.f32.mrf.mxu0 }
 0x8ee   :  { %v14650_v29 = vpop.f32.mrf.mxu0 }
 0x8f0   :  { %v3172_v31 = vpop.f32.mrf.mxu0 }
 0x8f1   :  { %v3528_v15 = vsel %vm444_vm1, %v3172_v31, -inf }
 0x8f2   :  { %3529 = vmax.xlane.f32.xlu0 %v3528_v15  ;;  %v14661_v59 = vpop.f32.mrf.mxu0 }
 0x8f4   :  { %v3175_v63 = vpop.f32.mrf.mxu0 }
 0x8f6   :  { %v14662_v21 = vpop.f32.mrf.mxu0 }
 0x8f8   :  { %v3272_v48 = vpop.f32.mrf.mxu0 }
 0x8f9   :  { %v3534_v0 = vsel %vm444_vm1, %v3272_v48, -inf }
 0x8fa   :  { %3535 = vmax.xlane.f32.xlu0 %v3534_v0  ;;  %v14673_v41 = vpop.f32.mrf.mxu0 }
 0x8fc   :  { %v3275_v18 = vpop.f32.mrf.mxu0 }
 0x8fe   :  { %v14674_v46 = vpop.f32.mrf.mxu0 }
 0x900   :  { %v16863_v20 = vpop.f32.mrf.mxu0 }
 0x902   :  { %v14685_v26 = vpop.f32.mrf.mxu0 }
 0x904   :  { %v3375_v23 = vpop.f32.mrf.mxu0 }
 0x906   :  { %v14686_v50 = vpop.f32.mrf.mxu0 }
 0x908   :  { %v16865_v25 = vpop.f32.mrf.mxu0 }
 0x90a   :  { %v14697_v30 = vpop.f32.mrf.mxu0 }
 0x90c   :  { %v3475_v2 = vpop.f32.mrf.mxu0 }
 0x90d   :  { %v3540_v2 = vsel %vm444_vm1, %v16863_v20, -inf }
 0x90e   :  { %v14698_v29 = vpop.f32.mrf.mxu0 }
 0x919   :  { %v16867_v15 = vpop.f32.mrf.mxu1 }
 0x91a   :  { %19974 = vst [vmem:[#allocation15_spill] sm:$0xff] %v16867_v15 }
 0x91b   :  { %v14655_v59 = vpop.f32.mrf.mxu1 }
 0x91d   :  { %v3084_v63 = vpop.f32.mrf.mxu1 }
 0x91e   :  { %v3546_v63 = vsel %vm444_vm1, %v16865_v25, -inf }
 0x91f   :  { %v14656_v21 = vpop.f32.mrf.mxu1 }
 0x921   :  { %v3222_v38 = vpop.f32.mrf.mxu1 }
 0x922   :  { %v3531_v0 = vsel %vm444_vm1, %v3222_v38, -inf }
 0x923   :  { %3532 = vmax.xlane.f32.xlu1 %v3531_v0  ;;  %v14667_v41 = vpop.f32.mrf.mxu1 }
 0x925   :  { %v3225_v18 = vpop.f32.mrf.mxu1 }
 0x927   :  { %v14668_v46 = vpop.f32.mrf.mxu1 }
 0x929   :  { %v3322_v26 = vpop.f32.mrf.mxu1 }
 0x92a   :  { %v3537_v23 = vsel %vm444_vm1, %v3322_v26, -inf }
 0x92b   :  { %3538 = vmax.xlane.f32.xlu0 %v3537_v23  ;;  %v14679_v50 = vpop.f32.mrf.mxu1 }
 0x92d   :  { %v3325_v30 = vpop.f32.mrf.mxu1 }
 0x92f   :  { %3541 = vmax.xlane.f32.xlu0 %v3540_v2  ;;  %v14680_v29 = vpop.f32.mrf.mxu1 }
 0x931   :  { %v3422_v59 = vpop.f32.mrf.mxu1 }
 0x932   :  { %v3543_v21 = vsel %vm444_vm1, %v3422_v59, -inf }
 0x933   :  { %3547 = vmax.xlane.f32.xlu0 %v3546_v63  ;;  %3544 = vmax.xlane.f32.xlu1 %v3543_v21  ;;  %v14691_v0 = vpop.f32.mrf.mxu1 }
 0x935   :  { %v3425_v41 = vpop.f32.mrf.mxu1 }
 0x937   :  { %v14692_v18 = vpop.f32.mrf.mxu1 }
 0x939   :  { %v16876_v46 = vpop.f32.mrf.mxu1 }
 0x93a   :  { %v3549_v2 = vsel %vm444_vm1, %v16876_v46, -inf }
 0x93b   :  { %v14703_v23 = vpop.f32.mrf.mxu1 }
 0x93d   :  { %v3525_v50 = vpop.f32.mrf.mxu1 }
 0x93f   :  { %v14704_v30 = vpop.f32.mrf.mxu1 }
 0x944   :  { %3864 = vrot.lane.b32.xlu1 %v16364_v33, %s15895_s23 }
 0x949   :  { %3816 = vrot.lane.b32.xlu0 %v16344_v6, %s15895_s23 }
 0x968   :  { %3550 = vmax.xlane.f32.xlu1 %v3549_v2  ;;  %v16889_v2 = vpop.permute.xlu1 %3768 }
 0x97b   :  { %v3530_v29 = vpop.xlane.xlu0 %3529 }
 0x97c   :  { %v3552_v63 = vsub.f32 %v3172_v31, %v3530_v29 }
 0x97e   :  { %v3560_v21 = vmul.f32 1.442695, %v3552_v63 }
 0x980   :  { %15626 = vpow2.f32 %v3560_v21 }
 0x983   :  { %v3536_v0 = vpop.xlane.xlu0 %3535 }
 0x984   :  { %v3554_v41 = vsub.f32 %v3272_v48, %v3536_v0 }
 0x986   :  { %v3564_v18 = vmul.f32 1.442695, %v3554_v41 }
 0x988   :  { %15628 = vpow2.f32 %v3564_v18 }
 0x98d   :  { %v15627_v23 = vpop.eup %15626 }
 0x98e   :  { %v3576_v50 = vsel %vm444_vm1, %v15627_v23, 0.0 }
 0x98f   :  { %3577 = vadd.xlane.f32.xlu0 %v3576_v50 }
 0x995   :  { %v16885_v30 = vpop.eup %15628 }
 0x996   :  { %v3582_v1 = vsel %vm444_vm1, %v16885_v30, 0.0 }
 0x997   :  { %3583 = vadd.xlane.f32.xlu0 %v3582_v1 }
 0x9ac   :  { %v3533_v31 = vpop.xlane.xlu1 %3532 }
 0x9ad   :  { %v3553_v29 = vsub.f32 %v3222_v38, %v3533_v31 }
 0x9af   :  { %v3562_v63 = vmul.f32 1.442695, %v3553_v29 }
 0x9b1   :  { %15630 = vpow2.f32 %v3562_v63 }
 0x9b4   :  { %v3539_v48 = vpop.xlane.xlu0 %3538 }
 0x9b5   :  { %v3555_v21 = vsub.f32 %v3322_v26, %v3539_v48 }
 0x9b7   :  { %v3566_v0 = vmul.f32 1.442695, %v3555_v21 }
 0x9b8   :  { %v3542_v41 = vpop.xlane.xlu0 %3541 }
 0x9b9   :  { %15632 = vpow2.f32 %v3566_v0  ;;  %v3556_v18 = vsub.f32 %v16863_v20, %v3542_v41 }
 0x9bb   :  { %v3568_v50 = vmul.f32 1.442695, %v3556_v18 }
 0x9bc   :  { %v3545_v20 = vpop.xlane.xlu1 %3544  ;;  %v3548_v63 = vpop.xlane.xlu0 %3547 }
 0x9bd   :  { %15634 = vpow2.f32 %v3568_v50  ;;  %v3557_v29 = vsub.f32 %v3422_v59, %v3545_v20  ;;  %v3558_v48 = vsub.f32 %v16865_v25, %v3548_v63 }
 0x9be   :  { %v16892_v53 = vpop.eup %15630 }
 0x9bf   :  { %v3579_v1 = vsel %vm444_vm1, %v16892_v53, 0.0  ;;  %v3570_v21 = vmul.f32 1.442695, %v3557_v29  ;;  %v3572_v0 = vmul.f32 1.442695, %v3558_v48 }
 0x9c0   :  { %3580 = vadd.xlane.f32.xlu1 %v3579_v1  ;;  %v16919_v25 = vpop.permute.xlu1 %3864  ;;  %v3817_v59 = vpop.permute.xlu0 %3816 }
 0x9c1   :  { %15636 = vpow2.f32 %v3570_v21 }
 0x9c2   :  { %15638 = vpow2.f32 %v3572_v0  ;;  %v3726_v0 = vsel %vm912_vm2, %v3721_v37, 0 }
 0x9c6   :  { %v16896_v44 = vpop.eup %15632 }
 0x9c7   :  { %v3585_v38 = vsel %vm444_vm1, %v16896_v44, 0.0 }
 0x9c8   :  { %3586 = vadd.xlane.f32.xlu1 %v3585_v38 }
 0x9ca   :  { %v16900_v26 = vpop.eup %15634 }
 0x9cb   :  { %v3588_v31 = vsel %vm444_vm1, %v16900_v26, 0.0 }
 0x9cc   :  { %3589 = vadd.xlane.f32.xlu0 %v3588_v31 }
 0x9ce   :  { %v16909_v41 = vpop.eup %15636 }
 0x9cf   :  { %v3591_v18 = vsel %vm444_vm1, %v16909_v41, 0.0  ;;  %v16913_v50 = vpop.eup %15638 }
 0x9d0   :  { %v3594_v1 = vsel %vm444_vm1, %v16913_v50, 0.0 }
 0x9d9   :  { %3960 = vrot.lane.b32.xlu1 %v16400_v12, %s15895_s23 }
 0x9e2   :  { %3912 = vrot.lane.b32.xlu0 %v16362_v3, %s15895_s23 }
 0x9f1   :  { %v3551_v38 = vpop.xlane.xlu1 %3550 }
 0x9f2   :  { %v3559_v31 = vsub.f32 %v16876_v46, %v3551_v38 }
 0x9f4   :  { %v3574_v29 = vmul.f32 1.442695, %v3559_v31 }
 0x9fd   :  { %3592 = vadd.xlane.f32.xlu1 %v3591_v18  ;;  %v19975_v18 = vmov 0.0  }
 0xa01   :  { %3595 = vadd.xlane.f32.xlu0 %v3594_v1 }
 0xa0e   :  { %4101 = vrot.lane.b32.xlu1 %v16113_v57, %s15896_s24 }
 0xa17   :  { %4051 = vrot.lane.b32.xlu0 %v16103_v49, %s15896_s24 }
 0xa18   :  { %v3578_v20 = vpop.xlane.xlu0 %3577 }
 0xa19   :  { %15640 = vrcp.f32 %v3578_v20  ;;  %v3822_v20 = vsel %vm912_vm2, %v3817_v59, 0 }
 0xa1a   :  { %15642 = vpow2.f32 %v3574_v29 }
 0xa1b   :  { %4049 = vrot.lane.b32.xlu0 %v16118_v60, %s15896_s24 }
 0xa1f   :  { %4151 = vrot.lane.b32.xlu0 %v16132_v8, %s15896_s24 }
 0xa20   :  { %v3584_v63 = vpop.xlane.xlu0 %3583 }
 0xa21   :  { %15644 = vrcp.f32 %v3584_v63 }
 0xa23   :  { %4149 = vrot.lane.b32.xlu0 %v16171_v32, %s15896_s24 }
 0xa26   :  { %v15641_v48 = vpop.eup %15640 }
 0xa27   :  { %v3608_v21 = vmul.f32 %v15641_v48, %v15627_v23  ;;  %4251 = vrot.lane.b32.xlu0 %v16142_v14, %s15896_s24  ;;  %v16938_v1 = vpop.eup %15642 }
 0xa28   :  { %v3597_v31 = vsel %vm444_vm1, %v16938_v1, 0.0 }
 0xa29   :  { %v3616_v46 = vpack.c.bf16 %v3608_v21, %v3608_v21 }
 0xa2b   :  { %4249 = vrot.lane.b32.xlu0 %v16165_v28, %s15896_s24  ;;  %14708 = vmatmul.mubr.msk.bf16.vlgmr.msra.gmra.mxu0 %vm444_vm1, %v3616_v46  ;;  %v3774_v46 = vsel %vm912_vm2, %v16889_v2, 0  ;;  %v3870_v2 = vsel %vm912_vm2, %v16919_v25, 0 }
 0xa2c   :  { %14718 = vmatpush3.bf16.msra.mxu0 %v3726_v0  ;;  %14719 = vmatprep.mubr.msk.bf16.mxu0 %vm15892_vm0, %v19975_v18 }
 0xa2d   :  { %14729 = vmatprep.subr.bf16.mxu0 %v19975_v18 }
 0xa2e   :  { %v15645_v23 = vpop.eup %15644 }
 0xa2f   :  { %v3610_v38 = vmul.f32 %v15645_v23, %v16885_v30  ;;  %4351 = vrot.lane.b32.xlu0 %v16174_v34, %s15896_s24 }
 0xa31   :  { %v3618_v37 = vpack.c.bf16 %v3610_v38, %v3610_v38 }
 0xa32   :  { %3598 = vadd.xlane.f32.xlu1 %v3597_v31 }
 0xa33   :  { %4349 = vrot.lane.b32.xlu0 %v16197_v52, %s15896_s24  ;;  %14720 = vmatmul.mubr.msk.bf16.vlgmr.msra.gmra.mxu0 %vm444_vm1, %v3618_v37 }
 0xa34   :  { %14730 = vmatpush3.bf16.msra.mxu0 %v3822_v20  ;;  %14731 = vmatprep.mubr.msk.bf16.mxu0 %vm15892_vm0, %v19975_v18 }
 0xa35   :  { %14741 = vmatprep.subr.bf16.mxu0 %v19975_v18 }
 0xa37   :  { %4545 = vrot.lane.b32.xlu0 %v16194_v51, %s15896_s24 }
 0xa43   :  { %4099 = vrot.lane.b32.xlu1 %v16140_v13, %s15896_s24 }
 0xa47   :  { %4201 = vrot.lane.b32.xlu1 %v16163_v27, %s15896_s24 }
 0xa49   :  { %v3581_v30 = vpop.xlane.xlu1 %3580 }
 0xa4a   :  { %15646 = vrcp.f32 %v3581_v30 }
 0xa4b   :  { %4199 = vrot.lane.b32.xlu1 %v16199_v54, %s15896_s24 }
 0xa4f   :  { %4301 = vrot.lane.b32.xlu1 %v16187_v47, %s15896_s24 }
 0xa51   :  { %v3587_v59 = vpop.xlane.xlu1 %3586 }
 0xa52   :  { %15648 = vrcp.f32 %v3587_v59 }
 0xa53   :  { %4299 = vrot.lane.b32.xlu1 %v16219_v42, %s15896_s24 }
 0xa55   :  { %v3590_v29 = vpop.xlane.xlu0 %3589 }
 0xa56   :  { %15650 = vrcp.f32 %v3590_v29 }
 0xa57   :  { %v15647_v63 = vpop.eup %15646  ;;  %4401 = vrot.lane.b32.xlu1 %v16213_v62, %s15896_s24 }
 0xa58   :  { %v3609_v48 = vmul.f32 %v15647_v63, %v16892_v53 }
 0xa59   :  { %v3913_v31 = vpop.permute.xlu0 %3912 }
 0xa5a   :  { %v3617_v21 = vpack.c.bf16 %v3609_v48, %v3609_v48 }
 0xa5b   :  { %4399 = vrot.lane.b32.xlu1 %v16233_v5, %s15896_s24 }
 0xa5c   :  { %14714 = vmatmul.mubr.msk.bf16.vlgmr.msra.gmra.mxu1 %vm444_vm1, %v3617_v21 }
 0xa5d   :  { %14724 = vmatpush3.bf16.msra.mxu1 %v3774_v46  ;;  %14725 = vmatprep.mubr.msk.bf16.mxu1 %vm15892_vm0, %v19975_v18 }
 0xa5e   :  { %14735 = vmatprep.subr.bf16.mxu1 %v19975_v18 }
 0xa5f   :  { %v15649_v0 = vpop.eup %15648  ;;  %4593 = vrot.lane.b32.xlu1 %v16230_v4, %s15896_s24 }
 0xa60   :  { %v3611_v53 = vmul.f32 %v15649_v0, %v16896_v44  ;;  %v3918_v44 = vsel %vm912_vm2, %v3913_v31, 0 }
 0xa62   :  { %v3619_v23 = vpack.c.bf16 %v3611_v53, %v3611_v53 }
 0xa63   :  { %v15651_v38 = vpop.eup %15650  ;;  %4641 = vrot.lane.b32.xlu1 %v16312_v61, %s15896_s24 }
 0xa64   :  { %v3612_v37 = vmul.f32 %v15651_v38, %v16900_v26  ;;  %14726 = vmatmul.mubr.msk.bf16.vlgmr.msra.gmra.mxu1 %vm444_vm1, %v3619_v23  ;;  %v3961_v26 = vpop.permute.xlu1 %3960 }
 0xa65   :  { %14736 = vmatpush3.bf16.msra.mxu1 %v3870_v2  ;;  %14737 = vmatprep.mubr.msk.bf16.mxu1 %vm15892_vm0, %v19975_v18  ;;  %v3966_v53 = vsel %vm912_vm2, %v3961_v26, 0 }
 0xa66   :  { %v3620_v20 = vpack.c.bf16 %v3612_v37, %v3612_v37  ;;  %14747 = vmatprep.subr.bf16.mxu1 %v19975_v18 }
 0xa67   :  { %4689 = vrot.lane.b32.xlu1 %v16327_v55, %s15896_s24 }
 0xa68   :  { %14732 = vmatmul.mubr.msk.bf16.vlgmr.msra.gmra.mxu0 %vm444_vm1, %v3620_v20 }
 0xa69   :  { %14742 = vmatpush3.bf16.msra.mxu0 %v3918_v44  ;;  %14743 = vmatprep.mubr.msk.bf16.mxu0 %vm15892_vm0, %v19975_v18 }
 0xa6a   :  { %14753 = vmatprep.subr.bf16.mxu0 %v19975_v18 }
 0xa86   :  { %v3593_v25 = vpop.xlane.xlu1 %3592 }
 0xa87   :  { %15652 = vrcp.f32 %v3593_v25 }
 0xa8a   :  { %v3596_v30 = vpop.xlane.xlu0 %3595 }
 0xa8b   :  { %15654 = vrcp.f32 %v3596_v30  ;;  %v4102_v30 = vpop.permute.xlu1 %4101 }
 0xa8e   :  { %v4052_v59 = vpop.permute.xlu0 %4051 }
 0xa8f   :  { %v4057_v37 = vsel %vm444_vm1, %v4052_v59, 0 }
 0xa92   :  { %v4050_v29 = vpop.permute.xlu0 %4049 }
 0xa94   :  { %v15653_v63 = vpop.eup %15652 }
 0xa95   :  { %v3613_v48 = vmul.f32 %v15653_v63, %v16909_v41 }
 0xa96   :  { %v4152_v21 = vpop.permute.xlu0 %4151 }
 0xa97   :  { %v3621_v46 = vpack.c.bf16 %v3613_v48, %v3613_v48 }
 0xa98   :  { %v15655_v0 = vpop.eup %15654 }
 0xa99   :  { %v3614_v23 = vmul.f32 %v15655_v0, %v16913_v50  ;;  %14738 = vmatmul.mubr.msk.bf16.vlgmr.msra.gmra.mxu1 %vm444_vm1, %v3621_v46  ;;  %v4157_v50 = vsel %vm444_vm1, %v4152_v21, 0 }
 0xa9a   :  { %14748 = vmatpush3.bf16.msra.mxu1 %v3966_v53  ;;  %14749 = vmatprep.mubr.msk.bf16.mxu1 %vm15892_vm0, %v19975_v18  ;;  %v4150_v2 = vpop.permute.xlu0 %4149 }
 0xa9b   :  { %v3622_v38 = vpack.c.bf16 %v3614_v23, %v3614_v23  ;;  %14759 = vmatprep.subr.bf16.mxu1 %v19975_v18 }
 0xa9d   :  { %14744 = vmatmul.mubr.msk.bf16.vlgmr.msra.gmra.mxu0 %vm444_vm1, %v3622_v38  ;;  %v4107_v38 = vsel %vm444_vm1, %v4102_v30, 0 }
 0xa9e   :  { %14754 = vmatpush3.bf16.xpose.msra.mxu0 %v4057_v37  ;;  %14755 = vmatprep.mubr.msk.bf16.mxu0 %vm15892_vm0, %v19975_v18  ;;  %v4252_v41 = vpop.permute.xlu0 %4251 }
 0xa9f   :  { %14765 = vmatprep.subr.bf16.mxu0 %v19975_v18  ;;  %v4257_v20 = vsel %vm444_vm1, %v4252_v41, 0 }
 0xaa2   :  { %v4250_v31 = vpop.permute.xlu0 %4249 }
 0xaa5   :  { %14756 = vmatmul.mubr.msk.bf16.vlgmr.msra.gmra.mxu0 %vm444_vm1, %v4050_v29 }
 0xaa6   :  { %14766 = vmatpush3.bf16.xpose.msra.mxu0 %v4157_v50  ;;  %14767 = vmatprep.mubr.msk.bf16.mxu0 %vm15892_vm0, %v19975_v18  ;;  %v4352_v44 = vpop.permute.xlu0 %4351 }
 0xaa7   :  { %14777 = vmatprep.subr.bf16.mxu0 %v19975_v18  ;;  %v4357_v25 = vsel %vm444_vm1, %v4352_v44, 0 }
 0xaaa   :  { %v4350_v26 = vpop.permute.xlu0 %4349 }
 0xaad   :  { %14768 = vmatmul.mubr.msk.bf16.vlgmr.msra.gmra.mxu0 %vm444_vm1, %v4150_v2 }
 0xaae   :  { %14778 = vmatpush3.bf16.xpose.msra.mxu0 %v4257_v20  ;;  %14779 = vmatprep.mubr.msk.bf16.mxu0 %vm15892_vm0, %v19975_v18  ;;  %v4546_v59 = vpop.permute.xlu0 %4545 }
 0xaaf   :  { %14789 = vmatprep.subr.bf16.mxu0 %v19975_v18  ;;  %v4551_v63 = vsel %vm912_vm2, %v4546_v59, 0 }
 0xab5   :  { %14780 = vmatmul.mubr.msk.bf16.vlgmr.msra.gmra.mxu0 %vm444_vm1, %v4250_v31 }
 0xab6   :  { %14790 = vmatpush3.bf16.xpose.msra.mxu0 %v4357_v25  ;;  %14791 = vmatprep.mubr.msk.bf16.mxu0 %vm15892_vm0, %v19975_v18 }
 0xab7   :  { %14801 = vmatprep.subr.bf16.mxu0 %v19975_v18 }
 0xabb   :  { %v3599_v29 = vpop.xlane.xlu1 %3598 }
 0xabc   :  { %15656 = vrcp.f32 %v3599_v29 }
 0xabd   :  { %14792 = vmatmul.mubr.msk.bf16.vlgmr.msra.gmra.mxu0 %vm444_vm1, %v4350_v26 }
 0xabe   :  { %14802 = vmatpush3.bf16.msra.mxu0 %v4551_v63  ;;  %14803 = vmatprep.mubr.msk.bf16.mxu0 %vm15892_vm0, %v19975_v18 }
 0xabf   :  { %14813 = vmatprep.subr.bf16.mxu0 %v19975_v18  ;;  %v4100_v48 = vpop.permute.xlu1 %4099 }
 0xac3   :  { %v4202_v21 = vpop.permute.xlu1 %4201 }
 0xac4   :  { %v4207_v37 = vsel %vm444_vm1, %v4202_v21, 0 }
 0xac7   :  { %v4200_v23 = vpop.permute.xlu1 %4199 }
 0xac9   :  { %v15657_v46 = vpop.eup %15656 }
 0xaca   :  { %v3615_v0 = vmul.f32 %v15657_v46, %v16938_v1 }
 0xacb   :  { %v4302_v2 = vpop.permute.xlu1 %4301 }
 0xacc   :  { %v3623_v53 = vpack.c.bf16 %v3615_v0, %v3615_v0  ;;  %v4307_v41 = vsel %vm444_vm1, %v4302_v2, 0 }
 0xace   :  { %14750 = vmatmul.mubr.msk.bf16.vlgmr.msra.gmra.mxu1 %vm444_vm1, %v3623_v53 }
 0xacf   :  { %14760 = vmatpush3.bf16.xpose.msra.mxu1 %v4107_v38  ;;  %14761 = vmatprep.mubr.msk.bf16.mxu1 %vm15892_vm0, %v19975_v18  ;;  %v4300_v1 = vpop.permute.xlu1 %4299 }
 0xad0   :  { %14771 = vmatprep.subr.bf16.mxu1 %v19975_v18 }
 0xad3   :  { %v4402_v50 = vpop.permute.xlu1 %4401 }
 0xad4   :  { %v4407_v20 = vsel %vm444_vm1, %v4402_v50, 0 }
 0xad6   :  { %14762 = vmatmul.mubr.msk.bf16.vlgmr.msra.gmra.mxu1 %vm444_vm1, %v4100_v48 }
 0xad7   :  { %14772 = vmatpush3.bf16.xpose.msra.mxu1 %v4207_v37  ;;  %14773 = vmatprep.mubr.msk.bf16.mxu1 %vm15892_vm0, %v19975_v18  ;;  %v4400_v31 = vpop.permute.xlu1 %4399 }
 0xad8   :  { %14783 = vmatprep.subr.bf16.mxu1 %v19975_v18 }
 0xadb   :  { %v4594_v44 = vpop.permute.xlu1 %4593 }
 0xadc   :  { %v4599_v30 = vsel %vm912_vm2, %v4594_v44, 0 }
 0xade   :  { %14774 = vmatmul.mubr.msk.bf16.vlgmr.msra.gmra.mxu1 %vm444_vm1, %v4200_v23 }
 0xadf   :  { %14784 = vmatpush3.bf16.xpose.msra.mxu1 %v4307_v41  ;;  %14785 = vmatprep.mubr.msk.bf16.mxu1 %vm15892_vm0, %v19975_v18  ;;  %v4642_v17 = vpop.permute.xlu1 %4641 }
 0xae0   :  { %14795 = vmatprep.subr.bf16.mxu1 %v19975_v18 }
 0xae6   :  { %14786 = vmatmul.mubr.msk.bf16.vlgmr.msra.gmra.mxu1 %vm444_vm1, %v4300_v1 }
 0xae7   :  { %14796 = vmatpush3.bf16.xpose.msra.mxu1 %v4407_v20  ;;  %14797 = vmatprep.mubr.msk.bf16.mxu1 %vm15892_vm0, %v19975_v18 }
 0xae8   :  { %14807 = vmatprep.subr.bf16.mxu1 %v19975_v18 }
 0xaeb   :  { %v17048_v26 = vpop.f32.mrf.mxu0 }
 0xaed   :  { %v14709_v25 = vpop.f32.mrf.mxu0 }
 0xaee   :  { %14798 = vmatmul.mubr.msk.bf16.vlgmr.msra.gmra.mxu1 %vm444_vm1, %v4400_v31 }
 0xaef   :  { %14808 = vmatpush3.bf16.msra.mxu1 %v4599_v30  ;;  %v3669_v59 = vpop.f32.mrf.mxu0  ;;  %14809 = vmatprep.mubr.msk.bf16.mxu1 %vm15892_vm0, %v19975_v18 }
 0xaf0   :  { %14819 = vmatprep.subr.bf16.mxu1 %v19975_v18 }
 0xaf1   :  { %v14710_v29 = vpop.f32.mrf.mxu0 }
 0xaf3   :  { %v17055_v63 = vpop.f32.mrf.mxu0 }
 0xaf5   :  { %v14721_v48 = vpop.f32.mrf.mxu0 }
 0xaf7   :  { %v3765_v21 = vpop.f32.mrf.mxu0 }
 0xaf9   :  { %v14722_v46 = vpop.f32.mrf.mxu0 }
 0xb1c   :  { %v17057_v0 = vpop.f32.mrf.mxu1 }
 0xb1d   :  { %19976 = vst [vmem:[#allocation16_spill] sm:$0xff] %v17057_v0 }
 0xb1e   :  { %v14715_v53 = vpop.f32.mrf.mxu1 }
 0xb20   :  { %v3717_v23 = vpop.f32.mrf.mxu1 }
 0xb22   :  { %v14716_v38 = vpop.f32.mrf.mxu1 }
 0xb24   :  { %v17059_v2 = vpop.f32.mrf.mxu1 }
 0xb25   :  { %19977 = vst [vmem:[#allocation17_spill] sm:$0xff] %v17059_v2 }
 0xb26   :  { %v14727_v37 = vpop.f32.mrf.mxu1 }
 0xb28   :  { %v3813_v1 = vpop.f32.mrf.mxu1  ;;  %v17061_v41 = vpop.f32.mrf.mxu0 }
 0xb29   :  { %19978 = vst [vmem:[#allocation18_spill] sm:$0xff] %v17061_v41 }
 0xb2a   :  { %v14728_v50 = vpop.f32.mrf.mxu1  ;;  %v14733_v31 = vpop.f32.mrf.mxu0 }
 0xb2c   :  { %v3861_v20 = vpop.f32.mrf.mxu0 }
 0xb2e   :  { %v14734_v44 = vpop.f32.mrf.mxu0 }
 0xb59   :  { %v17063_v25 = vpop.f32.mrf.mxu1 }
 0xb5a   :  { %19979 = vst [vmem:[#allocation19_spill] sm:$0xff] %v17063_v25 }
 0xb5b   :  { %v14739_v30 = vpop.f32.mrf.mxu1 }
 0xb5d   :  { %v3909_v59 = vpop.f32.mrf.mxu1  ;;  %v17065_v29 = vpop.f32.mrf.mxu0 }
 0xb5e   :  { %19980 = vst [vmem:[#allocation20_spill] sm:$0xff] %v17065_v29 }
 0xb5f   :  { %v14740_v48 = vpop.f32.mrf.mxu1  ;;  %v14745_v21 = vpop.f32.mrf.mxu0 }
 0xb61   :  { %v3957_v46 = vpop.f32.mrf.mxu0 }
 0xb63   :  { %v14746_v53 = vpop.f32.mrf.mxu0 }
 0xb65   :  { %v4093_v23 = vpop.f32.mrf.mxu0 }
 0xb66   :  { %v4449_v38 = vsel %vm444_vm1, %v4093_v23, -inf }
 0xb67   :  { %4450 = vmax.xlane.f32.xlu0 %v4449_v38  ;;  %v14757_v37 = vpop.f32.mrf.mxu0 }
 0xb69   :  { %v4096_v1 = vpop.f32.mrf.mxu0 }
 0xb6b   :  { %v14758_v50 = vpop.f32.mrf.mxu0 }
 0xb6d   :  { %v4193_v31 = vpop.f32.mrf.mxu0 }
 0xb6e   :  { %v4455_v20 = vsel %vm444_vm1, %v4193_v31, -inf }
 0xb6f   :  { %4456 = vmax.xlane.f32.xlu0 %v4455_v20  ;;  %v14769_v44 = vpop.f32.mrf.mxu0 }
 0xb71   :  { %v4196_v30 = vpop.f32.mrf.mxu0 }
 0xb73   :  { %v14770_v59 = vpop.f32.mrf.mxu0 }
 0xb75   :  { %v17069_v40 = vpop.f32.mrf.mxu0 }
 0xb77   :  { %v14781_v48 = vpop.f32.mrf.mxu0 }
 0xb79   :  { %v4296_v21 = vpop.f32.mrf.mxu0 }
 0xb7b   :  { %v14782_v46 = vpop.f32.mrf.mxu0 }
 0xb7d   :  { %v17071_v53 = vpop.f32.mrf.mxu0 }
 0xb7f   :  { %v14793_v39 = vpop.f32.mrf.mxu0 }
 0xb81   :  { %v4396_v25 = vpop.f32.mrf.mxu0 }
 0xb82   :  { %v4461_v25 = vsel %vm444_vm1, %v17069_v40, -inf }
 0xb83   :  { %v14794_v38 = vpop.f32.mrf.mxu0 }
 0xb8e   :  { %v17073_v37 = vpop.f32.mrf.mxu1 }
 0xb8f   :  { %19981 = vst [vmem:[#allocation21_spill] sm:$0xff] %v17073_v37 }
 0xb90   :  { %v14751_v1 = vpop.f32.mrf.mxu1 }
 0xb92   :  { %v4005_v50 = vpop.f32.mrf.mxu1 }
 0xb94   :  { %v14752_v15 = vpop.f32.mrf.mxu1 }
 0xb95   :  { %v4467_v15 = vsel %vm444_vm1, %v17071_v53, -inf }
 0xb96   :  { %v4143_v22 = vpop.f32.mrf.mxu1 }
 0xb97   :  { %v4452_v20 = vsel %vm444_vm1, %v4143_v22, -inf }
 0xb98   :  { %4453 = vmax.xlane.f32.xlu1 %v4452_v20  ;;  %v14763_v44 = vpop.f32.mrf.mxu1 }
 0xb9a   :  { %v4146_v30 = vpop.f32.mrf.mxu1 }
 0xb9c   :  { %v14764_v59 = vpop.f32.mrf.mxu1 }
 0xb9e   :  { %v4243_v48 = vpop.f32.mrf.mxu1 }
 0xb9f   :  { %v4458_v21 = vsel %vm444_vm1, %v4243_v48, -inf }
 0xba0   :  { %4459 = vmax.xlane.f32.xlu0 %v4458_v21  ;;  %v14775_v46 = vpop.f32.mrf.mxu1 }
 0xba2   :  { %v4246_v39 = vpop.f32.mrf.mxu1 }
 0xba4   :  { %4462 = vmax.xlane.f32.xlu0 %v4461_v25  ;;  %v14776_v38 = vpop.f32.mrf.mxu1 }
 0xba6   :  { %v4343_v1 = vpop.f32.mrf.mxu1 }
 0xba7   :  { %v4464_v50 = vsel %vm444_vm1, %v4343_v1, -inf }
 0xba8   :  { %4468 = vmax.xlane.f32.xlu0 %v4467_v15  ;;  %4465 = vmax.xlane.f32.xlu1 %v4464_v50  ;;  %v14787_v20 = vpop.f32.mrf.mxu1 }
 0xbaa   :  { %v4346_v44 = vpop.f32.mrf.mxu1 }
 0xbac   :  { %v14788_v30 = vpop.f32.mrf.mxu1 }
 0xbae   :  { %v17082_v59 = vpop.f32.mrf.mxu1 }
 0xbaf   :  { %v4470_v25 = vsel %vm444_vm1, %v17082_v59, -inf }
 0xbb0   :  { %v14799_v21 = vpop.f32.mrf.mxu1 }
 0xbb2   :  { %v4446_v46 = vpop.f32.mrf.mxu1 }
 0xbb4   :  { %v14800_v39 = vpop.f32.mrf.mxu1 }
 0xbb9   :  { %4785 = vrot.lane.b32.xlu1 %v16364_v33, %s15896_s24 }
 0xbbe   :  { %4737 = vrot.lane.b32.xlu0 %v16344_v6, %s15896_s24 }
 0xbdd   :  { %4471 = vmax.xlane.f32.xlu1 %v4470_v25  ;;  %v17095_v25 = vpop.permute.xlu1 %4689 }
 0xbf0   :  { %v4451_v38 = vpop.xlane.xlu0 %4450 }
 0xbf1   :  { %v4473_v15 = vsub.f32 %v4093_v23, %v4451_v38 }
 0xbf3   :  { %v4481_v50 = vmul.f32 1.442695, %v4473_v15 }
 0xbf5   :  { %15658 = vpow2.f32 %v4481_v50 }
 0xbf8   :  { %v4457_v20 = vpop.xlane.xlu0 %4456 }
 0xbf9   :  { %v4475_v44 = vsub.f32 %v4193_v31, %v4457_v20 }
 0xbfb   :  { %v4485_v30 = vmul.f32 1.442695, %v4475_v44 }
 0xbfd   :  { %15660 = vpow2.f32 %v4485_v30 }
 0xc02   :  { %v15659_v21 = vpop.eup %15658 }
 0xc03   :  { %v4497_v46 = vsel %vm444_vm1, %v15659_v21, 0.0 }
 0xc04   :  { %4498 = vadd.xlane.f32.xlu0 %v4497_v46 }
 0xc0a   :  { %v17091_v39 = vpop.eup %15660 }
 0xc0b   :  { %v4503_v37 = vsel %vm444_vm1, %v17091_v39, 0.0 }
 0xc0c   :  { %4504 = vadd.xlane.f32.xlu0 %v4503_v37 }
 0xc21   :  { %v4454_v23 = vpop.xlane.xlu1 %4453 }
 0xc22   :  { %v4474_v38 = vsub.f32 %v4143_v22, %v4454_v23 }
 0xc24   :  { %v4483_v15 = vmul.f32 1.442695, %v4474_v38 }
 0xc26   :  { %15662 = vpow2.f32 %v4483_v15 }
 0xc29   :  { %v4460_v31 = vpop.xlane.xlu0 %4459 }
 0xc2a   :  { %v4476_v50 = vsub.f32 %v4243_v48, %v4460_v31 }
 0xc2c   :  { %v4487_v20 = vmul.f32 1.442695, %v4476_v50 }
 0xc2d   :  { %v4463_v44 = vpop.xlane.xlu0 %4462 }
 0xc2e   :  { %15664 = vpow2.f32 %v4487_v20  ;;  %v4477_v30 = vsub.f32 %v17069_v40, %v4463_v44 }
 0xc30   :  { %v4489_v46 = vmul.f32 1.442695, %v4477_v30 }
 0xc31   :  { %v4466_v40 = vpop.xlane.xlu1 %4465  ;;  %v4469_v15 = vpop.xlane.xlu0 %4468 }
 0xc32   :  { %15666 = vpow2.f32 %v4489_v46  ;;  %v4478_v38 = vsub.f32 %v4343_v1, %v4466_v40  ;;  %v4479_v31 = vsub.f32 %v17071_v53, %v4469_v15 }
 0xc33   :  { %v17098_v56 = vpop.eup %15662 }
 0xc34   :  { %v4500_v37 = vsel %vm444_vm1, %v17098_v56, 0.0  ;;  %v4491_v50 = vmul.f32 1.442695, %v4478_v38  ;;  %v4493_v20 = vmul.f32 1.442695, %v4479_v31 }
 0xc35   :  { %4501 = vadd.xlane.f32.xlu1 %v4500_v37  ;;  %v17125_v53 = vpop.permute.xlu1 %4785  ;;  %v4738_v1 = vpop.permute.xlu0 %4737 }
 0xc36   :  { %15668 = vpow2.f32 %v4491_v50 }
 0xc37   :  { %15670 = vpow2.f32 %v4493_v20  ;;  %v4647_v20 = vsel %vm912_vm2, %v4642_v17, 0 }
 0xc3b   :  { %v17102_v29 = vpop.eup %15664 }
 0xc3c   :  { %v4506_v22 = vsel %vm444_vm1, %v17102_v29, 0.0 }
 0xc3d   :  { %4507 = vadd.xlane.f32.xlu1 %v4506_v22 }
 0xc3f   :  { %v17106_v48 = vpop.eup %15666 }
 0xc40   :  { %v4509_v23 = vsel %vm444_vm1, %v17106_v48, 0.0 }
 0xc41   :  { %4510 = vadd.xlane.f32.xlu0 %v4509_v23 }
 0xc43   :  { %v17115_v44 = vpop.eup %15668 }
 0xc44   :  { %v4512_v30 = vsel %vm444_vm1, %v17115_v44, 0.0  ;;  %v17119_v46 = vpop.eup %15670 }
 0xc45   :  { %v4515_v37 = vsel %vm444_vm1, %v17119_v46, 0.0 }
 0xc4e   :  { %4881 = vrot.lane.b32.xlu1 %v16400_v12, %s15896_s24 }
 0xc57   :  { %4833 = vrot.lane.b32.xlu0 %v16362_v3, %s15896_s24 }
 0xc66   :  { %v4472_v22 = vpop.xlane.xlu1 %4471 }
 0xc67   :  { %v4480_v23 = vsub.f32 %v17082_v59, %v4472_v22 }
 0xc69   :  { %v4495_v38 = vmul.f32 1.442695, %v4480_v23  ;;  %v4743_v23 = vsel %vm912_vm2, %v4738_v1, 0 }
 0xc72   :  { %4513 = vadd.xlane.f32.xlu1 %v4512_v30 }
 0xc76   :  { %4516 = vadd.xlane.f32.xlu0 %v4515_v37 }
 0xc83   :  { %5022 = vrot.lane.b32.xlu1 %v16113_v57, %s15897_s25 }
 0xc8c   :  { %4972 = vrot.lane.b32.xlu0 %v16103_v49, %s15897_s25 }
 0xc8d   :  { %v4499_v40 = vpop.xlane.xlu0 %4498 }
 0xc8e   :  { %15672 = vrcp.f32 %v4499_v40 }
 0xc8f   :  { %15674 = vpow2.f32 %v4495_v38 }
 0xc90   :  { %4970 = vrot.lane.b32.xlu0 %v16118_v60, %s15897_s25 }
 0xc94   :  { %5072 = vrot.lane.b32.xlu0 %v16132_v8, %s15897_s25 }
 0xc95   :  { %v4505_v15 = vpop.xlane.xlu0 %4504 }
 0xc96   :  { %15676 = vrcp.f32 %v4505_v15 }
 0xc98   :  { %5070 = vrot.lane.b32.xlu0 %v16171_v32, %s15897_s25 }
 0xc9b   :  { %v15673_v31 = vpop.eup %15672 }
 0xc9c   :  { %v4529_v50 = vmul.f32 %v15673_v31, %v15659_v21  ;;  %5172 = vrot.lane.b32.xlu0 %v16142_v14, %s15897_s25  ;;  %v17144_v30 = vpop.eup %15674 }
 0xc9d   :  { %v4518_v22 = vsel %vm444_vm1, %v17144_v30, 0.0 }
 0xc9e   :  { %v4537_v59 = vpack.c.bf16 %v4529_v50, %v4529_v50  ;;  %v4695_v50 = vsel %vm912_vm2, %v17095_v25, 0  ;;  %v4791_v25 = vsel %vm912_vm2, %v17125_v53, 0 }
 0xca0   :  { %5170 = vrot.lane.b32.xlu0 %v16165_v28, %s15897_s25  ;;  %14804 = vmatmul.mubr.msk.bf16.vlgmr.msra.gmra.mxu0 %vm444_vm1, %v4537_v59 }
 0xca1   :  { %14814 = vmatpush3.bf16.msra.mxu0 %v4647_v20  ;;  %14815 = vmatprep.mubr.msk.bf16.mxu0 %vm15892_vm0, %v19975_v18 }
 0xca2   :  { %14825 = vmatprep.subr.bf16.mxu0 %v19975_v18 }
 0xca3   :  { %v15677_v21 = vpop.eup %15676 }
 0xca4   :  { %v4531_v37 = vmul.f32 %v15677_v21, %v17091_v39  ;;  %5272 = vrot.lane.b32.xlu0 %v16174_v34, %s15897_s25 }
 0xca6   :  { %v4539_v17 = vpack.c.bf16 %v4531_v37, %v4531_v37 }
 0xca7   :  { %4519 = vadd.xlane.f32.xlu1 %v4518_v22 }
 0xca8   :  { %5270 = vrot.lane.b32.xlu0 %v16197_v52, %s15897_s25  ;;  %14816 = vmatmul.mubr.msk.bf16.vlgmr.msra.gmra.mxu0 %vm444_vm1, %v4539_v17 }
 0xca9   :  { %14826 = vmatpush3.bf16.msra.mxu0 %v4743_v23  ;;  %14827 = vmatprep.mubr.msk.bf16.mxu0 %vm15892_vm0, %v19975_v18 }
 0xcaa   :  { %14837 = vmatprep.subr.bf16.mxu0 %v19975_v18 }
 0xcac   :  { %5466 = vrot.lane.b32.xlu0 %v16194_v51, %s15897_s25 }
 0xcb8   :  { %5020 = vrot.lane.b32.xlu1 %v16140_v13, %s15897_s25 }
 0xcbc   :  { %5122 = vrot.lane.b32.xlu1 %v16163_v27, %s15897_s25 }
 0xcbe   :  { %v4502_v39 = vpop.xlane.xlu1 %4501 }
 0xcbf   :  { %15678 = vrcp.f32 %v4502_v39 }
 0xcc0   :  { %5120 = vrot.lane.b32.xlu1 %v16199_v54, %s15897_s25 }
 0xcc4   :  { %5222 = vrot.lane.b32.xlu1 %v16187_v47, %s15897_s25 }
 0xcc6   :  { %v4508_v1 = vpop.xlane.xlu1 %4507 }
 0xcc7   :  { %15680 = vrcp.f32 %v4508_v1 }
 0xcc8   :  { %5220 = vrot.lane.b32.xlu1 %v16219_v42, %s15897_s25 }
 0xcca   :  { %v4511_v40 = vpop.xlane.xlu0 %4510 }
 0xccb   :  { %15682 = vrcp.f32 %v4511_v40 }
 0xccc   :  { %v15679_v38 = vpop.eup %15678  ;;  %5322 = vrot.lane.b32.xlu1 %v16213_v62, %s15897_s25 }
 0xccd   :  { %v4530_v15 = vmul.f32 %v15679_v38, %v17098_v56 }
 0xcce   :  { %v4834_v17 = vpop.permute.xlu0 %4833 }
 0xccf   :  { %v4538_v31 = vpack.c.bf16 %v4530_v15, %v4530_v15 }
 0xcd0   :  { %5320 = vrot.lane.b32.xlu1 %v16233_v5, %s15897_s25 }
 0xcd1   :  { %14810 = vmatmul.mubr.msk.bf16.vlgmr.msra.gmra.mxu1 %vm444_vm1, %v4538_v31 }
 0xcd2   :  { %14820 = vmatpush3.bf16.msra.mxu1 %v4695_v50  ;;  %14821 = vmatprep.mubr.msk.bf16.mxu1 %vm15892_vm0, %v19975_v18 }
 0xcd3   :  { %14831 = vmatprep.subr.bf16.mxu1 %v19975_v18 }
 0xcd4   :  { %v15681_v59 = vpop.eup %15680  ;;  %5514 = vrot.lane.b32.xlu1 %v16230_v4, %s15897_s25 }
 0xcd5   :  { %v4532_v56 = vmul.f32 %v15681_v59, %v17102_v29  ;;  %v4839_v29 = vsel %vm912_vm2, %v4834_v17, 0 }
 0xcd7   :  { %v4540_v20 = vpack.c.bf16 %v4532_v56, %v4532_v56 }
 0xcd8   :  { %v15683_v21 = vpop.eup %15682  ;;  %5562 = vrot.lane.b32.xlu1 %v16312_v61, %s15897_s25 }
 0xcd9   :  { %v4533_v37 = vmul.f32 %v15683_v21, %v17106_v48  ;;  %14822 = vmatmul.mubr.msk.bf16.vlgmr.msra.gmra.mxu1 %vm444_vm1, %v4540_v20  ;;  %v4882_v48 = vpop.permute.xlu1 %4881 }
 0xcda   :  { %14832 = vmatpush3.bf16.msra.mxu1 %v4791_v25  ;;  %14833 = vmatprep.mubr.msk.bf16.mxu1 %vm15892_vm0, %v19975_v18  ;;  %v4887_v59 = vsel %vm912_vm2, %v4882_v48, 0 }
 0xcdb   :  { %v4541_v22 = vpack.c.bf16 %v4533_v37, %v4533_v37  ;;  %14843 = vmatprep.subr.bf16.mxu1 %v19975_v18 }
 0xcdc   :  { %5610 = vrot.lane.b32.xlu1 %v16327_v55, %s15897_s25 }
 0xcdd   :  { %14828 = vmatmul.mubr.msk.bf16.vlgmr.msra.gmra.mxu0 %vm444_vm1, %v4541_v22 }
 0xcde   :  { %14838 = vmatpush3.bf16.msra.mxu0 %v4839_v29  ;;  %14839 = vmatprep.mubr.msk.bf16.mxu0 %vm15892_vm0, %v19975_v18 }
 0xcdf   :  { %14849 = vmatprep.subr.bf16.mxu0 %v19975_v18 }
 0xcfb   :  { %v4514_v53 = vpop.xlane.xlu1 %4513 }
 0xcfc   :  { %15684 = vrcp.f32 %v4514_v53 }
 0xcff   :  { %v4517_v23 = vpop.xlane.xlu0 %4516  ;;  %v5023_v53 = vpop.permute.xlu1 %5022 }
 0xd00   :  { %15686 = vrcp.f32 %v4517_v23 }
 0xd03   :  { %v4973_v39 = vpop.permute.xlu0 %4972 }
 0xd04   :  { %v4978_v25 = vsel %vm444_vm1, %v4973_v39, 0 }
 0xd07   :  { %v4971_v1 = vpop.permute.xlu0 %4970 }
 0xd09   :  { %v15685_v40 = vpop.eup %15684 }
 0xd0a   :  { %v4534_v38 = vmul.f32 %v15685_v40, %v17115_v44 }
 0xd0b   :  { %v5073_v15 = vpop.permute.xlu0 %5072 }
 0xd0c   :  { %v4542_v31 = vpack.c.bf16 %v4534_v38, %v4534_v38 }
 0xd0d   :  { %v15687_v50 = vpop.eup %15686 }
 0xd0e   :  { %v4535_v56 = vmul.f32 %v15687_v50, %v17119_v46  ;;  %14834 = vmatmul.mubr.msk.bf16.vlgmr.msra.gmra.mxu1 %vm444_vm1, %v4542_v31  ;;  %v5078_v46 = vsel %vm444_vm1, %v5073_v15, 0 }
 0xd0f   :  { %14844 = vmatpush3.bf16.msra.mxu1 %v4887_v59  ;;  %14845 = vmatprep.mubr.msk.bf16.mxu1 %vm15892_vm0, %v19975_v18  ;;  %v5071_v21 = vpop.permute.xlu0 %5070 }
 0xd10   :  { %v4543_v20 = vpack.c.bf16 %v4535_v56, %v4535_v56  ;;  %14855 = vmatprep.subr.bf16.mxu1 %v19975_v18  ;;  %v5028_v56 = vsel %vm444_vm1, %v5023_v53, 0 }
 0xd12   :  { %14840 = vmatmul.mubr.msk.bf16.vlgmr.msra.gmra.mxu0 %vm444_vm1, %v4543_v20 }
 0xd13   :  { %14850 = vmatpush3.bf16.xpose.msra.mxu0 %v4978_v25  ;;  %14851 = vmatprep.mubr.msk.bf16.mxu0 %vm15892_vm0, %v19975_v18  ;;  %v5173_v44 = vpop.permute.xlu0 %5172 }
 0xd14   :  { %14861 = vmatprep.subr.bf16.mxu0 %v19975_v18  ;;  %v5178_v17 = vsel %vm444_vm1, %v5173_v44, 0 }
 0xd17   :  { %v5171_v37 = vpop.permute.xlu0 %5170 }
 0xd1a   :  { %14852 = vmatmul.mubr.msk.bf16.vlgmr.msra.gmra.mxu0 %vm444_vm1, %v4971_v1 }
 0xd1b   :  { %14862 = vmatpush3.bf16.xpose.msra.mxu0 %v5078_v46  ;;  %14863 = vmatprep.mubr.msk.bf16.mxu0 %vm15892_vm0, %v19975_v18  ;;  %v5273_v22 = vpop.permute.xlu0 %5272 }
 0xd1c   :  { %14873 = vmatprep.subr.bf16.mxu0 %v19975_v18  ;;  %v5278_v48 = vsel %vm444_vm1, %v5273_v22, 0 }
 0xd1f   :  { %v5271_v29 = vpop.permute.xlu0 %5270 }
 0xd22   :  { %14864 = vmatmul.mubr.msk.bf16.vlgmr.msra.gmra.mxu0 %vm444_vm1, %v5071_v21 }
 0xd23   :  { %14874 = vmatpush3.bf16.xpose.msra.mxu0 %v5178_v17  ;;  %14875 = vmatprep.mubr.msk.bf16.mxu0 %vm15892_vm0, %v19975_v18  ;;  %v5467_v23 = vpop.permute.xlu0 %5466 }
 0xd24   :  { %14885 = vmatprep.subr.bf16.mxu0 %v19975_v18  ;;  %v5472_v1 = vsel %vm912_vm2, %v5467_v23, 0 }
 0xd2a   :  { %14876 = vmatmul.mubr.msk.bf16.vlgmr.msra.gmra.mxu0 %vm444_vm1, %v5171_v37 }
 0xd2b   :  { %14886 = vmatpush3.bf16.xpose.msra.mxu0 %v5278_v48  ;;  %14887 = vmatprep.mubr.msk.bf16.mxu0 %vm15892_vm0, %v19975_v18 }
 0xd2c   :  { %14897 = vmatprep.subr.bf16.mxu0 %v19975_v18 }
 0xd30   :  { %v4520_v39 = vpop.xlane.xlu1 %4519 }
 0xd31   :  { %15688 = vrcp.f32 %v4520_v39 }
 0xd32   :  { %14888 = vmatmul.mubr.msk.bf16.vlgmr.msra.gmra.mxu0 %vm444_vm1, %v5271_v29 }
 0xd33   :  { %14898 = vmatpush3.bf16.msra.mxu0 %v5472_v1  ;;  %14899 = vmatprep.mubr.msk.bf16.mxu0 %vm15892_vm0, %v19975_v18 }
 0xd34   :  { %14909 = vmatprep.subr.bf16.mxu0 %v19975_v18  ;;  %v5021_v40 = vpop.permute.xlu1 %5020 }
 0xd38   :  { %v5123_v38 = vpop.permute.xlu1 %5122 }
 0xd39   :  { %v5128_v21 = vsel %vm444_vm1, %v5123_v38, 0 }
 0xd3c   :  { %v5121_v59 = vpop.permute.xlu1 %5120 }
 0xd3e   :  { %v15689_v15 = vpop.eup %15688 }
 0xd3f   :  { %v4536_v31 = vmul.f32 %v15689_v15, %v17144_v30 }
 0xd40   :  { %v5223_v20 = vpop.permute.xlu1 %5222 }
 0xd41   :  { %v4544_v50 = vpack.c.bf16 %v4536_v31, %v4536_v31  ;;  %v5228_v25 = vsel %vm444_vm1, %v5223_v20, 0 }
 0xd43   :  { %14846 = vmatmul.mubr.msk.bf16.vlgmr.msra.gmra.mxu1 %vm444_vm1, %v4544_v50 }
 0xd44   :  { %14856 = vmatpush3.bf16.xpose.msra.mxu1 %v5028_v56  ;;  %14857 = vmatprep.mubr.msk.bf16.mxu1 %vm15892_vm0, %v19975_v18  ;;  %v5221_v30 = vpop.permute.xlu1 %5220 }
 0xd45   :  { %14867 = vmatprep.subr.bf16.mxu1 %v19975_v18 }
 0xd48   :  { %v5323_v44 = vpop.permute.xlu1 %5322 }
 0xd49   :  { %v5328_v37 = vsel %vm444_vm1, %v5323_v44, 0 }
 0xd4b   :  { %14858 = vmatmul.mubr.msk.bf16.vlgmr.msra.gmra.mxu1 %vm444_vm1, %v5021_v40 }
 0xd4c   :  { %14868 = vmatpush3.bf16.xpose.msra.mxu1 %v5128_v21  ;;  %14869 = vmatprep.mubr.msk.bf16.mxu1 %vm15892_vm0, %v19975_v18  ;;  %v5321_v46 = vpop.permute.xlu1 %5320 }
 0xd4d   :  { %14879 = vmatprep.subr.bf16.mxu1 %v19975_v18 }
 0xd50   :  { %v5515_v17 = vpop.permute.xlu1 %5514 }
 0xd51   :  { %v5520_v48 = vsel %vm912_vm2, %v5515_v17, 0 }
 0xd53   :  { %14870 = vmatmul.mubr.msk.bf16.vlgmr.msra.gmra.mxu1 %vm444_vm1, %v5121_v59 }
 0xd54   :  { %14880 = vmatpush3.bf16.xpose.msra.mxu1 %v5228_v25  ;;  %14881 = vmatprep.mubr.msk.bf16.mxu1 %vm15892_vm0, %v19975_v18  ;;  %v5563_v41 = vpop.permute.xlu1 %5562 }
 0xd55   :  { %14891 = vmatprep.subr.bf16.mxu1 %v19975_v18 }
 0xd5b   :  { %14882 = vmatmul.mubr.msk.bf16.vlgmr.msra.gmra.mxu1 %vm444_vm1, %v5221_v30 }
 0xd5c   :  { %14892 = vmatpush3.bf16.xpose.msra.mxu1 %v5328_v37  ;;  %14893 = vmatprep.mubr.msk.bf16.mxu1 %vm15892_vm0, %v19975_v18 }
 0xd5d   :  { %14903 = vmatprep.subr.bf16.mxu1 %v19975_v18 }
 0xd60   :  { %v17254_v22 = vpop.f32.mrf.mxu0 }
 0xd62   :  { %v14805_v29 = vpop.f32.mrf.mxu0 }
 0xd63   :  { %14894 = vmatmul.mubr.msk.bf16.vlgmr.msra.gmra.mxu1 %vm444_vm1, %v5321_v46 }
 0xd64   :  { %14904 = vmatpush3.bf16.msra.mxu1 %v5520_v48  ;;  %v4590_v53 = vpop.f32.mrf.mxu0  ;;  %14905 = vmatprep.mubr.msk.bf16.mxu1 %vm15892_vm0, %v19975_v18 }
 0xd65   :  { %14915 = vmatprep.subr.bf16.mxu1 %v19975_v18 }
 0xd66   :  { %v14806_v23 = vpop.f32.mrf.mxu0 }
 0xd68   :  { %v17261_v39 = vpop.f32.mrf.mxu0 }
 0xd6a   :  { %v14817_v1 = vpop.f32.mrf.mxu0 }
 0xd6c   :  { %v4686_v40 = vpop.f32.mrf.mxu0 }
 0xd6e   :  { %v14818_v38 = vpop.f32.mrf.mxu0 }
 0xd91   :  { %v17263_v15 = vpop.f32.mrf.mxu1 }
 0xd92   :  { %19982 = vst [vmem:[#allocation22_spill] sm:$0xff] %v17263_v15 }
 0xd93   :  { %v14811_v31 = vpop.f32.mrf.mxu1 }
 0xd95   :  { %v4638_v50 = vpop.f32.mrf.mxu1 }
 0xd97   :  { %v14812_v59 = vpop.f32.mrf.mxu1 }
 0xd99   :  { %v17265_v56 = vpop.f32.mrf.mxu1 }
 0xd9a   :  { %19983 = vst [vmem:[#allocation23_spill] sm:$0xff] %v17265_v56 }
 0xd9b   :  { %v14823_v20 = vpop.f32.mrf.mxu1 }
 0xd9d   :  { %v4734_v21 = vpop.f32.mrf.mxu1  ;;  %v17267_v30 = vpop.f32.mrf.mxu0 }
 0xd9e   :  { %19984 = vst [vmem:[#allocation24_spill] sm:$0xff] %v17267_v30 }
 0xd9f   :  { %v14824_v25 = vpop.f32.mrf.mxu1  ;;  %v14829_v44 = vpop.f32.mrf.mxu0 }
 0xda1   :  { %v4782_v46 = vpop.f32.mrf.mxu0 }
 0xda3   :  { %v14830_v37 = vpop.f32.mrf.mxu0 }
 0xdce   :  { %v17269_v17 = vpop.f32.mrf.mxu1 }
 0xdcf   :  { %19985 = vst [vmem:[#allocation25_spill] sm:$0xff] %v17269_v17 }
 0xdd0   :  { %v14835_v29 = vpop.f32.mrf.mxu1 }
 0xdd2   :  { %v4830_v48 = vpop.f32.mrf.mxu1  ;;  %v17271_v53 = vpop.f32.mrf.mxu0 }
 0xdd3   :  { %19986 = vst [vmem:[#allocation26_spill] sm:$0xff] %v17271_v53 }
 0xdd4   :  { %v14836_v23 = vpop.f32.mrf.mxu1  ;;  %v14841_v1 = vpop.f32.mrf.mxu0 }
 0xdd6   :  { %v4878_v40 = vpop.f32.mrf.mxu0 }
 0xdd8   :  { %v14842_v38 = vpop.f32.mrf.mxu0 }
 0xdda   :  { %v5014_v31 = vpop.f32.mrf.mxu0 }
 0xddb   :  { %v5370_v50 = vsel %vm444_vm1, %v5014_v31, -inf }
 0xddc   :  { %5371 = vmax.xlane.f32.xlu0 %v5370_v50  ;;  %v14853_v59 = vpop.f32.mrf.mxu0 }
 0xdde   :  { %v5017_v20 = vpop.f32.mrf.mxu0 }
 0xde0   :  { %v14854_v21 = vpop.f32.mrf.mxu0 }
 0xde2   :  { %v5114_v25 = vpop.f32.mrf.mxu0 }
 0xde3   :  { %v5376_v44 = vsel %vm444_vm1, %v5114_v25, -inf }
 0xde4   :  { %5377 = vmax.xlane.f32.xlu0 %v5376_v44  ;;  %v14865_v46 = vpop.f32.mrf.mxu0 }
 0xde6   :  { %v5117_v37 = vpop.f32.mrf.mxu0 }
 0xde8   :  { %v14866_v29 = vpop.f32.mrf.mxu0 }
 0xdea   :  { %v17275_v48 = vpop.f32.mrf.mxu0 }
 0xdec   :  { %v14877_v23 = vpop.f32.mrf.mxu0 }
 0xdee   :  { %v5217_v1 = vpop.f32.mrf.mxu0 }
 0xdf0   :  { %v14878_v40 = vpop.f32.mrf.mxu0 }
 0xdf2   :  { %v17277_v38 = vpop.f32.mrf.mxu0 }
 0xdf4   :  { %v14889_v17 = vpop.f32.mrf.mxu0 }
 0xdf6   :  { %v5317_v53 = vpop.f32.mrf.mxu0 }
 0xdf7   :  { %v5382_v53 = vsel %vm444_vm1, %v17275_v48, -inf }
 0xdf8   :  { %v14890_v50 = vpop.f32.mrf.mxu0 }
 0xe03   :  { %v17279_v59 = vpop.f32.mrf.mxu1 }
 0xe04   :  { %19987 = vst [vmem:[#allocation27_spill] sm:$0xff] %v17279_v59 }
 0xe05   :  { %v14847_v20 = vpop.f32.mrf.mxu1 }
 0xe07   :  { %v4926_v21 = vpop.f32.mrf.mxu1 }
 0xe09   :  { %v14848_v30 = vpop.f32.mrf.mxu1 }
 0xe0a   :  { %v5388_v30 = vsel %vm444_vm1, %v17277_v38, -inf }
 0xe0b   :  { %v5064_v56 = vpop.f32.mrf.mxu1 }
 0xe0c   :  { %v5373_v44 = vsel %vm444_vm1, %v5064_v56, -inf }
 0xe0d   :  { %5374 = vmax.xlane.f32.xlu1 %v5373_v44  ;;  %v14859_v46 = vpop.f32.mrf.mxu1 }
 0xe0f   :  { %v5067_v37 = vpop.f32.mrf.mxu1 }
 0xe11   :  { %v14860_v29 = vpop.f32.mrf.mxu1 }
 0xe13   :  { %v5164_v23 = vpop.f32.mrf.mxu1 }
 0xe14   :  { %v5379_v1 = vsel %vm444_vm1, %v5164_v23, -inf }
 0xe15   :  { %5380 = vmax.xlane.f32.xlu0 %v5379_v1  ;;  %v14871_v40 = vpop.f32.mrf.mxu1 }
 0xe17   :  { %v5167_v17 = vpop.f32.mrf.mxu1 }
 0xe19   :  { %5383 = vmax.xlane.f32.xlu0 %v5382_v53  ;;  %v14872_v50 = vpop.f32.mrf.mxu1 }
 0xe1b   :  { %v5264_v20 = vpop.f32.mrf.mxu1 }
 0xe1c   :  { %v5385_v21 = vsel %vm444_vm1, %v5264_v20, -inf }
 0xe1d   :  { %5389 = vmax.xlane.f32.xlu0 %v5388_v30  ;;  %5386 = vmax.xlane.f32.xlu1 %v5385_v21  ;;  %v14883_v44 = vpop.f32.mrf.mxu1 }
 0xe1f   :  { %v5267_v46 = vpop.f32.mrf.mxu1 }
 0xe21   :  { %v14884_v37 = vpop.f32.mrf.mxu1 }
 0xe23   :  { %v17288_v29 = vpop.f32.mrf.mxu1 }
 0xe24   :  { %v5391_v53 = vsel %vm444_vm1, %v17288_v29, -inf }
 0xe25   :  { %v14895_v1 = vpop.f32.mrf.mxu1 }
 0xe27   :  { %v5367_v40 = vpop.f32.mrf.mxu1 }
 0xe29   :  { %v14896_v17 = vpop.f32.mrf.mxu1 }
 0xe2e   :  { %5706 = vrot.lane.b32.xlu1 %v16364_v33, %s15897_s25 }
 0xe33   :  { %5658 = vrot.lane.b32.xlu0 %v16344_v6, %s15897_s25 }
 0xe52   :  { %5392 = vmax.xlane.f32.xlu1 %v5391_v53  ;;  %v17301_v53 = vpop.permute.xlu1 %5610 }
 0xe65   :  { %v5372_v50 = vpop.xlane.xlu0 %5371 }
 0xe66   :  { %v5394_v30 = vsub.f32 %v5014_v31, %v5372_v50 }
 0xe68   :  { %v5402_v21 = vmul.f32 1.442695, %v5394_v30 }
 0xe6a   :  { %15690 = vpow2.f32 %v5402_v21 }
 0xe6d   :  { %v5378_v44 = vpop.xlane.xlu0 %5377 }
 0xe6e   :  { %v5396_v46 = vsub.f32 %v5114_v25, %v5378_v44 }
 0xe70   :  { %v5406_v37 = vmul.f32 1.442695, %v5396_v46 }
 0xe72   :  { %15692 = vpow2.f32 %v5406_v37 }
 0xe77   :  { %v15691_v1 = vpop.eup %15690 }
 0xe78   :  { %v5418_v40 = vsel %vm444_vm1, %v15691_v1, 0.0 }
 0xe79   :  { %5419 = vadd.xlane.f32.xlu0 %v5418_v40 }
 0xe7f   :  { %v17297_v17 = vpop.eup %15692 }
 0xe80   :  { %v5424_v59 = vsel %vm444_vm1, %v17297_v17, 0.0 }
 0xe81   :  { %5425 = vadd.xlane.f32.xlu0 %v5424_v59 }
 0xe96   :  { %v5375_v31 = vpop.xlane.xlu1 %5374 }
 0xe97   :  { %v5395_v50 = vsub.f32 %v5064_v56, %v5375_v31 }
 0xe99   :  { %v5404_v30 = vmul.f32 1.442695, %v5395_v50 }
 0xe9b   :  { %15694 = vpow2.f32 %v5404_v30 }
 0xe9e   :  { %v5381_v25 = vpop.xlane.xlu0 %5380 }
 0xe9f   :  { %v5397_v21 = vsub.f32 %v5164_v23, %v5381_v25 }
 0xea1   :  { %v5408_v44 = vmul.f32 1.442695, %v5397_v21 }
 0xea2   :  { %v5384_v46 = vpop.xlane.xlu0 %5383 }
 0xea3   :  { %15696 = vpow2.f32 %v5408_v44  ;;  %v5398_v37 = vsub.f32 %v17275_v48, %v5384_v46 }
 0xea5   :  { %v5410_v40 = vmul.f32 1.442695, %v5398_v37 }
 0xea6   :  { %v5387_v48 = vpop.xlane.xlu1 %5386  ;;  %v5390_v30 = vpop.xlane.xlu0 %5389 }
 0xea7   :  { %15698 = vpow2.f32 %v5410_v40  ;;  %v5399_v50 = vsub.f32 %v5264_v20, %v5387_v48  ;;  %v5400_v25 = vsub.f32 %v17277_v38, %v5390_v30 }
 0xea8   :  { %v17304_v15 = vpop.eup %15694 }
 0xea9   :  { %v5421_v59 = vsel %vm444_vm1, %v17304_v15, 0.0  ;;  %v5412_v21 = vmul.f32 1.442695, %v5399_v50  ;;  %v5414_v44 = vmul.f32 1.442695, %v5400_v25 }
 0xeaa   :  { %5422 = vadd.xlane.f32.xlu1 %v5421_v59  ;;  %v17331_v38 = vpop.permute.xlu1 %5706  ;;  %v5659_v20 = vpop.permute.xlu0 %5658 }
 0xeab   :  { %15700 = vpow2.f32 %v5412_v21 }
 0xeac   :  { %15702 = vpow2.f32 %v5414_v44  ;;  %v5568_v44 = vsel %vm912_vm2, %v5563_v41, 0 }
 0xeb0   :  { %v17308_v58 = vpop.eup %15696 }
 0xeb1   :  { %v5427_v56 = vsel %vm444_vm1, %v17308_v58, 0.0 }
 0xeb2   :  { %5428 = vadd.xlane.f32.xlu1 %v5427_v56 }
 0xeb4   :  { %v17312_v23 = vpop.eup %15698 }
 0xeb5   :  { %v5430_v31 = vsel %vm444_vm1, %v17312_v23, 0.0 }
 0xeb6   :  { %5431 = vadd.xlane.f32.xlu0 %v5430_v31 }
 0xeb8   :  { %v17321_v46 = vpop.eup %15700 }
 0xeb9   :  { %v5433_v37 = vsel %vm444_vm1, %v17321_v46, 0.0  ;;  %v17325_v40 = vpop.eup %15702 }
 0xeba   :  { %v5436_v59 = vsel %vm444_vm1, %v17325_v40, 0.0 }
 0xec3   :  { %5802 = vrot.lane.b32.xlu1 %v16400_v12, %s15897_s25 }
 0xecc   :  { %5754 = vrot.lane.b32.xlu0 %v16362_v3, %s15897_s25 }
 0xedb   :  { %v5393_v56 = vpop.xlane.xlu1 %5392 }
 0xedc   :  { %v5401_v31 = vsub.f32 %v17288_v29, %v5393_v56 }
 0xede   :  { %v5416_v50 = vmul.f32 1.442695, %v5401_v31  ;;  %v5664_v31 = vsel %vm912_vm2, %v5659_v20, 0 }
 0xee7   :  { %5434 = vadd.xlane.f32.xlu1 %v5433_v37 }
 0xeeb   :  { %5437 = vadd.xlane.f32.xlu0 %v5436_v59 }
 0xef8   :  { %5943 = vrot.lane.b32.xlu1 %v16113_v57, %s15898_s26 }
 0xf01   :  { %5893 = vrot.lane.b32.xlu0 %v16103_v49, %s15898_s26 }
 0xf02   :  { %v5420_v48 = vpop.xlane.xlu0 %5419 }
 0xf03   :  { %15704 = vrcp.f32 %v5420_v48 }
 0xf04   :  { %15706 = vpow2.f32 %v5416_v50 }
 0xf05   :  { %5891 = vrot.lane.b32.xlu0 %v16118_v60, %s15898_s26 }
 0xf09   :  { %5993 = vrot.lane.b32.xlu0 %v16132_v8, %s15898_s26 }
 0xf0a   :  { %v5426_v30 = vpop.xlane.xlu0 %5425 }
 0xf0b   :  { %15708 = vrcp.f32 %v5426_v30 }
 0xf0d   :  { %5991 = vrot.lane.b32.xlu0 %v16171_v32, %s15898_s26 }
 0xf10   :  { %v15705_v25 = vpop.eup %15704 }
 0xf11   :  { %v5450_v21 = vmul.f32 %v15705_v25, %v15691_v1  ;;  %6093 = vrot.lane.b32.xlu0 %v16142_v14, %s15898_s26  ;;  %v17350_v37 = vpop.eup %15706 }
 0xf12   :  { %v5439_v56 = vsel %vm444_vm1, %v17350_v37, 0.0 }
 0xf13   :  { %v5458_v29 = vpack.c.bf16 %v5450_v21, %v5450_v21  ;;  %v5616_v21 = vsel %vm912_vm2, %v17301_v53, 0  ;;  %v5712_v53 = vsel %vm912_vm2, %v17331_v38, 0 }
 0xf15   :  { %6091 = vrot.lane.b32.xlu0 %v16165_v28, %s15898_s26  ;;  %14900 = vmatmul.mubr.msk.bf16.vlgmr.msra.gmra.mxu0 %vm444_vm1, %v5458_v29 }
 0xf16   :  { %14910 = vmatpush3.bf16.msra.mxu0 %v5568_v44  ;;  %14911 = vmatprep.mubr.msk.bf16.mxu0 %vm15892_vm0, %v19975_v18 }
 0xf17   :  { %14921 = vmatprep.subr.bf16.mxu0 %v19975_v18 }
 0xf18   :  { %v15709_v1 = vpop.eup %15708 }
 0xf19   :  { %v5452_v59 = vmul.f32 %v15709_v1, %v17297_v17  ;;  %6193 = vrot.lane.b32.xlu0 %v16174_v34, %s15898_s26 }
 0xf1b   :  { %v5460_v41 = vpack.c.bf16 %v5452_v59, %v5452_v59 }
 0xf1c   :  { %5440 = vadd.xlane.f32.xlu1 %v5439_v56 }
 0xf1d   :  { %6191 = vrot.lane.b32.xlu0 %v16197_v52, %s15898_s26  ;;  %14912 = vmatmul.mubr.msk.bf16.vlgmr.msra.gmra.mxu0 %vm444_vm1, %v5460_v41 }
 0xf1e   :  { %14922 = vmatpush3.bf16.msra.mxu0 %v5664_v31  ;;  %14923 = vmatprep.mubr.msk.bf16.mxu0 %vm15892_vm0, %v19975_v18 }
 0xf1f   :  { %14933 = vmatprep.subr.bf16.mxu0 %v19975_v18 }
 0xf21   :  { %6387 = vrot.lane.b32.xlu0 %v16194_v51, %s15898_s26 }
 0xf2d   :  { %5941 = vrot.lane.b32.xlu1 %v16140_v13, %s15898_s26 }
 0xf31   :  { %6043 = vrot.lane.b32.xlu1 %v16163_v27, %s15898_s26 }
 0xf33   :  { %v5423_v17 = vpop.xlane.xlu1 %5422 }
 0xf34   :  { %15710 = vrcp.f32 %v5423_v17 }
 0xf35   :  { %6041 = vrot.lane.b32.xlu1 %v16199_v54, %s15898_s26 }
 0xf39   :  { %6143 = vrot.lane.b32.xlu1 %v16187_v47, %s15898_s26 }
 0xf3b   :  { %v5429_v20 = vpop.xlane.xlu1 %5428 }
 0xf3c   :  { %15712 = vrcp.f32 %v5429_v20 }
 0xf3d   :  { %6141 = vrot.lane.b32.xlu1 %v16219_v42, %s15898_s26 }
 0xf3f   :  { %v5432_v48 = vpop.xlane.xlu0 %5431 }
 0xf40   :  { %15714 = vrcp.f32 %v5432_v48 }
 0xf41   :  { %v15711_v50 = vpop.eup %15710  ;;  %6243 = vrot.lane.b32.xlu1 %v16213_v62, %s15898_s26 }
 0xf42   :  { %v5451_v30 = vmul.f32 %v15711_v50, %v17304_v15 }
 0xf43   :  { %v5755_v41 = vpop.permute.xlu0 %5754 }
 0xf44   :  { %v5459_v25 = vpack.c.bf16 %v5451_v30, %v5451_v30 }
 0xf45   :  { %6241 = vrot.lane.b32.xlu1 %v16233_v5, %s15898_s26 }
 0xf46   :  { %14906 = vmatmul.mubr.msk.bf16.vlgmr.msra.gmra.mxu1 %vm444_vm1, %v5459_v25 }
 0xf47   :  { %14916 = vmatpush3.bf16.msra.mxu1 %v5616_v21  ;;  %14917 = vmatprep.mubr.msk.bf16.mxu1 %vm15892_vm0, %v19975_v18 }
 0xf48   :  { %14927 = vmatprep.subr.bf16.mxu1 %v19975_v18 }
 0xf49   :  { %v15713_v29 = vpop.eup %15712  ;;  %6435 = vrot.lane.b32.xlu1 %v16230_v4, %s15898_s26 }
 0xf4a   :  { %v5453_v15 = vmul.f32 %v15713_v29, %v17308_v58  ;;  %v5760_v58 = vsel %vm912_vm2, %v5755_v41, 0 }
 0xf4c   :  { %v5461_v44 = vpack.c.bf16 %v5453_v15, %v5453_v15 }
 0xf4d   :  { %v15715_v1 = vpop.eup %15714  ;;  %6483 = vrot.lane.b32.xlu1 %v16312_v61, %s15898_s26 }
 0xf4e   :  { %v5454_v59 = vmul.f32 %v15715_v1, %v17312_v23  ;;  %14918 = vmatmul.mubr.msk.bf16.vlgmr.msra.gmra.mxu1 %vm444_vm1, %v5461_v44  ;;  %v5803_v23 = vpop.permute.xlu1 %5802 }
 0xf4f   :  { %14928 = vmatpush3.bf16.msra.mxu1 %v5712_v53  ;;  %14929 = vmatprep.mubr.msk.bf16.mxu1 %vm15892_vm0, %v19975_v18  ;;  %v5808_v29 = vsel %vm912_vm2, %v5803_v23, 0 }
 0xf50   :  { %v5462_v56 = vpack.c.bf16 %v5454_v59, %v5454_v59  ;;  %14939 = vmatprep.subr.bf16.mxu1 %v19975_v18 }
 0xf51   :  { %6531 = vrot.lane.b32.xlu1 %v16327_v55, %s15898_s26 }
 0xf52   :  { %14924 = vmatmul.mubr.msk.bf16.vlgmr.msra.gmra.mxu0 %vm444_vm1, %v5462_v56 }
 0xf53   :  { %14934 = vmatpush3.bf16.msra.mxu0 %v5760_v58  ;;  %14935 = vmatprep.mubr.msk.bf16.mxu0 %vm15892_vm0, %v19975_v18 }
 0xf54   :  { %14945 = vmatprep.subr.bf16.mxu0 %v19975_v18 }
 0xf70   :  { %v5435_v38 = vpop.xlane.xlu1 %5434 }
 0xf71   :  { %15716 = vrcp.f32 %v5435_v38 }
 0xf74   :  { %v5438_v31 = vpop.xlane.xlu0 %5437  ;;  %v5944_v38 = vpop.permute.xlu1 %5943 }
 0xf75   :  { %15718 = vrcp.f32 %v5438_v31 }
 0xf78   :  { %v5894_v17 = vpop.permute.xlu0 %5893 }
 0xf79   :  { %v5899_v53 = vsel %vm444_vm1, %v5894_v17, 0 }
 0xf7c   :  { %v5892_v20 = vpop.permute.xlu0 %5891 }
 0xf7e   :  { %v15717_v48 = vpop.eup %15716 }
 0xf7f   :  { %v5455_v50 = vmul.f32 %v15717_v48, %v17321_v46 }
 0xf80   :  { %v5994_v30 = vpop.permute.xlu0 %5993 }
 0xf81   :  { %v5463_v25 = vpack.c.bf16 %v5455_v50, %v5455_v50 }
 0xf82   :  { %v15719_v21 = vpop.eup %15718 }
 0xf83   :  { %v5456_v15 = vmul.f32 %v15719_v21, %v17325_v40  ;;  %14930 = vmatmul.mubr.msk.bf16.vlgmr.msra.gmra.mxu1 %vm444_vm1, %v5463_v25  ;;  %v5999_v40 = vsel %vm444_vm1, %v5994_v30, 0 }
 0xf84   :  { %14940 = vmatpush3.bf16.msra.mxu1 %v5808_v29  ;;  %14941 = vmatprep.mubr.msk.bf16.mxu1 %vm15892_vm0, %v19975_v18  ;;  %v5992_v1 = vpop.permute.xlu0 %5991 }
 0xf85   :  { %v5464_v44 = vpack.c.bf16 %v5456_v15, %v5456_v15  ;;  %14951 = vmatprep.subr.bf16.mxu1 %v19975_v18  ;;  %v5949_v15 = vsel %vm444_vm1, %v5944_v38, 0 }
 0xf87   :  { %14936 = vmatmul.mubr.msk.bf16.vlgmr.msra.gmra.mxu0 %vm444_vm1, %v5464_v44 }
 0xf88   :  { %14946 = vmatpush3.bf16.xpose.msra.mxu0 %v5899_v53  ;;  %14947 = vmatprep.mubr.msk.bf16.mxu0 %vm15892_vm0, %v19975_v18  ;;  %v6094_v46 = vpop.permute.xlu0 %6093 }
 0xf89   :  { %14957 = vmatprep.subr.bf16.mxu0 %v19975_v18  ;;  %v6099_v41 = vsel %vm444_vm1, %v6094_v46, 0 }
 0xf8c   :  { %v6092_v59 = vpop.permute.xlu0 %6091 }
 0xf8f   :  { %14948 = vmatmul.mubr.msk.bf16.vlgmr.msra.gmra.mxu0 %vm444_vm1, %v5892_v20 }
 0xf90   :  { %14958 = vmatpush3.bf16.xpose.msra.mxu0 %v5999_v40  ;;  %14959 = vmatprep.mubr.msk.bf16.mxu0 %vm15892_vm0, %v19975_v18  ;;  %v6194_v56 = vpop.permute.xlu0 %6193 }
 0xf91   :  { %14969 = vmatprep.subr.bf16.mxu0 %v19975_v18  ;;  %v6199_v23 = vsel %vm444_vm1, %v6194_v56, 0 }
 0xf94   :  { %v6192_v58 = vpop.permute.xlu0 %6191 }
 0xf97   :  { %14960 = vmatmul.mubr.msk.bf16.vlgmr.msra.gmra.mxu0 %vm444_vm1, %v5992_v1 }
 0xf98   :  { %14970 = vmatpush3.bf16.xpose.msra.mxu0 %v6099_v41  ;;  %14971 = vmatprep.mubr.msk.bf16.mxu0 %vm15892_vm0, %v19975_v18  ;;  %v6388_v31 = vpop.permute.xlu0 %6387 }
 0xf99   :  { %14981 = vmatprep.subr.bf16.mxu0 %v19975_v18  ;;  %v6393_v20 = vsel %vm912_vm2, %v6388_v31, 0 }
 0xf9f   :  { %14972 = vmatmul.mubr.msk.bf16.vlgmr.msra.gmra.mxu0 %vm444_vm1, %v6092_v59 }
 0xfa0   :  { %14982 = vmatpush3.bf16.xpose.msra.mxu0 %v6199_v23  ;;  %14983 = vmatprep.mubr.msk.bf16.mxu0 %vm15892_vm0, %v19975_v18 }
 0xfa1   :  { %14993 = vmatprep.subr.bf16.mxu0 %v19975_v18 }
 0xfa5   :  { %v5441_v17 = vpop.xlane.xlu1 %5440 }
 0xfa6   :  { %15720 = vrcp.f32 %v5441_v17 }
 0xfa7   :  { %14984 = vmatmul.mubr.msk.bf16.vlgmr.msra.gmra.mxu0 %vm444_vm1, %v6192_v58 }
 0xfa8   :  { %14994 = vmatpush3.bf16.msra.mxu0 %v6393_v20  ;;  %14995 = vmatprep.mubr.msk.bf16.mxu0 %vm15892_vm0, %v19975_v18 }
 0xfa9   :  { %15005 = vmatprep.subr.bf16.mxu0 %v19975_v18  ;;  %v5942_v48 = vpop.permute.xlu1 %5941 }
 0xfad   :  { %v6044_v50 = vpop.permute.xlu1 %6043 }
 0xfae   :  { %v6049_v1 = vsel %vm444_vm1, %v6044_v50, 0 }
 0xfb1   :  { %v6042_v29 = vpop.permute.xlu1 %6041 }
 0xfb3   :  { %v15721_v30 = vpop.eup %15720 }
 0xfb4   :  { %v5457_v25 = vmul.f32 %v15721_v30, %v17350_v37 }
 0xfb5   :  { %v6144_v44 = vpop.permute.xlu1 %6143 }
 0xfb6   :  { %v5465_v21 = vpack.c.bf16 %v5457_v25, %v5457_v25  ;;  %v6149_v53 = vsel %vm444_vm1, %v6144_v44, 0 }
 0xfb8   :  { %14942 = vmatmul.mubr.msk.bf16.vlgmr.msra.gmra.mxu1 %vm444_vm1, %v5465_v21 }
 0xfb9   :  { %14952 = vmatpush3.bf16.xpose.msra.mxu1 %v5949_v15  ;;  %14953 = vmatprep.mubr.msk.bf16.mxu1 %vm15892_vm0, %v19975_v18  ;;  %v6142_v37 = vpop.permute.xlu1 %6141 }
 0xfba   :  { %14963 = vmatprep.subr.bf16.mxu1 %v19975_v18 }
 0xfbd   :  { %v6244_v46 = vpop.permute.xlu1 %6243 }
 0xfbe   :  { %v6249_v59 = vsel %vm444_vm1, %v6244_v46, 0 }
 0xfc0   :  { %14954 = vmatmul.mubr.msk.bf16.vlgmr.msra.gmra.mxu1 %vm444_vm1, %v5942_v48 }
 0xfc1   :  { %14964 = vmatpush3.bf16.xpose.msra.mxu1 %v6049_v1  ;;  %14965 = vmatprep.mubr.msk.bf16.mxu1 %vm15892_vm0, %v19975_v18  ;;  %v6242_v40 = vpop.permute.xlu1 %6241 }
 0xfc2   :  { %14975 = vmatprep.subr.bf16.mxu1 %v19975_v18 }
 0xfc5   :  { %v6436_v41 = vpop.permute.xlu1 %6435 }
 0xfc6   :  { %v6441_v23 = vsel %vm912_vm2, %v6436_v41, 0 }
 0xfc8   :  { %14966 = vmatmul.mubr.msk.bf16.vlgmr.msra.gmra.mxu1 %vm444_vm1, %v6042_v29 }
 0xfc9   :  { %14976 = vmatpush3.bf16.xpose.msra.mxu1 %v6149_v53  ;;  %14977 = vmatprep.mubr.msk.bf16.mxu1 %vm15892_vm0, %v19975_v18 }
 0xfca   :  { %14987 = vmatprep.subr.bf16.mxu1 %v19975_v18 }
 0xfd0   :  { %14978 = vmatmul.mubr.msk.bf16.vlgmr.msra.gmra.mxu1 %vm444_vm1, %v6142_v37 }
 0xfd1   :  { %14988 = vmatpush3.bf16.xpose.msra.mxu1 %v6249_v59  ;;  %14989 = vmatprep.mubr.msk.bf16.mxu1 %vm15892_vm0, %v19975_v18 }
 0xfd2   :  { %14999 = vmatprep.subr.bf16.mxu1 %v19975_v18 }
 0xfd5   :  { %v17460_v56 = vpop.f32.mrf.mxu0 }
 0xfd7   :  { %v14901_v58 = vpop.f32.mrf.mxu0 }
 0xfd8   :  { %14990 = vmatmul.mubr.msk.bf16.vlgmr.msra.gmra.mxu1 %vm444_vm1, %v6242_v40 }
 0xfd9   :  { %15000 = vmatpush3.bf16.msra.mxu1 %v6441_v23  ;;  %v5511_v38 = vpop.f32.mrf.mxu0  ;;  %15001 = vmatprep.mubr.msk.bf16.mxu1 %vm15892_vm0, %v19975_v18 }
 0xfda   :  { %15011 = vmatprep.subr.bf16.mxu1 %v19975_v18 }
 0xfdb   :  { %v14902_v31 = vpop.f32.mrf.mxu0 }
 0xfdd   :  { %v17467_v17 = vpop.f32.mrf.mxu0 }
 0xfdf   :  { %v14913_v20 = vpop.f32.mrf.mxu0 }
 0xfe1   :  { %v5607_v48 = vpop.f32.mrf.mxu0 }
 0xfe3   :  { %v14914_v50 = vpop.f32.mrf.mxu0 }
0x1006   :  { %v17469_v30 = vpop.f32.mrf.mxu1 }
0x1007   :  { %19988 = vst [vmem:[#allocation28_spill] sm:$0xff] %v17469_v30  ;;  %v6484_v30 = vpop.permute.xlu1 %6483 }
0x1008   :  { %v14907_v25 = vpop.f32.mrf.mxu1 }
0x100a   :  { %v5559_v21 = vpop.f32.mrf.mxu1 }
0x100c   :  { %v14908_v29 = vpop.f32.mrf.mxu1 }
0x100e   :  { %v17471_v15 = vpop.f32.mrf.mxu1 }
0x100f   :  { %19989 = vst [vmem:[#allocation29_spill] sm:$0xff] %v17471_v15 }
0x1010   :  { %v14919_v44 = vpop.f32.mrf.mxu1 }
0x1012   :  { %v5655_v1 = vpop.f32.mrf.mxu1  ;;  %v17473_v37 = vpop.f32.mrf.mxu0 }
0x1013   :  { %19990 = vst [vmem:[#allocation30_spill] sm:$0xff] %v17473_v37 }
0x1014   :  { %v14920_v53 = vpop.f32.mrf.mxu1  ;;  %v14925_v46 = vpop.f32.mrf.mxu0 }
0x1016   :  { %v5703_v40 = vpop.f32.mrf.mxu0 }
0x1018   :  { %v14926_v59 = vpop.f32.mrf.mxu0 }
0x1043   :  { %v17475_v41 = vpop.f32.mrf.mxu1 }
0x1044   :  { %19991 = vst [vmem:[#allocation31_spill] sm:$0xff] %v17475_v41 }
0x1045   :  { %v14931_v58 = vpop.f32.mrf.mxu1 }
0x1047   :  { %v5751_v23 = vpop.f32.mrf.mxu1  ;;  %v17477_v38 = vpop.f32.mrf.mxu0 }
0x1048   :  { %19992 = vst [vmem:[#allocation32_spill] sm:$0xff] %v17477_v38 }
0x1049   :  { %v14932_v31 = vpop.f32.mrf.mxu1  ;;  %v14937_v20 = vpop.f32.mrf.mxu0 }
0x104b   :  { %v5799_v48 = vpop.f32.mrf.mxu0 }
0x104d   :  { %v14938_v50 = vpop.f32.mrf.mxu0 }
0x104f   :  { %v5935_v25 = vpop.f32.mrf.mxu0 }
0x1050   :  { %v6291_v21 = vsel %vm444_vm1, %v5935_v25, -inf }
0x1051   :  { %6292 = vmax.xlane.f32.xlu0 %v6291_v21  ;;  %v14949_v29 = vpop.f32.mrf.mxu0 }
0x1053   :  { %v5938_v44 = vpop.f32.mrf.mxu0 }
0x1055   :  { %v14950_v1 = vpop.f32.mrf.mxu0 }
0x1057   :  { %v6035_v53 = vpop.f32.mrf.mxu0 }
0x1058   :  { %v6297_v46 = vsel %vm444_vm1, %v6035_v53, -inf }
0x1059   :  { %6298 = vmax.xlane.f32.xlu0 %v6297_v46  ;;  %v14961_v40 = vpop.f32.mrf.mxu0 }
0x105b   :  { %v6038_v59 = vpop.f32.mrf.mxu0 }
0x105d   :  { %v14962_v58 = vpop.f32.mrf.mxu0 }
0x105f   :  { %v17481_v23 = vpop.f32.mrf.mxu0 }
0x1061   :  { %v14973_v31 = vpop.f32.mrf.mxu0 }
0x1063   :  { %v6138_v20 = vpop.f32.mrf.mxu0 }
0x1065   :  { %v14974_v48 = vpop.f32.mrf.mxu0 }
0x1067   :  { %v17483_v50 = vpop.f32.mrf.mxu0 }
0x1069   :  { %v14985_v41 = vpop.f32.mrf.mxu0 }
0x106b   :  { %v6238_v38 = vpop.f32.mrf.mxu0 }
0x106c   :  { %v6303_v38 = vsel %vm444_vm1, %v17481_v23, -inf }
0x106d   :  { %v14986_v21 = vpop.f32.mrf.mxu0 }
0x1078   :  { %v17485_v29 = vpop.f32.mrf.mxu1 }
0x1079   :  { %19993 = vst [vmem:[#allocation33_spill] sm:$0xff] %v17485_v29 }
0x107a   :  { %v14943_v44 = vpop.f32.mrf.mxu1 }
0x107c   :  { %v5847_v1 = vpop.f32.mrf.mxu1 }
0x107e   :  { %v14944_v37 = vpop.f32.mrf.mxu1 }
0x107f   :  { %v6309_v37 = vsel %vm444_vm1, %v17483_v50, -inf }
0x1080   :  { %v5985_v15 = vpop.f32.mrf.mxu1 }
0x1081   :  { %v6294_v46 = vsel %vm444_vm1, %v5985_v15, -inf }
0x1082   :  { %6295 = vmax.xlane.f32.xlu1 %v6294_v46  ;;  %v14955_v40 = vpop.f32.mrf.mxu1 }
0x1084   :  { %v5988_v59 = vpop.f32.mrf.mxu1 }
0x1086   :  { %v14956_v58 = vpop.f32.mrf.mxu1 }
0x1088   :  { %v6085_v31 = vpop.f32.mrf.mxu1 }
0x1089   :  { %v6300_v20 = vsel %vm444_vm1, %v6085_v31, -inf }
0x108a   :  { %6301 = vmax.xlane.f32.xlu0 %v6300_v20  ;;  %v14967_v48 = vpop.f32.mrf.mxu1 }
0x108c   :  { %v6088_v41 = vpop.f32.mrf.mxu1 }
0x108e   :  { %6304 = vmax.xlane.f32.xlu0 %v6303_v38  ;;  %v14968_v21 = vpop.f32.mrf.mxu1 }
0x1090   :  { %v6185_v44 = vpop.f32.mrf.mxu1 }
0x1091   :  { %v6306_v1 = vsel %vm444_vm1, %v6185_v44, -inf }
0x1092   :  { %6310 = vmax.xlane.f32.xlu0 %v6309_v37  ;;  %6307 = vmax.xlane.f32.xlu1 %v6306_v1  ;;  %v14979_v46 = vpop.f32.mrf.mxu1 }
0x1094   :  { %v6188_v40 = vpop.f32.mrf.mxu1 }
0x1096   :  { %v14980_v59 = vpop.f32.mrf.mxu1 }
0x1098   :  { %v17494_v58 = vpop.f32.mrf.mxu1 }
0x1099   :  { %v6312_v38 = vsel %vm444_vm1, %v17494_v58, -inf }
0x109a   :  { %v14991_v20 = vpop.f32.mrf.mxu1 }
0x109c   :  { %v6288_v48 = vpop.f32.mrf.mxu1 }
0x109e   :  { %v14992_v41 = vpop.f32.mrf.mxu1 }
0x10a3   :  { %6627 = vrot.lane.b32.xlu1 %v16364_v33, %s15898_s26 }
0x10a8   :  { %6579 = vrot.lane.b32.xlu0 %v16344_v6, %s15898_s26 }
0x10c7   :  { %6313 = vmax.xlane.f32.xlu1 %v6312_v38  ;;  %v17507_v38 = vpop.permute.xlu1 %6531 }
0x10da   :  { %v6293_v21 = vpop.xlane.xlu0 %6292 }
0x10db   :  { %v6315_v37 = vsub.f32 %v5935_v25, %v6293_v21 }
0x10dd   :  { %v6323_v1 = vmul.f32 1.442695, %v6315_v37 }
0x10df   :  { %15722 = vpow2.f32 %v6323_v1 }
0x10e2   :  { %v6299_v46 = vpop.xlane.xlu0 %6298 }
0x10e3   :  { %v6317_v40 = vsub.f32 %v6035_v53, %v6299_v46 }
0x10e5   :  { %v6327_v59 = vmul.f32 1.442695, %v6317_v40 }
0x10e7   :  { %15724 = vpow2.f32 %v6327_v59 }
0x10ec   :  { %v15723_v20 = vpop.eup %15722 }
0x10ed   :  { %v6339_v48 = vsel %vm444_vm1, %v15723_v20, 0.0 }
0x10ee   :  { %6340 = vadd.xlane.f32.xlu0 %v6339_v48 }
0x10f4   :  { %v17503_v41 = vpop.eup %15724 }
0x10f5   :  { %v6345_v29 = vsel %vm444_vm1, %v17503_v41, 0.0 }
0x10f6   :  { %6346 = vadd.xlane.f32.xlu0 %v6345_v29 }
0x110b   :  { %v6296_v25 = vpop.xlane.xlu1 %6295 }
0x110c   :  { %v6316_v21 = vsub.f32 %v5985_v15, %v6296_v25 }
0x110e   :  { %v6325_v37 = vmul.f32 1.442695, %v6316_v21 }
0x1110   :  { %15726 = vpow2.f32 %v6325_v37 }
0x1113   :  { %v6302_v53 = vpop.xlane.xlu0 %6301 }
0x1114   :  { %v6318_v1 = vsub.f32 %v6085_v31, %v6302_v53 }
0x1116   :  { %v6329_v46 = vmul.f32 1.442695, %v6318_v1 }
0x1117   :  { %v6305_v40 = vpop.xlane.xlu0 %6304 }
0x1118   :  { %15728 = vpow2.f32 %v6329_v46  ;;  %v6319_v59 = vsub.f32 %v17481_v23, %v6305_v40 }
0x111a   :  { %v6331_v48 = vmul.f32 1.442695, %v6319_v59 }
0x111b   :  { %v6308_v23 = vpop.xlane.xlu1 %6307  ;;  %v6311_v37 = vpop.xlane.xlu0 %6310 }
0x111c   :  { %15730 = vpow2.f32 %v6331_v48  ;;  %v6320_v21 = vsub.f32 %v6185_v44, %v6308_v23  ;;  %v6321_v53 = vsub.f32 %v17483_v50, %v6311_v37 }
0x111d   :  { %v17510_v2 = vpop.eup %15726 }
0x111e   :  { %v6342_v29 = vsel %vm444_vm1, %v17510_v2, 0.0  ;;  %v6333_v1 = vmul.f32 1.442695, %v6320_v21  ;;  %v6335_v46 = vmul.f32 1.442695, %v6321_v53 }
0x111f   :  { %6343 = vadd.xlane.f32.xlu1 %v6342_v29  ;;  %v17537_v50 = vpop.permute.xlu1 %6627  ;;  %v6580_v44 = vpop.permute.xlu0 %6579 }
0x1120   :  { %15732 = vpow2.f32 %v6333_v1 }
0x1121   :  { %15734 = vpow2.f32 %v6335_v46  ;;  %v6489_v46 = vsel %vm912_vm2, %v6484_v30, 0 }
0x1125   :  { %v17514_v24 = vpop.eup %15728 }
0x1126   :  { %v6348_v15 = vsel %vm444_vm1, %v17514_v24, 0.0 }
0x1127   :  { %6349 = vadd.xlane.f32.xlu1 %v6348_v15 }
0x1129   :  { %v17518_v31 = vpop.eup %15730 }
0x112a   :  { %v6351_v25 = vsel %vm444_vm1, %v17518_v31, 0.0 }
0x112b   :  { %6352 = vadd.xlane.f32.xlu0 %v6351_v25 }
0x112d   :  { %v17527_v40 = vpop.eup %15732 }
0x112e   :  { %v6354_v59 = vsel %vm444_vm1, %v17527_v40, 0.0  ;;  %v17531_v48 = vpop.eup %15734 }
0x112f   :  { %v6357_v29 = vsel %vm444_vm1, %v17531_v48, 0.0 }
0x1138   :  { %6723 = vrot.lane.b32.xlu1 %v16400_v12, %s15898_s26 }
0x1141   :  { %6675 = vrot.lane.b32.xlu0 %v16362_v3, %s15898_s26 }
0x1150   :  { %v6314_v15 = vpop.xlane.xlu1 %6313 }
0x1151   :  { %v6322_v25 = vsub.f32 %v17494_v58, %v6314_v15 }
0x1153   :  { %v6337_v21 = vmul.f32 1.442695, %v6322_v25  ;;  %v6585_v25 = vsel %vm912_vm2, %v6580_v44, 0 }
0x115c   :  { %6355 = vadd.xlane.f32.xlu1 %v6354_v59 }
0x1160   :  { %6358 = vadd.xlane.f32.xlu0 %v6357_v29 }
0x116d   :  { %6864 = vrot.lane.b32.xlu1 %v16113_v57, %s15899_s27 }
0x1176   :  { %6814 = vrot.lane.b32.xlu0 %v16103_v49, %s15899_s27 }
0x1177   :  { %v6341_v23 = vpop.xlane.xlu0 %6340 }
0x1178   :  { %15736 = vrcp.f32 %v6341_v23 }
0x1179   :  { %15738 = vpow2.f32 %v6337_v21 }
0x117a   :  { %6812 = vrot.lane.b32.xlu0 %v16118_v60, %s15899_s27 }
0x117e   :  { %6914 = vrot.lane.b32.xlu0 %v16132_v8, %s15899_s27 }
0x117f   :  { %v6347_v37 = vpop.xlane.xlu0 %6346 }
0x1180   :  { %15740 = vrcp.f32 %v6347_v37 }
0x1182   :  { %6912 = vrot.lane.b32.xlu0 %v16171_v32, %s15899_s27 }
0x1185   :  { %v15737_v53 = vpop.eup %15736 }
0x1186   :  { %v6371_v1 = vmul.f32 %v15737_v53, %v15723_v20  ;;  %7014 = vrot.lane.b32.xlu0 %v16142_v14, %s15899_s27  ;;  %v17556_v59 = vpop.eup %15738 }
0x1187   :  { %v6360_v15 = vsel %vm444_vm1, %v17556_v59, 0.0 }
0x1188   :  { %v6379_v58 = vpack.c.bf16 %v6371_v1, %v6371_v1  ;;  %v6537_v1 = vsel %vm912_vm2, %v17507_v38, 0  ;;  %v6633_v38 = vsel %vm912_vm2, %v17537_v50, 0 }
0x118a   :  { %7012 = vrot.lane.b32.xlu0 %v16165_v28, %s15899_s27  ;;  %14996 = vmatmul.mubr.msk.bf16.vlgmr.msra.gmra.mxu0 %vm444_vm1, %v6379_v58 }
0x118b   :  { %15006 = vmatpush3.bf16.msra.mxu0 %v6489_v46  ;;  %15007 = vmatprep.mubr.msk.bf16.mxu0 %vm15892_vm0, %v19975_v18 }
0x118c   :  { %15017 = vmatprep.subr.bf16.mxu0 %v19975_v18 }
0x118d   :  { %v15741_v20 = vpop.eup %15740 }
0x118e   :  { %v6373_v29 = vmul.f32 %v15741_v20, %v17503_v41  ;;  %7114 = vrot.lane.b32.xlu0 %v16174_v34, %s15899_s27 }
0x1190   :  { %v6381_v30 = vpack.c.bf16 %v6373_v29, %v6373_v29 }
0x1191   :  { %6361 = vadd.xlane.f32.xlu1 %v6360_v15 }
0x1192   :  { %7112 = vrot.lane.b32.xlu0 %v16197_v52, %s15899_s27  ;;  %15008 = vmatmul.mubr.msk.bf16.vlgmr.msra.gmra.mxu0 %vm444_vm1, %v6381_v30 }
0x1193   :  { %15018 = vmatpush3.bf16.msra.mxu0 %v6585_v25  ;;  %15019 = vmatprep.mubr.msk.bf16.mxu0 %vm15892_vm0, %v19975_v18 }
0x1194   :  { %15029 = vmatprep.subr.bf16.mxu0 %v19975_v18 }
0x1196   :  { %7308 = vrot.lane.b32.xlu0 %v16194_v51, %s15899_s27 }
0x11a2   :  { %6862 = vrot.lane.b32.xlu1 %v16140_v13, %s15899_s27 }
0x11a6   :  { %6964 = vrot.lane.b32.xlu1 %v16163_v27, %s15899_s27 }
0x11a8   :  { %v6344_v41 = vpop.xlane.xlu1 %6343 }
0x11a9   :  { %15742 = vrcp.f32 %v6344_v41 }
0x11aa   :  { %6962 = vrot.lane.b32.xlu1 %v16199_v54, %s15899_s27 }
0x11ae   :  { %7064 = vrot.lane.b32.xlu1 %v16187_v47, %s15899_s27 }
0x11b0   :  { %v6350_v44 = vpop.xlane.xlu1 %6349 }
0x11b1   :  { %15744 = vrcp.f32 %v6350_v44 }
0x11b2   :  { %7062 = vrot.lane.b32.xlu1 %v16219_v42, %s15899_s27 }
0x11b4   :  { %v6353_v23 = vpop.xlane.xlu0 %6352 }
0x11b5   :  { %15746 = vrcp.f32 %v6353_v23 }
0x11b6   :  { %v15743_v21 = vpop.eup %15742  ;;  %7164 = vrot.lane.b32.xlu1 %v16213_v62, %s15899_s27 }
0x11b7   :  { %v6372_v37 = vmul.f32 %v15743_v21, %v17510_v2 }
0x11b8   :  { %v6676_v30 = vpop.permute.xlu0 %6675 }
0x11b9   :  { %v6380_v53 = vpack.c.bf16 %v6372_v37, %v6372_v37 }
0x11ba   :  { %7162 = vrot.lane.b32.xlu1 %v16233_v5, %s15899_s27 }
0x11bb   :  { %15002 = vmatmul.mubr.msk.bf16.vlgmr.msra.gmra.mxu1 %vm444_vm1, %v6380_v53 }
0x11bc   :  { %15012 = vmatpush3.bf16.msra.mxu1 %v6537_v1  ;;  %15013 = vmatprep.mubr.msk.bf16.mxu1 %vm15892_vm0, %v19975_v18 }
0x11bd   :  { %15023 = vmatprep.subr.bf16.mxu1 %v19975_v18 }
0x11be   :  { %v15745_v58 = vpop.eup %15744  ;;  %7356 = vrot.lane.b32.xlu1 %v16230_v4, %s15899_s27 }
0x11bf   :  { %v6374_v2 = vmul.f32 %v15745_v58, %v17514_v24  ;;  %v6681_v24 = vsel %vm912_vm2, %v6676_v30, 0 }
0x11c1   :  { %v6382_v46 = vpack.c.bf16 %v6374_v2, %v6374_v2 }
0x11c2   :  { %v15747_v20 = vpop.eup %15746  ;;  %7404 = vrot.lane.b32.xlu1 %v16312_v61, %s15899_s27 }
0x11c3   :  { %v6375_v29 = vmul.f32 %v15747_v20, %v17518_v31  ;;  %15014 = vmatmul.mubr.msk.bf16.vlgmr.msra.gmra.mxu1 %vm444_vm1, %v6382_v46  ;;  %v6724_v31 = vpop.permute.xlu1 %6723 }
0x11c4   :  { %15024 = vmatpush3.bf16.msra.mxu1 %v6633_v38  ;;  %15025 = vmatprep.mubr.msk.bf16.mxu1 %vm15892_vm0, %v19975_v18  ;;  %v6729_v58 = vsel %vm912_vm2, %v6724_v31, 0 }
0x11c5   :  { %v6383_v15 = vpack.c.bf16 %v6375_v29, %v6375_v29  ;;  %15035 = vmatprep.subr.bf16.mxu1 %v19975_v18 }
0x11c6   :  { %7452 = vrot.lane.b32.xlu1 %v16327_v55, %s15899_s27 }
0x11c7   :  { %15020 = vmatmul.mubr.msk.bf16.vlgmr.msra.gmra.mxu0 %vm444_vm1, %v6383_v15 }
0x11c8   :  { %15030 = vmatpush3.bf16.msra.mxu0 %v6681_v24  ;;  %15031 = vmatprep.mubr.msk.bf16.mxu0 %vm15892_vm0, %v19975_v18 }
0x11c9   :  { %15041 = vmatprep.subr.bf16.mxu0 %v19975_v18 }
0x11e5   :  { %v6356_v50 = vpop.xlane.xlu1 %6355 }
0x11e6   :  { %15748 = vrcp.f32 %v6356_v50 }
0x11e9   :  { %v6359_v25 = vpop.xlane.xlu0 %6358  ;;  %v6865_v50 = vpop.permute.xlu1 %6864 }
0x11ea   :  { %15750 = vrcp.f32 %v6359_v25 }
0x11ed   :  { %v6815_v41 = vpop.permute.xlu0 %6814 }
0x11ee   :  { %v6820_v38 = vsel %vm444_vm1, %v6815_v41, 0 }
0x11f1   :  { %v6813_v44 = vpop.permute.xlu0 %6812 }
0x11f3   :  { %v15749_v23 = vpop.eup %15748 }
0x11f4   :  { %v6376_v21 = vmul.f32 %v15749_v23, %v17527_v40 }
0x11f5   :  { %v6915_v37 = vpop.permute.xlu0 %6914 }
0x11f6   :  { %v6384_v53 = vpack.c.bf16 %v6376_v21, %v6376_v21 }
0x11f7   :  { %v15751_v1 = vpop.eup %15750 }
0x11f8   :  { %v6377_v2 = vmul.f32 %v15751_v1, %v17531_v48  ;;  %15026 = vmatmul.mubr.msk.bf16.vlgmr.msra.gmra.mxu1 %vm444_vm1, %v6384_v53  ;;  %v6920_v48 = vsel %vm444_vm1, %v6915_v37, 0 }
0x11f9   :  { %15036 = vmatpush3.bf16.msra.mxu1 %v6729_v58  ;;  %15037 = vmatprep.mubr.msk.bf16.mxu1 %vm15892_vm0, %v19975_v18  ;;  %v6913_v20 = vpop.permute.xlu0 %6912 }
0x11fa   :  { %v6385_v46 = vpack.c.bf16 %v6377_v2, %v6377_v2  ;;  %15047 = vmatprep.subr.bf16.mxu1 %v19975_v18  ;;  %v6870_v2 = vsel %vm444_vm1, %v6865_v50, 0 }
0x11fc   :  { %15032 = vmatmul.mubr.msk.bf16.vlgmr.msra.gmra.mxu0 %vm444_vm1, %v6385_v46 }
0x11fd   :  { %15042 = vmatpush3.bf16.xpose.msra.mxu0 %v6820_v38  ;;  %15043 = vmatprep.mubr.msk.bf16.mxu0 %vm15892_vm0, %v19975_v18  ;;  %v7015_v40 = vpop.permute.xlu0 %7014 }
0x11fe   :  { %15053 = vmatprep.subr.bf16.mxu0 %v19975_v18  ;;  %v7020_v30 = vsel %vm444_vm1, %v7015_v40, 0 }
0x1201   :  { %v7013_v29 = vpop.permute.xlu0 %7012 }
0x1204   :  { %15044 = vmatmul.mubr.msk.bf16.vlgmr.msra.gmra.mxu0 %vm444_vm1, %v6813_v44 }
0x1205   :  { %15054 = vmatpush3.bf16.xpose.msra.mxu0 %v6920_v48  ;;  %15055 = vmatprep.mubr.msk.bf16.mxu0 %vm15892_vm0, %v19975_v18  ;;  %v7115_v15 = vpop.permute.xlu0 %7114 }
0x1206   :  { %15065 = vmatprep.subr.bf16.mxu0 %v19975_v18  ;;  %v7120_v31 = vsel %vm444_vm1, %v7115_v15, 0 }
0x1209   :  { %v7113_v24 = vpop.permute.xlu0 %7112 }
0x120c   :  { %15056 = vmatmul.mubr.msk.bf16.vlgmr.msra.gmra.mxu0 %vm444_vm1, %v6913_v20 }
0x120d   :  { %15066 = vmatpush3.bf16.xpose.msra.mxu0 %v7020_v30  ;;  %15067 = vmatprep.mubr.msk.bf16.mxu0 %vm15892_vm0, %v19975_v18  ;;  %v7309_v25 = vpop.permute.xlu0 %7308 }
0x120e   :  { %15077 = vmatprep.subr.bf16.mxu0 %v19975_v18  ;;  %v7314_v44 = vsel %vm912_vm2, %v7309_v25, 0 }
0x1214   :  { %15068 = vmatmul.mubr.msk.bf16.vlgmr.msra.gmra.mxu0 %vm444_vm1, %v7013_v29 }
0x1215   :  { %15078 = vmatpush3.bf16.xpose.msra.mxu0 %v7120_v31  ;;  %15079 = vmatprep.mubr.msk.bf16.mxu0 %vm15892_vm0, %v19975_v18 }
0x1216   :  { %15089 = vmatprep.subr.bf16.mxu0 %v19975_v18 }
0x121a   :  { %v6362_v41 = vpop.xlane.xlu1 %6361 }
0x121b   :  { %15752 = vrcp.f32 %v6362_v41 }
0x121c   :  { %15080 = vmatmul.mubr.msk.bf16.vlgmr.msra.gmra.mxu0 %vm444_vm1, %v7113_v24 }
0x121d   :  { %15090 = vmatpush3.bf16.msra.mxu0 %v7314_v44  ;;  %15091 = vmatprep.mubr.msk.bf16.mxu0 %vm15892_vm0, %v19975_v18 }
0x121e   :  { %15101 = vmatprep.subr.bf16.mxu0 %v19975_v18  ;;  %v6863_v23 = vpop.permute.xlu1 %6862 }
0x1222   :  { %v6965_v21 = vpop.permute.xlu1 %6964 }
0x1223   :  { %v6970_v20 = vsel %vm444_vm1, %v6965_v21, 0 }
0x1226   :  { %v6963_v58 = vpop.permute.xlu1 %6962 }
0x1228   :  { %v15753_v37 = vpop.eup %15752 }
0x1229   :  { %v6378_v53 = vmul.f32 %v15753_v37, %v17556_v59 }
0x122a   :  { %v7065_v46 = vpop.permute.xlu1 %7064 }
0x122b   :  { %v6386_v1 = vpack.c.bf16 %v6378_v53, %v6378_v53  ;;  %v7070_v38 = vsel %vm444_vm1, %v7065_v46, 0 }
0x122d   :  { %15038 = vmatmul.mubr.msk.bf16.vlgmr.msra.gmra.mxu1 %vm444_vm1, %v6386_v1 }
0x122e   :  { %15048 = vmatpush3.bf16.xpose.msra.mxu1 %v6870_v2  ;;  %15049 = vmatprep.mubr.msk.bf16.mxu1 %vm15892_vm0, %v19975_v18  ;;  %v7063_v59 = vpop.permute.xlu1 %7062 }
0x122f   :  { %15059 = vmatprep.subr.bf16.mxu1 %v19975_v18 }
0x1232   :  { %v7165_v40 = vpop.permute.xlu1 %7164 }
0x1233   :  { %v7170_v29 = vsel %vm444_vm1, %v7165_v40, 0 }
0x1235   :  { %15050 = vmatmul.mubr.msk.bf16.vlgmr.msra.gmra.mxu1 %vm444_vm1, %v6863_v23 }
0x1236   :  { %15060 = vmatpush3.bf16.xpose.msra.mxu1 %v6970_v20  ;;  %15061 = vmatprep.mubr.msk.bf16.mxu1 %vm15892_vm0, %v19975_v18  ;;  %v7163_v48 = vpop.permute.xlu1 %7162 }
0x1237   :  { %15071 = vmatprep.subr.bf16.mxu1 %v19975_v18 }
0x123a   :  { %v7357_v30 = vpop.permute.xlu1 %7356 }
0x123b   :  { %v7362_v31 = vsel %vm912_vm2, %v7357_v30, 0 }
0x123d   :  { %15062 = vmatmul.mubr.msk.bf16.vlgmr.msra.gmra.mxu1 %vm444_vm1, %v6963_v58 }
0x123e   :  { %15072 = vmatpush3.bf16.xpose.msra.mxu1 %v7070_v38  ;;  %15073 = vmatprep.mubr.msk.bf16.mxu1 %vm15892_vm0, %v19975_v18 }
0x123f   :  { %15083 = vmatprep.subr.bf16.mxu1 %v19975_v18 }
0x1245   :  { %15074 = vmatmul.mubr.msk.bf16.vlgmr.msra.gmra.mxu1 %vm444_vm1, %v7063_v59 }
0x1246   :  { %15084 = vmatpush3.bf16.xpose.msra.mxu1 %v7170_v29  ;;  %15085 = vmatprep.mubr.msk.bf16.mxu1 %vm15892_vm0, %v19975_v18 }
0x1247   :  { %15095 = vmatprep.subr.bf16.mxu1 %v19975_v18 }
0x124a   :  { %v17666_v15 = vpop.f32.mrf.mxu0 }
0x124c   :  { %v14997_v24 = vpop.f32.mrf.mxu0 }
0x124d   :  { %15086 = vmatmul.mubr.msk.bf16.vlgmr.msra.gmra.mxu1 %vm444_vm1, %v7163_v48 }
0x124e   :  { %15096 = vmatpush3.bf16.msra.mxu1 %v7362_v31  ;;  %v6432_v50 = vpop.f32.mrf.mxu0  ;;  %15097 = vmatprep.mubr.msk.bf16.mxu1 %vm15892_vm0, %v19975_v18 }
0x124f   :  { %15107 = vmatprep.subr.bf16.mxu1 %v19975_v18 }
0x1250   :  { %v14998_v25 = vpop.f32.mrf.mxu0 }
0x1252   :  { %v17673_v41 = vpop.f32.mrf.mxu0 }
0x1254   :  { %v15009_v44 = vpop.f32.mrf.mxu0 }
0x1256   :  { %v6528_v23 = vpop.f32.mrf.mxu0 }
0x1258   :  { %v15010_v21 = vpop.f32.mrf.mxu0 }
0x127b   :  { %v17675_v37 = vpop.f32.mrf.mxu1 }
0x127c   :  { %19994 = vst [vmem:[#allocation34_spill] sm:$0xff] %v17675_v37  ;;  %v7405_v37 = vpop.permute.xlu1 %7404 }
0x127d   :  { %v15003_v53 = vpop.f32.mrf.mxu1 }
0x127f   :  { %v6480_v1 = vpop.f32.mrf.mxu1 }
0x1281   :  { %v15004_v58 = vpop.f32.mrf.mxu1 }
0x1283   :  { %v17677_v2 = vpop.f32.mrf.mxu1 }
0x1284   :  { %19995 = vst [vmem:[#allocation35_spill] sm:$0xff] %v17677_v2 }
0x1285   :  { %v15015_v46 = vpop.f32.mrf.mxu1 }
0x1287   :  { %v6576_v20 = vpop.f32.mrf.mxu1  ;;  %v17679_v59 = vpop.f32.mrf.mxu0 }
0x1288   :  { %19996 = vst [vmem:[#allocation36_spill] sm:$0xff] %v17679_v59 }
0x1289   :  { %v15016_v38 = vpop.f32.mrf.mxu1  ;;  %v15021_v40 = vpop.f32.mrf.mxu0 }
0x128b   :  { %v6624_v48 = vpop.f32.mrf.mxu0 }
0x128d   :  { %v15022_v29 = vpop.f32.mrf.mxu0 }
0x12b8   :  { %v17681_v30 = vpop.f32.mrf.mxu1 }
0x12b9   :  { %19997 = vst [vmem:[#allocation37_spill] sm:$0xff] %v17681_v30 }
0x12ba   :  { %v15027_v24 = vpop.f32.mrf.mxu1 }
0x12bc   :  { %v6672_v31 = vpop.f32.mrf.mxu1  ;;  %v17683_v50 = vpop.f32.mrf.mxu0 }
0x12bd   :  { %19998 = vst [vmem:[#allocation38_spill] sm:$0xff] %v17683_v50 }
0x12be   :  { %v15028_v25 = vpop.f32.mrf.mxu1  ;;  %v15033_v44 = vpop.f32.mrf.mxu0 }
0x12c0   :  { %v6720_v23 = vpop.f32.mrf.mxu0 }
0x12c2   :  { %v15034_v21 = vpop.f32.mrf.mxu0 }
0x12c4   :  { %v6856_v53 = vpop.f32.mrf.mxu0 }
0x12c5   :  { %v7212_v1 = vsel %vm444_vm1, %v6856_v53, -inf }
0x12c6   :  { %7213 = vmax.xlane.f32.xlu0 %v7212_v1  ;;  %v15045_v58 = vpop.f32.mrf.mxu0 }
0x12c8   :  { %v6859_v46 = vpop.f32.mrf.mxu0 }
0x12ca   :  { %v15046_v20 = vpop.f32.mrf.mxu0 }
0x12cc   :  { %v6956_v38 = vpop.f32.mrf.mxu0 }
0x12cd   :  { %v7218_v40 = vsel %vm444_vm1, %v6956_v38, -inf }
0x12ce   :  { %7219 = vmax.xlane.f32.xlu0 %v7218_v40  ;;  %v15057_v48 = vpop.f32.mrf.mxu0 }
0x12d0   :  { %v6959_v29 = vpop.f32.mrf.mxu0 }
0x12d2   :  { %v15058_v24 = vpop.f32.mrf.mxu0 }
0x12d4   :  { %v17687_v31 = vpop.f32.mrf.mxu0 }
0x12d6   :  { %v15069_v25 = vpop.f32.mrf.mxu0 }
0x12d8   :  { %v7059_v44 = vpop.f32.mrf.mxu0 }
0x12da   :  { %v15070_v23 = vpop.f32.mrf.mxu0 }
0x12dc   :  { %v17689_v21 = vpop.f32.mrf.mxu0 }
0x12de   :  { %v15081_v30 = vpop.f32.mrf.mxu0 }
0x12e0   :  { %v7159_v50 = vpop.f32.mrf.mxu0 }
0x12e1   :  { %v7224_v50 = vsel %vm444_vm1, %v17687_v31, -inf }
0x12e2   :  { %v15082_v1 = vpop.f32.mrf.mxu0 }
0x12ed   :  { %v17691_v58 = vpop.f32.mrf.mxu1 }
0x12ee   :  { %19999 = vst [vmem:[#allocation39_spill] sm:$0xff] %v17691_v58 }
0x12ef   :  { %v15039_v46 = vpop.f32.mrf.mxu1 }
0x12f1   :  { %v6768_v20 = vpop.f32.mrf.mxu1 }
0x12f3   :  { %v15040_v59 = vpop.f32.mrf.mxu1 }
0x12f4   :  { %v7230_v59 = vsel %vm444_vm1, %v17689_v21, -inf }
0x12f5   :  { %v6906_v2 = vpop.f32.mrf.mxu1 }
0x12f6   :  { %v7215_v40 = vsel %vm444_vm1, %v6906_v2, -inf }
0x12f7   :  { %7216 = vmax.xlane.f32.xlu1 %v7215_v40  ;;  %v15051_v48 = vpop.f32.mrf.mxu1 }
0x12f9   :  { %v6909_v29 = vpop.f32.mrf.mxu1 }
0x12fb   :  { %v15052_v24 = vpop.f32.mrf.mxu1 }
0x12fd   :  { %v7006_v25 = vpop.f32.mrf.mxu1 }
0x12fe   :  { %v7221_v44 = vsel %vm444_vm1, %v7006_v25, -inf }
0x12ff   :  { %7222 = vmax.xlane.f32.xlu0 %v7221_v44  ;;  %v15063_v23 = vpop.f32.mrf.mxu1 }
0x1301   :  { %v7009_v30 = vpop.f32.mrf.mxu1 }
0x1303   :  { %7225 = vmax.xlane.f32.xlu0 %v7224_v50  ;;  %v15064_v1 = vpop.f32.mrf.mxu1 }
0x1305   :  { %v7106_v46 = vpop.f32.mrf.mxu1 }
0x1306   :  { %v7227_v20 = vsel %vm444_vm1, %v7106_v46, -inf }
0x1307   :  { %7231 = vmax.xlane.f32.xlu0 %v7230_v59  ;;  %7228 = vmax.xlane.f32.xlu1 %v7227_v20  ;;  %v15075_v40 = vpop.f32.mrf.mxu1 }
0x1309   :  { %v7109_v48 = vpop.f32.mrf.mxu1 }
0x130b   :  { %v15076_v29 = vpop.f32.mrf.mxu1 }
0x130d   :  { %v17700_v24 = vpop.f32.mrf.mxu1 }
0x130e   :  { %v7233_v50 = vsel %vm444_vm1, %v17700_v24, -inf }
0x130f   :  { %v15087_v44 = vpop.f32.mrf.mxu1 }
0x1311   :  { %v7209_v23 = vpop.f32.mrf.mxu1 }
0x1313   :  { %v15088_v30 = vpop.f32.mrf.mxu1 }
0x1318   :  { %7548 = vrot.lane.b32.xlu1 %v16364_v33, %s15899_s27 }
0x131d   :  { %7500 = vrot.lane.b32.xlu0 %v16344_v6, %s15899_s27 }
0x133c   :  { %7234 = vmax.xlane.f32.xlu1 %v7233_v50  ;;  %v17713_v50 = vpop.permute.xlu1 %7452 }
0x134f   :  { %v7214_v1 = vpop.xlane.xlu0 %7213 }
0x1350   :  { %v7236_v59 = vsub.f32 %v6856_v53, %v7214_v1 }
0x1352   :  { %v7244_v20 = vmul.f32 1.442695, %v7236_v59 }
0x1354   :  { %15754 = vpow2.f32 %v7244_v20 }
0x1357   :  { %v7220_v40 = vpop.xlane.xlu0 %7219 }
0x1358   :  { %v7238_v48 = vsub.f32 %v6956_v38, %v7220_v40 }
0x135a   :  { %v7248_v29 = vmul.f32 1.442695, %v7238_v48 }
0x135c   :  { %15756 = vpow2.f32 %v7248_v29 }
0x1361   :  { %v15755_v44 = vpop.eup %15754 }
0x1362   :  { %v7260_v23 = vsel %vm444_vm1, %v15755_v44, 0.0 }
0x1363   :  { %7261 = vadd.xlane.f32.xlu0 %v7260_v23 }
0x1369   :  { %v17709_v30 = vpop.eup %15756 }
0x136a   :  { %v7266_v58 = vsel %vm444_vm1, %v17709_v30, 0.0 }
0x136b   :  { %7267 = vadd.xlane.f32.xlu0 %v7266_v58 }
0x1380   :  { %v7217_v53 = vpop.xlane.xlu1 %7216 }
0x1381   :  { %v7237_v1 = vsub.f32 %v6906_v2, %v7217_v53 }
0x1383   :  { %v7246_v59 = vmul.f32 1.442695, %v7237_v1 }
0x1385   :  { %15758 = vpow2.f32 %v7246_v59 }
0x1388   :  { %v7223_v38 = vpop.xlane.xlu0 %7222 }
0x1389   :  { %v7239_v20 = vsub.f32 %v7006_v25, %v7223_v38 }
0x138b   :  { %v7250_v40 = vmul.f32 1.442695, %v7239_v20 }
0x138c   :  { %v7226_v48 = vpop.xlane.xlu0 %7225 }
0x138d   :  { %15760 = vpow2.f32 %v7250_v40  ;;  %v7240_v29 = vsub.f32 %v17687_v31, %v7226_v48 }
0x138f   :  { %v7252_v23 = vmul.f32 1.442695, %v7240_v29 }
0x1390   :  { %v7229_v31 = vpop.xlane.xlu1 %7228  ;;  %v7232_v59 = vpop.xlane.xlu0 %7231 }
0x1391   :  { %15762 = vpow2.f32 %v7252_v23  ;;  %v7241_v1 = vsub.f32 %v7106_v46, %v7229_v31  ;;  %v7242_v38 = vsub.f32 %v17689_v21, %v7232_v59 }
0x1392   :  { %v17716_v0 = vpop.eup %15758 }
0x1393   :  { %v7263_v58 = vsel %vm444_vm1, %v17716_v0, 0.0  ;;  %v7254_v20 = vmul.f32 1.442695, %v7241_v1  ;;  %v7256_v40 = vmul.f32 1.442695, %v7242_v38 }
0x1394   :  { %7264 = vadd.xlane.f32.xlu1 %v7263_v58  ;;  %v17743_v21 = vpop.permute.xlu1 %7548  ;;  %v7501_v46 = vpop.permute.xlu0 %7500 }
0x1395   :  { %15764 = vpow2.f32 %v7254_v20 }
0x1396   :  { %15766 = vpow2.f32 %v7256_v40  ;;  %v7410_v40 = vsel %vm912_vm2, %v7405_v37, 0 }
0x139a   :  { %v17720_v35 = vpop.eup %15760 }
0x139b   :  { %v7269_v2 = vsel %vm444_vm1, %v17720_v35, 0.0 }
0x139c   :  { %7270 = vadd.xlane.f32.xlu1 %v7269_v2 }
0x139e   :  { %v17724_v25 = vpop.eup %15762 }
0x139f   :  { %v7272_v53 = vsel %vm444_vm1, %v17724_v25, 0.0 }
0x13a0   :  { %7273 = vadd.xlane.f32.xlu0 %v7272_v53 }
0x13a2   :  { %v17733_v48 = vpop.eup %15764 }
0x13a3   :  { %v7275_v29 = vsel %vm444_vm1, %v17733_v48, 0.0  ;;  %v17737_v23 = vpop.eup %15766 }
0x13a4   :  { %v7278_v58 = vsel %vm444_vm1, %v17737_v23, 0.0 }
0x13ad   :  { %7644 = vrot.lane.b32.xlu1 %v16400_v12, %s15899_s27 }
0x13b6   :  { %7596 = vrot.lane.b32.xlu0 %v16362_v3, %s15899_s27 }
0x13c5   :  { %v7235_v2 = vpop.xlane.xlu1 %7234 }
0x13c6   :  { %v7243_v53 = vsub.f32 %v17700_v24, %v7235_v2 }
0x13c8   :  { %v7258_v1 = vmul.f32 1.442695, %v7243_v53  ;;  %v7506_v53 = vsel %vm912_vm2, %v7501_v46, 0 }
0x13d1   :  { %7276 = vadd.xlane.f32.xlu1 %v7275_v29 }
0x13d5   :  { %7279 = vadd.xlane.f32.xlu0 %v7278_v58 }
0x13e2   :  { %7785 = vrot.lane.b32.xlu1 %v16113_v57, %s15900_s28 }
0x13eb   :  { %7735 = vrot.lane.b32.xlu0 %v16103_v49, %s15900_s28 }
0x13ec   :  { %v7262_v31 = vpop.xlane.xlu0 %7261 }
0x13ed   :  { %15768 = vrcp.f32 %v7262_v31 }
0x13ee   :  { %15770 = vpow2.f32 %v7258_v1 }
0x13ef   :  { %7733 = vrot.lane.b32.xlu0 %v16118_v60, %s15900_s28 }
0x13f3   :  { %7835 = vrot.lane.b32.xlu0 %v16132_v8, %s15900_s28 }
0x13f4   :  { %v7268_v59 = vpop.xlane.xlu0 %7267 }
0x13f5   :  { %15772 = vrcp.f32 %v7268_v59 }
0x13f7   :  { %7833 = vrot.lane.b32.xlu0 %v16171_v32, %s15900_s28 }
0x13fa   :  { %v15769_v38 = vpop.eup %15768 }
0x13fb   :  { %v7292_v20 = vmul.f32 %v15769_v38, %v15755_v44  ;;  %7935 = vrot.lane.b32.xlu0 %v16142_v14, %s15900_s28  ;;  %v17762_v29 = vpop.eup %15770 }
0x13fc   :  { %v7281_v2 = vsel %vm444_vm1, %v17762_v29, 0.0 }
0x13fd   :  { %v7300_v24 = vpack.c.bf16 %v7292_v20, %v7292_v20  ;;  %v7458_v20 = vsel %vm912_vm2, %v17713_v50, 0  ;;  %v7554_v50 = vsel %vm912_vm2, %v17743_v21, 0 }
0x13ff   :  { %7933 = vrot.lane.b32.xlu0 %v16165_v28, %s15900_s28  ;;  %15092 = vmatmul.mubr.msk.bf16.vlgmr.msra.gmra.mxu0 %vm444_vm1, %v7300_v24 }
0x1400   :  { %15102 = vmatpush3.bf16.msra.mxu0 %v7410_v40  ;;  %15103 = vmatprep.mubr.msk.bf16.mxu0 %vm15892_vm0, %v19975_v18 }
0x1401   :  { %15113 = vmatprep.subr.bf16.mxu0 %v19975_v18 }
0x1402   :  { %v15773_v44 = vpop.eup %15772 }
0x1403   :  { %v7294_v58 = vmul.f32 %v15773_v44, %v17709_v30  ;;  %8035 = vrot.lane.b32.xlu0 %v16174_v34, %s15900_s28 }
0x1405   :  { %v7302_v37 = vpack.c.bf16 %v7294_v58, %v7294_v58 }
0x1406   :  { %7282 = vadd.xlane.f32.xlu1 %v7281_v2 }
0x1407   :  { %8033 = vrot.lane.b32.xlu0 %v16197_v52, %s15900_s28  ;;  %15104 = vmatmul.mubr.msk.bf16.vlgmr.msra.gmra.mxu0 %vm444_vm1, %v7302_v37 }
0x1408   :  { %15114 = vmatpush3.bf16.msra.mxu0 %v7506_v53  ;;  %15115 = vmatprep.mubr.msk.bf16.mxu0 %vm15892_vm0, %v19975_v18 }
0x1409   :  { %15125 = vmatprep.subr.bf16.mxu0 %v19975_v18 }
0x140b   :  { %8229 = vrot.lane.b32.xlu0 %v16194_v51, %s15900_s28 }
0x1417   :  { %7783 = vrot.lane.b32.xlu1 %v16140_v13, %s15900_s28 }
0x141b   :  { %7885 = vrot.lane.b32.xlu1 %v16163_v27, %s15900_s28 }
0x141d   :  { %v7265_v30 = vpop.xlane.xlu1 %7264 }
0x141e   :  { %15774 = vrcp.f32 %v7265_v30 }
0x141f   :  { %7883 = vrot.lane.b32.xlu1 %v16199_v54, %s15900_s28 }
0x1423   :  { %7985 = vrot.lane.b32.xlu1 %v16187_v47, %s15900_s28 }
0x1425   :  { %v7271_v46 = vpop.xlane.xlu1 %7270 }
0x1426   :  { %15776 = vrcp.f32 %v7271_v46 }
0x1427   :  { %7983 = vrot.lane.b32.xlu1 %v16219_v42, %s15900_s28 }
0x1429   :  { %v7274_v31 = vpop.xlane.xlu0 %7273 }
0x142a   :  { %15778 = vrcp.f32 %v7274_v31 }
0x142b   :  { %v15775_v1 = vpop.eup %15774  ;;  %8085 = vrot.lane.b32.xlu1 %v16213_v62, %s15900_s28 }
0x142c   :  { %v7293_v59 = vmul.f32 %v15775_v1, %v17716_v0 }
0x142d   :  { %v7597_v37 = vpop.permute.xlu0 %7596 }
0x142e   :  { %v7301_v38 = vpack.c.bf16 %v7293_v59, %v7293_v59 }
0x142f   :  { %8083 = vrot.lane.b32.xlu1 %v16233_v5, %s15900_s28 }
0x1430   :  { %15098 = vmatmul.mubr.msk.bf16.vlgmr.msra.gmra.mxu1 %vm444_vm1, %v7301_v38 }
0x1431   :  { %15108 = vmatpush3.bf16.msra.mxu1 %v7458_v20  ;;  %15109 = vmatprep.mubr.msk.bf16.mxu1 %vm15892_vm0, %v19975_v18 }
0x1432   :  { %15119 = vmatprep.subr.bf16.mxu1 %v19975_v18 }
0x1433   :  { %v15777_v24 = vpop.eup %15776  ;;  %8277 = vrot.lane.b32.xlu1 %v16230_v4, %s15900_s28 }
0x1434   :  { %v7295_v0 = vmul.f32 %v15777_v24, %v17720_v35  ;;  %v7602_v35 = vsel %vm912_vm2, %v7597_v37, 0 }
0x1436   :  { %v7303_v40 = vpack.c.bf16 %v7295_v0, %v7295_v0 }
0x1437   :  { %v15779_v44 = vpop.eup %15778  ;;  %8325 = vrot.lane.b32.xlu1 %v16312_v61, %s15900_s28 }
0x1438   :  { %v7296_v58 = vmul.f32 %v15779_v44, %v17724_v25  ;;  %15110 = vmatmul.mubr.msk.bf16.vlgmr.msra.gmra.mxu1 %vm444_vm1, %v7303_v40  ;;  %v7645_v25 = vpop.permute.xlu1 %7644 }
0x1439   :  { %15120 = vmatpush3.bf16.msra.mxu1 %v7554_v50  ;;  %15121 = vmatprep.mubr.msk.bf16.mxu1 %vm15892_vm0, %v19975_v18  ;;  %v7650_v24 = vsel %vm912_vm2, %v7645_v25, 0 }
0x143a   :  { %v7304_v2 = vpack.c.bf16 %v7296_v58, %v7296_v58  ;;  %15131 = vmatprep.subr.bf16.mxu1 %v19975_v18 }
0x143b   :  { %8373 = vrot.lane.b32.xlu1 %v16327_v55, %s15900_s28 }
0x143c   :  { %15116 = vmatmul.mubr.msk.bf16.vlgmr.msra.gmra.mxu0 %vm444_vm1, %v7304_v2 }
0x143d   :  { %15126 = vmatpush3.bf16.msra.mxu0 %v7602_v35  ;;  %15127 = vmatprep.mubr.msk.bf16.mxu0 %vm15892_vm0, %v19975_v18 }
0x143e   :  { %15137 = vmatprep.subr.bf16.mxu0 %v19975_v18 }
0x145a   :  { %v7277_v21 = vpop.xlane.xlu1 %7276 }
0x145b   :  { %15780 = vrcp.f32 %v7277_v21 }
0x145e   :  { %v7280_v53 = vpop.xlane.xlu0 %7279  ;;  %v7786_v21 = vpop.permute.xlu1 %7785 }
0x145f   :  { %15782 = vrcp.f32 %v7280_v53 }
0x1462   :  { %v7736_v30 = vpop.permute.xlu0 %7735 }
0x1463   :  { %v7741_v50 = vsel %vm444_vm1, %v7736_v30, 0 }
0x1466   :  { %v7734_v46 = vpop.permute.xlu0 %7733 }
0x1468   :  { %v15781_v31 = vpop.eup %15780 }
0x1469   :  { %v7297_v1 = vmul.f32 %v15781_v31, %v17733_v48 }
0x146a   :  { %v7836_v59 = vpop.permute.xlu0 %7835 }
0x146b   :  { %v7305_v38 = vpack.c.bf16 %v7297_v1, %v7297_v1 }
0x146c   :  { %v15783_v20 = vpop.eup %15782 }
0x146d   :  { %v7298_v0 = vmul.f32 %v15783_v20, %v17737_v23  ;;  %15122 = vmatmul.mubr.msk.bf16.vlgmr.msra.gmra.mxu1 %vm444_vm1, %v7305_v38  ;;  %v7841_v23 = vsel %vm444_vm1, %v7836_v59, 0 }
0x146e   :  { %15132 = vmatpush3.bf16.msra.mxu1 %v7650_v24  ;;  %15133 = vmatprep.mubr.msk.bf16.mxu1 %vm15892_vm0, %v19975_v18  ;;  %v7834_v44 = vpop.permute.xlu0 %7833 }
0x146f   :  { %v7306_v40 = vpack.c.bf16 %v7298_v0, %v7298_v0  ;;  %15143 = vmatprep.subr.bf16.mxu1 %v19975_v18  ;;  %v7791_v0 = vsel %vm444_vm1, %v7786_v21, 0 }
0x1471   :  { %15128 = vmatmul.mubr.msk.bf16.vlgmr.msra.gmra.mxu0 %vm444_vm1, %v7306_v40 }
0x1472   :  { %15138 = vmatpush3.bf16.xpose.msra.mxu0 %v7741_v50  ;;  %15139 = vmatprep.mubr.msk.bf16.mxu0 %vm15892_vm0, %v19975_v18  ;;  %v7936_v48 = vpop.permute.xlu0 %7935 }
0x1473   :  { %15149 = vmatprep.subr.bf16.mxu0 %v19975_v18  ;;  %v7941_v37 = vsel %vm444_vm1, %v7936_v48, 0 }
0x1476   :  { %v7934_v58 = vpop.permute.xlu0 %7933 }
0x1479   :  { %15140 = vmatmul.mubr.msk.bf16.vlgmr.msra.gmra.mxu0 %vm444_vm1, %v7734_v46 }
0x147a   :  { %15150 = vmatpush3.bf16.xpose.msra.mxu0 %v7841_v23  ;;  %15151 = vmatprep.mubr.msk.bf16.mxu0 %vm15892_vm0, %v19975_v18  ;;  %v8036_v2 = vpop.permute.xlu0 %8035 }
0x147b   :  { %15161 = vmatprep.subr.bf16.mxu0 %v19975_v18  ;;  %v8041_v25 = vsel %vm444_vm1, %v8036_v2, 0 }
0x147e   :  { %v8034_v35 = vpop.permute.xlu0 %8033 }
0x1481   :  { %15152 = vmatmul.mubr.msk.bf16.vlgmr.msra.gmra.mxu0 %vm444_vm1, %v7834_v44 }
0x1482   :  { %15162 = vmatpush3.bf16.xpose.msra.mxu0 %v7941_v37  ;;  %15163 = vmatprep.mubr.msk.bf16.mxu0 %vm15892_vm0, %v19975_v18  ;;  %v8230_v53 = vpop.permute.xlu0 %8229 }
0x1483   :  { %15173 = vmatprep.subr.bf16.mxu0 %v19975_v18  ;;  %v8235_v46 = vsel %vm912_vm2, %v8230_v53, 0 }
0x1489   :  { %15164 = vmatmul.mubr.msk.bf16.vlgmr.msra.gmra.mxu0 %vm444_vm1, %v7934_v58 }
0x148a   :  { %15174 = vmatpush3.bf16.xpose.msra.mxu0 %v8041_v25  ;;  %15175 = vmatprep.mubr.msk.bf16.mxu0 %vm15892_vm0, %v19975_v18 }
0x148b   :  { %15185 = vmatprep.subr.bf16.mxu0 %v19975_v18 }
0x148f   :  { %v7283_v30 = vpop.xlane.xlu1 %7282 }
0x1490   :  { %15784 = vrcp.f32 %v7283_v30 }
0x1491   :  { %15176 = vmatmul.mubr.msk.bf16.vlgmr.msra.gmra.mxu0 %vm444_vm1, %v8034_v35 }
0x1492   :  { %15186 = vmatpush3.bf16.msra.mxu0 %v8235_v46  ;;  %15187 = vmatprep.mubr.msk.bf16.mxu0 %vm15892_vm0, %v19975_v18 }
0x1493   :  { %15197 = vmatprep.subr.bf16.mxu0 %v19975_v18  ;;  %v7784_v31 = vpop.permute.xlu1 %7783 }
0x1497   :  { %v7886_v1 = vpop.permute.xlu1 %7885 }
0x1498   :  { %v7891_v44 = vsel %vm444_vm1, %v7886_v1, 0 }
0x149b   :  { %v7884_v24 = vpop.permute.xlu1 %7883 }
0x149d   :  { %v15785_v59 = vpop.eup %15784 }
0x149e   :  { %v7299_v38 = vmul.f32 %v15785_v59, %v17762_v29 }
0x149f   :  { %v7986_v40 = vpop.permute.xlu1 %7985 }
0x14a0   :  { %v7307_v20 = vpack.c.bf16 %v7299_v38, %v7299_v38  ;;  %v7991_v50 = vsel %vm444_vm1, %v7986_v40, 0 }
0x14a2   :  { %15134 = vmatmul.mubr.msk.bf16.vlgmr.msra.gmra.mxu1 %vm444_vm1, %v7307_v20 }
0x14a3   :  { %15144 = vmatpush3.bf16.xpose.msra.mxu1 %v7791_v0  ;;  %15145 = vmatprep.mubr.msk.bf16.mxu1 %vm15892_vm0, %v19975_v18  ;;  %v7984_v29 = vpop.permute.xlu1 %7983 }
0x14a4   :  { %15155 = vmatprep.subr.bf16.mxu1 %v19975_v18 }
0x14a7   :  { %v8086_v48 = vpop.permute.xlu1 %8085 }
0x14a8   :  { %v8091_v58 = vsel %vm444_vm1, %v8086_v48, 0 }
0x14aa   :  { %15146 = vmatmul.mubr.msk.bf16.vlgmr.msra.gmra.mxu1 %vm444_vm1, %v7784_v31 }
0x14ab   :  { %15156 = vmatpush3.bf16.xpose.msra.mxu1 %v7891_v44  ;;  %15157 = vmatprep.mubr.msk.bf16.mxu1 %vm15892_vm0, %v19975_v18  ;;  %v8084_v23 = vpop.permute.xlu1 %8083 }
0x14ac   :  { %15167 = vmatprep.subr.bf16.mxu1 %v19975_v18 }
0x14af   :  { %v8278_v37 = vpop.permute.xlu1 %8277 }
0x14b0   :  { %v8283_v25 = vsel %vm912_vm2, %v8278_v37, 0 }
0x14b2   :  { %15158 = vmatmul.mubr.msk.bf16.vlgmr.msra.gmra.mxu1 %vm444_vm1, %v7884_v24 }
0x14b3   :  { %15168 = vmatpush3.bf16.xpose.msra.mxu1 %v7991_v50  ;;  %15169 = vmatprep.mubr.msk.bf16.mxu1 %vm15892_vm0, %v19975_v18 }
0x14b4   :  { %15179 = vmatprep.subr.bf16.mxu1 %v19975_v18 }
0x14ba   :  { %15170 = vmatmul.mubr.msk.bf16.vlgmr.msra.gmra.mxu1 %vm444_vm1, %v7984_v29 }
0x14bb   :  { %15180 = vmatpush3.bf16.xpose.msra.mxu1 %v8091_v58  ;;  %15181 = vmatprep.mubr.msk.bf16.mxu1 %vm15892_vm0, %v19975_v18 }
0x14bc   :  { %15191 = vmatprep.subr.bf16.mxu1 %v19975_v18 }
0x14bf   :  { %v17872_v2 = vpop.f32.mrf.mxu0 }
0x14c1   :  { %v15093_v35 = vpop.f32.mrf.mxu0 }
0x14c2   :  { %15182 = vmatmul.mubr.msk.bf16.vlgmr.msra.gmra.mxu1 %vm444_vm1, %v8084_v23 }
0x14c3   :  { %15192 = vmatpush3.bf16.msra.mxu1 %v8283_v25  ;;  %v7353_v21 = vpop.f32.mrf.mxu0  ;;  %15193 = vmatprep.mubr.msk.bf16.mxu1 %vm15892_vm0, %v19975_v18 }
0x14c4   :  { %15203 = vmatprep.subr.bf16.mxu1 %v19975_v18 }
0x14c5   :  { %v15094_v53 = vpop.f32.mrf.mxu0 }
0x14c7   :  { %v17879_v30 = vpop.f32.mrf.mxu0 }
0x14c9   :  { %v15105_v46 = vpop.f32.mrf.mxu0 }
0x14cb   :  { %v7449_v31 = vpop.f32.mrf.mxu0 }
0x14cd   :  { %v15106_v1 = vpop.f32.mrf.mxu0 }
0x14f0   :  { %v17881_v59 = vpop.f32.mrf.mxu1 }
0x14f1   :  { %20000 = vst [vmem:[#allocation40_spill] sm:$0xff] %v17881_v59  ;;  %v8326_v59 = vpop.permute.xlu1 %8325 }
0x14f2   :  { %v15099_v38 = vpop.f32.mrf.mxu1 }
0x14f4   :  { %v7401_v20 = vpop.f32.mrf.mxu1 }
0x14f6   :  { %v15100_v24 = vpop.f32.mrf.mxu1 }
0x14f8   :  { %v17883_v0 = vpop.f32.mrf.mxu1 }
0x14f9   :  { %20001 = vst [vmem:[#allocation41_spill] sm:$0xff] %v17883_v0 }
0x14fa   :  { %v15111_v40 = vpop.f32.mrf.mxu1 }
0x14fc   :  { %v7497_v44 = vpop.f32.mrf.mxu1  ;;  %v17885_v29 = vpop.f32.mrf.mxu0 }
0x14fd   :  { %20002 = vst [vmem:[#allocation42_spill] sm:$0xff] %v17885_v29 }
0x14fe   :  { %v15112_v50 = vpop.f32.mrf.mxu1  ;;  %v15117_v48 = vpop.f32.mrf.mxu0 }
0x1500   :  { %v7545_v23 = vpop.f32.mrf.mxu0 }
0x1502   :  { %v15118_v58 = vpop.f32.mrf.mxu0 }
0x152d   :  { %v17887_v37 = vpop.f32.mrf.mxu1 }
0x152e   :  { %20003 = vst [vmem:[#allocation43_spill] sm:$0xff] %v17887_v37 }
0x152f   :  { %v15123_v35 = vpop.f32.mrf.mxu1 }
0x1531   :  { %v7593_v25 = vpop.f32.mrf.mxu1  ;;  %v17889_v21 = vpop.f32.mrf.mxu0 }
0x1532   :  { %20004 = vst [vmem:[#allocation44_spill] sm:$0xff] %v17889_v21 }
0x1533   :  { %v15124_v53 = vpop.f32.mrf.mxu1  ;;  %v15129_v46 = vpop.f32.mrf.mxu0 }
0x1535   :  { %v7641_v31 = vpop.f32.mrf.mxu0 }
0x1537   :  { %v15130_v1 = vpop.f32.mrf.mxu0 }
0x1539   :  { %v7777_v38 = vpop.f32.mrf.mxu0 }
0x153a   :  { %v8133_v20 = vsel %vm444_vm1, %v7777_v38, -inf }
0x153b   :  { %8134 = vmax.xlane.f32.xlu0 %v8133_v20  ;;  %v15141_v24 = vpop.f32.mrf.mxu0 }
0x153d   :  { %v7780_v40 = vpop.f32.mrf.mxu0 }
0x153f   :  { %v15142_v44 = vpop.f32.mrf.mxu0 }
0x1541   :  { %v7877_v50 = vpop.f32.mrf.mxu0 }
0x1542   :  { %v8139_v48 = vsel %vm444_vm1, %v7877_v50, -inf }
0x1543   :  { %8140 = vmax.xlane.f32.xlu0 %v8139_v48  ;;  %v15153_v23 = vpop.f32.mrf.mxu0 }
0x1545   :  { %v7880_v58 = vpop.f32.mrf.mxu0 }
0x1547   :  { %v15154_v35 = vpop.f32.mrf.mxu0 }
0x1549   :  { %v17893_v25 = vpop.f32.mrf.mxu0 }
0x154b   :  { %v15165_v53 = vpop.f32.mrf.mxu0 }
0x154d   :  { %v7980_v46 = vpop.f32.mrf.mxu0 }
0x154f   :  { %v15166_v31 = vpop.f32.mrf.mxu0 }
0x1551   :  { %v17895_v1 = vpop.f32.mrf.mxu0 }
0x1553   :  { %v15177_v37 = vpop.f32.mrf.mxu0 }
0x1555   :  { %v8080_v21 = vpop.f32.mrf.mxu0 }
0x1556   :  { %v8145_v21 = vsel %vm444_vm1, %v17893_v25, -inf }
0x1557   :  { %v15178_v20 = vpop.f32.mrf.mxu0 }
0x1562   :  { %v17897_v24 = vpop.f32.mrf.mxu1 }
0x1563   :  { %20005 = vst [vmem:[#allocation45_spill] sm:$0xff] %v17897_v24 }
0x1564   :  { %v15135_v40 = vpop.f32.mrf.mxu1 }
0x1566   :  { %v7689_v44 = vpop.f32.mrf.mxu1 }
0x1568   :  { %v15136_v29 = vpop.f32.mrf.mxu1 }
0x1569   :  { %v8151_v29 = vsel %vm444_vm1, %v17895_v1, -inf }
0x156a   :  { %v7827_v0 = vpop.f32.mrf.mxu1 }
0x156b   :  { %v8136_v48 = vsel %vm444_vm1, %v7827_v0, -inf }
0x156c   :  { %8137 = vmax.xlane.f32.xlu1 %v8136_v48  ;;  %v15147_v23 = vpop.f32.mrf.mxu1 }
0x156e   :  { %v7830_v58 = vpop.f32.mrf.mxu1 }
0x1570   :  { %v15148_v35 = vpop.f32.mrf.mxu1 }
0x1572   :  { %v7927_v53 = vpop.f32.mrf.mxu1 }
0x1573   :  { %v8142_v46 = vsel %vm444_vm1, %v7927_v53, -inf }
0x1574   :  { %8143 = vmax.xlane.f32.xlu0 %v8142_v46  ;;  %v15159_v31 = vpop.f32.mrf.mxu1 }
0x1576   :  { %v7930_v37 = vpop.f32.mrf.mxu1 }
0x1578   :  { %8146 = vmax.xlane.f32.xlu0 %v8145_v21  ;;  %v15160_v20 = vpop.f32.mrf.mxu1 }
0x157a   :  { %v8027_v40 = vpop.f32.mrf.mxu1 }
0x157b   :  { %v8148_v44 = vsel %vm444_vm1, %v8027_v40, -inf }
0x157c   :  { %8152 = vmax.xlane.f32.xlu0 %v8151_v29  ;;  %8149 = vmax.xlane.f32.xlu1 %v8148_v44  ;;  %v15171_v48 = vpop.f32.mrf.mxu1 }
0x157e   :  { %v8030_v23 = vpop.f32.mrf.mxu1 }
0x1580   :  { %v15172_v58 = vpop.f32.mrf.mxu1 }
0x1582   :  { %v17906_v35 = vpop.f32.mrf.mxu1 }
0x1583   :  { %v8154_v21 = vsel %vm444_vm1, %v17906_v35, -inf }
0x1584   :  { %v15183_v46 = vpop.f32.mrf.mxu1 }
0x1586   :  { %v8130_v31 = vpop.f32.mrf.mxu1 }
0x1588   :  { %v15184_v37 = vpop.f32.mrf.mxu1 }
0x158d   :  { %8469 = vrot.lane.b32.xlu1 %v16364_v33, %s15900_s28 }
0x1592   :  { %8421 = vrot.lane.b32.xlu0 %v16344_v6, %s15900_s28 }
0x15b1   :  { %8155 = vmax.xlane.f32.xlu1 %v8154_v21  ;;  %v17919_v21 = vpop.permute.xlu1 %8373 }
0x15c4   :  { %v8135_v20 = vpop.xlane.xlu0 %8134 }
0x15c5   :  { %v8157_v29 = vsub.f32 %v7777_v38, %v8135_v20 }
0x15c7   :  { %v8165_v44 = vmul.f32 1.442695, %v8157_v29 }
0x15c9   :  { %15786 = vpow2.f32 %v8165_v44 }
0x15cc   :  { %v8141_v48 = vpop.xlane.xlu0 %8140 }
0x15cd   :  { %v8159_v23 = vsub.f32 %v7877_v50, %v8141_v48 }
0x15cf   :  { %v8169_v58 = vmul.f32 1.442695, %v8159_v23 }
0x15d1   :  { %15788 = vpow2.f32 %v8169_v58 }
0x15d6   :  { %v15787_v46 = vpop.eup %15786 }
0x15d7   :  { %v8181_v31 = vsel %vm444_vm1, %v15787_v46, 0.0 }
0x15d8   :  { %8182 = vadd.xlane.f32.xlu0 %v8181_v31 }
0x15de   :  { %v17915_v37 = vpop.eup %15788 }
0x15df   :  { %v8187_v24 = vsel %vm444_vm1, %v17915_v37, 0.0 }
0x15e0   :  { %8188 = vadd.xlane.f32.xlu0 %v8187_v24 }
0x15f5   :  { %v8138_v38 = vpop.xlane.xlu1 %8137 }
0x15f6   :  { %v8158_v20 = vsub.f32 %v7827_v0, %v8138_v38 }
0x15f8   :  { %v8167_v29 = vmul.f32 1.442695, %v8158_v20 }
0x15fa   :  { %15790 = vpow2.f32 %v8167_v29 }
0x15fd   :  { %v8144_v50 = vpop.xlane.xlu0 %8143 }
0x15fe   :  { %v8160_v44 = vsub.f32 %v7927_v53, %v8144_v50 }
0x1600   :  { %v8171_v48 = vmul.f32 1.442695, %v8160_v44 }
0x1601   :  { %v8147_v23 = vpop.xlane.xlu0 %8146 }
0x1602   :  { %15792 = vpow2.f32 %v8171_v48  ;;  %v8161_v58 = vsub.f32 %v17893_v25, %v8147_v23 }
0x1604   :  { %v8173_v31 = vmul.f32 1.442695, %v8161_v58 }
0x1605   :  { %v8150_v25 = vpop.xlane.xlu1 %8149  ;;  %v8153_v29 = vpop.xlane.xlu0 %8152 }
0x1606   :  { %15794 = vpow2.f32 %v8173_v31  ;;  %v8162_v20 = vsub.f32 %v8027_v40, %v8150_v25  ;;  %v8163_v50 = vsub.f32 %v17895_v1, %v8153_v29 }
0x1607   :  { %v17922_v43 = vpop.eup %15790 }
0x1608   :  { %v8184_v24 = vsel %vm444_vm1, %v17922_v43, 0.0  ;;  %v8175_v44 = vmul.f32 1.442695, %v8162_v20  ;;  %v8177_v48 = vmul.f32 1.442695, %v8163_v50 }
0x1609   :  { %8185 = vadd.xlane.f32.xlu1 %v8184_v24  ;;  %v8470_v1 = vpop.permute.xlu1 %8469  ;;  %v8422_v40 = vpop.permute.xlu0 %8421 }
0x160a   :  { %15796 = vpow2.f32 %v8175_v44  ;;  %v8475_v44 = vsel %vm912_vm2, %v8470_v1, 0 }
0x160b   :  { %15798 = vpow2.f32 %v8177_v48 }
0x160f   :  { %v17926_v7 = vpop.eup %15792 }
0x1610   :  { %v8190_v0 = vsel %vm444_vm1, %v17926_v7, 0.0 }
0x1611   :  { %8191 = vadd.xlane.f32.xlu1 %v8190_v0 }
0x1613   :  { %v17930_v53 = vpop.eup %15794 }
0x1614   :  { %v8193_v38 = vsel %vm444_vm1, %v17930_v53, 0.0 }
0x1615   :  { %8194 = vadd.xlane.f32.xlu0 %v8193_v38 }
0x1617   :  { %v17939_v23 = vpop.eup %15796 }
0x1618   :  { %v8196_v58 = vsel %vm444_vm1, %v17939_v23, 0.0  ;;  %v17943_v31 = vpop.eup %15798 }
0x1619   :  { %v8199_v24 = vsel %vm444_vm1, %v17943_v31, 0.0 }
0x1622   :  { %8565 = vrot.lane.b32.xlu1 %v16400_v12, %s15900_s28 }
0x162b   :  { %8517 = vrot.lane.b32.xlu0 %v16362_v3, %s15900_s28 }
0x163a   :  { %v8156_v0 = vpop.xlane.xlu1 %8155 }
0x163b   :  { %v8164_v38 = vsub.f32 %v17906_v35, %v8156_v0  ;;  %v8331_v35 = vsel %vm912_vm2, %v8326_v59, 0  ;;  %v8427_v59 = vsel %vm912_vm2, %v8422_v40, 0 }
0x163d   :  { %v8179_v20 = vmul.f32 1.442695, %v8164_v38 }
0x1646   :  { %8197 = vadd.xlane.f32.xlu1 %v8196_v58 }
0x164a   :  { %8200 = vadd.xlane.f32.xlu0 %v8199_v24 }
0x1657   :  { %8706 = vrot.lane.b32.xlu1 %v16113_v57, %s15901_s29 }
0x1660   :  { %8656 = vrot.lane.b32.xlu0 %v16103_v49, %s15901_s29 }
0x1661   :  { %v8183_v25 = vpop.xlane.xlu0 %8182 }
0x1662   :  { %15800 = vrcp.f32 %v8183_v25 }
0x1663   :  { %15802 = vpow2.f32 %v8179_v20 }
0x1664   :  { %8654 = vrot.lane.b32.xlu0 %v16118_v60, %s15901_s29 }
0x1668   :  { %8756 = vrot.lane.b32.xlu0 %v16132_v8, %s15901_s29 }
0x1669   :  { %v8189_v29 = vpop.xlane.xlu0 %8188 }
0x166a   :  { %15804 = vrcp.f32 %v8189_v29 }
0x166c   :  { %8754 = vrot.lane.b32.xlu0 %v16171_v32, %s15901_s29 }
0x166f   :  { %v15801_v57 = vpop.eup %15800 }
0x1670   :  { %v8213_v50 = vmul.f32 %v15801_v57, %v15787_v46  ;;  %8856 = vrot.lane.b32.xlu0 %v16142_v14, %s15901_s29  ;;  %v17966_v60 = vpop.eup %15802 }
0x1672   :  { %v8221_v49 = vpack.c.bf16 %v8213_v50, %v8213_v50 }
0x1674   :  { %8854 = vrot.lane.b32.xlu0 %v16165_v28, %s15901_s29  ;;  %15188 = vmatmul.mubr.msk.bf16.vlgmr.msra.gmra.mxu0 %vm444_vm1, %v8221_v49  ;;  %v8202_v28 = vsel %vm444_vm1, %v17966_v60, 0.0 }
0x1675   :  { %15198 = vmatpush3.bf16.msra.mxu0 %v8331_v35  ;;  %15199 = vmatprep.mubr.msk.bf16.mxu0 %vm15892_vm0, %v19975_v18 }
0x1676   :  { %15209 = vmatprep.subr.bf16.mxu0 %v19975_v18 }
0x1677   :  { %v15805_v8 = vpop.eup %15804 }
0x1678   :  { %v8215_v32 = vmul.f32 %v15805_v8, %v17915_v37  ;;  %8956 = vrot.lane.b32.xlu0 %v16174_v34, %s15901_s29 }
0x167a   :  { %v8223_v14 = vpack.c.bf16 %v8215_v32, %v8215_v32 }
0x167b   :  { %8203 = vadd.xlane.f32.xlu1 %v8202_v28 }
0x167c   :  { %8954 = vrot.lane.b32.xlu0 %v16197_v52, %s15901_s29  ;;  %15200 = vmatmul.mubr.msk.bf16.vlgmr.msra.gmra.mxu0 %vm444_vm1, %v8223_v14 }
0x167d   :  { %15210 = vmatpush3.bf16.msra.mxu0 %v8427_v59  ;;  %15211 = vmatprep.mubr.msk.bf16.mxu0 %vm15892_vm0, %v19975_v18 }
0x167e   :  { %15221 = vmatprep.subr.bf16.mxu0 %v19975_v18 }
0x168c   :  { %8704 = vrot.lane.b32.xlu1 %v16140_v13, %s15901_s29 }
0x1690   :  { %8806 = vrot.lane.b32.xlu1 %v16163_v27, %s15901_s29 }
0x1692   :  { %v8186_v34 = vpop.xlane.xlu1 %8185 }
0x1693   :  { %15806 = vrcp.f32 %v8186_v34 }
0x1694   :  { %8804 = vrot.lane.b32.xlu1 %v16199_v54, %s15901_s29 }
0x1698   :  { %8906 = vrot.lane.b32.xlu1 %v16187_v47, %s15901_s29  ;;  %v8379_v47 = vsel %vm912_vm2, %v17919_v21, 0 }
0x169a   :  { %v8192_v52 = vpop.xlane.xlu1 %8191 }
0x169b   :  { %15808 = vrcp.f32 %v8192_v52 }
0x169c   :  { %8904 = vrot.lane.b32.xlu1 %v16219_v42, %s15901_s29 }
0x169e   :  { %v8195_v46 = vpop.xlane.xlu0 %8194 }
0x169f   :  { %15810 = vrcp.f32 %v8195_v46 }
0x16a0   :  { %v15807_v37 = vpop.eup %15806  ;;  %9006 = vrot.lane.b32.xlu1 %v16213_v62, %s15901_s29 }
0x16a1   :  { %v8214_v13 = vmul.f32 %v15807_v37, %v17922_v43 }
0x16a2   :  { %v8518_v21 = vpop.permute.xlu0 %8517 }
0x16a3   :  { %v8222_v27 = vpack.c.bf16 %v8214_v13, %v8214_v13  ;;  %v8523_v58 = vsel %vm912_vm2, %v8518_v21, 0 }
0x16a4   :  { %9004 = vrot.lane.b32.xlu1 %v16233_v5, %s15901_s29 }
0x16a5   :  { %15194 = vmatmul.mubr.msk.bf16.vlgmr.msra.gmra.mxu1 %vm444_vm1, %v8222_v27 }
0x16a6   :  { %15204 = vmatpush3.bf16.msra.mxu1 %v8379_v47  ;;  %15205 = vmatprep.mubr.msk.bf16.mxu1 %vm15892_vm0, %v19975_v18 }
0x16a7   :  { %15215 = vmatprep.subr.bf16.mxu1 %v19975_v18 }
0x16a8   :  { %v15809_v54 = vpop.eup %15808 }
0x16a9   :  { %v8216_v62 = vmul.f32 %v15809_v54, %v17926_v7  ;;  %v8566_v7 = vpop.permute.xlu1 %8565 }
0x16aa   :  { %v8571_v29 = vsel %vm912_vm2, %v8566_v7, 0 }
0x16ab   :  { %v8224_v42 = vpack.c.bf16 %v8216_v62, %v8216_v62 }
0x16ac   :  { %v15811_v43 = vpop.eup %15810 }
0x16ad   :  { %v8217_v5 = vmul.f32 %v15811_v43, %v17930_v53  ;;  %15206 = vmatmul.mubr.msk.bf16.vlgmr.msra.gmra.mxu1 %vm444_vm1, %v8224_v42 }
0x16ae   :  { %15216 = vmatpush3.bf16.msra.mxu1 %v8475_v44  ;;  %15217 = vmatprep.mubr.msk.bf16.mxu1 %vm15892_vm0, %v19975_v18 }
0x16af   :  { %v8225_v48 = vpack.c.bf16 %v8217_v5, %v8217_v5  ;;  %15227 = vmatprep.subr.bf16.mxu1 %v19975_v18 }
0x16b1   :  { %15212 = vmatmul.mubr.msk.bf16.vlgmr.msra.gmra.mxu0 %vm444_vm1, %v8225_v48 }
0x16b2   :  { %15222 = vmatpush3.bf16.msra.mxu0 %v8523_v58  ;;  %15223 = vmatprep.mubr.msk.bf16.mxu0 %vm15892_vm0, %v19975_v18 }
0x16b3   :  { %15233 = vmatprep.subr.bf16.mxu0 %v19975_v18 }
0x16cf   :  { %v8198_v53 = vpop.xlane.xlu1 %8197 }
0x16d0   :  { %15812 = vrcp.f32 %v8198_v53 }
0x16d3   :  { %v8201_v24 = vpop.xlane.xlu0 %8200  ;;  %v8707_v34 = vpop.permute.xlu1 %8706 }
0x16d4   :  { %15814 = vrcp.f32 %v8201_v24  ;;  %v8712_v62 = vsel %vm444_vm1, %v8707_v34, 0 }
0x16d7   :  { %v8657_v1 = vpop.permute.xlu0 %8656 }
0x16d8   :  { %v8662_v35 = vsel %vm444_vm1, %v8657_v1, 0 }
0x16db   :  { %v8655_v0 = vpop.permute.xlu0 %8654 }
0x16dd   :  { %v15813_v40 = vpop.eup %15812 }
0x16de   :  { %v8218_v38 = vmul.f32 %v15813_v40, %v17939_v23 }
0x16df   :  { %v8757_v50 = vpop.permute.xlu0 %8756 }
0x16e0   :  { %v8226_v25 = vpack.c.bf16 %v8218_v38, %v8218_v38 }
0x16e1   :  { %v15815_v20 = vpop.eup %15814 }
0x16e2   :  { %v8219_v57 = vmul.f32 %v15815_v20, %v17943_v31  ;;  %15218 = vmatmul.mubr.msk.bf16.vlgmr.msra.gmra.mxu1 %vm444_vm1, %v8226_v25  ;;  %v8762_v31 = vsel %vm444_vm1, %v8757_v50, 0 }
0x16e3   :  { %15228 = vmatpush3.bf16.msra.mxu1 %v8571_v29  ;;  %15229 = vmatprep.mubr.msk.bf16.mxu1 %vm15892_vm0, %v19975_v18  ;;  %v8755_v23 = vpop.permute.xlu0 %8754 }
0x16e4   :  { %v8227_v49 = vpack.c.bf16 %v8219_v57, %v8219_v57  ;;  %15239 = vmatprep.subr.bf16.mxu1 %v19975_v18 }
0x16e6   :  { %15224 = vmatmul.mubr.msk.bf16.vlgmr.msra.gmra.mxu0 %vm444_vm1, %v8227_v49 }
0x16e7   :  { %15234 = vmatpush3.bf16.xpose.msra.mxu0 %v8662_v35  ;;  %15235 = vmatprep.mubr.msk.bf16.mxu0 %vm15892_vm0, %v19975_v18  ;;  %v8857_v8 = vpop.permute.xlu0 %8856 }
0x16e8   :  { %15245 = vmatprep.subr.bf16.mxu0 %v19975_v18  ;;  %v8862_v14 = vsel %vm444_vm1, %v8857_v8, 0 }
0x16eb   :  { %v8855_v32 = vpop.permute.xlu0 %8854 }
0x16ee   :  { %15236 = vmatmul.mubr.msk.bf16.vlgmr.msra.gmra.mxu0 %vm444_vm1, %v8655_v0 }
0x16ef   :  { %15246 = vmatpush3.bf16.xpose.msra.mxu0 %v8762_v31  ;;  %15247 = vmatprep.mubr.msk.bf16.mxu0 %vm15892_vm0, %v19975_v18  ;;  %v8957_v28 = vpop.permute.xlu0 %8956 }
0x16f0   :  { %15257 = vmatprep.subr.bf16.mxu0 %v19975_v18  ;;  %v8962_v59 = vsel %vm444_vm1, %v8957_v28, 0 }
0x16f3   :  { %v8955_v46 = vpop.permute.xlu0 %8954 }
0x16f6   :  { %15248 = vmatmul.mubr.msk.bf16.vlgmr.msra.gmra.mxu0 %vm444_vm1, %v8755_v23 }
0x16f7   :  { %15258 = vmatpush3.bf16.xpose.msra.mxu0 %v8862_v14  ;;  %15259 = vmatprep.mubr.msk.bf16.mxu0 %vm15892_vm0, %v19975_v18 }
0x16f8   :  { %15269 = vmatprep.subr.bf16.mxu0 %v19975_v18 }
0x16fe   :  { %15260 = vmatmul.mubr.msk.bf16.vlgmr.msra.gmra.mxu0 %vm444_vm1, %v8855_v32 }
0x16ff   :  { %15270 = vmatpush3.bf16.xpose.msra.mxu0 %v8962_v59  ;;  %15271 = vmatprep.mubr.msk.bf16.mxu0 %vm15892_vm0, %v19975_v18 }
0x1700   :  { %15281 = vmatprep.subr.bf16.mxu0 %v19975_v18 }
0x1704   :  { %v8204_v52 = vpop.xlane.xlu1 %8203 }
0x1705   :  { %15816 = vrcp.f32 %v8204_v52 }
0x1706   :  { %15272 = vmatmul.mubr.msk.bf16.vlgmr.msra.gmra.mxu0 %vm444_vm1, %v8955_v46 }
0x1707   :  { %15283 = vmatprep.mubr.msk.bf16.mxu0 %vm15892_vm0, %v19975_v18 }
0x1708   :  { %v8705_v37 = vpop.permute.xlu1 %8704 }
0x170c   :  { %v8807_v47 = vpop.permute.xlu1 %8806 }
0x170d   :  { %v8812_v43 = vsel %vm444_vm1, %v8807_v47, 0 }
0x1710   :  { %v8805_v42 = vpop.permute.xlu1 %8804 }
0x1712   :  { %v15817_v13 = vpop.eup %15816 }
0x1713   :  { %v8220_v27 = vmul.f32 %v15817_v13, %v17966_v60 }
0x1714   :  { %v8907_v44 = vpop.permute.xlu1 %8906 }
0x1715   :  { %v8228_v54 = vpack.c.bf16 %v8220_v27, %v8220_v27  ;;  %v8912_v5 = vsel %vm444_vm1, %v8907_v44, 0 }
0x1717   :  { %15230 = vmatmul.mubr.msk.bf16.vlgmr.msra.gmra.mxu1 %vm444_vm1, %v8228_v54 }
0x1718   :  { %15240 = vmatpush3.bf16.xpose.msra.mxu1 %v8712_v62  ;;  %15241 = vmatprep.mubr.msk.bf16.mxu1 %vm15892_vm0, %v19975_v18  ;;  %v8905_v60 = vpop.permute.xlu1 %8904 }
0x1719   :  { %15251 = vmatprep.subr.bf16.mxu1 %v19975_v18 }
0x171c   :  { %v9007_v21 = vpop.permute.xlu1 %9006 }
0x171d   :  { %v9012_v48 = vsel %vm444_vm1, %v9007_v21, 0 }
0x171f   :  { %15242 = vmatmul.mubr.msk.bf16.vlgmr.msra.gmra.mxu1 %vm444_vm1, %v8705_v37 }
0x1720   :  { %15252 = vmatpush3.bf16.xpose.msra.mxu1 %v8812_v43  ;;  %15253 = vmatprep.mubr.msk.bf16.mxu1 %vm15892_vm0, %v19975_v18  ;;  %v9005_v7 = vpop.permute.xlu1 %9004 }
0x1721   :  { %15263 = vmatprep.subr.bf16.mxu1 %v19975_v18 }
0x1727   :  { %15254 = vmatmul.mubr.msk.bf16.vlgmr.msra.gmra.mxu1 %vm444_vm1, %v8805_v42 }
0x1728   :  { %15264 = vmatpush3.bf16.xpose.msra.mxu1 %v8912_v5  ;;  %15265 = vmatprep.mubr.msk.bf16.mxu1 %vm15892_vm0, %v19975_v18 }
0x1729   :  { %15275 = vmatprep.subr.bf16.mxu1 %v19975_v18 }
0x172f   :  { %15266 = vmatmul.mubr.msk.bf16.vlgmr.msra.gmra.mxu1 %vm444_vm1, %v8905_v60 }
0x1730   :  { %15276 = vmatpush3.bf16.xpose.msra.mxu1 %v9012_v48  ;;  %15277 = vmatprep.mubr.msk.bf16.mxu1 %vm15892_vm0, %v19975_v18 }
0x1731   :  { %15287 = vmatprep.subr.bf16.mxu1 %v19975_v18 }
0x1734   :  { %v18065_v58 = vpop.f32.mrf.mxu0 }
0x1736   :  { %v15189_v53 = vpop.f32.mrf.mxu0 }
0x1737   :  { %15278 = vmatmul.mubr.msk.bf16.vlgmr.msra.gmra.mxu1 %vm444_vm1, %v9005_v7 }
0x1738   :  { %v8274_v24 = vpop.f32.mrf.mxu0  ;;  %15289 = vmatprep.mubr.msk.bf16.mxu1 %vm15892_vm0, %v19975_v18 }
0x173a   :  { %v15190_v1 = vpop.f32.mrf.mxu0 }
0x173c   :  { %v18070_v40 = vpop.f32.mrf.mxu0 }
0x173e   :  { %v15201_v0 = vpop.f32.mrf.mxu0 }
0x1740   :  { %v8370_v38 = vpop.f32.mrf.mxu0 }
0x1742   :  { %v15202_v25 = vpop.f32.mrf.mxu0 }
0x1765   :  { %v18072_v20 = vpop.f32.mrf.mxu1 }
0x1767   :  { %v15195_v29 = vpop.f32.mrf.mxu1 }
0x1769   :  { %v8322_v57 = vpop.f32.mrf.mxu1 }
0x176b   :  { %v15196_v50 = vpop.f32.mrf.mxu1 }
0x176d   :  { %v18074_v49 = vpop.f32.mrf.mxu1 }
0x176f   :  { %v15207_v35 = vpop.f32.mrf.mxu1 }
0x1771   :  { %v8418_v23 = vpop.f32.mrf.mxu1  ;;  %v18076_v31 = vpop.f32.mrf.mxu0 }
0x1773   :  { %v15208_v8 = vpop.f32.mrf.mxu1  ;;  %v15213_v32 = vpop.f32.mrf.mxu0 }
0x1775   :  { %v8466_v14 = vpop.f32.mrf.mxu0 }
0x1777   :  { %v15214_v28 = vpop.f32.mrf.mxu0 }
0x17a2   :  { %v18078_v59 = vpop.f32.mrf.mxu1 }
0x17a4   :  { %v15219_v34 = vpop.f32.mrf.mxu1 }
0x17a6   :  { %v8514_v52 = vpop.f32.mrf.mxu1  ;;  %v18080_v46 = vpop.f32.mrf.mxu0 }
0x17a8   :  { %v15220_v37 = vpop.f32.mrf.mxu1  ;;  %v15225_v13 = vpop.f32.mrf.mxu0 }
0x17aa   :  { %v8562_v27 = vpop.f32.mrf.mxu0 }
0x17ac   :  { %v15226_v47 = vpop.f32.mrf.mxu0 }
0x17ae   :  { %v8698_v54 = vpop.f32.mrf.mxu0 }
0x17af   :  { %v9054_v62 = vsel %vm444_vm1, %v8698_v54, -inf }
0x17b0   :  { %9055 = vmax.xlane.f32.xlu0 %v9054_v62  ;;  %v15237_v42 = vpop.f32.mrf.mxu0 }
0x17b2   :  { %v8701_v43 = vpop.f32.mrf.mxu0 }
0x17b4   :  { %v15238_v44 = vpop.f32.mrf.mxu0 }
0x17b6   :  { %v8798_v60 = vpop.f32.mrf.mxu0 }
0x17b7   :  { %v9060_v5 = vsel %vm444_vm1, %v8798_v60, -inf }
0x17b8   :  { %9061 = vmax.xlane.f32.xlu0 %v9060_v5  ;;  %v15249_v21 = vpop.f32.mrf.mxu0 }
0x17ba   :  { %v8801_v48 = vpop.f32.mrf.mxu0 }
0x17bc   :  { %v15250_v7 = vpop.f32.mrf.mxu0 }
0x17be   :  { %v18084_v53 = vpop.f32.mrf.mxu0 }
0x17bf   :  { %v9066_v62 = vsel %vm444_vm1, %v18084_v53, -inf }
0x17c0   :  { %v15261_v24 = vpop.f32.mrf.mxu0 }
0x17c2   :  { %v8901_v1 = vpop.f32.mrf.mxu0 }
0x17c4   :  { %v15262_v0 = vpop.f32.mrf.mxu0 }
0x17c6   :  { %v18086_v38 = vpop.f32.mrf.mxu0 }
0x17c7   :  { %v9072_v44 = vsel %vm444_vm1, %v18086_v38, -inf }
0x17c8   :  { %v15273_v25 = vpop.f32.mrf.mxu0 }
0x17ca   :  { %v9001_v29 = vpop.f32.mrf.mxu0 }
0x17cc   :  { %v15274_v57 = vpop.f32.mrf.mxu0 }
0x17d7   :  { %v18088_v50 = vpop.f32.mrf.mxu1 }
0x17d9   :  { %v15231_v35 = vpop.f32.mrf.mxu1 }
0x17db   :  { %v8610_v23 = vpop.f32.mrf.mxu1 }
0x17dd   :  { %v15232_v8 = vpop.f32.mrf.mxu1 }
0x17df   :  { %v8748_v32 = vpop.f32.mrf.mxu1 }
0x17e0   :  { %v9057_v14 = vsel %vm444_vm1, %v8748_v32, -inf }
0x17e1   :  { %9058 = vmax.xlane.f32.xlu1 %v9057_v14  ;;  %v15243_v28 = vpop.f32.mrf.mxu1 }
0x17e3   :  { %v8751_v34 = vpop.f32.mrf.mxu1 }
0x17e5   :  { %v15244_v52 = vpop.f32.mrf.mxu1 }
0x17e7   :  { %v18091_v37 = vpop.f32.mrf.mxu1 }
0x17e8   :  { %v9063_v13 = vsel %vm444_vm1, %v18091_v37, -inf }
0x17e9   :  { %9064 = vmax.xlane.f32.xlu0 %v9063_v13  ;;  %v15255_v27 = vpop.f32.mrf.mxu1 }
0x17eb   :  { %v8851_v47 = vpop.f32.mrf.mxu1 }
0x17ed   :  { %9067 = vmax.xlane.f32.xlu0 %v9066_v62  ;;  %v15256_v42 = vpop.f32.mrf.mxu1 }
0x17ef   :  { %v18097_v43 = vpop.f32.mrf.mxu1 }
0x17f0   :  { %v9069_v5 = vsel %vm444_vm1, %v18097_v43, -inf }
0x17f1   :  { %9073 = vmax.xlane.f32.xlu0 %v9072_v44  ;;  %9070 = vmax.xlane.f32.xlu1 %v9069_v5  ;;  %v15267_v21 = vpop.f32.mrf.mxu1 }
0x17f3   :  { %v8951_v48 = vpop.f32.mrf.mxu1 }
0x17f5   :  { %v15268_v7 = vpop.f32.mrf.mxu1 }
0x17f7   :  { %v18103_v24 = vpop.f32.mrf.mxu1 }
0x17f8   :  { %v9075_v29 = vsel %vm444_vm1, %v18103_v24, -inf }
0x17f9   :  { %v15279_v1 = vpop.f32.mrf.mxu1 }
0x17fb   :  { %v9051_v0 = vpop.f32.mrf.mxu1 }
0x17fd   :  { %v15280_v25 = vpop.f32.mrf.mxu1 }
0x1802   :  { %9198 = vrot.lane.b32.xlu1 %v16230_v4, %s15901_s29 }
0x1806   :  { %9246 = vrot.lane.b32.xlu1 %v16312_v61, %s15901_s29 }
0x1807   :  { %9150 = vrot.lane.b32.xlu0 %v16194_v51, %s15901_s29 }
0x182a   :  { %9076 = vmax.xlane.f32.xlu1 %v9075_v29 }
0x1839   :  { %v9056_v57 = vpop.xlane.xlu0 %9055 }
0x183a   :  { %v9078_v35 = vsub.f32 %v8698_v54, %v9056_v57 }
0x183b   :  { %9294 = vrot.lane.b32.xlu1 %v16327_v55, %s15901_s29 }
0x183c   :  { %v9086_v23 = vmul.f32 1.442695, %v9078_v35 }
0x183e   :  { %15818 = vpow2.f32 %v9086_v23 }
0x1841   :  { %v9062_v8 = vpop.xlane.xlu0 %9061 }
0x1842   :  { %v9080_v14 = vsub.f32 %v8798_v60, %v9062_v8 }
0x1844   :  { %v9090_v4 = vmul.f32 1.442695, %v9080_v14 }
0x1846   :  { %15820 = vpow2.f32 %v9090_v4  ;;  %v20012_v4 = vld [vmem:[#allocation14_spill] sm:$0xff] }
0x184b   :  { %v18115_v28 = vpop.eup %15818 }
0x184c   :  { %v9102_v51 = vsel %vm444_vm1, %v18115_v28, 0.0 }
0x184d   :  { %9103 = vadd.xlane.f32.xlu0 %v9102_v51  ;;  %v20014_v51 = vld [vmem:[#allocation18_spill] sm:$0xff] }
0x1853   :  { %v18119_v61 = vpop.eup %15820 }
0x1854   :  { %v9108_v54 = vsel %vm444_vm1, %v18119_v61, 0.0 }
0x1855   :  { %9109 = vadd.xlane.f32.xlu0 %v9108_v54  ;;  %v20016_v54 = vld [vmem:[#allocation20_spill] sm:$0xff] }
0x186a   :  { %v9059_v34 = vpop.xlane.xlu1 %9058 }
0x186b   :  { %v9079_v55 = vsub.f32 %v8748_v32, %v9059_v34  ;;  %9342 = vrot.lane.b32.xlu0 %v16344_v6, %s15901_s29  ;;  %v20017_v34 = vld [vmem:[#allocation28_spill] sm:$0xff] }
0x186d   :  { %v9088_v60 = vmul.f32 1.442695, %v9079_v55  ;;  %v20018_v55 = vld [vmem:[#allocation24_spill] sm:$0xff] }
0x186f   :  { %15822 = vpow2.f32 %v9088_v60  ;;  %v20019_v60 = vld [vmem:[#allocation29_spill] sm:$0xff] }
0x1872   :  { %v9065_v52 = vpop.xlane.xlu0 %9064 }
0x1873   :  { %v9081_v29 = vsub.f32 %v18091_v37, %v9065_v52 }
0x1875   :  { %v9092_v57 = vmul.f32 1.442695, %v9081_v29 }
0x1876   :  { %v9068_v13 = vpop.xlane.xlu0 %9067 }
0x1877   :  { %v9082_v27 = vsub.f32 %v18084_v53, %v9068_v13  ;;  %v20020_v13 = vld [vmem:[#allocation26_spill] sm:$0xff] }
0x1879   :  { %v9094_v47 = vmul.f32 1.442695, %v9082_v27  ;;  %v20021_v27 = vld [vmem:[#allocation34_spill] sm:$0xff] }
0x187a   :  { %v9074_v62 = vpop.xlane.xlu0 %9073  ;;  %v9071_v42 = vpop.xlane.xlu1 %9070 }
0x187b   :  { %15824 = vpow2.f32 %v9094_v47  ;;  %v9084_v44 = vsub.f32 %v18086_v38, %v9074_v62  ;;  %v9083_v35 = vsub.f32 %v18097_v43, %v9071_v42  ;;  %v20022_v62 = vld [vmem:[#allocation30_spill] sm:$0xff]  ;;  %v20023_v42 = vld [vmem:[#allocation35_spill] sm:$0xff] }
0x187c   :  { %v18127_v5 = vpop.eup %15822 }
0x187d   :  { %v9098_v21 = vmul.f32 1.442695, %v9084_v44  ;;  %v9105_v32 = vsel %vm444_vm1, %v18127_v5, 0.0  ;;  %v9096_v23 = vmul.f32 1.442695, %v9083_v35  ;;  %v20024_v44 = vld [vmem:[#allocation32_spill] sm:$0xff] }
0x187e   :  { %v9151_v48 = vpop.permute.xlu0 %9150  ;;  %v9199_v6 = vpop.permute.xlu1 %9198  ;;  %9106 = vadd.xlane.f32.xlu1 %v9105_v32  ;;  %v20026_v32 = vld [vmem:[#allocation36_spill] sm:$0xff] }
0x187f   :  { %15826 = vpow2.f32 %v9098_v21  ;;  %v9156_v7 = vsel %vm912_vm2, %v9151_v48, 0  ;;  %v9204_v53 = vsel %vm912_vm2, %v9199_v6, 0  ;;  %v20025_v21 = vld [vmem:[#allocation40_spill] sm:$0xff]  ;;  %v20027_v48 = vld [vmem:[#allocation41_spill] sm:$0xff] }
0x1880   :  { %15282 = vmatpush3.bf16.msra.mxu0 %v9156_v7  ;;  %15288 = vmatpush3.bf16.msra.mxu1 %v9204_v53  ;;  %15828 = vpow2.f32 %v9092_v57  ;;  %v20028_v7 = vld [vmem:[#allocation38_spill] sm:$0xff] }
0x1881   :  { %15293 = vmatprep.subr.bf16.mxu0 %v19975_v18  ;;  %15299 = vmatprep.subr.bf16.mxu1 %v19975_v18  ;;  %15830 = vpow2.f32 %v9096_v23  ;;  %v20029_v57 = vld [vmem:[#allocation42_spill] sm:$0xff] }
0x1888   :  { %v18135_v38 = vpop.eup %15824 }
0x1889   :  { %v9114_v1 = vsel %vm444_vm1, %v18135_v38, 0.0 }
0x188a   :  { %9115 = vadd.xlane.f32.xlu0 %v9114_v1 }
0x188c   :  { %v18139_v0 = vpop.eup %15826 }
0x188d   :  { %v9120_v25 = vsel %vm444_vm1, %v18139_v0, 0.0  ;;  %v18153_v8 = vpop.eup %15828 }
0x188e   :  { %9121 = vadd.xlane.f32.xlu0 %v9120_v25  ;;  %v9111_v37 = vsel %vm444_vm1, %v18153_v8, 0.0  ;;  %v18159_v43 = vpop.eup %15830 }
0x188f   :  { %9390 = vrot.lane.b32.xlu1 %v16364_v33, %s15901_s29  ;;  %v9247_v33 = vpop.permute.xlu1 %9246 }
0x18a4   :  { %9438 = vrot.lane.b32.xlu0 %v16362_v3, %s15901_s29 }
0x18a8   :  { %2174 = vrot.lane.b32.xlu0 %v16617_v36, %s15902_s30 }
0x18ac   :  { %2178 = vrot.lane.b32.xlu0 %v16624_v45, %s15902_s30  ;;  %v9117_v45 = vsel %vm444_vm1, %v18159_v43, 0.0 }
0x18b0   :  { %3095 = vrot.lane.b32.xlu0 %v16842_v16, %s15903_s14 }
0x18b3   :  { %9112 = vadd.xlane.f32.xlu1 %v9111_v37  ;;  %v9077_v3 = vpop.xlane.xlu1 %9076 }
0x18b4   :  { %v9085_v14 = vsub.f32 %v18103_v24, %v9077_v3  ;;  %3099 = vrot.lane.b32.xlu0 %v16849_v10, %s15903_s14 }
0x18b6   :  { %v9100_v36 = vmul.f32 1.442695, %v9085_v14 }
0x18b7   :  { %9118 = vadd.xlane.f32.xlu1 %v9117_v45  ;;  %v9295_v52 = vpop.permute.xlu1 %9294  ;;  %v20033_v45 = vld [vmem:[#allocation13_spill] sm:$0xff] }
0x18b8   :  { %15832 = vpow2.f32 %v9100_v36  ;;  %4016 = vrot.lane.b32.xlu0 %v17048_v26, %s15904_s15  ;;  %v9300_v35 = vsel %vm912_vm2, %v9295_v52, 0  ;;  %v20043_v52 = vld [vmem:[#allocation43_spill] sm:$0xff] }
0x18bc   :  { %4020 = vrot.lane.b32.xlu0 %v17055_v63, %s15904_s15 }
0x18c0   :  { %4937 = vrot.lane.b32.xlu0 %v17254_v22, %s15905_s16 }
0x18c4   :  { %4941 = vrot.lane.b32.xlu0 %v17261_v39, %s15905_s16 }
0x18c5   :  { %v18174_v16 = vpop.eup %15832 }
0x18c6   :  { %v9123_v10 = vsel %vm444_vm1, %v18174_v16, 0.0 }
0x18c7   :  { %9124 = vadd.xlane.f32.xlu1 %v9123_v10 }
0x18c8   :  { %5858 = vrot.lane.b32.xlu0 %v17460_v56, %s15906_s1  ;;  %v20007_v56 = vld [vmem:[#allocation11_spill] sm:$0xff] }
0x18cc   :  { %5862 = vrot.lane.b32.xlu0 %v17467_v17, %s15906_s1  ;;  %v9252_v17 = vsel %vm912_vm2, %v9247_v33, 0 }
0x18d0   :  { %6779 = vrot.lane.b32.xlu0 %v17666_v15, %s15907_s17  ;;  %v20009_v15 = vld [vmem:[#allocation16_spill] sm:$0xff] }
0x18d4   :  { %6783 = vrot.lane.b32.xlu0 %v17673_v41, %s15907_s17 }
0x18d6   :  { %v9104_v26 = vpop.xlane.xlu0 %9103 }
0x18d7   :  { %15834 = vrcp.f32 %v9104_v26 }
0x18d8   :  { %7700 = vrot.lane.b32.xlu0 %v17872_v2, %s15901_s29  ;;  %9486 = vrot.lane.b32.xlu1 %v16400_v12, %s15901_s29 }
0x18dc   :  { %7704 = vrot.lane.b32.xlu0 %v17879_v30, %s15901_s29  ;;  %2176 = vrot.lane.b32.xlu1 %v16641_v9, %s15902_s30  ;;  %v20006_v9 = vld [vmem:[#allocation7_spill] sm:$0xff] }
0x18de   :  { %v9110_v63 = vpop.xlane.xlu0 %9109 }
0x18df   :  { %15836 = vrcp.f32 %v9110_v63 }
0x18e0   :  { %8621 = vrot.lane.b32.xlu0 %v18065_v58, %s15900_s28  ;;  %2180 = vrot.lane.b32.xlu1 %v16643_v11, %s15902_s30  ;;  %v20010_v58 = vld [vmem:[#allocation12_spill] sm:$0xff] }
0x18e2   :  { %v9343_v2 = vpop.permute.xlu0 %9342 }
0x18e3   :  { %v9348_v24 = vsel %vm912_vm2, %v9343_v2, 0 }
0x18e4   :  { %v15835_v22 = vpop.eup %15834  ;;  %8625 = vrot.lane.b32.xlu0 %v18070_v40, %s15900_s28  ;;  %3097 = vrot.lane.b32.xlu1 %v16851_v19, %s15903_s14  ;;  %v20008_v19 = vld [vmem:[#allocation9_spill] sm:$0xff] }
0x18e5   :  { %v9134_v12 = vmul.f32 %v15835_v22, %v18115_v28  ;;  %v20011_v40 = vld [vmem:[#allocation17_spill] sm:$0xff]  ;;  %v20013_v28 = vld [vmem:[#allocation22_spill] sm:$0xff]  ;;  %v20034_v22 = vld [vmem:[#allocation15_spill] sm:$0xff] }
0x18e7   :  { %v9142_v39 = vpack.c.bf16 %v9134_v12, %v9134_v12 }
0x18e8   :  { %2182 = vrot.lane.b32.xlu0 %v20006_v9, %s15902_s30  ;;  %3101 = vrot.lane.b32.xlu1 %v20007_v56, %s15903_s14  ;;  %v20035_v9 = vld [vmem:[#allocation19_spill] sm:$0xff] }
0x18e9   :  { %15284 = vmatmul.mubr.msk.bf16.vlgmr.msra.gmra.mxu0 %vm444_vm1, %v9142_v39 }
0x18ea   :  { %15294 = vmatpush3.bf16.msra.mxu0 %v9252_v17  ;;  %15295 = vmatprep.mubr.msk.bf16.mxu0 %vm15892_vm0, %v19975_v18 }
0x18eb   :  { %15305 = vmatprep.subr.bf16.mxu0 %v19975_v18 }
0x18ec   :  { %v15837_v11 = vpop.eup %15836  ;;  %2186 = vrot.lane.b32.xlu0 %v20008_v19, %s15902_s30  ;;  %4018 = vrot.lane.b32.xlu1 %v20009_v15, %s15904_s15 }
0x18ed   :  { %v9136_v41 = vmul.f32 %v15837_v11, %v18119_v61  ;;  %v20015_v61 = vld [vmem:[#allocation23_spill] sm:$0xff]  ;;  %v20037_v11 = vld [vmem:[#allocation25_spill] sm:$0xff] }
0x18ef   :  { %v9144_v30 = vpack.c.bf16 %v9136_v41, %v9136_v41  ;;  %v20038_v41 = vld [vmem:[#allocation27_spill] sm:$0xff] }
0x18f0   :  { %3103 = vrot.lane.b32.xlu0 %v20010_v58, %s15903_s14  ;;  %4022 = vrot.lane.b32.xlu1 %v20011_v40, %s15904_s15 }
0x18f1   :  { %15296 = vmatmul.mubr.msk.bf16.vlgmr.msra.gmra.mxu0 %vm444_vm1, %v9144_v30  ;;  %v20039_v30 = vld [vmem:[#allocation31_spill] sm:$0xff] }
0x18f2   :  { %15306 = vmatpush3.bf16.msra.mxu0 %v9348_v24  ;;  %15307 = vmatprep.mubr.msk.bf16.mxu0 %vm15892_vm0, %v19975_v18  ;;  %v20040_v24 = vld [vmem:[#allocation33_spill] sm:$0xff] }
0x18f3   :  { %15317 = vmatprep.subr.bf16.mxu0 %v19975_v18 }
0x18f4   :  { %3107 = vrot.lane.b32.xlu0 %v20012_v4, %s15903_s14  ;;  %4939 = vrot.lane.b32.xlu1 %v20013_v28, %s15905_s16 }
0x18f8   :  { %4024 = vrot.lane.b32.xlu0 %v20014_v51, %s15904_s15  ;;  %4943 = vrot.lane.b32.xlu1 %v20015_v61, %s15905_s16  ;;  %v20041_v51 = vld [vmem:[#allocation37_spill] sm:$0xff] }
0x18fc   :  { %4028 = vrot.lane.b32.xlu0 %v20016_v54, %s15904_s15  ;;  %5860 = vrot.lane.b32.xlu1 %v20017_v34, %s15906_s1  ;;  %v20042_v54 = vld [vmem:[#allocation39_spill] sm:$0xff] }
0x1900   :  { %4945 = vrot.lane.b32.xlu0 %v20018_v55, %s15905_s16  ;;  %5864 = vrot.lane.b32.xlu1 %v20019_v60, %s15906_s1 }
0x1904   :  { %4949 = vrot.lane.b32.xlu0 %v20020_v13, %s15905_s16  ;;  %6781 = vrot.lane.b32.xlu1 %v20021_v27, %s15907_s17 }
0x1907   :  { %v9107_v47 = vpop.xlane.xlu1 %9106 }
0x1908   :  { %15838 = vrcp.f32 %v9107_v47  ;;  %5866 = vrot.lane.b32.xlu0 %v20022_v62, %s15906_s1  ;;  %6785 = vrot.lane.b32.xlu1 %v20023_v42, %s15907_s17  ;;  %v20044_v42 = vld [vmem:[#allocation45_spill] sm:$0xff] }
0x190b   :  { %v9391_v15 = vpop.permute.xlu1 %9390 }
0x190c   :  { %5870 = vrot.lane.b32.xlu0 %v20024_v44, %s15906_s1  ;;  %7702 = vrot.lane.b32.xlu1 %v20025_v21, %s15901_s29  ;;  %v9396_v47 = vsel %vm912_vm2, %v9391_v15, 0 }
0x1910   :  { %6787 = vrot.lane.b32.xlu0 %v20026_v32, %s15907_s17  ;;  %7706 = vrot.lane.b32.xlu1 %v20027_v48, %s15901_s29 }
0x1913   :  { %v9116_v6 = vpop.xlane.xlu0 %9115 }
0x1914   :  { %15840 = vrcp.f32 %v9116_v6  ;;  %6791 = vrot.lane.b32.xlu0 %v20028_v7, %s15907_s17  ;;  %8623 = vrot.lane.b32.xlu1 %v18072_v20, %s15900_s28  ;;  %v20030_v20 = vld [vmem:[#allocation44_spill] sm:$0xff] }
0x1915   :  { %v15839_v53 = vpop.eup %15838 }
0x1916   :  { %v9135_v1 = vmul.f32 %v15839_v53, %v18127_v5  ;;  %v20031_v5 = vld [vmem:[#allocation8_spill] sm:$0xff] }
0x1917   :  { %v9122_v25 = vpop.xlane.xlu0 %9121 }
0x1918   :  { %v9143_v29 = vpack.c.bf16 %v9135_v1, %v9135_v1  ;;  %15842 = vrcp.f32 %v9122_v25  ;;  %7708 = vrot.lane.b32.xlu0 %v20029_v57, %s15901_s29  ;;  %8627 = vrot.lane.b32.xlu1 %v18074_v49, %s15900_s28  ;;  %v20032_v49 = vld [vmem:[#allocation10_spill] sm:$0xff] }
0x191a   :  { %15290 = vmatmul.mubr.msk.bf16.vlgmr.msra.gmra.mxu1 %vm444_vm1, %v9143_v29 }
0x191b   :  { %15300 = vmatpush3.bf16.msra.mxu1 %v9300_v35  ;;  %v9439_v23 = vpop.permute.xlu0 %9438  ;;  %15301 = vmatprep.mubr.msk.bf16.mxu1 %vm15892_vm0, %v19975_v18 }
0x191c   :  { %7712 = vrot.lane.b32.xlu0 %v20030_v20, %s15901_s29  ;;  %2184 = vrot.lane.b32.xlu1 %v20031_v5, %s15902_s30  ;;  %v9444_v26 = vsel %vm912_vm2, %v9439_v23, 0 }
0x191d   :  { %15311 = vmatprep.subr.bf16.mxu1 %v19975_v18 }
0x191f   :  { %v2175_v33 = vpop.permute.xlu0 %2174 }
0x1920   :  { %2199 = vst.msk [vmem:[#allocation2] sm:$0xff] %vm2198_vm3, %v2175_v33  ;;  %2188 = vrot.lane.b32.xlu1 %v20032_v49, %s15902_s30  ;;  %v20045_v33 = vmov 0  }
0x1921   :  { %v15841_v37 = vpop.eup %15840 }
0x1922   :  { %v9138_v3 = vmul.f32 %v15841_v37, %v18135_v38 }
0x1923   :  { %v2179_v14 = vpop.permute.xlu0 %2178 }
0x1924   :  { %v9146_v36 = vpack.c.bf16 %v9138_v3, %v9138_v3  ;;  %2201 = vst.msk [vmem:[#allocation2 + $0x10] sm:$0xff] %vm2198_vm3, %v2179_v14  ;;  %3105 = vrot.lane.b32.xlu1 %v20033_v45, %s15903_s14 }
0x1925   :  { %v15843_v10 = vpop.eup %15842 }
0x1926   :  { %15308 = vmatmul.mubr.msk.bf16.vlgmr.msra.gmra.mxu0 %vm444_vm1, %v9146_v36  ;;  %v9140_v38 = vmul.f32 %v15843_v10, %v18139_v0  ;;  %v20036_v0 = vld [vmem:[#allocation21_spill] sm:$0xff] }
0x1927   :  { %15318 = vmatpush3.bf16.msra.mxu0 %v9444_v26  ;;  %v3096_v63 = vpop.permute.xlu0 %3095  ;;  %15319 = vmatprep.mubr.msk.bf16.mxu0 %vm15892_vm0, %v19975_v18 }
0x1928   :  { %3120 = vst.msk [vmem:[#allocation2] sm:$0xff] %vm3119_vm4, %v3096_v63  ;;  %3109 = vrot.lane.b32.xlu1 %v20034_v22, %s15903_s14  ;;  %v9148_v39 = vpack.c.bf16 %v9140_v38, %v9140_v38 }
0x192b   :  { %v3100_v12 = vpop.permute.xlu0 %3099 }
0x192c   :  { %3122 = vst.msk [vmem:[#allocation2 + $0x10] sm:$0xff] %vm3119_vm4, %v3100_v12  ;;  %4026 = vrot.lane.b32.xlu1 %v20035_v9, %s15904_s15 }
0x192e   :  { %15320 = vmatmul.mubr.msk.bf16.vlgmr.msra.gmra.mxu0 %vm444_vm1, %v9148_v39 }
0x192f   :  { %v4017_v56 = vpop.permute.xlu0 %4016 }
0x1930   :  { %4041 = vst.msk [vmem:[#allocation2] sm:$0xff] %vm4040_vm5, %v4017_v56  ;;  %4030 = vrot.lane.b32.xlu1 %v20036_v0, %s15904_s15 }
0x1933   :  { %v4021_v17 = vpop.permute.xlu0 %4020 }
0x1934   :  { %4043 = vst.msk [vmem:[#allocation2 + $0x10] sm:$0xff] %vm4040_vm5, %v4021_v17  ;;  %4947 = vrot.lane.b32.xlu1 %v20037_v11, %s15905_s16 }
0x1937   :  { %v4938_v19 = vpop.permute.xlu0 %4937 }
0x1938   :  { %4962 = vst.msk [vmem:[#allocation2] sm:$0xff] %vm4961_vm6, %v4938_v19  ;;  %4951 = vrot.lane.b32.xlu1 %v20038_v41, %s15905_s16 }
0x193b   :  { %v4942_v2 = vpop.permute.xlu0 %4941 }
0x193c   :  { %4964 = vst.msk [vmem:[#allocation2 + $0x10] sm:$0xff] %vm4961_vm6, %v4942_v2  ;;  %5868 = vrot.lane.b32.xlu1 %v20039_v30, %s15906_s1  ;;  %v9113_v58 = vpop.xlane.xlu1 %9112 }
0x193d   :  { %15844 = vrcp.f32 %v9113_v58 }
0x193f   :  { %v5859_v40 = vpop.permute.xlu0 %5858 }
0x1940   :  { %5883 = vst.msk [vmem:[#allocation2] sm:$0xff] %vm5882_vm7, %v5859_v40  ;;  %5872 = vrot.lane.b32.xlu1 %v20040_v24, %s15906_s1  ;;  %v9119_v4 = vpop.xlane.xlu1 %9118 }
0x1941   :  { %15846 = vrcp.f32 %v9119_v4 }
0x1943   :  { %v5863_v28 = vpop.permute.xlu0 %5862 }
0x1944   :  { %5885 = vst.msk [vmem:[#allocation2 + $0x10] sm:$0xff] %vm5882_vm7, %v5863_v28  ;;  %6789 = vrot.lane.b32.xlu1 %v20041_v51, %s15907_s17 }
0x1947   :  { %v6780_v61 = vpop.permute.xlu0 %6779 }
0x1948   :  { %6804 = vst.msk [vmem:[#allocation2] sm:$0xff] %vm6803_vm8, %v6780_v61  ;;  %6793 = vrot.lane.b32.xlu1 %v20042_v54, %s15907_s17 }
0x194a   :  { %v15845_v34 = vpop.eup %15844 }
0x194b   :  { %v9137_v55 = vmul.f32 %v15845_v34, %v18153_v8  ;;  %v6784_v60 = vpop.permute.xlu0 %6783 }
0x194c   :  { %6806 = vst.msk [vmem:[#allocation2 + $0x10] sm:$0xff] %vm6803_vm8, %v6784_v60  ;;  %7710 = vrot.lane.b32.xlu1 %v20043_v52, %s15901_s29 }
0x194d   :  { %v9145_v13 = vpack.c.bf16 %v9137_v55, %v9137_v55 }
0x194e   :  { %v15847_v27 = vpop.eup %15846 }
0x194f   :  { %v7701_v62 = vpop.permute.xlu0 %7700  ;;  %15302 = vmatmul.mubr.msk.bf16.vlgmr.msra.gmra.mxu1 %vm444_vm1, %v9145_v13  ;;  %v9139_v44 = vmul.f32 %v15847_v27, %v18159_v43 }
0x1950   :  { %7725 = vst.msk [vmem:[#allocation2] sm:$0xff] %vm7724_vm9, %v7701_v62  ;;  %15312 = vmatpush3.bf16.msra.mxu1 %v9396_v47  ;;  %7714 = vrot.lane.b32.xlu1 %v20044_v42, %s15901_s29  ;;  %v9125_v8 = vpop.xlane.xlu1 %9124 }
0x1951   :  { %15848 = vrcp.f32 %v9125_v8  ;;  %15313 = vmatprep.mubr.msk.bf16.mxu1 %vm15892_vm0, %v19975_v18  ;;  %15323 = vmatprep.subr.bf16.mxu1 %v19975_v18  ;;  %v9147_v48 = vpack.c.bf16 %v9139_v44, %v9139_v44 }
0x1953   :  { %v7705_v21 = vpop.permute.xlu0 %7704 }
0x1954   :  { %7727 = vst.msk [vmem:[#allocation2 + $0x10] sm:$0xff] %vm7724_vm9, %v7705_v21  ;;  %v9487_v32 = vpop.permute.xlu1 %9486 }
0x1955   :  { %v9492_v6 = vsel %vm912_vm2, %v9487_v32, 0 }
0x1957   :  { %v8622_v7 = vpop.permute.xlu0 %8621  ;;  %15314 = vmatmul.mubr.msk.bf16.vlgmr.msra.gmra.mxu1 %vm444_vm1, %v9147_v48 }
0x1958   :  { %8646 = vst.msk [vmem:[#allocation2] sm:$0xff] %vm8645_vm10, %v8622_v7  ;;  %15324 = vmatpush3.bf16.msra.mxu1 %v9492_v6  ;;  %v2177_v43 = vpop.permute.xlu1 %2176  ;;  %15325 = vmatprep.mubr.msk.bf16.mxu1 %vm15892_vm0, %v19975_v18 }
0x1959   :  { %2200 = vst.msk [vmem:[#allocation2 + $0x8] sm:$0xff] %vm2198_vm3, %v2177_v43  ;;  %v15397_v43 = vld [vmem:[%s19930_s3 + $0x20] sm:$0xff]  }
0x195a   :  { %15329 = vmatprep.subr.bf16.mxu0 %v15397_v43 }
0x195b   :  { %v8626_v53 = vpop.permute.xlu0 %8625  ;;  %15330 = vmatpush3.bf16.msra.mxu0 %v15397_v43  ;;  %v15884_v43 = vld [vmem:[%s19928_s0 + $0x8] sm:$0xff] }
0x195c   :  { %8648 = vst.msk [vmem:[#allocation2 + $0x10] sm:$0xff] %vm8645_vm10, %v8626_v53  ;;  %v2181_v1 = vpop.permute.xlu1 %2180  ;;  %v15398_v53 = vld [vmem:[%s19930_s3 + $0x18] sm:$0xff]  }
0x195d   :  { %2202 = vst.msk [vmem:[#allocation2 + $0x18] sm:$0xff] %vm2198_vm3, %v2181_v1  ;;  %15331 = vmatprep.subr.bf16.mxu0 %v15398_v53 }
0x195e   :  { %v15849_v25 = vpop.eup %15848 }
0x195f   :  { %v9141_v29 = vmul.f32 %v15849_v25, %v18174_v16  ;;  %v2183_v57 = vpop.permute.xlu0 %2182  ;;  %v15399_v25 = vld [vmem:[%s19930_s3 + $0x10] sm:$0xff]   ;;  %15332 = vmatpush3.bf16.msra.mxu0 %v15398_v53 }
0x1960   :  { %2203 = vst.msk [vmem:[#allocation2 + $0x20] sm:$0xff] %vm2198_vm3, %v2183_v57  ;;  %v3098_v35 = vpop.permute.xlu1 %3097  ;;  %15333 = vmatprep.subr.bf16.mxu0 %v15399_v25 }
0x1961   :  { %v9149_v23 = vpack.c.bf16 %v9141_v29, %v9141_v29  ;;  %3121 = vst.msk [vmem:[#allocation2 + $0x8] sm:$0xff] %vm3119_vm4, %v3098_v35 }
0x1963   :  { %v2187_v20 = vpop.permute.xlu0 %2186  ;;  %15326 = vmatmul.mubr.msk.bf16.vlgmr.msra.gmra.mxu1 %vm444_vm1, %v9149_v23  ;;  %15334 = vmatpush3.bf16.msra.mxu0 %v15399_v25 }
0x1964   :  { %2205 = vst.msk [vmem:[#allocation2 + $0x30] sm:$0xff] %vm2198_vm3, %v2187_v20  ;;  %v3102_v5 = vpop.permute.xlu1 %3101  ;;  %10739 = vmatprep.mubr.bf16.mxu1 %v20045_v33 }
0x1965   :  { %3123 = vst.msk [vmem:[#allocation2 + $0x18] sm:$0xff] %vm3119_vm4, %v3102_v5 }
0x1967   :  { %v3104_v49 = vpop.permute.xlu0 %3103 }
0x1968   :  { %3124 = vst.msk [vmem:[#allocation2 + $0x20] sm:$0xff] %vm3119_vm4, %v3104_v49  ;;  %v4019_v16 = vpop.permute.xlu1 %4018 }
0x1969   :  { %4042 = vst.msk [vmem:[#allocation2 + $0x8] sm:$0xff] %vm4040_vm5, %v4019_v16  ;;  %v15400_v16 = vld [vmem:[%s19930_s3 + $0x8] sm:$0xff]  }
0x196a   :  { %15335 = vmatprep.subr.bf16.mxu0 %v15400_v16 }
0x196b   :  { %v3108_v37 = vpop.permute.xlu0 %3107  ;;  %15336 = vmatpush3.bf16.msra.mxu0 %v15400_v16 }
0x196c   :  { %3126 = vst.msk [vmem:[#allocation2 + $0x30] sm:$0xff] %vm3119_vm4, %v3108_v37  ;;  %v4023_v3 = vpop.permute.xlu1 %4022  ;;  %v15401_v37 = vld [vmem:[%s19930_s3] sm:$0xff]  }
0x196d   :  { %4044 = vst.msk [vmem:[#allocation2 + $0x18] sm:$0xff] %vm4040_vm5, %v4023_v3  ;;  %15337 = vmatprep.subr.bf16.mxu0 %v15401_v37 }
0x196f   :  { %v4025_v14 = vpop.permute.xlu0 %4024  ;;  %15338 = vmatpush3.bf16.msra.mxu0 %v15401_v37 }
0x1970   :  { %4045 = vst.msk [vmem:[#allocation2 + $0x20] sm:$0xff] %vm4040_vm5, %v4025_v14  ;;  %v4940_v36 = vpop.permute.xlu1 %4939 }
0x1971   :  { %4963 = vst.msk [vmem:[#allocation2 + $0x8] sm:$0xff] %vm4961_vm6, %v4940_v36 }
0x1973   :  { %v4029_v45 = vpop.permute.xlu0 %4028 }
0x1974   :  { %4047 = vst.msk [vmem:[#allocation2 + $0x30] sm:$0xff] %vm4040_vm5, %v4029_v45  ;;  %v4944_v10 = vpop.permute.xlu1 %4943 }
0x1975   :  { %4965 = vst.msk [vmem:[#allocation2 + $0x18] sm:$0xff] %vm4961_vm6, %v4944_v10 }
0x1977   :  { %v4946_v26 = vpop.permute.xlu0 %4945 }
0x1978   :  { %4966 = vst.msk [vmem:[#allocation2 + $0x20] sm:$0xff] %vm4961_vm6, %v4946_v26  ;;  %v5861_v63 = vpop.permute.xlu1 %5860 }
0x1979   :  { %5884 = vst.msk [vmem:[#allocation2 + $0x8] sm:$0xff] %vm5882_vm7, %v5861_v63 }
0x197b   :  { %v4950_v38 = vpop.permute.xlu0 %4949 }
0x197c   :  { %4968 = vst.msk [vmem:[#allocation2 + $0x30] sm:$0xff] %vm4961_vm6, %v4950_v38  ;;  %v5865_v22 = vpop.permute.xlu1 %5864 }
0x197d   :  { %5886 = vst.msk [vmem:[#allocation2 + $0x18] sm:$0xff] %vm5882_vm7, %v5865_v22 }
0x197f   :  { %v5867_v12 = vpop.permute.xlu0 %5866 }
0x1980   :  { %5887 = vst.msk [vmem:[#allocation2 + $0x20] sm:$0xff] %vm5882_vm7, %v5867_v12  ;;  %v6782_v39 = vpop.permute.xlu1 %6781 }
0x1981   :  { %6805 = vst.msk [vmem:[#allocation2 + $0x8] sm:$0xff] %vm6803_vm8, %v6782_v39 }
0x1983   :  { %v5871_v9 = vpop.permute.xlu0 %5870 }
0x1984   :  { %5889 = vst.msk [vmem:[#allocation2 + $0x30] sm:$0xff] %vm5882_vm7, %v5871_v9  ;;  %v6786_v56 = vpop.permute.xlu1 %6785 }
0x1985   :  { %6807 = vst.msk [vmem:[#allocation2 + $0x18] sm:$0xff] %vm6803_vm8, %v6786_v56 }
0x1987   :  { %v6788_v0 = vpop.permute.xlu0 %6787 }
0x1988   :  { %6808 = vst.msk [vmem:[#allocation2 + $0x20] sm:$0xff] %vm6803_vm8, %v6788_v0  ;;  %v7703_v17 = vpop.permute.xlu1 %7702 }
0x1989   :  { %7726 = vst.msk [vmem:[#allocation2 + $0x8] sm:$0xff] %vm7724_vm9, %v7703_v17 }
0x198b   :  { %v6792_v11 = vpop.permute.xlu0 %6791 }
0x198c   :  { %6810 = vst.msk [vmem:[#allocation2 + $0x30] sm:$0xff] %vm6803_vm8, %v6792_v11  ;;  %v7707_v19 = vpop.permute.xlu1 %7706 }
0x198d   :  { %7728 = vst.msk [vmem:[#allocation2 + $0x18] sm:$0xff] %vm7724_vm9, %v7707_v19 }
0x198f   :  { %v7709_v15 = vpop.permute.xlu0 %7708 }
0x1990   :  { %7729 = vst.msk [vmem:[#allocation2 + $0x20] sm:$0xff] %vm7724_vm9, %v7709_v15  ;;  %v8624_v41 = vpop.permute.xlu1 %8623 }
0x1991   :  { %8647 = vst.msk [vmem:[#allocation2 + $0x8] sm:$0xff] %vm8645_vm10, %v8624_v41 }
0x1993   :  { %v7713_v2 = vpop.permute.xlu0 %7712 }
0x1994   :  { %7731 = vst.msk [vmem:[#allocation2 + $0x30] sm:$0xff] %vm7724_vm9, %v7713_v2  ;;  %v8628_v30 = vpop.permute.xlu1 %8627 }
0x1995   :  { %8649 = vst.msk [vmem:[#allocation2 + $0x18] sm:$0xff] %vm8645_vm10, %v8628_v30 }
0x1998   :  { %v2185_v58 = vpop.permute.xlu1 %2184 }
0x1999   :  { %2204 = vst.msk [vmem:[#allocation2 + $0x28] sm:$0xff] %vm2198_vm3, %v2185_v58 }
0x199c   :  { %v2189_v40 = vpop.permute.xlu1 %2188 }
0x199d   :  { %2206 = vst.msk [vmem:[#allocation2 + $0x38] sm:$0xff] %vm2198_vm3, %v2189_v40 }
0x19a0   :  { %v3106_v24 = vpop.permute.xlu1 %3105 }
0x19a1   :  { %3125 = vst.msk [vmem:[#allocation2 + $0x28] sm:$0xff] %vm3119_vm4, %v3106_v24 }
0x19a4   :  { %v3110_v4 = vpop.permute.xlu1 %3109 }
0x19a5   :  { %3127 = vst.msk [vmem:[#allocation2 + $0x38] sm:$0xff] %vm3119_vm4, %v3110_v4 }
0x19a8   :  { %v4027_v28 = vpop.permute.xlu1 %4026 }
0x19a9   :  { %4046 = vst.msk [vmem:[#allocation2 + $0x28] sm:$0xff] %vm4040_vm5, %v4027_v28  ;;  %v9192_v51 = vpop.f32.mrf.mxu0 }
0x19aa   :  { %9542 = vrot.lane.b32.xlu0 %v9192_v51, %s15899_s27 }
0x19ab   :  { %v15285_v61 = vpop.f32.mrf.mxu0 }
0x19ac   :  { %v4031_v54 = vpop.permute.xlu1 %4030 }
0x19ad   :  { %4048 = vst.msk [vmem:[#allocation2 + $0x38] sm:$0xff] %vm4040_vm5, %v4031_v54  ;;  %v9195_v34 = vpop.f32.mrf.mxu0 }
0x19af   :  { %v15286_v55 = vpop.f32.mrf.mxu0 }
0x19b0   :  { %v4948_v60 = vpop.permute.xlu1 %4947 }
0x19b1   :  { %4967 = vst.msk [vmem:[#allocation2 + $0x28] sm:$0xff] %vm4961_vm6, %v4948_v60  ;;  %v9288_v52 = vpop.f32.mrf.mxu0 }
0x19b2   :  { %9546 = vrot.lane.b32.xlu0 %v9288_v52, %s15899_s27 }
0x19b3   :  { %v15297_v13 = vpop.f32.mrf.mxu0 }
0x19b4   :  { %v4952_v27 = vpop.permute.xlu1 %4951 }
0x19b5   :  { %4969 = vst.msk [vmem:[#allocation2 + $0x38] sm:$0xff] %vm4961_vm6, %v4952_v27  ;;  %v9291_v47 = vpop.f32.mrf.mxu0 }
0x19b6   :  { %8629 = vrot.lane.b32.xlu0 %v18076_v31, %s15900_s28  ;;  %v13388_v47 = vld [vmem:[%s19931_s4] ss:$0 sm:$0xff] }
0x19b7   :  { %v15298_v62 = vpop.f32.mrf.mxu0 }
0x19b8   :  { %v5869_v42 = vpop.permute.xlu1 %5868 }
0x19b9   :  { %5888 = vst.msk [vmem:[#allocation2 + $0x28] sm:$0xff] %vm5882_vm7, %v5869_v42 }
0x19ba   :  { %8633 = vrot.lane.b32.xlu0 %v18080_v46, %s15900_s28 }
0x19bc   :  { %v5873_v8 = vpop.permute.xlu1 %5872 }
0x19bd   :  { %5890 = vst.msk [vmem:[#allocation2 + $0x38] sm:$0xff] %vm5882_vm7, %v5873_v8 }
0x19c0   :  { %v6790_v44 = vpop.permute.xlu1 %6789 }
0x19c1   :  { %6809 = vst.msk [vmem:[#allocation2 + $0x28] sm:$0xff] %vm6803_vm8, %v6790_v44 }
0x19c4   :  { %v6794_v21 = vpop.permute.xlu1 %6793 }
0x19c5   :  { %6811 = vst.msk [vmem:[#allocation2 + $0x38] sm:$0xff] %vm6803_vm8, %v6794_v21  ;;  %v15882_v21 = vld [vmem:[%s19928_s0] sm:$0xff] }
0x19c8   :  { %v7711_v32 = vpop.permute.xlu1 %7710 }
0x19c9   :  { %7730 = vst.msk [vmem:[#allocation2 + $0x28] sm:$0xff] %vm7724_vm9, %v7711_v32 }
0x19cc   :  { %v7715_v31 = vpop.permute.xlu1 %7714 }
0x19cd   :  { %7732 = vst.msk [vmem:[#allocation2 + $0x38] sm:$0xff] %vm7724_vm9, %v7715_v31 }
0x19da   :  { %v9240_v48 = vpop.f32.mrf.mxu1 }
0x19db   :  { %9544 = vrot.lane.b32.xlu1 %v9240_v48, %s15899_s27 }
0x19dc   :  { %v15291_v6 = vpop.f32.mrf.mxu1 }
0x19dd   :  { %v15883_v6 = vld [vmem:[%s19928_s0 + $0x10] sm:$0xff] }
0x19de   :  { %v9243_v46 = vpop.f32.mrf.mxu1 }
0x19e0   :  { %v15292_v7 = vpop.f32.mrf.mxu1 }
0x19e6   :  { %v9384_v1 = vpop.f32.mrf.mxu0 }
0x19e7   :  { %9550 = vrot.lane.b32.xlu0 %v9384_v1, %s15899_s27  ;;  %v15885_v1 = vld [vmem:[%s19928_s0 + $0x18] sm:$0xff] }
0x19e8   :  { %v15309_v29 = vpop.f32.mrf.mxu0 }
0x19ea   :  { %v9387_v57 = vpop.f32.mrf.mxu0 }
0x19ec   :  { %v15310_v35 = vpop.f32.mrf.mxu0 }
0x19ee   :  { %v9480_v23 = vpop.f32.mrf.mxu0 }
0x19ef   :  { %9554 = vrot.lane.b32.xlu0 %v9480_v23, %s15899_s27 }
0x19f0   :  { %v15321_v20 = vpop.f32.mrf.mxu0 }
0x19f2   :  { %v9483_v5 = vpop.f32.mrf.mxu0 }
0x19f3   :  { %v15886_v5 = vld [vmem:[%s19928_s0 + $0x20] sm:$0xff] }
0x19f4   :  { %v15322_v49 = vpop.f32.mrf.mxu0 }
0x1a0f   :  { %v9336_v3 = vpop.f32.mrf.mxu1 }
0x1a10   :  { %9548 = vrot.lane.b32.xlu1 %v9336_v3, %s15899_s27  ;;  %v15887_v3 = vld [vmem:[%s19928_s0 + $0x30] sm:$0xff] }
0x1a11   :  { %v15303_v14 = vpop.f32.mrf.mxu1 }
0x1a13   :  { %v9339_v36 = vpop.f32.mrf.mxu1 }
0x1a14   :  { %8631 = vrot.lane.b32.xlu1 %v18078_v59, %s15900_s28 }
0x1a15   :  { %v15304_v45 = vpop.f32.mrf.mxu1 }
0x1a16   :  { %v15888_v45 = vld [vmem:[%s19928_s0 + $0x28] sm:$0xff] }
0x1a17   :  { %v9432_v10 = vpop.f32.mrf.mxu1 }
0x1a18   :  { %8635 = vrot.lane.b32.xlu1 %v18088_v50, %s15900_s28 }
0x1a19   :  { %v15315_v26 = vpop.f32.mrf.mxu1 }
0x1a1a   :  { %v15889_v26 = vld [vmem:[%s19928_s0 + $0x38] sm:$0xff] }
0x1a1b   :  { %v9435_v63 = vpop.f32.mrf.mxu1 }
0x1a1c   :  { %v9543_v38 = vpop.permute.xlu0 %9542  ;;  %9552 = vrot.lane.b32.xlu1 %v9432_v10, %s15899_s27 }
0x1a1d   :  { %9567 = vst.msk [vmem:[#allocation2] sm:$0xff] %vm9566_vm11, %v9543_v38  ;;  %v15316_v22 = vpop.f32.mrf.mxu1  ;;  %v9967_v38 = vld [vmem:[%s19932_s5 + $0x380] sm:$0xff] }
0x1a1e   :  { %v9975_v22 = vld [vmem:[%s19932_s5 + $0x3c0] sm:$0xff] }
0x1a23   :  { %v9528_v12 = vpop.f32.mrf.mxu1 }
0x1a24   :  { %v9547_v39 = vpop.permute.xlu0 %9546  ;;  %9556 = vrot.lane.b32.xlu1 %v9528_v12, %s15899_s27  ;;  %v9575_v11 = vld [vmem:[#allocation2] sm:$0xff]  ;;  %v9968_v12 = vld [vmem:[%s19932_s5 + $0x388] sm:$0xff] }
0x1a25   :  { %9569 = vst.msk [vmem:[#allocation2 + $0x10] sm:$0xff] %vm9566_vm11, %v9547_v39  ;;  %v15327_v59 = vpop.f32.mrf.mxu1  ;;  %v13513_v39 = vcombine.low %v9967_v38, %v9975_v22 }
0x1a26   :  { %v13514_v59 = vcombine.high %v9967_v38, %v9975_v22  ;;  %v9927_v38 = vld [vmem:[%s19932_s5 + $0x240] sm:$0xff] }
0x1a27   :  { %v9531_v9 = vpop.f32.mrf.mxu1 }
0x1a28   :  { %v8630_v56 = vpop.permute.xlu0 %8629  ;;  %v9976_v9 = vld [vmem:[%s19932_s5 + $0x3c8] sm:$0xff]  ;;  %10707 = vmatprep.subr.bf16.mxu1 %v13514_v59 }
0x1a29   :  { %8650 = vst.msk [vmem:[#allocation2 + $0x20] sm:$0xff] %vm8645_vm10, %v8630_v56  ;;  %v15328_v50 = vpop.f32.mrf.mxu1  ;;  %v13515_v56 = vcombine.low %v9968_v12, %v9976_v9  ;;  %10708 = vmatpush1.bf16.msra.mxu1 %v13513_v39  ;;  %v9928_v59 = vld [vmem:[%s19932_s5 + $0x248] sm:$0xff] }
0x1a2a   :  { %v13516_v50 = vcombine.high %v9968_v12, %v9976_v9 }
0x1a2c   :  { %v8634_v0 = vpop.permute.xlu0 %8633  ;;  %v9577_v24 = vld [vmem:[#allocation2 + $0x10] sm:$0xff]  ;;  %10780 = vmatprep.subr.bf16.mxu0 %v13516_v50 }
0x1a2d   :  { %8652 = vst.msk [vmem:[#allocation2 + $0x30] sm:$0xff] %vm8645_vm10, %v8634_v0  ;;  %v20046_v0 = vlaneseq }
0x1a4d   :  { %v9545_v17 = vpop.permute.xlu1 %9544 }
0x1a4e   :  { %9568 = vst.msk [vmem:[#allocation2 + $0x8] sm:$0xff] %vm9566_vm11, %v9545_v17  ;;  %v9713_v17 = vand.u32 127, %v20046_v0 }
0x1a50   :  { %vm9714_vm13 = vcmp.lt.s32.totalorder %v9713_v17, 50 }
0x1a55   :  { %v9576_v19 = vld [vmem:[#allocation2 + $0x8] sm:$0xff] }
0x1a56   :  { %v9583_v15 = vpack.c.bf16 %v9576_v19, %v9575_v11 }
0x1a58   :  { %15339 = vmatprep.mubr.msk.bf16.mxu0 %vm9634_vm12, %v9583_v15  ;;  %v18484_v15 = vsel %vm9714_vm13, 1.0, %v19975_v18 }
0x1a59   :  { %v9551_v41 = vpop.permute.xlu0 %9550  ;;  %20047 = vst [vmem:[#allocation7_spill] sm:$0xff] %v18484_v15 }
0x1a5a   :  { %9571 = vst.msk [vmem:[#allocation2 + $0x20] sm:$0xff] %vm9566_vm11, %v9551_v41 }
0x1a61   :  { %v9555_v2 = vpop.permute.xlu0 %9554  ;;  %v9579_v54 = vld [vmem:[#allocation2 + $0x20] sm:$0xff] }
0x1a62   :  { %9573 = vst.msk [vmem:[#allocation2 + $0x30] sm:$0xff] %vm9566_vm11, %v9555_v2 }
0x1a69   :  { %v9581_v60 = vld [vmem:[#allocation2 + $0x30] sm:$0xff] }
0x1a82   :  { %v9549_v30 = vpop.permute.xlu1 %9548 }
0x1a83   :  { %9570 = vst.msk [vmem:[#allocation2 + $0x18] sm:$0xff] %vm9566_vm11, %v9549_v30 }
0x1a86   :  { %v8632_v58 = vpop.permute.xlu1 %8631 }
0x1a87   :  { %8651 = vst.msk [vmem:[#allocation2 + $0x28] sm:$0xff] %vm8645_vm10, %v8632_v58 }
0x1a8a   :  { %v8636_v40 = vpop.permute.xlu1 %8635  ;;  %v9578_v4 = vld [vmem:[#allocation2 + $0x18] sm:$0xff] }
0x1a8b   :  { %8653 = vst.msk [vmem:[#allocation2 + $0x38] sm:$0xff] %vm8645_vm10, %v8636_v40  ;;  %v9584_v28 = vpack.c.bf16 %v9578_v4, %v9577_v24 }
0x1a8d   :  { %15340 = vmatmul.mubr.msk.bf16.vlgmr.msra.gmra.mxu0 %vm9634_vm12, %v9584_v28 }
0x1a8e   :  { %v9553_v51 = vpop.permute.xlu1 %9552  ;;  %10781 = vmatpush1.bf16.msra.mxu0 %v13515_v56 }
0x1a8f   :  { %9572 = vst.msk [vmem:[#allocation2 + $0x28] sm:$0xff] %vm9566_vm11, %v9553_v51 }
0x1a96   :  { %v9557_v61 = vpop.permute.xlu1 %9556  ;;  %v9580_v34 = vld [vmem:[#allocation2 + $0x28] sm:$0xff] }
0x1a97   :  { %9574 = vst.msk [vmem:[#allocation2 + $0x38] sm:$0xff] %vm9566_vm11, %v9557_v61  ;;  %v9585_v55 = vpack.c.bf16 %v9580_v34, %v9579_v54 }
0x1a99   :  { %15343 = vmatprep.mubr.msk.bf16.mxu0 %vm9634_vm12, %v9585_v55 }
0x1a9e   :  { %v9582_v52 = vld [vmem:[#allocation2 + $0x38] sm:$0xff] }
0x1a9f   :  { %v9586_v13 = vpack.c.bf16 %v9582_v52, %v9581_v60 }
0x1aa1   :  { %15344 = vmatmul.mubr.msk.bf16.gmra.mxu0 %vm9634_vm12, %v9586_v13 }
0x1aa2   :  { %10812 = vmatprep.mubr.bf16.mxu0 %v20045_v33 }
0x1b4d   :  { %v15341_v27 = vpop.f32.mrf.mxu0 }
0x1b4e   :  { %v9690_v44 = vadd.f32 %v15341_v27, %v13388_v47 }
0x1b4f   :  { %v9681_v62 = vpop.f32.mrf.mxu0 }
0x1b50   :  { %v9682_v42 = vadd.f32 %v13388_v47, %v9681_v62  ;;  %v9719_v46 = vadd.f32 %v15883_v6, %v9690_v44  ;;  %v9951_v62 = vld [vmem:[%s19932_s5 + $0x300] sm:$0xff] }
0x1b51   :  { %v15342_v8 = vpop.f32.mrf.mxu0 }
0x1b52   :  { %v9717_v32 = vadd.f32 %v15882_v21, %v9682_v42  ;;  %v9693_v7 = vadd.f32 %v15342_v8, %v13388_v47  ;;  %v9959_v42 = vld [vmem:[%s19932_s5 + $0x340] sm:$0xff]  ;;  %v9952_v8 = vld [vmem:[%s19932_s5 + $0x308] sm:$0xff] }
0x1b53   :  { %v9684_v31 = vpop.f32.mrf.mxu0  ;;  %v13498_v21 = vcombine.high %v9951_v62, %v9959_v42 }
0x1b54   :  { %v9685_v48 = vadd.f32 %v13388_v47, %v9684_v31  ;;  %9727 = vadd.xlane.f32.xlu0 %v9717_v32  ;;  %v9720_v25 = vadd.f32 %v15885_v1, %v9693_v7  ;;  %v13497_v31 = vcombine.low %v9951_v62, %v9959_v42  ;;  %v9943_v1 = vld [vmem:[%s19932_s5 + $0x2c0] sm:$0xff] }
0x1b55   :  { %10709 = vmatprep.subr.bf16.mxu1 %v13498_v21  ;;  %v9871_v42 = vld [vmem:[%s19932_s5 + $0x80] sm:$0xff] }
0x1b56   :  { %v9718_v53 = vadd.f32 %v15884_v43, %v9685_v48  ;;  %10710 = vmatpush1.bf16.msra.mxu1 %v13497_v31 }
0x1b58   :  { %9731 = vadd.xlane.f32.xlu0 %v9719_v46  ;;  %9729 = vadd.xlane.f32.xlu1 %v9718_v53 }
0x1b5c   :  { %9733 = vadd.xlane.f32.xlu0 %v9720_v25 }
0x1b61   :  { %v15345_v29 = vpop.f32.mrf.mxu0 }
0x1b62   :  { %v9706_v20 = vadd.f32 %v15345_v29, %v13388_v47 }
0x1b63   :  { %v9697_v57 = vpop.f32.mrf.mxu0 }
0x1b64   :  { %v9698_v35 = vadd.f32 %v13388_v47, %v9697_v57  ;;  %v18455_v14 = vadd.f32 %v15887_v3, %v9706_v20  ;;  %v9944_v20 = vld [vmem:[%s19932_s5 + $0x2c8] sm:$0xff] }
0x1b65   :  { %v15346_v23 = vpop.f32.mrf.mxu0 }
0x1b66   :  { %v18449_v49 = vadd.f32 %v15886_v5, %v9698_v35  ;;  %v9709_v36 = vadd.f32 %v15346_v23, %v13388_v47 }
0x1b67   :  { %v9700_v16 = vpop.f32.mrf.mxu0 }
0x1b68   :  { %v9701_v37 = vadd.f32 %v13388_v47, %v9700_v16  ;;  %9735 = vadd.xlane.f32.xlu0 %v18449_v49  ;;  %v18467_v63 = vadd.f32 %v15889_v26, %v9709_v36  ;;  %v9919_v26 = vld [vmem:[%s19932_s5 + $0x200] sm:$0xff] }
0x1b69   :  { %v13466_v39 = vcombine.high %v9919_v26, %v9927_v38  ;;  %v13465_v9 = vcombine.low %v9919_v26, %v9927_v38 }
0x1b6a   :  { %v18460_v10 = vadd.f32 %v15888_v45, %v9701_v37 }
0x1b6c   :  { %9737 = vadd.xlane.f32.xlu1 %v18460_v10  ;;  %9739 = vadd.xlane.f32.xlu0 %v18455_v14 }
0x1b70   :  { %9741 = vadd.xlane.f32.xlu1 %v18467_v63 }
0x1bdd   :  { %v9728_v11 = vpop.xlane.xlu0 %9727 }
0x1bde   :  { %v9743_v19 = vmul.f32 0.02, %v9728_v11 }
0x1be0   :  { %v9751_v41 = vsub.f32 %v9717_v32, %v9743_v19  ;;  %v9960_v32 = vld [vmem:[%s19932_s5 + $0x348] sm:$0xff]  ;;  %v9903_v19 = vld [vmem:[%s19932_s5 + $0x180] sm:$0xff] }
0x1be1   :  { %v9732_v2 = vpop.xlane.xlu0 %9731  ;;  %v9730_v30 = vpop.xlane.xlu1 %9729  ;;  %v13499_v48 = vcombine.low %v9952_v8, %v9960_v32  ;;  %v13500_v6 = vcombine.high %v9952_v8, %v9960_v32  ;;  %v9879_v8 = vld [vmem:[%s19932_s5 + $0xc0] sm:$0xff]  ;;  %v9880_v32 = vld [vmem:[%s19932_s5 + $0xc8] sm:$0xff] }
0x1be2   :  { %v18487_v58 = vmul.f32 %v18484_v15, %v9751_v41  ;;  %v9745_v40 = vmul.f32 0.02, %v9732_v2  ;;  %v9744_v24 = vmul.f32 0.02, %v9730_v30  ;;  %v9911_v41 = vld [vmem:[%s19932_s5 + $0x1c0] sm:$0xff]  ;;  %v13418_v21 = vcombine.high %v9871_v42, %v9879_v8 }
0x1be3   :  { %10782 = vmatprep.subr.bf16.mxu0 %v13500_v6  ;;  %v13450_v30 = vcombine.high %v9903_v19, %v9911_v41  ;;  %v13417_v31 = vcombine.low %v9871_v42, %v9879_v8 }
0x1be4   :  { %v9753_v4 = vsub.f32 %v9719_v46, %v9745_v40  ;;  %v9752_v28 = vsub.f32 %v9718_v53, %v9744_v24  ;;  %v9767_v51 = vmul.f32 %v18487_v58, %v18487_v58  ;;  %v9935_v53 = vld [vmem:[%s19932_s5 + $0x280] sm:$0xff]  ;;  %10783 = vmatpush1.bf16.msra.mxu0 %v13499_v48  ;;  %v9912_v40 = vld [vmem:[%s19932_s5 + $0x1c8] sm:$0xff]  ;;  %v13449_v24 = vcombine.low %v9903_v19, %v9911_v41 }
0x1be5   :  { %v9734_v61 = vpop.xlane.xlu0 %9733  ;;  %v13482_v23 = vcombine.high %v9935_v53, %v9943_v1  ;;  %v13481_v5 = vcombine.low %v9935_v53, %v9943_v1  ;;  %v9864_v1 = vld [vmem:[%s19932_s5 + $0x48] sm:$0xff] }
0x1be6   :  { %v18492_v54 = vmul.f32 %v18484_v15, %v9753_v4  ;;  %v18495_v18 = vmul.f32 %v18484_v15, %v9752_v28  ;;  %v9746_v34 = vmul.f32 0.02, %v9734_v61  ;;  %9775 = vadd.xlane.f32.xlu0 %v9767_v51  ;;  %v9887_v61 = vld [vmem:[%s19932_s5 + $0x100] sm:$0xff] }
0x1be7   :  { %10711 = vmatprep.subr.bf16.mxu1 %v13482_v23  ;;  %v18617_v23 = vld [vmem:[%s19932_s5 + $0x390] sm:$0xff] }
0x1be8   :  { %v9754_v55 = vsub.f32 %v9720_v25, %v9746_v34  ;;  %v9769_v60 = vmul.f32 %v18492_v54, %v18492_v54  ;;  %v9768_v52 = vmul.f32 %v18495_v18, %v18495_v18  ;;  %v9936_v25 = vld [vmem:[%s19932_s5 + $0x288] sm:$0xff]  ;;  %10712 = vmatpush1.bf16.msra.mxu1 %v13481_v5  ;;  %v9895_v34 = vld [vmem:[%s19932_s5 + $0x140] sm:$0xff]  ;;  %v18627_v5 = vld [vmem:[%s19932_s5 + $0x398] sm:$0xff] }
0x1be9   :  { %v13484_v16 = vcombine.high %v9936_v25, %v9944_v20  ;;  %10713 = vmatprep.subr.bf16.mxu1 %v13466_v39 }
0x1bea   :  { %v18502_v13 = vmul.f32 %v18484_v15, %v9754_v55  ;;  %9779 = vadd.xlane.f32.xlu0 %v9769_v60  ;;  %9777 = vadd.xlane.f32.xlu1 %v9768_v52  ;;  %v9888_v55 = vld [vmem:[%s19932_s5 + $0x108] sm:$0xff]  ;;  %v13434_v60 = vcombine.high %v9887_v61, %v9895_v34 }
0x1beb   :  { %10784 = vmatprep.subr.bf16.mxu0 %v13484_v16  ;;  %v9896_v52 = vld [vmem:[%s19932_s5 + $0x148] sm:$0xff]  ;;  %v18634_v16 = vld [vmem:[%s19932_s5 + $0x3d8] sm:$0xff] }
0x1bec   :  { %v9770_v27 = vmul.f32 %v18502_v13, %v18502_v13  ;;  %10714 = vmatpush1.bf16.msra.mxu1 %v13465_v9  ;;  %v13436_v62 = vcombine.high %v9888_v55, %v9896_v52 }
0x1bed   :  { %10715 = vmatprep.subr.bf16.mxu1 %v13450_v30 }
0x1bee   :  { %9781 = vadd.xlane.f32.xlu1 %v9770_v27  ;;  %v13433_v27 = vcombine.low %v9887_v61, %v9895_v34 }
0x1bf0   :  { %10716 = vmatpush1.bf16.msra.mxu1 %v13449_v24 }
0x1bf1   :  { %v9736_v47 = vpop.xlane.xlu0 %9735  ;;  %10717 = vmatprep.subr.bf16.mxu1 %v13434_v60 }
0x1bf2   :  { %v9747_v44 = vmul.f32 0.02, %v9736_v47  ;;  %v13435_v47 = vcombine.low %v9888_v55, %v9896_v52 }
0x1bf4   :  { %v9755_v46 = vsub.f32 %v18449_v49, %v9747_v44  ;;  %v13483_v49 = vcombine.low %v9936_v25, %v9944_v20  ;;  %10718 = vmatpush1.bf16.msra.mxu1 %v13433_v27  ;;  %v9872_v44 = vld [vmem:[%s19932_s5 + $0x88] sm:$0xff]  ;;  %v18622_v20 = vld [vmem:[%s19932_s5 + $0x3d0] sm:$0xff] }
0x1bf5   :  { %v9740_v7 = vpop.xlane.xlu0 %9739  ;;  %v9738_v43 = vpop.xlane.xlu1 %9737  ;;  %v13419_v48 = vcombine.low %v9872_v44, %v9880_v32  ;;  %v13420_v6 = vcombine.high %v9872_v44, %v9880_v32  ;;  %10719 = vmatprep.subr.bf16.mxu1 %v13418_v21 }
0x1bf6   :  { %v18529_v29 = vmul.f32 %v18484_v15, %v9755_v46  ;;  %v9749_v57 = vmul.f32 0.02, %v9740_v7  ;;  %v9748_v35 = vmul.f32 0.02, %v9738_v43  ;;  %10785 = vmatpush1.bf16.msra.mxu0 %v13483_v49  ;;  %v9855_v46 = vld [vmem:[%s19932_s5] sm:$0xff]  ;;  %v9856_v43 = vld [vmem:[%s19932_s5 + $0x8] sm:$0xff]  ;;  %v13518_v49 = vcombine.high %v18617_v23, %v18622_v20 }
0x1bf7   :  { %v9863_v7 = vld [vmem:[%s19932_s5 + $0x40] sm:$0xff] }
0x1bf8   :  { %v9757_v37 = vsub.f32 %v18455_v14, %v9749_v57  ;;  %v9756_v3 = vsub.f32 %v18460_v10, %v9748_v35  ;;  %v9771_v36 = vmul.f32 %v18529_v29, %v18529_v29  ;;  %v9920_v14 = vld [vmem:[%s19932_s5 + $0x208] sm:$0xff]  ;;  %10720 = vmatpush1.bf16.msra.mxu1 %v13417_v31  ;;  %v13402_v53 = vcombine.high %v9855_v46, %v9863_v7  ;;  %v9961_v31 = vld [vmem:[%s19932_s5 + $0x350] sm:$0xff] }
0x1bf9   :  { %v9742_v45 = vpop.xlane.xlu1 %9741  ;;  %v13467_v56 = vcombine.low %v9920_v14, %v9928_v59  ;;  %v13468_v50 = vcombine.high %v9920_v14, %v9928_v59  ;;  %v13401_v25 = vcombine.low %v9855_v46, %v9863_v7  ;;  %v13403_v57 = vcombine.low %v9856_v43, %v9864_v1 }
0x1bfa   :  { %v18548_v10 = vmul.f32 %v18484_v15, %v9757_v37  ;;  %v18551_v22 = vmul.f32 %v18484_v15, %v9756_v3  ;;  %v9750_v12 = vmul.f32 0.02, %v9742_v45  ;;  %9783 = vadd.xlane.f32.xlu0 %v9771_v36  ;;  %v13404_v35 = vcombine.high %v9856_v43, %v9864_v1  ;;  %10721 = vmatprep.subr.bf16.mxu1 %v13402_v53  ;;  %v9945_v43 = vld [vmem:[%s19932_s5 + $0x2d0] sm:$0xff] }
0x1bfb   :  { %10786 = vmatprep.subr.bf16.mxu0 %v13468_v50  ;;  %v13517_v37 = vcombine.low %v18617_v23, %v18622_v20  ;;  %v13519_v3 = vcombine.low %v18627_v5, %v18634_v16  ;;  %v13520_v36 = vcombine.high %v18627_v5, %v18634_v16  ;;  %v9922_v5 = vld [vmem:[%s19932_s5 + $0x218] sm:$0xff] }
0x1bfc   :  { %v9758_v0 = vsub.f32 %v18467_v63, %v9750_v12  ;;  %v9773_v17 = vmul.f32 %v18548_v10, %v18548_v10  ;;  %v9772_v11 = vmul.f32 %v18551_v22, %v18551_v22  ;;  %v9904_v63 = vld [vmem:[%s19932_s5 + $0x188] sm:$0xff]  ;;  %10787 = vmatpush1.bf16.msra.mxu0 %v13467_v56  ;;  %10722 = vmatpush1.bf16.msra.mxu1 %v13401_v25  ;;  %v9930_v16 = vld [vmem:[%s19932_s5 + $0x258] sm:$0xff] }
0x1bfd   :  { %v13451_v4 = vcombine.low %v9904_v63, %v9912_v40  ;;  %v13452_v28 = vcombine.high %v9904_v63, %v9912_v40  ;;  %10853 = vmatprep.subr.bf16.mxu1 %v13518_v49  ;;  %v18646_v63 = vld [vmem:[%s19933_s9] ss:$0 sm:$0xff] }
0x1bfe   :  { %v18571_v2 = vmul.f32 %v18484_v15, %v9758_v0  ;;  %9787 = vadd.xlane.f32.xlu0 %v9773_v17  ;;  %9785 = vadd.xlane.f32.xlu1 %v9772_v11 }
0x1bff   :  { %10788 = vmatprep.subr.bf16.mxu0 %v13452_v28 }
0x1c00   :  { %v9774_v51 = vmul.f32 %v18571_v2, %v18571_v2  ;;  %10789 = vmatpush1.bf16.msra.mxu0 %v13451_v4 }
0x1c01   :  { %10790 = vmatprep.subr.bf16.mxu0 %v13436_v62 }
0x1c02   :  { %9789 = vadd.xlane.f32.xlu1 %v9774_v51 }
0x1c04   :  { %10791 = vmatpush1.bf16.msra.mxu0 %v13435_v47 }
0x1c05   :  { %10792 = vmatprep.subr.bf16.mxu0 %v13420_v6 }
0x1c08   :  { %10793 = vmatpush1.bf16.msra.mxu0 %v13419_v48  ;;  %v9962_v48 = vld [vmem:[%s19932_s5 + $0x358] sm:$0xff] }
0x1c09   :  { %10794 = vmatprep.subr.bf16.mxu0 %v13404_v35  ;;  %v9946_v35 = vld [vmem:[%s19932_s5 + $0x2d8] sm:$0xff] }
0x1c0c   :  { %10795 = vmatpush1.bf16.msra.mxu0 %v13403_v57  ;;  %v9938_v57 = vld [vmem:[%s19932_s5 + $0x298] sm:$0xff] }
0x1c0d   :  { %10926 = vmatprep.subr.bf16.mxu0 %v13520_v36  ;;  %v13488_v20 = vcombine.high %v9938_v57, %v9946_v35 }
0x1c6f   :  { %v9776_v45 = vpop.xlane.xlu0 %9775 }
0x1c70   :  { %v9791_v26 = vmul.f32 0.02, %v9776_v45 }
0x1c72   :  { %v9799_v38 = vadd.f32 1e-05, %v9791_v26  ;;  %v9921_v26 = vld [vmem:[%s19932_s5 + $0x210] sm:$0xff] }
0x1c73   :  { %v9780_v14 = vpop.xlane.xlu0 %9779  ;;  %v9778_v12 = vpop.xlane.xlu1 %9777 }
0x1c74   :  { %15850 = vrsqrt.f32 %v9799_v38  ;;  %v9793_v39 = vmul.f32 0.02, %v9780_v14  ;;  %v9792_v59 = vmul.f32 0.02, %v9778_v12  ;;  %v9929_v38 = vld [vmem:[%s19932_s5 + $0x250] sm:$0xff]  ;;  %v13487_v12 = vcombine.low %v9938_v57, %v9946_v35 }
0x1c76   :  { %v9800_v9 = vadd.f32 1e-05, %v9792_v59  ;;  %v9801_v56 = vadd.f32 1e-05, %v9793_v39  ;;  %v9905_v39 = vld [vmem:[%s19932_s5 + $0x190] sm:$0xff] }
0x1c77   :  { %v9782_v50 = vpop.xlane.xlu1 %9781  ;;  %v9913_v59 = vld [vmem:[%s19932_s5 + $0x1d0] sm:$0xff] }
0x1c78   :  { %v9794_v0 = vmul.f32 0.02, %v9782_v50  ;;  %15852 = vrsqrt.f32 %v9800_v9  ;;  %v13470_v50 = vcombine.high %v9921_v26, %v9929_v38 }
0x1c79   :  { %15854 = vrsqrt.f32 %v9801_v56 }
0x1c7a   :  { %v9802_v17 = vadd.f32 1e-05, %v9794_v0  ;;  %v13472_v0 = vcombine.high %v9922_v5, %v9930_v16 }
0x1c7c   :  { %15856 = vrsqrt.f32 %v9802_v17  ;;  %v9906_v17 = vld [vmem:[%s19932_s5 + $0x198] sm:$0xff] }
0x1c81   :  { %v15851_v11 = vpop.eup %15850 }
0x1c82   :  { %v9815_v19 = vmul.f32 %v15851_v11, %v18487_v58  ;;  %v18653_v58 = vld [vmem:[%s19934_s10] ss:$0 sm:$0xff]  ;;  %v9914_v11 = vld [vmem:[%s19932_s5 + $0x1d8] sm:$0xff] }
0x1c83   :  { %v9784_v41 = vpop.xlane.xlu0 %9783 }
0x1c84   :  { %v9795_v30 = vmul.f32 0.02, %v9784_v41  ;;  %v9829_v4 = vmul.f32 %v18646_v63, %v9815_v19  ;;  %v13469_v41 = vcombine.low %v9921_v26, %v9929_v38 }
0x1c85   :  { %v15853_v40 = vpop.eup %15852 }
0x1c86   :  { %v9803_v24 = vadd.f32 1e-05, %v9795_v30  ;;  %v9816_v28 = vmul.f32 %v15853_v40, %v18495_v18  ;;  %v15855_v34 = vpop.eup %15854  ;;  %v9953_v18 = vld [vmem:[%s19932_s5 + $0x310] sm:$0xff]  ;;  %v18661_v42 = vadd.f32 %v18653_v58, %v9829_v4  ;;  %v13471_v30 = vcombine.low %v9922_v5, %v9930_v16  ;;  %v9979_v5 = vld [vmem:[%s19932_s5 + $0x3e0] sm:$0xff]  ;;  %v9972_v16 = vld [vmem:[%s19932_s5 + $0x3a8] sm:$0xff] }
0x1c87   :  { %v9788_v51 = vpop.xlane.xlu0 %9787  ;;  %v9786_v61 = vpop.xlane.xlu1 %9785  ;;  %v9817_v8 = vmul.f32 %v15855_v34, %v18492_v54  ;;  %v9937_v54 = vld [vmem:[%s19932_s5 + $0x290] sm:$0xff]  ;;  %v13502_v1 = vcombine.high %v9953_v18, %v9961_v31  ;;  %v13501_v36 = vcombine.low %v9953_v18, %v9961_v31  ;;  %v13454_v4 = vcombine.high %v9905_v39, %v9913_v59  ;;  %v9874_v31 = vld [vmem:[%s19932_s5 + $0x98] sm:$0xff] }
0x1c88   :  { %15858 = vrsqrt.f32 %v9803_v24  ;;  %v9797_v55 = vmul.f32 0.02, %v9788_v51  ;;  %v9796_v60 = vmul.f32 0.02, %v9786_v61  ;;  %v9830_v27 = vmul.f32 %v18646_v63, %v9816_v28  ;;  %v9889_v40 = vld [vmem:[%s19932_s5 + $0x110] sm:$0xff]  ;;  %v9890_v28 = vld [vmem:[%s19932_s5 + $0x118] sm:$0xff] }
0x1c89   :  { %v15857_v52 = vpop.eup %15856  ;;  %v9831_v49 = vmul.f32 %v18646_v63, %v9817_v8  ;;  %v13486_v23 = vcombine.high %v9937_v54, %v9945_v43  ;;  %v9897_v24 = vld [vmem:[%s19932_s5 + $0x150] sm:$0xff]  ;;  %v9898_v61 = vld [vmem:[%s19932_s5 + $0x158] sm:$0xff] }
0x1c8a   :  { %v9818_v47 = vmul.f32 %v15857_v52, %v18502_v13  ;;  %v9804_v62 = vadd.f32 1e-05, %v9796_v60  ;;  %v18665_v44 = vadd.f32 %v18653_v58, %v9830_v27  ;;  %v9805_v21 = vadd.f32 1e-05, %v9797_v55  ;;  %v9954_v13 = vld [vmem:[%s19932_s5 + $0x318] sm:$0xff] }
0x1c8b   :  { %v9790_v32 = vpop.xlane.xlu1 %9789  ;;  %v13504_v25 = vcombine.high %v9954_v13, %v9962_v48  ;;  %v13503_v45 = vcombine.low %v9954_v13, %v9962_v48  ;;  %v13453_v52 = vcombine.low %v9905_v39, %v9913_v59  ;;  %v13455_v27 = vcombine.low %v9906_v17, %v9914_v11 }
0x1c8c   :  { %v9798_v6 = vmul.f32 0.02, %v9790_v32  ;;  %v18681_v46 = vpack.c.bf16 %v18665_v44, %v18661_v42  ;;  %v9832_v7 = vmul.f32 %v18646_v63, %v9818_v47  ;;  %15860 = vrsqrt.f32 %v9804_v62 }
0x1c8d   :  { %15862 = vrsqrt.f32 %v9805_v21  ;;  %v13438_v18 = vcombine.high %v9889_v40, %v9897_v24  ;;  %v13440_v8 = vcombine.high %v9890_v28, %v9898_v61  ;;  %v9873_v21 = vld [vmem:[%s19932_s5 + $0x90] sm:$0xff] }
0x1c8e   :  { %v9806_v53 = vadd.f32 1e-05, %v9798_v6  ;;  %10740 = vmatmul.mubr.bf16.vlgmr.msra.gmra.mxu1 %v18681_v46  ;;  %10813 = vmatmul.mubr.bf16.vlgmr.msra.gmra.mxu0 %v18681_v46  ;;  %v18709_v14 = vadd.f32 %v18653_v58, %v9832_v7  ;;  %v13437_v7 = vcombine.low %v9889_v40, %v9897_v24  ;;  %v9939_v40 = vld [vmem:[%s19932_s5 + $0x2a0] sm:$0xff] }
0x1c8f   :  { %10854 = vmatpush1.bf16.msra.mxu1 %v13517_v37  ;;  %10927 = vmatpush1.bf16.msra.mxu0 %v13519_v3  ;;  %v18720_v37 = vadd.f32 %v18653_v58, %v9831_v49  ;;  %v13485_v3 = vcombine.low %v9937_v54, %v9945_v43  ;;  %v9882_v54 = vld [vmem:[%s19932_s5 + $0xd8] sm:$0xff]  ;;  %v9857_v43 = vld [vmem:[%s19932_s5 + $0x10] sm:$0xff]  ;;  %v9947_v24 = vld [vmem:[%s19932_s5 + $0x2e0] sm:$0xff] }
0x1c90   :  { %15864 = vrsqrt.f32 %v9806_v53  ;;  %20048 = vst [vmem:[#allocation11_spill] sm:$0xff] %v18709_v14  ;;  %10749 = vmatprep.mubr.bf16.mxu1 %v20045_v33  ;;  %10822 = vmatprep.mubr.bf16.mxu0 %v20045_v33  ;;  %v9865_v53 = vld [vmem:[%s19932_s5 + $0x50] sm:$0xff]  ;;  %v13424_v49 = vcombine.high %v9874_v31, %v9882_v54  ;;  %v13423_v26 = vcombine.low %v9874_v31, %v9882_v54  ;;  %v9916_v31 = vld [vmem:[%s19932_s5 + $0x1e8] sm:$0xff] }
0x1c91   :  { %10855 = vmatprep.subr.bf16.mxu1 %v13502_v1  ;;  %10928 = vmatprep.subr.bf16.mxu0 %v13504_v25  ;;  %20049 = vst [vmem:[#allocation9_spill] sm:$0xff] %v18720_v37  ;;  %v18730_v56 = vpack.c.bf16 %v18709_v14, %v18720_v37  ;;  %v9866_v1 = vld [vmem:[%s19932_s5 + $0x58] sm:$0xff]  ;;  %v13405_v39 = vcombine.low %v9857_v43, %v9865_v53 }
0x1c93   :  { %10856 = vmatpush1.bf16.msra.mxu1 %v13501_v36  ;;  %10929 = vmatpush1.bf16.msra.mxu0 %v13503_v45 }
0x1c94   :  { %10857 = vmatprep.subr.bf16.mxu1 %v13486_v23  ;;  %10930 = vmatprep.subr.bf16.mxu0 %v13488_v20  ;;  %v13406_v23 = vcombine.high %v9857_v43, %v9865_v53  ;;  %v9891_v43 = vld [vmem:[%s19932_s5 + $0x120] sm:$0xff] }
0x1c95   :  { %v15859_v9 = vpop.eup %15858  ;;  %v9899_v53 = vld [vmem:[%s19932_s5 + $0x160] sm:$0xff] }
0x1c96   :  { %v9819_v19 = vmul.f32 %v15859_v9, %v18529_v29  ;;  %10750 = vmatmul.mubr.bf16.gmra.mxu1 %v18730_v56  ;;  %10823 = vmatmul.mubr.bf16.gmra.mxu0 %v18730_v56  ;;  %v13456_v29 = vcombine.high %v9906_v17, %v9914_v11  ;;  %v9963_v17 = vld [vmem:[%s19932_s5 + $0x360] sm:$0xff]  ;;  %v9956_v11 = vld [vmem:[%s19932_s5 + $0x328] sm:$0xff] }
0x1c97   :  { %10858 = vmatpush1.bf16.msra.mxu1 %v13485_v3  ;;  %10931 = vmatpush1.bf16.msra.mxu0 %v13487_v12  ;;  %v9980_v3 = vld [vmem:[%s19932_s5 + $0x3e8] sm:$0xff] }
0x1c98   :  { %10859 = vmatprep.subr.bf16.mxu1 %v13470_v50  ;;  %10932 = vmatprep.subr.bf16.mxu0 %v13472_v0  ;;  %v9833_v34 = vmul.f32 %v18646_v63, %v9819_v19  ;;  %v13524_v0 = vcombine.high %v9972_v16, %v9980_v3  ;;  %v9964_v19 = vld [vmem:[%s19932_s5 + $0x368] sm:$0xff] }
0x1c99   :  { %v15861_v51 = vpop.eup %15860  ;;  %10759 = vmatprep.mubr.bf16.mxu1 %v20045_v33  ;;  %10832 = vmatprep.mubr.bf16.mxu0 %v20045_v33 }
0x1c9a   :  { %v9820_v55 = vmul.f32 %v15861_v51, %v18551_v22  ;;  %v15863_v60 = vpop.eup %15862  ;;  %v9881_v22 = vld [vmem:[%s19932_s5 + $0xd0] sm:$0xff]  ;;  %v18769_v13 = vadd.f32 %v18653_v58, %v9833_v34  ;;  %v13508_v51 = vcombine.high %v9956_v11, %v9964_v19  ;;  %v13507_v34 = vcombine.low %v9956_v11, %v9964_v19 }
0x1c9b   :  { %10860 = vmatpush1.bf16.msra.mxu1 %v13469_v41  ;;  %10933 = vmatpush1.bf16.msra.mxu0 %v13471_v30  ;;  %v9821_v48 = vmul.f32 %v15863_v60, %v18548_v10  ;;  %v9858_v10 = vld [vmem:[%s19932_s5 + $0x18] sm:$0xff]  ;;  %v13422_v35 = vcombine.high %v9873_v21, %v9881_v22  ;;  %v13421_v45 = vcombine.low %v9873_v21, %v9881_v22  ;;  %v9931_v60 = vld [vmem:[%s19932_s5 + $0x260] sm:$0xff] }
0x1c9c   :  { %v9834_v62 = vmul.f32 %v18646_v63, %v9820_v55  ;;  %10861 = vmatprep.subr.bf16.mxu1 %v13454_v4  ;;  %10934 = vmatprep.subr.bf16.mxu0 %v13456_v29  ;;  %20050 = vst [vmem:[#allocation16_spill] sm:$0xff] %v18769_v13  ;;  %v13408_v20 = vcombine.high %v9858_v10, %v9866_v1  ;;  %v9940_v4 = vld [vmem:[%s19932_s5 + $0x2a8] sm:$0xff]  ;;  %v9923_v55 = vld [vmem:[%s19932_s5 + $0x220] sm:$0xff] }
0x1c9d   :  { %v15865_v47 = vpop.eup %15864  ;;  %v9835_v36 = vmul.f32 %v18646_v63, %v9821_v48  ;;  %v13407_v59 = vcombine.low %v9858_v10, %v9866_v1  ;;  %v13523_v30 = vcombine.low %v9972_v16, %v9980_v3  ;;  %v9948_v29 = vld [vmem:[%s19932_s5 + $0x2e8] sm:$0xff]  ;;  %v9907_v21 = vld [vmem:[%s19932_s5 + $0x1a0] sm:$0xff]  ;;  %v13474_v48 = vcombine.high %v9923_v55, %v9931_v60 }
0x1c9e   :  { %v9822_v32 = vmul.f32 %v15865_v47, %v18571_v2  ;;  %v18773_v6 = vadd.f32 %v18653_v58, %v9834_v62  ;;  %v13439_v2 = vcombine.low %v9890_v28, %v9898_v61  ;;  %v13490_v47 = vcombine.high %v9939_v40, %v9947_v24  ;;  %v9915_v22 = vld [vmem:[%s19932_s5 + $0x1e0] sm:$0xff]  ;;  %v9892_v10 = vld [vmem:[%s19932_s5 + $0x128] sm:$0xff] }
0x1c9f   :  { %10862 = vmatpush1.bf16.msra.mxu1 %v13453_v52  ;;  %10935 = vmatpush1.bf16.msra.mxu0 %v13455_v27  ;;  %v18816_v12 = vadd.f32 %v18653_v58, %v9835_v36  ;;  %v9924_v52 = vld [vmem:[%s19932_s5 + $0x228] sm:$0xff]  ;;  %v13492_v62 = vcombine.high %v9940_v4, %v9948_v29  ;;  %v13441_v16 = vcombine.low %v9891_v43, %v9899_v53 }
0x1ca0   :  { %20051 = vst [vmem:[#allocation12_spill] sm:$0xff] %v18773_v6  ;;  %v18792_v25 = vpack.c.bf16 %v18773_v6, %v18769_v13  ;;  %v9836_v57 = vmul.f32 %v18646_v63, %v9822_v32  ;;  %10863 = vmatprep.subr.bf16.mxu1 %v13438_v18  ;;  %10936 = vmatprep.subr.bf16.mxu0 %v13440_v8  ;;  %v9971_v63 = vld [vmem:[%s19932_s5 + $0x3a0] sm:$0xff]  ;;  %v9932_v27 = vld [vmem:[%s19932_s5 + $0x268] sm:$0xff] }
0x1ca1   :  { %20053 = vst [vmem:[#allocation14_spill] sm:$0xff] %v18816_v12  ;;  %v13522_v50 = vcombine.high %v9971_v63, %v9979_v5  ;;  %v13521_v41 = vcombine.low %v9971_v63, %v9979_v5  ;;  %v13489_v18 = vcombine.low %v9939_v40, %v9947_v24  ;;  %v13491_v8 = vcombine.low %v9940_v4, %v9948_v29  ;;  %v9908_v32 = vld [vmem:[%s19932_s5 + $0x1a8] sm:$0xff]  ;;  %v9974_v40 = vld [vmem:[%s19932_s5 + $0x3b8] sm:$0xff] }
0x1ca2   :  { %10760 = vmatmul.mubr.bf16.gmra.mxu1 %v18792_v25  ;;  %10833 = vmatmul.mubr.bf16.gmra.mxu0 %v18792_v25  ;;  %v18799_v38 = vadd.f32 %v18653_v58, %v9836_v57  ;;  %v9955_v58 = vld [vmem:[%s19932_s5 + $0x320] sm:$0xff]  ;;  %v13476_v54 = vcombine.high %v9924_v52, %v9932_v27  ;;  %v9900_v1 = vld [vmem:[%s19932_s5 + $0x168] sm:$0xff]  ;;  %v13458_v57 = vcombine.high %v9907_v21, %v9915_v22  ;;  %v9982_v24 = vld [vmem:[%s19932_s5 + $0x3f8] sm:$0xff] }
0x1ca3   :  { %10864 = vmatpush1.bf16.msra.mxu1 %v13437_v7  ;;  %10937 = vmatpush1.bf16.msra.mxu0 %v13439_v2  ;;  %v13506_v28 = vcombine.high %v9955_v58, %v9963_v17  ;;  %v13505_v61 = vcombine.low %v9955_v58, %v9963_v17  ;;  %v13473_v7 = vcombine.low %v9923_v55, %v9931_v60  ;;  %v9958_v55 = vld [vmem:[%s19932_s5 + $0x338] sm:$0xff] }
0x1ca4   :  { %20052 = vst [vmem:[#allocation17_spill] sm:$0xff] %v18799_v38  ;;  %10769 = vmatprep.mubr.bf16.mxu1 %v20045_v33  ;;  %10842 = vmatprep.mubr.bf16.mxu0 %v20045_v33  ;;  %v18820_v9 = vpack.c.bf16 %v18799_v38, %v18816_v12  ;;  %v13475_v2 = vcombine.low %v9924_v52, %v9932_v27  ;;  %v9966_v60 = vld [vmem:[%s19932_s5 + $0x378] sm:$0xff] }
0x1ca5   :  { %10865 = vmatprep.subr.bf16.mxu1 %v13422_v35  ;;  %10938 = vmatprep.subr.bf16.mxu0 %v13424_v49  ;;  %v13460_v35 = vcombine.high %v9908_v32, %v9916_v31  ;;  %v13457_v49 = vcombine.low %v9907_v21, %v9915_v22  ;;  %v13459_v36 = vcombine.low %v9908_v32, %v9916_v31  ;;  %v9942_v32 = vld [vmem:[%s19932_s5 + $0x2b8] sm:$0xff] }
0x1ca6   :  { %v13442_v63 = vcombine.high %v9891_v43, %v9899_v53  ;;  %v13444_v5 = vcombine.high %v9892_v10, %v9900_v1  ;;  %v13443_v3 = vcombine.low %v9892_v10, %v9900_v1  ;;  %v13528_v27 = vcombine.high %v9974_v40, %v9982_v24  ;;  %v9950_v31 = vld [vmem:[%s19932_s5 + $0x2f8] sm:$0xff] }
0x1ca7   :  { %10866 = vmatpush1.bf16.msra.mxu1 %v13421_v45  ;;  %10939 = vmatpush1.bf16.msra.mxu0 %v13423_v26  ;;  %v9875_v45 = vld [vmem:[%s19932_s5 + $0xa0] sm:$0xff]  ;;  %v13512_v22 = vcombine.high %v9958_v55, %v9966_v60  ;;  %v13496_v53 = vcombine.high %v9942_v32, %v9950_v31  ;;  %v9926_v10 = vld [vmem:[%s19932_s5 + $0x238] sm:$0xff] }
0x1ca8   :  { %10867 = vmatprep.subr.bf16.mxu1 %v13406_v23  ;;  %10940 = vmatprep.subr.bf16.mxu0 %v13408_v20  ;;  %v9883_v26 = vld [vmem:[%s19932_s5 + $0xe0] sm:$0xff]  ;;  %v9876_v23 = vld [vmem:[%s19932_s5 + $0xa8] sm:$0xff]  ;;  %v9934_v1 = vld [vmem:[%s19932_s5 + $0x278] sm:$0xff] }
0x1ca9   :  { %v9884_v20 = vld [vmem:[%s19932_s5 + $0xe8] sm:$0xff]  ;;  %v13426_v58 = vcombine.high %v9875_v45, %v9883_v26  ;;  %v13425_v11 = vcombine.low %v9875_v45, %v9883_v26  ;;  %v13480_v26 = vcombine.high %v9926_v10, %v9934_v1 }
0x1caa   :  { %10770 = vmatmul.mubr.bf16.gmra.mxu1 %v18820_v9  ;;  %10843 = vmatmul.mubr.bf16.gmra.mxu0 %v18820_v9  ;;  %v13428_v17 = vcombine.high %v9876_v23, %v9884_v20  ;;  %v13427_v19 = vcombine.low %v9876_v23, %v9884_v20  ;;  %v9910_v23 = vld [vmem:[%s19932_s5 + $0x1b8] sm:$0xff] }
0x1cab   :  { %10868 = vmatpush1.bf16.msra.mxu1 %v13405_v39  ;;  %10941 = vmatpush1.bf16.msra.mxu0 %v13407_v59  ;;  %v9859_v39 = vld [vmem:[%s19932_s5 + $0x20] sm:$0xff]  ;;  %v9918_v20 = vld [vmem:[%s19932_s5 + $0x1f8] sm:$0xff] }
0x1cac   :  { %10885 = vmatprep.mubr.bf16.mxu1 %v20045_v33  ;;  %10958 = vmatprep.mubr.bf16.mxu0 %v20045_v33  ;;  %v9867_v59 = vld [vmem:[%s19932_s5 + $0x60] sm:$0xff] }
0x1cad   :  { %10999 = vmatprep.subr.bf16.mxu1 %v13522_v50  ;;  %11072 = vmatprep.subr.bf16.mxu0 %v13524_v0  ;;  %v9860_v50 = vld [vmem:[%s19932_s5 + $0x28] sm:$0xff]  ;;  %v13410_v4 = vcombine.high %v9859_v39, %v9867_v59 }
0x1cae   :  { %v9868_v0 = vld [vmem:[%s19932_s5 + $0x68] sm:$0xff] }
0x1caf   :  { %v13412_v29 = vcombine.high %v9860_v50, %v9868_v0 }
0x1cb2   :  { %10886 = vmatmul.mubr.bf16.vlgmr.msra.gmra.mxu1 %v18681_v46  ;;  %10959 = vmatmul.mubr.bf16.vlgmr.msra.gmra.mxu0 %v18681_v46 }
0x1cb3   :  { %11000 = vmatpush1.bf16.msra.mxu1 %v13521_v41  ;;  %11073 = vmatpush1.bf16.msra.mxu0 %v13523_v30  ;;  %v9973_v41 = vld [vmem:[%s19932_s5 + $0x3b0] sm:$0xff] }
0x1cb4   :  { %11001 = vmatprep.subr.bf16.mxu1 %v13506_v28  ;;  %11074 = vmatprep.subr.bf16.mxu0 %v13508_v51  ;;  %v9981_v30 = vld [vmem:[%s19932_s5 + $0x3f0] sm:$0xff]  ;;  %v13409_v28 = vcombine.low %v9859_v39, %v9867_v59  ;;  %v13411_v51 = vcombine.low %v9860_v50, %v9868_v0  ;;  %v9894_v39 = vld [vmem:[%s19932_s5 + $0x138] sm:$0xff]  ;;  %v13464_v0 = vcombine.high %v9910_v23, %v9918_v20 }
0x1cb5   :  { %10895 = vmatprep.mubr.bf16.mxu1 %v20045_v33  ;;  %10968 = vmatprep.mubr.bf16.mxu0 %v20045_v33  ;;  %v13526_v52 = vcombine.high %v9973_v41, %v9981_v30  ;;  %v9902_v59 = vld [vmem:[%s19932_s5 + $0x178] sm:$0xff] }
0x1cb7   :  { %11002 = vmatpush1.bf16.msra.mxu1 %v13505_v61  ;;  %11075 = vmatpush1.bf16.msra.mxu0 %v13507_v34  ;;  %v9957_v61 = vld [vmem:[%s19932_s5 + $0x330] sm:$0xff] }
0x1cb8   :  { %11003 = vmatprep.subr.bf16.mxu1 %v13490_v47  ;;  %11076 = vmatprep.subr.bf16.mxu0 %v13492_v62  ;;  %v9965_v34 = vld [vmem:[%s19932_s5 + $0x370] sm:$0xff]  ;;  %v13525_v47 = vcombine.low %v9973_v41, %v9981_v30  ;;  %v13527_v62 = vcombine.low %v9974_v40, %v9982_v24  ;;  %v9878_v41 = vld [vmem:[%s19932_s5 + $0xb8] sm:$0xff]  ;;  %v13448_v40 = vcombine.high %v9894_v39, %v9902_v59 }
0x1cb9   :  { %v13510_v21 = vcombine.high %v9957_v61, %v9965_v34  ;;  %v9886_v24 = vld [vmem:[%s19932_s5 + $0xf8] sm:$0xff] }
0x1cba   :  { %10896 = vmatmul.mubr.bf16.gmra.mxu1 %v18730_v56  ;;  %10969 = vmatmul.mubr.bf16.gmra.mxu0 %v18730_v56 }
0x1cbb   :  { %11004 = vmatpush1.bf16.msra.mxu1 %v13489_v18  ;;  %11077 = vmatpush1.bf16.msra.mxu0 %v13491_v8  ;;  %v9941_v18 = vld [vmem:[%s19932_s5 + $0x2b0] sm:$0xff] }
0x1cbc   :  { %11005 = vmatprep.subr.bf16.mxu1 %v13474_v48  ;;  %11078 = vmatprep.subr.bf16.mxu0 %v13476_v54  ;;  %v9949_v8 = vld [vmem:[%s19932_s5 + $0x2f0] sm:$0xff]  ;;  %v13509_v48 = vcombine.low %v9957_v61, %v9965_v34  ;;  %v13511_v54 = vcombine.low %v9958_v55, %v9966_v60  ;;  %v13432_v34 = vcombine.high %v9878_v41, %v9886_v24  ;;  %v9862_v55 = vld [vmem:[%s19932_s5 + $0x38] sm:$0xff] }
0x1cbd   :  { %10905 = vmatprep.mubr.bf16.mxu1 %v20045_v33  ;;  %10978 = vmatprep.mubr.bf16.mxu0 %v20045_v33  ;;  %v13494_v43 = vcombine.high %v9941_v18, %v9949_v8  ;;  %v9870_v60 = vld [vmem:[%s19932_s5 + $0x78] sm:$0xff] }
0x1cbf   :  { %11006 = vmatpush1.bf16.msra.mxu1 %v13473_v7  ;;  %11079 = vmatpush1.bf16.msra.mxu0 %v13475_v2  ;;  %v9925_v7 = vld [vmem:[%s19932_s5 + $0x230] sm:$0xff] }
0x1cc0   :  { %11007 = vmatprep.subr.bf16.mxu1 %v13458_v57  ;;  %11080 = vmatprep.subr.bf16.mxu0 %v13460_v35  ;;  %v9933_v2 = vld [vmem:[%s19932_s5 + $0x270] sm:$0xff]  ;;  %v13493_v57 = vcombine.low %v9941_v18, %v9949_v8  ;;  %v13495_v35 = vcombine.low %v9942_v32, %v9950_v31  ;;  %v13415_v8 = vcombine.low %v9862_v55, %v9870_v60  ;;  %v15404_v32 = vld [vmem:[%s19935_s7 + $0x38] sm:$0xff]  }
0x1cc1   :  { %v13478_v45 = vcombine.high %v9925_v7, %v9933_v2  ;;  %v15405_v31 = vld [vmem:[%s19935_s7 + $0xb8] sm:$0xff]  }
0x1cc2   :  { %10906 = vmatmul.mubr.bf16.gmra.mxu1 %v18792_v25  ;;  %10979 = vmatmul.mubr.bf16.gmra.mxu0 %v18792_v25 }
0x1cc3   :  { %11008 = vmatpush1.bf16.msra.mxu1 %v13457_v49  ;;  %11081 = vmatpush1.bf16.msra.mxu0 %v13459_v36  ;;  %v9909_v49 = vld [vmem:[%s19932_s5 + $0x1b0] sm:$0xff] }
0x1cc4   :  { %11009 = vmatprep.subr.bf16.mxu1 %v13442_v63  ;;  %11082 = vmatprep.subr.bf16.mxu0 %v13444_v5  ;;  %v9917_v36 = vld [vmem:[%s19932_s5 + $0x1f0] sm:$0xff]  ;;  %v13477_v63 = vcombine.low %v9925_v7, %v9933_v2  ;;  %v13479_v5 = vcombine.low %v9926_v10, %v9934_v1  ;;  %v15413_v10 = vld [vmem:[%s19935_s7 + $0xa8] sm:$0xff]   ;;  %v15414_v1 = vld [vmem:[%s19935_s7 + $0x60] sm:$0xff]  }
0x1cc5   :  { %10915 = vmatprep.mubr.bf16.mxu1 %v20045_v33  ;;  %10988 = vmatprep.mubr.bf16.mxu0 %v20045_v33  ;;  %v13462_v50 = vcombine.high %v9909_v49, %v9917_v36  ;;  %v15408_v7 = vld [vmem:[%s19935_s7 + $0x30] sm:$0xff]  }
0x1cc6   :  { %v15409_v2 = vld [vmem:[%s19935_s7 + $0xb0] sm:$0xff]  }
0x1cc7   :  { %11010 = vmatpush1.bf16.msra.mxu1 %v13441_v16  ;;  %11083 = vmatpush1.bf16.msra.mxu0 %v13443_v3  ;;  %v9893_v16 = vld [vmem:[%s19932_s5 + $0x130] sm:$0xff] }
0x1cc8   :  { %11011 = vmatprep.subr.bf16.mxu1 %v13426_v58  ;;  %11084 = vmatprep.subr.bf16.mxu0 %v13428_v17  ;;  %v9901_v3 = vld [vmem:[%s19932_s5 + $0x170] sm:$0xff]  ;;  %v13461_v58 = vcombine.low %v9909_v49, %v9917_v36  ;;  %v13463_v17 = vcombine.low %v9910_v23, %v9918_v20  ;;  %v15417_v49 = vld [vmem:[%s19935_s7 + $0xa0] sm:$0xff]   ;;  %v15419_v36 = vld [vmem:[%s19935_s7 + $0xd8] sm:$0xff]  }
0x1cc9   :  { %v13446_v30 = vcombine.high %v9893_v16, %v9901_v3  ;;  %v15422_v23 = vld [vmem:[%s19935_s7 + $0x50] sm:$0xff]  }
0x1cca   :  { %10916 = vmatmul.mubr.bf16.gmra.mxu1 %v18820_v9  ;;  %10989 = vmatmul.mubr.bf16.gmra.mxu0 %v18820_v9  ;;  %v15423_v20 = vld [vmem:[%s19935_s7 + $0xd0] sm:$0xff]  }
0x1ccb   :  { %11012 = vmatpush1.bf16.msra.mxu1 %v13425_v11  ;;  %11085 = vmatpush1.bf16.msra.mxu0 %v13427_v19  ;;  %v9877_v11 = vld [vmem:[%s19932_s5 + $0xb0] sm:$0xff] }
0x1ccc   :  { %11013 = vmatprep.subr.bf16.mxu1 %v13410_v4  ;;  %11086 = vmatprep.subr.bf16.mxu0 %v13412_v29  ;;  %v9885_v19 = vld [vmem:[%s19932_s5 + $0xf0] sm:$0xff]  ;;  %v13445_v4 = vcombine.low %v9893_v16, %v9901_v3  ;;  %v13447_v29 = vcombine.low %v9894_v39, %v9902_v59  ;;  %v15428_v16 = vld [vmem:[%s19935_s7 + $0x8] sm:$0xff]   ;;  %v15430_v39 = vld [vmem:[%s19935_s7 + $0x40] sm:$0xff]  }
0x1ccd   :  { %11031 = vmatprep.mubr.bf16.mxu1 %v20045_v33  ;;  %11104 = vmatprep.mubr.bf16.mxu0 %v20045_v33  ;;  %v13430_v61 = vcombine.high %v9877_v11, %v9885_v19  ;;  %v15429_v3 = vld [vmem:[%s19935_s7 + $0x88] sm:$0xff]   ;;  %v15431_v59 = vld [vmem:[%s19935_s7 + $0xc0] sm:$0xff]  }
0x1ccf   :  { %11014 = vmatpush1.bf16.msra.mxu1 %v13409_v28  ;;  %11087 = vmatpush1.bf16.msra.mxu0 %v13411_v51  ;;  %v9861_v28 = vld [vmem:[%s19932_s5 + $0x30] sm:$0xff] }
0x1cd0   :  { %11145 = vmatprep.subr.bf16.mxu1 %v13526_v52  ;;  %11218 = vmatprep.subr.bf16.mxu0 %v13528_v27  ;;  %v9869_v51 = vld [vmem:[%s19932_s5 + $0x70] sm:$0xff]  ;;  %v13429_v52 = vcombine.low %v9877_v11, %v9885_v19  ;;  %v13431_v27 = vcombine.low %v9878_v41, %v9886_v24  ;;  %v19158_v19 = vld [vmem:[%s19936_s6] sm:$0xff] }
0x1cd1   :  { %v13413_v18 = vcombine.low %v9861_v28, %v9869_v51 }
0x1cd2   :  { %11032 = vmatmul.mubr.bf16.vlgmr.msra.gmra.mxu1 %v18681_v46  ;;  %11105 = vmatmul.mubr.bf16.vlgmr.msra.gmra.mxu0 %v18681_v46 }
0x1cd3   :  { %11146 = vmatpush1.bf16.msra.mxu1 %v13525_v47  ;;  %11219 = vmatpush1.bf16.msra.mxu0 %v13527_v62  ;;  %v13414_v47 = vcombine.high %v9861_v28, %v9869_v51  ;;  %v13416_v62 = vcombine.high %v9862_v55, %v9870_v60  ;;  %v20057_v51 = vld [vmem:[#allocation6_spill] sm:$0xff] }
0x1cd4   :  { %11147 = vmatprep.subr.bf16.mxu1 %v13510_v21  ;;  %11220 = vmatprep.subr.bf16.mxu0 %v13512_v22  ;;  %v15402_v21 = vld [vmem:[%s19935_s7 + $0x78] sm:$0xff]  }
0x1cd5   :  { %11041 = vmatprep.mubr.bf16.mxu1 %v20045_v33  ;;  %11114 = vmatprep.mubr.bf16.mxu0 %v20045_v33  ;;  %v15403_v22 = vld [vmem:[%s19935_s7 + $0xf8] sm:$0xff]  }
0x1cd7   :  { %11148 = vmatpush1.bf16.msra.mxu1 %v13509_v48  ;;  %11221 = vmatpush1.bf16.msra.mxu0 %v13511_v54  ;;  %v15406_v48 = vld [vmem:[%s19935_s7 + $0x70] sm:$0xff]  }
0x1cd8   :  { %11149 = vmatprep.subr.bf16.mxu1 %v13494_v43  ;;  %11222 = vmatprep.subr.bf16.mxu0 %v13496_v53  ;;  %v15407_v54 = vld [vmem:[%s19935_s7 + $0xf0] sm:$0xff]   ;;  %v15411_v43 = vld [vmem:[%s19935_s7 + $0xe8] sm:$0xff]  }
0x1cd9   :  { %v15412_v53 = vld [vmem:[%s19935_s7 + $0x28] sm:$0xff]  }
0x1cda   :  { %11042 = vmatmul.mubr.bf16.gmra.mxu1 %v18730_v56  ;;  %11115 = vmatmul.mubr.bf16.gmra.mxu0 %v18730_v56 }
0x1cdb   :  { %11150 = vmatpush1.bf16.msra.mxu1 %v13493_v57  ;;  %11223 = vmatpush1.bf16.msra.mxu0 %v13495_v35  ;;  %v15415_v57 = vld [vmem:[%s19935_s7 + $0xe0] sm:$0xff]  }
0x1cdc   :  { %11151 = vmatprep.subr.bf16.mxu1 %v13478_v45  ;;  %11224 = vmatprep.subr.bf16.mxu0 %v13480_v26  ;;  %v15416_v35 = vld [vmem:[%s19935_s7 + $0x20] sm:$0xff]   ;;  %v15420_v45 = vld [vmem:[%s19935_s7 + $0x18] sm:$0xff]  }
0x1cdd   :  { %11051 = vmatprep.mubr.bf16.mxu1 %v20045_v33  ;;  %11124 = vmatprep.mubr.bf16.mxu0 %v20045_v33  ;;  %v15421_v26 = vld [vmem:[%s19935_s7 + $0x98] sm:$0xff]  }
0x1cdf   :  { %11152 = vmatpush1.bf16.msra.mxu1 %v13477_v63  ;;  %11225 = vmatpush1.bf16.msra.mxu0 %v13479_v5  ;;  %v15424_v63 = vld [vmem:[%s19935_s7 + $0x10] sm:$0xff]  }
0x1ce0   :  { %11153 = vmatprep.subr.bf16.mxu1 %v13462_v50  ;;  %11226 = vmatprep.subr.bf16.mxu0 %v13464_v0  ;;  %v15425_v5 = vld [vmem:[%s19935_s7 + $0x90] sm:$0xff]   ;;  %v15432_v50 = vld [vmem:[%s19935_s7] sm:$0xff]  }
0x1ce1   :  { %v15433_v0 = vld [vmem:[%s19935_s7 + $0x80] sm:$0xff]  }
0x1ce2   :  { %11052 = vmatmul.mubr.bf16.gmra.mxu1 %v18792_v25  ;;  %11125 = vmatmul.mubr.bf16.gmra.mxu0 %v18792_v25 }
0x1ce3   :  { %11154 = vmatpush1.bf16.msra.mxu1 %v13461_v58  ;;  %11227 = vmatpush1.bf16.msra.mxu0 %v13463_v17  ;;  %v15434_v58 = vld [vmem:[%s19935_s7 + $0x178] sm:$0xff]   ;;  %v20054_v17 = vld [vmem:[#allocation3_spill] sm:$0xff] }
0x1ce4   :  { %11155 = vmatprep.subr.bf16.mxu1 %v13446_v30  ;;  %11228 = vmatprep.subr.bf16.mxu0 %v13448_v40  ;;  %v10001_v11 = vsub.s32 3, %v20054_v17  ;;  %v20055_v40 = vld [vmem:[#allocation4_spill] sm:$0xff] }
0x1ce5   :  { %11061 = vmatprep.mubr.bf16.mxu1 %v20045_v33  ;;  %11134 = vmatprep.mubr.bf16.mxu0 %v20045_v33  ;;  %v19162_v24 = vrot.slane %v19158_v19, %v20055_v40 }
0x1ce7   :  { %11156 = vmatpush1.bf16.msra.mxu1 %v13445_v4  ;;  %11229 = vmatpush1.bf16.msra.mxu0 %v13447_v29  ;;  %v19167_v4 = vrot.slane %v19158_v19, %v10001_v11  ;;  %v20056_v29 = vld [vmem:[#allocation5_spill] sm:$0xff] }
0x1ce8   :  { %11157 = vmatprep.subr.bf16.mxu1 %v13430_v61  ;;  %11230 = vmatprep.subr.bf16.mxu0 %v13432_v34  ;;  %v19171_v28 = vrot.slane %v19158_v19, %v20056_v29  ;;  %v19175_v61 = vrot.slane %v19158_v19, %v20057_v51 }
0x1cea   :  { %11062 = vmatmul.mubr.bf16.gmra.mxu1 %v18820_v9  ;;  %11135 = vmatmul.mubr.bf16.gmra.mxu0 %v18820_v9 }
0x1ceb   :  { %11158 = vmatpush1.bf16.msra.mxu1 %v13429_v52  ;;  %11231 = vmatpush1.bf16.msra.mxu0 %v13431_v27 }
0x1cec   :  { %11159 = vmatprep.subr.bf16.mxu1 %v13414_v47  ;;  %11232 = vmatprep.subr.bf16.mxu0 %v13416_v62 }
0x1ced   :  { %11177 = vmatprep.mubr.bf16.mxu1 %v20045_v33  ;;  %11250 = vmatprep.mubr.bf16.mxu0 %v20045_v33 }
0x1cef   :  { %11160 = vmatpush1.bf16.msra.mxu1 %v13413_v18  ;;  %11233 = vmatpush1.bf16.msra.mxu0 %v13415_v8 }
0x1cf0   :  { %14025 = vmatprep.subr.bf16.mxu1 %v15402_v21  ;;  %14065 = vmatprep.subr.bf16.mxu0 %v15403_v22 }
0x1cf2   :  { %11178 = vmatmul.mubr.bf16.vlgmr.msra.gmra.mxu1 %v18681_v46  ;;  %11251 = vmatmul.mubr.bf16.vlgmr.msra.gmra.mxu0 %v18681_v46  ;;  %v15410_v46 = vld [vmem:[%s19935_s7 + $0x68] sm:$0xff]  }
0x1cf3   :  { %11187 = vmatprep.mubr.bf16.mxu1 %v20045_v33  ;;  %11260 = vmatprep.mubr.bf16.mxu0 %v20045_v33 }
0x1cf4   :  { %14026 = vmatpush3.bf16.msra.mxu1 %v15404_v32  ;;  %14066 = vmatpush3.bf16.msra.mxu0 %v15405_v31 }
0x1cf5   :  { %14027 = vmatprep.subr.bf16.mxu1 %v15406_v48  ;;  %14067 = vmatprep.subr.bf16.mxu0 %v15407_v54 }
0x1cf8   :  { %14028 = vmatpush3.bf16.msra.mxu1 %v15408_v7  ;;  %14068 = vmatpush3.bf16.msra.mxu0 %v15409_v2 }
0x1cf9   :  { %14029 = vmatprep.subr.bf16.mxu1 %v15410_v46  ;;  %14069 = vmatprep.subr.bf16.mxu0 %v15411_v43 }
0x1cfa   :  { %11188 = vmatmul.mubr.bf16.gmra.mxu1 %v18730_v56  ;;  %11261 = vmatmul.mubr.bf16.gmra.mxu0 %v18730_v56  ;;  %v15418_v56 = vld [vmem:[%s19935_s7 + $0x58] sm:$0xff]  }
0x1cfb   :  { %11197 = vmatprep.mubr.bf16.mxu1 %v20045_v33  ;;  %11270 = vmatprep.mubr.bf16.mxu0 %v20045_v33 }
0x1cfc   :  { %14030 = vmatpush3.bf16.msra.mxu1 %v15412_v53  ;;  %14070 = vmatpush3.bf16.msra.mxu0 %v15413_v10 }
0x1cfd   :  { %14031 = vmatprep.subr.bf16.mxu1 %v15414_v1  ;;  %14071 = vmatprep.subr.bf16.mxu0 %v15415_v57 }
0x1d00   :  { %14032 = vmatpush3.bf16.msra.mxu1 %v15416_v35  ;;  %14072 = vmatpush3.bf16.msra.mxu0 %v15417_v49 }
0x1d01   :  { %14033 = vmatprep.subr.bf16.mxu1 %v15418_v56  ;;  %14073 = vmatprep.subr.bf16.mxu0 %v15419_v36 }
0x1d02   :  { %11198 = vmatmul.mubr.bf16.gmra.mxu1 %v18792_v25  ;;  %11271 = vmatmul.mubr.bf16.gmra.mxu0 %v18792_v25  ;;  %v15426_v25 = vld [vmem:[%s19935_s7 + $0x48] sm:$0xff]  }
0x1d03   :  { %11207 = vmatprep.mubr.bf16.mxu1 %v20045_v33  ;;  %11280 = vmatprep.mubr.bf16.mxu0 %v20045_v33  ;;  %v15427_v33 = vld [vmem:[%s19935_s7 + $0xc8] sm:$0xff]  }
0x1d04   :  { %14034 = vmatpush3.bf16.msra.mxu1 %v15420_v45  ;;  %14074 = vmatpush3.bf16.msra.mxu0 %v15421_v26  ;;  %v15436_v26 = vld [vmem:[%s19935_s7 + $0x138] sm:$0xff]  }
0x1d05   :  { %14035 = vmatprep.subr.bf16.mxu1 %v15422_v23  ;;  %14075 = vmatprep.subr.bf16.mxu0 %v15423_v20  ;;  %v15437_v23 = vld [vmem:[%s19935_s7 + $0x1b8] sm:$0xff]  }
0x1d08   :  { %14036 = vmatpush3.bf16.msra.mxu1 %v15424_v63  ;;  %14076 = vmatpush3.bf16.msra.mxu0 %v15425_v5 }
0x1d09   :  { %14037 = vmatprep.subr.bf16.mxu1 %v15426_v25  ;;  %14077 = vmatprep.subr.bf16.mxu0 %v15427_v33 }
0x1d0a   :  { %11208 = vmatmul.mubr.bf16.gmra.mxu1 %v18820_v9  ;;  %11281 = vmatmul.mubr.bf16.gmra.mxu0 %v18820_v9  ;;  %v15435_v9 = vld [vmem:[%s19935_s7 + $0x1f8] sm:$0xff]  }
0x1d0c   :  { %14038 = vmatpush3.bf16.msra.mxu1 %v15428_v16  ;;  %14078 = vmatpush3.bf16.msra.mxu0 %v15429_v3  ;;  %v15438_v16 = vld [vmem:[%s19935_s7 + $0x170] sm:$0xff]  }
0x1d0d   :  { %14039 = vmatprep.subr.bf16.mxu1 %v15430_v39  ;;  %14079 = vmatprep.subr.bf16.mxu0 %v15431_v59  ;;  %v15439_v3 = vld [vmem:[%s19935_s7 + $0x1f0] sm:$0xff]  }
0x1d10   :  { %14040 = vmatpush3.bf16.msra.mxu1 %v15432_v50  ;;  %14080 = vmatpush3.bf16.msra.mxu0 %v15433_v0 }
0x1d11   :  { %14105 = vmatprep.subr.bf16.mxu1 %v15434_v58  ;;  %14145 = vmatprep.subr.bf16.mxu0 %v15435_v9 }
0x1d4e   :  { %v10741_v41 = vpop.f32.mrf.mxu1  ;;  %v10814_v30 = vpop.f32.mrf.mxu0 }
0x1d4f   :  { %v10742_v8 = vadd.f32 %v10741_v41, %v19171_v28  ;;  %v10815_v21 = vadd.f32 %v10814_v30, %v19175_v61 }
0x1d50   :  { %v10743_v34 = vpop.f32.mrf.mxu1  ;;  %v10816_v55 = vpop.f32.mrf.mxu0 }
0x1d51   :  { %v10744_v27 = vadd.f32 %v10743_v34, %v19162_v24  ;;  %v10817_v47 = vadd.f32 %v10816_v55, %v19167_v4  ;;  %v11291_v57 = vmax.f32 %v10742_v8, 0.0  ;;  %v11293_v35 = vmax.f32 %v10815_v21, 0.0  ;;  %v15440_v55 = vld [vmem:[%s19935_s7 + $0x130] sm:$0xff]  }
0x1d52   :  { %v10745_v60 = vpop.f32.mrf.mxu1  ;;  %v10818_v52 = vpop.f32.mrf.mxu0 }
0x1d53   :  { %v10746_v62 = vadd.f32 %v10745_v60, %v19171_v28  ;;  %v10819_v18 = vadd.f32 %v10818_v52, %v19175_v61  ;;  %v11292_v43 = vmax.f32 %v10744_v27, 0.0  ;;  %v11294_v53 = vmax.f32 %v10817_v47, 0.0  ;;  %v15441_v60 = vld [vmem:[%s19935_s7 + $0x1b0] sm:$0xff]   ;;  %v15442_v47 = vld [vmem:[%s19935_s7 + $0x168] sm:$0xff]  }
0x1d54   :  { %v10747_v22 = vpop.f32.mrf.mxu1  ;;  %v10820_v32 = vpop.f32.mrf.mxu0 }
0x1d55   :  { %v10748_v31 = vadd.f32 %v10747_v22, %v19162_v24  ;;  %v10821_v48 = vadd.f32 %v10820_v32, %v19167_v4  ;;  %v11307_v54 = vmax.f32 %v10746_v62, 0.0  ;;  %v11309_v7 = vmax.f32 %v10819_v18, 0.0  ;;  %v15443_v62 = vld [vmem:[%s19935_s7 + $0x1e8] sm:$0xff]  }
0x1d56   :  { %v10751_v2 = vpop.f32.mrf.mxu1  ;;  %v10824_v46 = vpop.f32.mrf.mxu0 }
0x1d57   :  { %v11308_v10 = vmax.f32 %v10748_v31, 0.0  ;;  %v11310_v1 = vmax.f32 %v10821_v48, 0.0  ;;  %v11419_v20 = vpack.c.bf16 %v11307_v54, %v11291_v57  ;;  %v11421_v63 = vpack.c.bf16 %v11309_v7, %v11293_v35  ;;  %v15444_v7 = vld [vmem:[%s19935_s7 + $0x128] sm:$0xff]   ;;  %v15447_v57 = vld [vmem:[%s19935_s7 + $0x1e0] sm:$0xff]  }
0x1d58   :  { %v10753_v49 = vpop.f32.mrf.mxu1  ;;  %v10826_v56 = vpop.f32.mrf.mxu0  ;;  %v10752_v0 = vadd.f32 %v10751_v2, %v19171_v28  ;;  %v10825_v58 = vadd.f32 %v10824_v46, %v19175_v61  ;;  %v15445_v2 = vld [vmem:[%s19935_s7 + $0x1a8] sm:$0xff]  }
0x1d59   :  { %v11420_v36 = vpack.c.bf16 %v11308_v10, %v11292_v43  ;;  %v11422_v45 = vpack.c.bf16 %v11310_v1, %v11294_v53  ;;  %v10754_v5 = vadd.f32 %v10753_v49, %v19162_v24  ;;  %v10827_v39 = vadd.f32 %v10826_v56, %v19167_v4  ;;  %v15446_v1 = vld [vmem:[%s19935_s7 + $0x160] sm:$0xff]  }
0x1d5a   :  { %v10755_v25 = vpop.f32.mrf.mxu1  ;;  %v10828_v33 = vpop.f32.mrf.mxu0  ;;  %v11323_v32 = vmax.f32 %v10752_v0, 0.0  ;;  %v11325_v31 = vmax.f32 %v10825_v58, 0.0  ;;  %v15448_v56 = vld [vmem:[%s19935_s7 + $0x120] sm:$0xff]   ;;  %v15452_v58 = vld [vmem:[%s19935_s7 + $0x118] sm:$0xff]  }
0x1d5b   :  { %v10756_v59 = vadd.f32 %v10755_v25, %v19171_v28  ;;  %v10829_v50 = vadd.f32 %v10828_v33, %v19175_v61  ;;  %12546 = vmatprep.mubr.bf16.mxu1 %v11420_v36  ;;  %12611 = vmatprep.mubr.bf16.mxu0 %v11422_v45  ;;  %v11324_v18 = vmax.f32 %v10754_v5, 0.0  ;;  %v11326_v8 = vmax.f32 %v10827_v39, 0.0  ;;  %v15449_v36 = vld [vmem:[%s19935_s7 + $0x1a0] sm:$0xff]  }
0x1d5c   :  { %v10757_v9 = vpop.f32.mrf.mxu1  ;;  %v10830_v41 = vpop.f32.mrf.mxu0  ;;  %12547 = vmatmul.mubr.bf16.vlgmr.msra.gmra.mxu1 %v11419_v20  ;;  %12612 = vmatmul.mubr.bf16.vlgmr.msra.gmra.mxu0 %v11421_v63  ;;  %v15451_v20 = vld [vmem:[%s19935_s7 + $0x1d8] sm:$0xff]  }
0x1d5d   :  { %v10758_v30 = vadd.f32 %v10757_v9, %v19162_v24  ;;  %v10831_v34 = vadd.f32 %v10830_v41, %v19167_v4  ;;  %14106 = vmatpush3.bf16.msra.mxu1 %v15436_v26  ;;  %14146 = vmatpush3.bf16.msra.mxu0 %v15437_v23  ;;  %v11339_v52 = vmax.f32 %v10756_v59, 0.0  ;;  %v11341_v27 = vmax.f32 %v10829_v50, 0.0  ;;  %v15450_v23 = vld [vmem:[%s19935_s7 + $0x158] sm:$0xff]  }
0x1d5e   :  { %14107 = vmatprep.subr.bf16.mxu1 %v15438_v16  ;;  %14147 = vmatprep.subr.bf16.mxu0 %v15439_v3 }
0x1d5f   :  { %v11340_v21 = vmax.f32 %v10758_v30, 0.0  ;;  %v11342_v22 = vmax.f32 %v10831_v34, 0.0  ;;  %v11435_v46 = vpack.c.bf16 %v11339_v52, %v11323_v32  ;;  %v11437_v43 = vpack.c.bf16 %v11341_v27, %v11325_v31 }
0x1d61   :  { %v11436_v48 = vpack.c.bf16 %v11340_v21, %v11324_v18  ;;  %v11438_v54 = vpack.c.bf16 %v11342_v22, %v11326_v8  ;;  %14108 = vmatpush3.bf16.msra.mxu1 %v15440_v55  ;;  %14148 = vmatpush3.bf16.msra.mxu0 %v15441_v60  ;;  %v15453_v55 = vld [vmem:[%s19935_s7 + $0x198] sm:$0xff]   ;;  %v15454_v60 = vld [vmem:[%s19935_s7 + $0x150] sm:$0xff]  }
0x1d62   :  { %v10761_v53 = vpop.f32.mrf.mxu1  ;;  %v10834_v10 = vpop.f32.mrf.mxu0  ;;  %14109 = vmatprep.subr.bf16.mxu1 %v15442_v47  ;;  %14149 = vmatprep.subr.bf16.mxu0 %v15443_v62 }
0x1d63   :  { %12554 = vmatprep.mubr.bf16.mxu1 %v11436_v48  ;;  %12619 = vmatprep.mubr.bf16.mxu0 %v11438_v54  ;;  %v10762_v16 = vadd.f32 %v10761_v53, %v19171_v28  ;;  %v10835_v3 = vadd.f32 %v10834_v10, %v19175_v61  ;;  %v10009_v48 = vsub.s32 5, %v20054_v17  ;;  %v15455_v54 = vld [vmem:[%s19935_s7 + $0x1d0] sm:$0xff]  }
0x1d64   :  { %v10763_v35 = vpop.f32.mrf.mxu1  ;;  %v10836_v49 = vpop.f32.mrf.mxu0  ;;  %12555 = vmatmul.mubr.bf16.gmra.mxu1 %v11435_v46  ;;  %12620 = vmatmul.mubr.bf16.gmra.mxu0 %v11437_v43 }
0x1d65   :  { %14110 = vmatpush3.bf16.msra.mxu1 %v15444_v7  ;;  %14150 = vmatpush3.bf16.msra.mxu0 %v15445_v2  ;;  %v10764_v63 = vadd.f32 %v10763_v35, %v19162_v24  ;;  %v10837_v5 = vadd.f32 %v10836_v49, %v19167_v4  ;;  %v11355_v18 = vmax.f32 %v10762_v16, 0.0  ;;  %v11357_v8 = vmax.f32 %v10835_v3, 0.0  ;;  %v15456_v7 = vld [vmem:[%s19935_s7 + $0x110] sm:$0xff]   ;;  %v15458_v35 = vld [vmem:[%s19935_s7 + $0x148] sm:$0xff]  }
0x1d66   :  { %v10765_v45 = vpop.f32.mrf.mxu1  ;;  %v10838_v26 = vpop.f32.mrf.mxu0  ;;  %14111 = vmatprep.subr.bf16.mxu1 %v15446_v1  ;;  %14151 = vmatprep.subr.bf16.mxu0 %v15447_v57  ;;  %v10017_v1 = vsub.s32 7, %v20054_v17  ;;  %v15457_v57 = vld [vmem:[%s19935_s7 + $0x190] sm:$0xff]  }
0x1d67   :  { %v10766_v25 = vadd.f32 %v10765_v45, %v19171_v28  ;;  %v10839_v33 = vadd.f32 %v10838_v26, %v19175_v61  ;;  %v11356_v52 = vmax.f32 %v10764_v63, 0.0  ;;  %v11358_v27 = vmax.f32 %v10837_v5, 0.0  ;;  %v15459_v45 = vld [vmem:[%s19935_s7 + $0x1c8] sm:$0xff]  }
0x1d68   :  { %v10767_v39 = vpop.f32.mrf.mxu1  ;;  %v10840_v59 = vpop.f32.mrf.mxu0  ;;  %v10005_v5 = vsub.s32 4, %v20054_v17 }
0x1d69   :  { %v10768_v50 = vadd.f32 %v10767_v39, %v19162_v24  ;;  %v10841_v0 = vadd.f32 %v10840_v59, %v19167_v4  ;;  %14112 = vmatpush3.bf16.msra.mxu1 %v15448_v56  ;;  %14152 = vmatpush3.bf16.msra.mxu0 %v15449_v36  ;;  %v11371_v9 = vmax.f32 %v10766_v25, 0.0  ;;  %v11373_v41 = vmax.f32 %v10839_v33, 0.0 }
0x1d6a   :  { %v10771_v30 = vpop.f32.mrf.mxu1  ;;  %v10844_v34 = vpop.f32.mrf.mxu0  ;;  %14113 = vmatprep.subr.bf16.mxu1 %v15450_v23  ;;  %14153 = vmatprep.subr.bf16.mxu0 %v15451_v20  ;;  %v10013_v25 = vsub.s32 6, %v20054_v17 }
0x1d6b   :  { %v11372_v47 = vmax.f32 %v10768_v50, 0.0  ;;  %v11374_v62 = vmax.f32 %v10841_v0, 0.0  ;;  %v11451_v2 = vpack.c.bf16 %v11371_v9, %v11355_v18  ;;  %v11453_v46 = vpack.c.bf16 %v11373_v41, %v11357_v8  ;;  %v15462_v0 = vld [vmem:[%s19935_s7 + $0x140] sm:$0xff]  }
0x1d6c   :  { %v10773_v21 = vpop.f32.mrf.mxu1  ;;  %v10846_v22 = vpop.f32.mrf.mxu0  ;;  %v10772_v26 = vadd.f32 %v10771_v30, %v19171_v28  ;;  %v10845_v23 = vadd.f32 %v10844_v34, %v19175_v61  ;;  %v19291_v50 = vrot.slane %v19158_v19, %v10009_v48  ;;  %v15463_v8 = vld [vmem:[%s19935_s7 + $0x1c0] sm:$0xff]  }
0x1d6d   :  { %v11452_v32 = vpack.c.bf16 %v11372_v47, %v11356_v52  ;;  %v11454_v31 = vpack.c.bf16 %v11374_v62, %v11358_v27  ;;  %14114 = vmatpush3.bf16.msra.mxu1 %v15452_v58  ;;  %v10774_v43 = vadd.f32 %v10773_v21, %v19162_v24  ;;  %14154 = vmatpush3.bf16.msra.mxu0 %v15453_v55  ;;  %v15464_v21 = vld [vmem:[%s19935_s7 + $0x100] sm:$0xff]  }
0x1d6e   :  { %v10775_v53 = vpop.f32.mrf.mxu1  ;;  %v10848_v10 = vpop.f32.mrf.mxu0  ;;  %14115 = vmatprep.subr.bf16.mxu1 %v15454_v60  ;;  %v10847_v49 = vadd.f32 %v10846_v22, %v19167_v4  ;;  %14155 = vmatprep.subr.bf16.mxu0 %v15455_v54  ;;  %v11387_v34 = vmax.f32 %v10772_v26, 0.0  ;;  %v11389_v55 = vmax.f32 %v10845_v23, 0.0  ;;  %v19307_v60 = vrot.slane %v19158_v19, %v10005_v5 }
0x1d6f   :  { %v10776_v56 = vadd.f32 %v10775_v53, %v19171_v28  ;;  %v10849_v36 = vadd.f32 %v10848_v10, %v19175_v61  ;;  %12562 = vmatprep.mubr.bf16.mxu1 %v11452_v32  ;;  %12627 = vmatprep.mubr.bf16.mxu0 %v11454_v31  ;;  %v15460_v28 = vld [vmem:[%s19935_s7 + $0x108] sm:$0xff]   ;;  %v11388_v58 = vmax.f32 %v10774_v43, 0.0  ;;  %v19312_v52 = vrot.slane %v19158_v19, %v10013_v25  ;;  %v15467_v10 = vld [vmem:[%s19935_s7 + $0x2f8] sm:$0xff]  }
0x1d70   :  { %v10777_v20 = vpop.f32.mrf.mxu1  ;;  %v10850_v63 = vpop.f32.mrf.mxu0  ;;  %12563 = vmatmul.mubr.bf16.gmra.mxu1 %v11451_v2  ;;  %12628 = vmatmul.mubr.bf16.gmra.mxu0 %v11453_v46  ;;  %v11390_v9 = vmax.f32 %v10847_v49, 0.0  ;;  %v15466_v2 = vld [vmem:[%s19935_s7 + $0x278] sm:$0xff]  }
0x1d71   :  { %v10778_v33 = vadd.f32 %v10777_v20, %v19162_v24  ;;  %v10851_v16 = vadd.f32 %v10850_v63, %v19167_v4  ;;  %14116 = vmatpush3.bf16.msra.mxu1 %v15456_v7  ;;  %v11403_v3 = vmax.f32 %v10776_v56, 0.0  ;;  %v11405_v61 = vmax.f32 %v10849_v36, 0.0  ;;  %14156 = vmatpush3.bf16.msra.mxu0 %v15457_v57  ;;  %v15461_v4 = vld [vmem:[%s19935_s7 + $0x188] sm:$0xff]   ;;  %v15465_v7 = vld [vmem:[%s19935_s7 + $0x180] sm:$0xff]  }
0x1d72   :  { %v10887_v39 = vpop.f32.mrf.mxu1  ;;  %v10960_v59 = vpop.f32.mrf.mxu0  ;;  %v19296_v24 = vrot.slane %v19158_v19, %v10017_v1  ;;  %14117 = vmatprep.subr.bf16.mxu1 %v15458_v35  ;;  %14157 = vmatprep.subr.bf16.mxu0 %v15459_v45 }
0x1d73   :  { %v11404_v41 = vmax.f32 %v10778_v33, 0.0  ;;  %v11406_v30 = vmax.f32 %v10851_v16, 0.0  ;;  %v11467_v22 = vpack.c.bf16 %v11403_v3, %v11387_v34  ;;  %v11469_v32 = vpack.c.bf16 %v11405_v61, %v11389_v55 }
0x1d74   :  { %v10889_v27 = vpop.f32.mrf.mxu1  ;;  %v10962_v47 = vpop.f32.mrf.mxu0  ;;  %v10888_v57 = vadd.f32 %v10887_v39, %v19307_v60  ;;  %v10961_v35 = vadd.f32 %v10960_v59, %v19312_v52 }
0x1d75   :  { %v11468_v62 = vpack.c.bf16 %v11404_v41, %v11388_v58  ;;  %v11470_v18 = vpack.c.bf16 %v11406_v30, %v11390_v9  ;;  %14118 = vmatpush3.bf16.msra.mxu1 %v15460_v28  ;;  %v10890_v31 = vadd.f32 %v10889_v27, %v19291_v50  ;;  %14158 = vmatpush3.bf16.msra.mxu0 %v15461_v4  ;;  %v15468_v9 = vld [vmem:[%s19935_s7 + $0x238] sm:$0xff]  }
0x1d76   :  { %v10891_v54 = vpop.f32.mrf.mxu1  ;;  %v10964_v19 = vpop.f32.mrf.mxu0  ;;  %14119 = vmatprep.subr.bf16.mxu1 %v15462_v0  ;;  %v10963_v46 = vadd.f32 %v10962_v47, %v19296_v24  ;;  %14159 = vmatprep.subr.bf16.mxu0 %v15463_v8  ;;  %v11295_v61 = vmax.f32 %v10888_v57, 0.0  ;;  %v11297_v39 = vmax.f32 %v10961_v35, 0.0  ;;  %v15469_v41 = vld [vmem:[%s19935_s7 + $0x2b8] sm:$0xff]   ;;  %v15473_v35 = vld [vmem:[%s19935_s7 + $0x2b0] sm:$0xff]  }
0x1d77   :  { %v10892_v43 = vadd.f32 %v10891_v54, %v19307_v60  ;;  %v10965_v53 = vadd.f32 %v10964_v19, %v19312_v52  ;;  %12570 = vmatprep.mubr.bf16.mxu1 %v11468_v62  ;;  %12635 = vmatprep.mubr.bf16.mxu0 %v11470_v18  ;;  %v11296_v33 = vmax.f32 %v10890_v31, 0.0  ;;  %v15470_v62 = vld [vmem:[%s19935_s7 + $0x270] sm:$0xff]  }
0x1d78   :  { %v10893_v49 = vpop.f32.mrf.mxu1  ;;  %v10966_v56 = vpop.f32.mrf.mxu0  ;;  %12571 = vmatmul.mubr.bf16.gmra.mxu1 %v11467_v22  ;;  %12636 = vmatmul.mubr.bf16.gmra.mxu0 %v11469_v32  ;;  %v11298_v16 = vmax.f32 %v10963_v46, 0.0  ;;  %v15471_v18 = vld [vmem:[%s19935_s7 + $0x2f0] sm:$0xff]  }
0x1d79   :  { %v10894_v36 = vadd.f32 %v10893_v49, %v19291_v50  ;;  %v10967_v45 = vadd.f32 %v10966_v56, %v19296_v24  ;;  %14120 = vmatpush3.bf16.msra.mxu1 %v15464_v21  ;;  %v11311_v26 = vmax.f32 %v10892_v43, 0.0  ;;  %v11313_v23 = vmax.f32 %v10965_v53, 0.0  ;;  %14160 = vmatpush3.bf16.msra.mxu0 %v15465_v7  ;;  %v15472_v46 = vld [vmem:[%s19935_s7 + $0x230] sm:$0xff]   ;;  %v15474_v49 = vld [vmem:[%s19935_s7 + $0x268] sm:$0xff]  }
0x1d7a   :  { %v10897_v20 = vpop.f32.mrf.mxu1  ;;  %v10970_v63 = vpop.f32.mrf.mxu0  ;;  %14185 = vmatprep.subr.bf16.mxu1 %v15466_v2  ;;  %14225 = vmatprep.subr.bf16.mxu0 %v15467_v10 }
0x1d7b   :  { %v11312_v28 = vmax.f32 %v10894_v36, 0.0  ;;  %v11314_v3 = vmax.f32 %v10967_v45, 0.0  ;;  %v11423_v30 = vpack.c.bf16 %v11311_v26, %v11295_v61  ;;  %v11425_v34 = vpack.c.bf16 %v11313_v23, %v11297_v39  ;;  %v15476_v61 = vld [vmem:[%s19935_s7 + $0x228] sm:$0xff]  }
0x1d7c   :  { %v10899_v59 = vpop.f32.mrf.mxu1  ;;  %v10972_v4 = vpop.f32.mrf.mxu0  ;;  %v10898_v32 = vadd.f32 %v10897_v20, %v19307_v60  ;;  %v10971_v31 = vadd.f32 %v10970_v63, %v19312_v52 }
0x1d7d   :  { %v11424_v0 = vpack.c.bf16 %v11312_v28, %v11296_v33  ;;  %v11426_v58 = vpack.c.bf16 %v11314_v3, %v11298_v16  ;;  %v10900_v55 = vadd.f32 %v10899_v59, %v19291_v50  ;;  %v10973_v8 = vadd.f32 %v10972_v4, %v19296_v24  ;;  %v15475_v3 = vld [vmem:[%s19935_s7 + $0x2e8] sm:$0xff]  }
0x1d7e   :  { %v10901_v27 = vpop.f32.mrf.mxu1  ;;  %v10974_v47 = vpop.f32.mrf.mxu0  ;;  %v11327_v23 = vmax.f32 %v10898_v32, 0.0  ;;  %v11329_v20 = vmax.f32 %v10971_v31, 0.0  ;;  %v15480_v32 = vld [vmem:[%s19935_s7 + $0x220] sm:$0xff]  }
0x1d7f   :  { %v10902_v21 = vadd.f32 %v10901_v27, %v19307_v60  ;;  %v10975_v22 = vadd.f32 %v10974_v47, %v19312_v52  ;;  %12676 = vmatprep.mubr.bf16.mxu1 %v11424_v0  ;;  %12741 = vmatprep.mubr.bf16.mxu0 %v11426_v58  ;;  %v11328_v56 = vmax.f32 %v10900_v55, 0.0  ;;  %v11330_v36 = vmax.f32 %v10973_v8, 0.0  ;;  %v15479_v27 = vld [vmem:[%s19935_s7 + $0x2e0] sm:$0xff]  }
0x1d80   :  { %v10903_v54 = vpop.f32.mrf.mxu1  ;;  %v10976_v19 = vpop.f32.mrf.mxu0  ;;  %12677 = vmatmul.mubr.bf16.vlgmr.msra.gmra.mxu1 %v11423_v30  ;;  %12742 = vmatmul.mubr.bf16.vlgmr.msra.gmra.mxu0 %v11425_v34 }
0x1d81   :  { %v10904_v7 = vadd.f32 %v10903_v54, %v19291_v50  ;;  %v10977_v2 = vadd.f32 %v10976_v19, %v19296_v24  ;;  %14186 = vmatpush3.bf16.msra.mxu1 %v15468_v9  ;;  %14226 = vmatpush3.bf16.msra.mxu0 %v15469_v41  ;;  %v11343_v43 = vmax.f32 %v10902_v21, 0.0  ;;  %v11345_v53 = vmax.f32 %v10975_v22, 0.0  ;;  %v15477_v9 = vld [vmem:[%s19935_s7 + $0x2a8] sm:$0xff]   ;;  %v15478_v41 = vld [vmem:[%s19935_s7 + $0x260] sm:$0xff]  }
0x1d82   :  { %v10907_v10 = vpop.f32.mrf.mxu1  ;;  %v10980_v57 = vpop.f32.mrf.mxu0  ;;  %14187 = vmatprep.subr.bf16.mxu1 %v15470_v62  ;;  %14227 = vmatprep.subr.bf16.mxu0 %v15471_v18 }
0x1d83   :  { %v11344_v45 = vmax.f32 %v10904_v7, 0.0  ;;  %v11346_v26 = vmax.f32 %v10977_v2, 0.0  ;;  %v11439_v39 = vpack.c.bf16 %v11343_v43, %v11327_v23  ;;  %v11441_v59 = vpack.c.bf16 %v11345_v53, %v11329_v20  ;;  %v15481_v2 = vld [vmem:[%s19935_s7 + $0x2a0] sm:$0xff]   ;;  %v15483_v23 = vld [vmem:[%s19935_s7 + $0x2d8] sm:$0xff]  }
0x1d84   :  { %v10909_v63 = vpop.f32.mrf.mxu1  ;;  %v10982_v33 = vpop.f32.mrf.mxu0  ;;  %v10908_v47 = vadd.f32 %v10907_v10, %v19307_v60  ;;  %v10981_v62 = vadd.f32 %v10980_v57, %v19312_v52  ;;  %v15484_v20 = vld [vmem:[%s19935_s7 + $0x218] sm:$0xff]  }
0x1d85   :  { %v11440_v16 = vpack.c.bf16 %v11344_v45, %v11328_v56  ;;  %v11442_v28 = vpack.c.bf16 %v11346_v26, %v11330_v36  ;;  %14188 = vmatpush3.bf16.msra.mxu1 %v15472_v46  ;;  %v10910_v4 = vadd.f32 %v10909_v63, %v19291_v50  ;;  %14228 = vmatpush3.bf16.msra.mxu0 %v15473_v35  ;;  %v15482_v46 = vld [vmem:[%s19935_s7 + $0x258] sm:$0xff]  }
0x1d86   :  { %v10911_v0 = vpop.f32.mrf.mxu1  ;;  %v10984_v58 = vpop.f32.mrf.mxu0  ;;  %14189 = vmatprep.subr.bf16.mxu1 %v15474_v49  ;;  %v10983_v30 = vadd.f32 %v10982_v33, %v19296_v24  ;;  %14229 = vmatprep.subr.bf16.mxu0 %v15475_v3  ;;  %v11359_v35 = vmax.f32 %v10908_v47, 0.0  ;;  %v11361_v49 = vmax.f32 %v10981_v62, 0.0  ;;  %v19424_v47 = vld [vmem:[%s19936_s6 + $0x8] sm:$0xff] }
0x1d87   :  { %v10912_v34 = vadd.f32 %v10911_v0, %v19307_v60  ;;  %v10985_v55 = vadd.f32 %v10984_v58, %v19312_v52  ;;  %12684 = vmatprep.mubr.bf16.mxu1 %v11440_v16  ;;  %12749 = vmatprep.mubr.bf16.mxu0 %v11442_v28  ;;  %v11360_v43 = vmax.f32 %v10910_v4, 0.0  ;;  %v15487_v58 = vld [vmem:[%s19935_s7 + $0x2d0] sm:$0xff]  }
0x1d88   :  { %v10913_v18 = vpop.f32.mrf.mxu1  ;;  %v10986_v8 = vpop.f32.mrf.mxu0  ;;  %12685 = vmatmul.mubr.bf16.gmra.mxu1 %v11439_v39  ;;  %12750 = vmatmul.mubr.bf16.gmra.mxu0 %v11441_v59  ;;  %v11362_v53 = vmax.f32 %v10983_v30, 0.0  ;;  %v15486_v39 = vld [vmem:[%s19935_s7 + $0x250] sm:$0xff]  }
0x1d89   :  { %v10914_v21 = vadd.f32 %v10913_v18, %v19291_v50  ;;  %v10987_v22 = vadd.f32 %v10986_v8, %v19296_v24  ;;  %14190 = vmatpush3.bf16.msra.mxu1 %v15476_v61  ;;  %v11375_v31 = vmax.f32 %v10912_v34, 0.0  ;;  %v11377_v54 = vmax.f32 %v10985_v55, 0.0  ;;  %14230 = vmatpush3.bf16.msra.mxu0 %v15477_v9  ;;  %v15485_v61 = vld [vmem:[%s19935_s7 + $0x298] sm:$0xff]  }
0x1d8a   :  { %v10917_v19 = vpop.f32.mrf.mxu1  ;;  %v10990_v7 = vpop.f32.mrf.mxu0  ;;  %14191 = vmatprep.subr.bf16.mxu1 %v15478_v41  ;;  %14231 = vmatprep.subr.bf16.mxu0 %v15479_v27 }
0x1d8b   :  { %v11376_v10 = vmax.f32 %v10914_v21, 0.0  ;;  %v11378_v57 = vmax.f32 %v10987_v22, 0.0  ;;  %v11455_v63 = vpack.c.bf16 %v11375_v31, %v11359_v35  ;;  %v11457_v33 = vpack.c.bf16 %v11377_v54, %v11361_v49  ;;  %v15489_v21 = vld [vmem:[%s19935_s7 + $0x290] sm:$0xff]   ;;  %v15490_v22 = vld [vmem:[%s19935_s7 + $0x248] sm:$0xff]  }
0x1d8c   :  { %v10919_v56 = vpop.f32.mrf.mxu1  ;;  %v10992_v36 = vpop.f32.mrf.mxu0  ;;  %v10918_v9 = vadd.f32 %v10917_v19, %v19307_v60  ;;  %v10991_v41 = vadd.f32 %v10990_v7, %v19312_v52  ;;  %v15492_v35 = vld [vmem:[%s19935_s7 + $0x208] sm:$0xff]  }
0x1d8d   :  { %v11456_v45 = vpack.c.bf16 %v11376_v10, %v11360_v43  ;;  %v11458_v26 = vpack.c.bf16 %v11378_v57, %v11362_v53  ;;  %14192 = vmatpush3.bf16.msra.mxu1 %v15480_v32  ;;  %v10920_v16 = vadd.f32 %v10919_v56, %v19291_v50  ;;  %14232 = vmatpush3.bf16.msra.mxu0 %v15481_v2  ;;  %v15491_v57 = vld [vmem:[%s19935_s7 + $0x2c8] sm:$0xff]  }
0x1d8e   :  { %v10921_v28 = vpop.f32.mrf.mxu1  ;;  %v10994_v3 = vpop.f32.mrf.mxu0  ;;  %14193 = vmatprep.subr.bf16.mxu1 %v15482_v46  ;;  %v10993_v59 = vadd.f32 %v10992_v36, %v19296_v24  ;;  %14233 = vmatprep.subr.bf16.mxu0 %v15483_v23  ;;  %v11393_v7 = vmax.f32 %v10991_v41, 0.0  ;;  %v19450_v2 = vrot.slane %v19424_v47, %v20057_v51 }
0x1d8f   :  { %v10922_v4 = vadd.f32 %v10921_v28, %v19307_v60  ;;  %v10995_v0 = vadd.f32 %v10994_v3, %v19312_v52  ;;  %12692 = vmatprep.mubr.bf16.mxu1 %v11456_v45  ;;  %12757 = vmatprep.mubr.bf16.mxu0 %v11458_v26  ;;  %v15488_v60 = vld [vmem:[%s19935_s7 + $0x210] sm:$0xff]   ;;  %v11392_v32 = vmax.f32 %v10920_v16, 0.0  ;;  %v15493_v45 = vld [vmem:[%s19935_s7 + $0x288] sm:$0xff]   ;;  %v15494_v26 = vld [vmem:[%s19935_s7 + $0x240] sm:$0xff]  }
0x1d90   :  { %v10923_v30 = vpop.f32.mrf.mxu1  ;;  %v10996_v34 = vpop.f32.mrf.mxu0  ;;  %12693 = vmatmul.mubr.bf16.gmra.mxu1 %v11455_v63  ;;  %12758 = vmatmul.mubr.bf16.gmra.mxu0 %v11457_v33  ;;  %v11394_v31 = vmax.f32 %v10993_v59, 0.0  ;;  %v15495_v33 = vld [vmem:[%s19935_s7 + $0x2c0] sm:$0xff]  }
0x1d91   :  { %v10924_v55 = vadd.f32 %v10923_v30, %v19291_v50  ;;  %v10997_v27 = vadd.f32 %v10996_v34, %v19296_v24  ;;  %14194 = vmatpush3.bf16.msra.mxu1 %v15484_v20  ;;  %v11407_v52 = vmax.f32 %v10922_v4, 0.0  ;;  %v11409_v62 = vmax.f32 %v10995_v0, 0.0  ;;  %14234 = vmatpush3.bf16.msra.mxu0 %v15485_v61  ;;  %v15496_v4 = vld [vmem:[%s19935_s7 + $0x200] sm:$0xff]   ;;  %v15498_v34 = vld [vmem:[%s19935_s7 + $0x378] sm:$0xff]  }
0x1d92   :  { %v11033_v18 = vpop.f32.mrf.mxu1  ;;  %v11106_v8 = vpop.f32.mrf.mxu0  ;;  %v19431_v50 = vrot.slane %v19424_v47, %v20055_v40  ;;  %v19436_v24 = vrot.slane %v19424_v47, %v10001_v11  ;;  %14195 = vmatprep.subr.bf16.mxu1 %v15486_v39  ;;  %14235 = vmatprep.subr.bf16.mxu0 %v15487_v58  ;;  %v11391_v40 = vmax.f32 %v10918_v9, 0.0  ;;  %v19446_v11 = vrot.slane %v19424_v47, %v20056_v29  ;;  %v15497_v30 = vld [vmem:[%s19935_s7 + $0x280] sm:$0xff]  }
0x1d93   :  { %v11408_v54 = vmax.f32 %v10924_v55, 0.0  ;;  %v11410_v19 = vmax.f32 %v10997_v27, 0.0  ;;  %v11473_v29 = vpack.c.bf16 %v11409_v62, %v11393_v7  ;;  %v11107_v28 = vadd.f32 %v11106_v8, %v19450_v2 }
0x1d94   :  { %v11035_v46 = vpop.f32.mrf.mxu1  ;;  %v11108_v43 = vpop.f32.mrf.mxu0  ;;  %v11471_v49 = vpack.c.bf16 %v11407_v52, %v11391_v40  ;;  %v11034_v16 = vadd.f32 %v11033_v18, %v19446_v11 }
0x1d95   :  { %v11472_v53 = vpack.c.bf16 %v11408_v54, %v11392_v32  ;;  %v11474_v10 = vpack.c.bf16 %v11410_v19, %v11394_v31  ;;  %14196 = vmatpush3.bf16.msra.mxu1 %v15488_v60  ;;  %v11036_v56 = vadd.f32 %v11035_v46, %v19431_v50  ;;  %14236 = vmatpush3.bf16.msra.mxu0 %v15489_v21  ;;  %v11301_v18 = vmax.f32 %v11107_v28, 0.0  ;;  %v15500_v54 = vld [vmem:[%s19935_s7 + $0x338] sm:$0xff]  }
0x1d96   :  { %v11037_v51 = vpop.f32.mrf.mxu1  ;;  %v11110_v36 = vpop.f32.mrf.mxu0  ;;  %14197 = vmatprep.subr.bf16.mxu1 %v15490_v22  ;;  %v11109_v23 = vadd.f32 %v11108_v43, %v19436_v24  ;;  %14237 = vmatprep.subr.bf16.mxu0 %v15491_v57  ;;  %v11299_v62 = vmax.f32 %v11034_v16, 0.0  ;;  %v15499_v22 = vld [vmem:[%s19935_s7 + $0x3f8] sm:$0xff]  }
0x1d97   :  { %v11038_v20 = vadd.f32 %v11037_v51, %v19446_v11  ;;  %v11111_v63 = vadd.f32 %v11110_v36, %v19450_v2  ;;  %12700 = vmatprep.mubr.bf16.mxu1 %v11472_v53  ;;  %12765 = vmatprep.mubr.bf16.mxu0 %v11474_v10  ;;  %v11300_v55 = vmax.f32 %v11036_v56, 0.0  ;;  %v15501_v53 = vld [vmem:[%s19935_s7 + $0x3b8] sm:$0xff]   ;;  %v15502_v10 = vld [vmem:[%s19935_s7 + $0x370] sm:$0xff]  }
0x1d98   :  { %v11039_v3 = vpop.f32.mrf.mxu1  ;;  %v11112_v61 = vpop.f32.mrf.mxu0  ;;  %12701 = vmatmul.mubr.bf16.gmra.mxu1 %v11471_v49  ;;  %12766 = vmatmul.mubr.bf16.gmra.mxu0 %v11473_v29  ;;  %v11302_v27 = vmax.f32 %v11109_v23, 0.0  ;;  %v15503_v29 = vld [vmem:[%s19935_s7 + $0x3f0] sm:$0xff]  }
0x1d99   :  { %v11040_v39 = vadd.f32 %v11039_v3, %v19431_v50  ;;  %v11113_v59 = vadd.f32 %v11112_v61, %v19436_v24  ;;  %14198 = vmatpush3.bf16.msra.mxu1 %v15492_v35  ;;  %v11315_v0 = vmax.f32 %v11038_v20, 0.0  ;;  %v11317_v58 = vmax.f32 %v11111_v63, 0.0  ;;  %14238 = vmatpush3.bf16.msra.mxu0 %v15493_v45  ;;  %v15504_v20 = vld [vmem:[%s19935_s7 + $0x330] sm:$0xff]   ;;  %v15506_v61 = vld [vmem:[%s19935_s7 + $0x368] sm:$0xff]  }
0x1d9a   :  { %v11043_v9 = vpop.f32.mrf.mxu1  ;;  %v11116_v41 = vpop.f32.mrf.mxu0  ;;  %14199 = vmatprep.subr.bf16.mxu1 %v15494_v26  ;;  %14239 = vmatprep.subr.bf16.mxu0 %v15495_v33  ;;  %v15505_v3 = vld [vmem:[%s19935_s7 + $0x3b0] sm:$0xff]  }
0x1d9b   :  { %v11316_v60 = vmax.f32 %v11040_v39, 0.0  ;;  %v11318_v52 = vmax.f32 %v11113_v59, 0.0  ;;  %v11427_v19 = vpack.c.bf16 %v11315_v0, %v11299_v62  ;;  %v11429_v40 = vpack.c.bf16 %v11317_v58, %v11301_v18 }
0x1d9c   :  { %v11045_v8 = vpop.f32.mrf.mxu1  ;;  %v11118_v21 = vpop.f32.mrf.mxu0  ;;  %v11044_v56 = vadd.f32 %v11043_v9, %v19446_v11  ;;  %v11117_v51 = vadd.f32 %v11116_v41, %v19450_v2 }
0x1d9d   :  { %v11428_v32 = vpack.c.bf16 %v11316_v60, %v11300_v55  ;;  %v11430_v31 = vpack.c.bf16 %v11318_v52, %v11302_v27  ;;  %14200 = vmatpush3.bf16.msra.mxu1 %v15496_v4  ;;  %v11046_v7 = vadd.f32 %v11045_v8, %v19431_v50  ;;  %14240 = vmatpush3.bf16.msra.mxu0 %v15497_v30  ;;  %v15508_v60 = vld [vmem:[%s19935_s7 + $0x328] sm:$0xff]  }
0x1d9e   :  { %v11047_v46 = vpop.f32.mrf.mxu1  ;;  %v11120_v43 = vpop.f32.mrf.mxu0  ;;  %14265 = vmatprep.subr.bf16.mxu1 %v15498_v34  ;;  %v11119_v57 = vadd.f32 %v11118_v21, %v19436_v24  ;;  %14305 = vmatprep.subr.bf16.mxu0 %v15499_v22  ;;  %v11331_v58 = vmax.f32 %v11044_v56, 0.0  ;;  %v11333_v9 = vmax.f32 %v11117_v51, 0.0  ;;  %v15507_v34 = vld [vmem:[%s19935_s7 + $0x3e8] sm:$0xff]  }
0x1d9f   :  { %v11048_v35 = vadd.f32 %v11047_v46, %v19446_v11  ;;  %v11121_v49 = vadd.f32 %v11120_v43, %v19450_v2  ;;  %12806 = vmatprep.mubr.bf16.mxu1 %v11428_v32  ;;  %12871 = vmatprep.mubr.bf16.mxu0 %v11430_v31  ;;  %v11332_v39 = vmax.f32 %v11046_v7, 0.0  ;;  %v15509_v22 = vld [vmem:[%s19935_s7 + $0x3a8] sm:$0xff]   ;;  %v15510_v32 = vld [vmem:[%s19935_s7 + $0x360] sm:$0xff]  }
0x1da0   :  { %v11049_v36 = vpop.f32.mrf.mxu1  ;;  %v11122_v45 = vpop.f32.mrf.mxu0  ;;  %12807 = vmatmul.mubr.bf16.vlgmr.msra.gmra.mxu1 %v11427_v19  ;;  %12872 = vmatmul.mubr.bf16.vlgmr.msra.gmra.mxu0 %v11429_v40  ;;  %v11334_v59 = vmax.f32 %v11119_v57, 0.0  ;;  %v15511_v40 = vld [vmem:[%s19935_s7 + $0x3e0] sm:$0xff]  }
0x1da1   :  { %v11050_v26 = vadd.f32 %v11049_v36, %v19431_v50  ;;  %v11123_v23 = vadd.f32 %v11122_v45, %v19436_v24  ;;  %14266 = vmatpush3.bf16.msra.mxu1 %v15500_v54  ;;  %v11347_v63 = vmax.f32 %v11048_v35, 0.0  ;;  %v11349_v33 = vmax.f32 %v11121_v49, 0.0  ;;  %14306 = vmatpush3.bf16.msra.mxu0 %v15501_v53  ;;  %v15512_v35 = vld [vmem:[%s19935_s7 + $0x320] sm:$0xff]   ;;  %v15514_v45 = vld [vmem:[%s19935_s7 + $0x358] sm:$0xff]  }
0x1da2   :  { %v11053_v16 = vpop.f32.mrf.mxu1  ;;  %v11126_v28 = vpop.f32.mrf.mxu0  ;;  %14267 = vmatprep.subr.bf16.mxu1 %v15502_v10  ;;  %14307 = vmatprep.subr.bf16.mxu0 %v15503_v29  ;;  %v15513_v36 = vld [vmem:[%s19935_s7 + $0x3a0] sm:$0xff]  }
0x1da3   :  { %v11348_v4 = vmax.f32 %v11050_v26, 0.0  ;;  %v11350_v0 = vmax.f32 %v11123_v23, 0.0  ;;  %v11443_v52 = vpack.c.bf16 %v11347_v63, %v11331_v58  ;;  %v11445_v62 = vpack.c.bf16 %v11349_v33, %v11333_v9 }
0x1da4   :  { %v11055_v41 = vpop.f32.mrf.mxu1  ;;  %v11128_v30 = vpop.f32.mrf.mxu0  ;;  %v11054_v7 = vadd.f32 %v11053_v16, %v19446_v11  ;;  %v11127_v46 = vadd.f32 %v11126_v28, %v19450_v2 }
0x1da5   :  { %v11444_v55 = vpack.c.bf16 %v11348_v4, %v11332_v39  ;;  %v11446_v27 = vpack.c.bf16 %v11350_v0, %v11334_v59  ;;  %14268 = vmatpush3.bf16.msra.mxu1 %v15504_v20  ;;  %v11056_v18 = vadd.f32 %v11055_v41, %v19431_v50  ;;  %14308 = vmatpush3.bf16.msra.mxu0 %v15505_v3  ;;  %v15516_v4 = vld [vmem:[%s19935_s7 + $0x318] sm:$0xff]  }
0x1da6   :  { %v11057_v8 = vpop.f32.mrf.mxu1  ;;  %v11130_v21 = vpop.f32.mrf.mxu0  ;;  %14269 = vmatprep.subr.bf16.mxu1 %v15506_v61  ;;  %v11129_v31 = vadd.f32 %v11128_v30, %v19436_v24  ;;  %14309 = vmatprep.subr.bf16.mxu0 %v15507_v34  ;;  %v11363_v33 = vmax.f32 %v11054_v7, 0.0  ;;  %v11365_v16 = vmax.f32 %v11127_v46, 0.0  ;;  %v15515_v61 = vld [vmem:[%s19935_s7 + $0x3d8] sm:$0xff]   ;;  %v15522_v46 = vld [vmem:[%s19935_s7 + $0x348] sm:$0xff]  }
0x1da7   :  { %v11058_v54 = vadd.f32 %v11057_v8, %v19446_v11  ;;  %v11131_v19 = vadd.f32 %v11130_v21, %v19450_v2  ;;  %12814 = vmatprep.mubr.bf16.mxu1 %v11444_v55  ;;  %12879 = vmatprep.mubr.bf16.mxu0 %v11446_v27  ;;  %v11364_v26 = vmax.f32 %v11056_v18, 0.0  ;;  %v15517_v34 = vld [vmem:[%s19935_s7 + $0x398] sm:$0xff]   ;;  %v15518_v55 = vld [vmem:[%s19935_s7 + $0x350] sm:$0xff]  }
0x1da8   :  { %v11059_v43 = vpop.f32.mrf.mxu1  ;;  %v11132_v53 = vpop.f32.mrf.mxu0  ;;  %12815 = vmatmul.mubr.bf16.gmra.mxu1 %v11443_v52  ;;  %12880 = vmatmul.mubr.bf16.gmra.mxu0 %v11445_v62  ;;  %v11366_v23 = vmax.f32 %v11129_v31, 0.0  ;;  %v15519_v62 = vld [vmem:[%s19935_s7 + $0x3d0] sm:$0xff]  }
0x1da9   :  { %v11060_v10 = vadd.f32 %v11059_v43, %v19431_v50  ;;  %v11133_v57 = vadd.f32 %v11132_v53, %v19436_v24  ;;  %14270 = vmatpush3.bf16.msra.mxu1 %v15508_v60  ;;  %v11379_v49 = vmax.f32 %v11058_v54, 0.0  ;;  %v11381_v29 = vmax.f32 %v11131_v19, 0.0  ;;  %14310 = vmatpush3.bf16.msra.mxu0 %v15509_v22  ;;  %v15520_v54 = vld [vmem:[%s19935_s7 + $0x310] sm:$0xff]  }
0x1daa   :  { %v11063_v56 = vpop.f32.mrf.mxu1  ;;  %v11136_v51 = vpop.f32.mrf.mxu0  ;;  %14271 = vmatprep.subr.bf16.mxu1 %v15510_v32  ;;  %14311 = vmatprep.subr.bf16.mxu0 %v15511_v40 }
0x1dab   :  { %v11380_v20 = vmax.f32 %v11060_v10, 0.0  ;;  %v11382_v63 = vmax.f32 %v11133_v57, 0.0  ;;  %v11459_v0 = vpack.c.bf16 %v11379_v49, %v11363_v33  ;;  %v11461_v58 = vpack.c.bf16 %v11381_v29, %v11365_v16 }
0x1dac   :  { %v11065_v28 = vpop.f32.mrf.mxu1  ;;  %v11138_v3 = vpop.f32.mrf.mxu0  ;;  %v11064_v18 = vadd.f32 %v11063_v56, %v19446_v11  ;;  %v11137_v8 = vadd.f32 %v11136_v51, %v19450_v2  ;;  %v19598_v49 = vrot.slane %v19424_v47, %v10013_v25  ;;  %v15523_v51 = vld [vmem:[%s19935_s7 + $0x3c8] sm:$0xff]  }
0x1dad   :  { %v11460_v39 = vpack.c.bf16 %v11380_v20, %v11364_v26  ;;  %v11462_v59 = vpack.c.bf16 %v11382_v63, %v11366_v23  ;;  %14272 = vmatpush3.bf16.msra.mxu1 %v15512_v35  ;;  %v11066_v9 = vadd.f32 %v11065_v28, %v19431_v50  ;;  %14312 = vmatpush3.bf16.msra.mxu0 %v15513_v36  ;;  %v15524_v26 = vld [vmem:[%s19935_s7 + $0x308] sm:$0xff]   ;;  %v15526_v63 = vld [vmem:[%s19935_s7 + $0x340] sm:$0xff]  }
0x1dae   :  { %v11067_v41 = vpop.f32.mrf.mxu1  ;;  %v11140_v30 = vpop.f32.mrf.mxu0  ;;  %14273 = vmatprep.subr.bf16.mxu1 %v15514_v45  ;;  %v11139_v27 = vadd.f32 %v11138_v3, %v19436_v24  ;;  %14313 = vmatprep.subr.bf16.mxu0 %v15515_v61  ;;  %v11397_v35 = vmax.f32 %v11137_v8, 0.0  ;;  %v15525_v20 = vld [vmem:[%s19935_s7 + $0x388] sm:$0xff]   ;;  %v15527_v3 = vld [vmem:[%s19935_s7 + $0x3c0] sm:$0xff]  }
0x1daf   :  { %v11068_v60 = vadd.f32 %v11067_v41, %v19446_v11  ;;  %v11141_v52 = vadd.f32 %v11140_v30, %v19450_v2  ;;  %12822 = vmatprep.mubr.bf16.mxu1 %v11460_v39  ;;  %12887 = vmatprep.mubr.bf16.mxu0 %v11462_v59  ;;  %v19577_v2 = vrot.slane %v19424_v47, %v10009_v48  ;;  %v11396_v43 = vmax.f32 %v11066_v9, 0.0  ;;  %v15528_v9 = vld [vmem:[%s19935_s7 + $0x300] sm:$0xff]  }
0x1db0   :  { %v11069_v21 = vpop.f32.mrf.mxu1  ;;  %v11142_v22 = vpop.f32.mrf.mxu0  ;;  %12823 = vmatmul.mubr.bf16.gmra.mxu1 %v11459_v0  ;;  %12888 = vmatmul.mubr.bf16.gmra.mxu0 %v11461_v58  ;;  %v11398_v53 = vmax.f32 %v11139_v27, 0.0  ;;  %v11395_v48 = vmax.f32 %v11064_v18, 0.0  ;;  %v15529_v27 = vld [vmem:[%s19935_s7 + $0x380] sm:$0xff]  }
0x1db1   :  { %v11070_v32 = vadd.f32 %v11069_v21, %v19431_v50  ;;  %v11143_v31 = vadd.f32 %v11142_v22, %v19436_v24  ;;  %14274 = vmatpush3.bf16.msra.mxu1 %v15516_v4  ;;  %v11411_v19 = vmax.f32 %v11068_v60, 0.0  ;;  %v11413_v40 = vmax.f32 %v11141_v52, 0.0  ;;  %14314 = vmatpush3.bf16.msra.mxu0 %v15517_v34  ;;  %v15521_v24 = vld [vmem:[%s19935_s7 + $0x390] sm:$0xff]  }
0x1db2   :  { %v11179_v11 = vpop.f32.mrf.mxu1  ;;  %v11252_v7 = vpop.f32.mrf.mxu0  ;;  %v19582_v50 = vrot.slane %v19424_v47, %v10017_v1  ;;  %14275 = vmatprep.subr.bf16.mxu1 %v15518_v55  ;;  %14315 = vmatprep.subr.bf16.mxu0 %v15519_v62  ;;  %v19593_v1 = vrot.slane %v19424_v47, %v10005_v5 }
0x1db3   :  { %v11412_v10 = vmax.f32 %v11070_v32, 0.0  ;;  %v11414_v57 = vmax.f32 %v11143_v31, 0.0  ;;  %v11475_v5 = vpack.c.bf16 %v11411_v19, %v11395_v48  ;;  %v11477_v23 = vpack.c.bf16 %v11413_v40, %v11397_v35 }
0x1db4   :  { %v11181_v29 = vpop.f32.mrf.mxu1  ;;  %v11254_v56 = vpop.f32.mrf.mxu0  ;;  %v11180_v61 = vadd.f32 %v11179_v11, %v19593_v1  ;;  %v11253_v39 = vadd.f32 %v11252_v7, %v19598_v49 }
0x1db5   :  { %v11476_v36 = vpack.c.bf16 %v11412_v10, %v11396_v43  ;;  %v11478_v45 = vpack.c.bf16 %v11414_v57, %v11398_v53  ;;  %14276 = vmatpush3.bf16.msra.mxu1 %v15520_v54  ;;  %v11182_v17 = vadd.f32 %v11181_v29, %v19577_v2  ;;  %14316 = vmatpush3.bf16.msra.mxu0 %v15521_v24 }
0x1db6   :  { %v11183_v25 = vpop.f32.mrf.mxu1  ;;  %v11256_v47 = vpop.f32.mrf.mxu0  ;;  %14277 = vmatprep.subr.bf16.mxu1 %v15522_v46  ;;  %v11255_v33 = vadd.f32 %v11254_v56, %v19582_v50  ;;  %14317 = vmatprep.subr.bf16.mxu0 %v15523_v51  ;;  %v11303_v8 = vmax.f32 %v11180_v61, 0.0  ;;  %v11305_v21 = vmax.f32 %v11253_v39, 0.0 }
0x1db7   :  { %v11184_v16 = vadd.f32 %v11183_v25, %v19593_v1  ;;  %v11257_v28 = vadd.f32 %v11256_v47, %v19598_v49  ;;  %12830 = vmatprep.mubr.bf16.mxu1 %v11476_v36  ;;  %12895 = vmatprep.mubr.bf16.mxu0 %v11478_v45  ;;  %v11304_v60 = vmax.f32 %v11182_v17, 0.0 }
0x1db8   :  { %v11185_v59 = vpop.f32.mrf.mxu1  ;;  %v11258_v4 = vpop.f32.mrf.mxu0  ;;  %12831 = vmatmul.mubr.bf16.gmra.mxu1 %v11475_v5  ;;  %12896 = vmatmul.mubr.bf16.gmra.mxu0 %v11477_v23  ;;  %v11306_v52 = vmax.f32 %v11255_v33, 0.0 }
0x1db9   :  { %v11186_v0 = vadd.f32 %v11185_v59, %v19577_v2  ;;  %v11259_v58 = vadd.f32 %v11258_v4, %v19582_v50  ;;  %14278 = vmatpush3.bf16.msra.mxu1 %v15524_v26  ;;  %v11319_v41 = vmax.f32 %v11184_v16, 0.0  ;;  %v11321_v30 = vmax.f32 %v11257_v28, 0.0  ;;  %14318 = vmatpush3.bf16.msra.mxu0 %v15525_v20 }
0x1dba   :  { %v11189_v34 = vpop.f32.mrf.mxu1  ;;  %v11262_v55 = vpop.f32.mrf.mxu0  ;;  %14279 = vmatprep.subr.bf16.mxu1 %v15526_v63  ;;  %14319 = vmatprep.subr.bf16.mxu0 %v15527_v3 }
0x1dbb   :  { %v11320_v62 = vmax.f32 %v11186_v0, 0.0  ;;  %v11322_v18 = vmax.f32 %v11259_v58, 0.0  ;;  %v11431_v19 = vpack.c.bf16 %v11319_v41, %v11303_v8  ;;  %v11433_v40 = vpack.c.bf16 %v11321_v30, %v11305_v21 }
0x1dbc   :  { %v11191_v22 = vpop.f32.mrf.mxu1  ;;  %v11264_v32 = vpop.f32.mrf.mxu0  ;;  %v11190_v10 = vadd.f32 %v11189_v34, %v19593_v1  ;;  %v11263_v57 = vadd.f32 %v11262_v55, %v19598_v49 }
0x1dbd   :  { %v11432_v31 = vpack.c.bf16 %v11320_v62, %v11304_v60  ;;  %v11434_v54 = vpack.c.bf16 %v11322_v18, %v11306_v52  ;;  %14280 = vmatpush3.bf16.msra.mxu1 %v15528_v9  ;;  %v11192_v11 = vadd.f32 %v11191_v22, %v19577_v2  ;;  %14320 = vmatpush3.bf16.msra.mxu0 %v15529_v27 }
0x1dbe   :  { %v11193_v7 = vpop.f32.mrf.mxu1  ;;  %v11266_v24 = vpop.f32.mrf.mxu0  ;;  %v11265_v46 = vadd.f32 %v11264_v32, %v19582_v50  ;;  %v11335_v47 = vmax.f32 %v11190_v10, 0.0  ;;  %v11337_v20 = vmax.f32 %v11263_v57, 0.0 }
0x1dbf   :  { %v11194_v43 = vadd.f32 %v11193_v7, %v19593_v1  ;;  %v11267_v53 = vadd.f32 %v11266_v24, %v19598_v49  ;;  %12936 = vmatprep.mubr.bf16.mxu1 %v11432_v31  ;;  %13001 = vmatprep.mubr.bf16.mxu0 %v11434_v54  ;;  %v11336_v5 = vmax.f32 %v11192_v11, 0.0 }
0x1dc0   :  { %v11195_v48 = vpop.f32.mrf.mxu1  ;;  %v11268_v35 = vpop.f32.mrf.mxu0  ;;  %12937 = vmatmul.mubr.bf16.vlgmr.msra.gmra.mxu1 %v11431_v19  ;;  %13002 = vmatmul.mubr.bf16.vlgmr.msra.gmra.mxu0 %v11433_v40  ;;  %v11338_v23 = vmax.f32 %v11265_v46, 0.0 }
0x1dc1   :  { %v11196_v29 = vadd.f32 %v11195_v48, %v19577_v2  ;;  %v11269_v56 = vadd.f32 %v11268_v35, %v19582_v50  ;;  %v11351_v51 = vmax.f32 %v11194_v43, 0.0  ;;  %v11353_v36 = vmax.f32 %v11267_v53, 0.0 }
0x1dc2   :  { %v11199_v45 = vpop.f32.mrf.mxu1  ;;  %v11272_v26 = vpop.f32.mrf.mxu0 }
0x1dc3   :  { %v11352_v17 = vmax.f32 %v11196_v29, 0.0  ;;  %v11354_v25 = vmax.f32 %v11269_v56, 0.0  ;;  %v11447_v3 = vpack.c.bf16 %v11351_v51, %v11335_v47  ;;  %v11449_v61 = vpack.c.bf16 %v11353_v36, %v11337_v20 }
0x1dc4   :  { %v11201_v63 = vpop.f32.mrf.mxu1  ;;  %v11274_v33 = vpop.f32.mrf.mxu0  ;;  %v11200_v41 = vadd.f32 %v11199_v45, %v19593_v1  ;;  %v11273_v30 = vadd.f32 %v11272_v26, %v19598_v49 }
0x1dc5   :  { %v11448_v16 = vpack.c.bf16 %v11352_v17, %v11336_v5  ;;  %v11450_v28 = vpack.c.bf16 %v11354_v25, %v11338_v23  ;;  %v11202_v39 = vadd.f32 %v11201_v63, %v19577_v2  ;;  %v11275_v0 = vadd.f32 %v11274_v33, %v19582_v50 }
0x1dc6   :  { %v11203_v59 = vpop.f32.mrf.mxu1  ;;  %v11276_v4 = vpop.f32.mrf.mxu0  ;;  %v11367_v54 = vmax.f32 %v11200_v41, 0.0  ;;  %v11369_v19 = vmax.f32 %v11273_v30, 0.0 }
0x1dc7   :  { %v11204_v58 = vadd.f32 %v11203_v59, %v19593_v1  ;;  %v11277_v9 = vadd.f32 %v11276_v4, %v19598_v49  ;;  %12944 = vmatprep.mubr.bf16.mxu1 %v11448_v16  ;;  %13009 = vmatprep.mubr.bf16.mxu0 %v11450_v28  ;;  %v11368_v21 = vmax.f32 %v11202_v39, 0.0  ;;  %v11370_v22 = vmax.f32 %v11275_v0, 0.0 }
0x1dc8   :  { %v11205_v34 = vpop.f32.mrf.mxu1  ;;  %v11278_v55 = vpop.f32.mrf.mxu0  ;;  %12945 = vmatmul.mubr.bf16.gmra.mxu1 %v11447_v3  ;;  %13010 = vmatmul.mubr.bf16.gmra.mxu0 %v11449_v61 }
0x1dc9   :  { %v11206_v27 = vadd.f32 %v11205_v34, %v19577_v2  ;;  %v11279_v60 = vadd.f32 %v11278_v55, %v19582_v50  ;;  %v11383_v52 = vmax.f32 %v11204_v58, 0.0  ;;  %v11385_v62 = vmax.f32 %v11277_v9, 0.0 }
0x1dca   :  { %v11209_v18 = vpop.f32.mrf.mxu1  ;;  %v11282_v8 = vpop.f32.mrf.mxu0 }
0x1dcb   :  { %v11384_v32 = vmax.f32 %v11206_v27, 0.0  ;;  %v11386_v31 = vmax.f32 %v11279_v60, 0.0  ;;  %v11463_v46 = vpack.c.bf16 %v11383_v52, %v11367_v54  ;;  %v11465_v43 = vpack.c.bf16 %v11385_v62, %v11369_v19 }
0x1dcc   :  { %v11211_v40 = vpop.f32.mrf.mxu1  ;;  %v11284_v11 = vpop.f32.mrf.mxu0  ;;  %v11210_v56 = vadd.f32 %v11209_v18, %v19593_v1  ;;  %v11283_v45 = vadd.f32 %v11282_v8, %v19598_v49 }
0x1dcd   :  { %v11464_v7 = vpack.c.bf16 %v11384_v32, %v11368_v21  ;;  %v11466_v24 = vpack.c.bf16 %v11386_v31, %v11370_v22  ;;  %v11212_v53 = vadd.f32 %v11211_v40, %v19577_v2  ;;  %v11285_v48 = vadd.f32 %v11284_v11, %v19582_v50 }
0x1dce   :  { %v11213_v10 = vpop.f32.mrf.mxu1  ;;  %v11286_v57 = vpop.f32.mrf.mxu0  ;;  %v11399_v33 = vmax.f32 %v11210_v56, 0.0  ;;  %v11401_v16 = vmax.f32 %v11283_v45, 0.0 }
0x1dcf   :  { %v11214_v35 = vadd.f32 %v11213_v10, %v19593_v1  ;;  %v11287_v29 = vadd.f32 %v11286_v57, %v19598_v49  ;;  %12952 = vmatprep.mubr.bf16.mxu1 %v11464_v7  ;;  %13017 = vmatprep.mubr.bf16.mxu0 %v11466_v24  ;;  %v11400_v23 = vmax.f32 %v11212_v53, 0.0  ;;  %v11402_v25 = vmax.f32 %v11285_v48, 0.0 }
0x1dd0   :  { %v11215_v51 = vpop.f32.mrf.mxu1  ;;  %v11288_v36 = vpop.f32.mrf.mxu0  ;;  %12953 = vmatmul.mubr.bf16.gmra.mxu1 %v11463_v46  ;;  %13018 = vmatmul.mubr.bf16.gmra.mxu0 %v11465_v43 }
0x1dd1   :  { %v11216_v26 = vadd.f32 %v11215_v51, %v19577_v2  ;;  %v11289_v5 = vadd.f32 %v11288_v36, %v19582_v50  ;;  %v11415_v17 = vmax.f32 %v11214_v35, 0.0  ;;  %v11417_v47 = vmax.f32 %v11287_v29, 0.0  ;;  %v19656_v50 = vld [vmem:[%s19937_s8] ss:$0 sm:$0xff] }
0x1dd3   :  { %v11416_v20 = vmax.f32 %v11216_v26, 0.0  ;;  %v11418_v63 = vmax.f32 %v11289_v5, 0.0  ;;  %v11479_v3 = vpack.c.bf16 %v11415_v17, %v11399_v33  ;;  %v11481_v61 = vpack.c.bf16 %v11417_v47, %v11401_v16 }
0x1dd5   :  { %v11480_v28 = vpack.c.bf16 %v11416_v20, %v11400_v23  ;;  %v11482_v1 = vpack.c.bf16 %v11418_v63, %v11402_v25 }
0x1dd7   :  { %12960 = vmatprep.mubr.bf16.mxu1 %v11480_v28  ;;  %13025 = vmatprep.mubr.bf16.mxu0 %v11482_v1 }
0x1dd8   :  { %12961 = vmatmul.mubr.bf16.gmra.mxu1 %v11479_v3  ;;  %13026 = vmatmul.mubr.bf16.gmra.mxu0 %v11481_v61 }
0x1e1c   :  { %v14041_v2 = vpop.f32.mrf.mxu1  ;;  %v14081_v49 = vpop.f32.mrf.mxu0 }
0x1e1e   :  { %v14042_v39 = vpop.f32.mrf.mxu1  ;;  %v14082_v59 = vpop.f32.mrf.mxu0 }
0x1e1f   :  { %v14043_v4 = vadd.f32 %v14042_v39, %v14041_v2  ;;  %v14083_v0 = vadd.f32 %v14082_v59, %v14081_v49 }
0x1e20   :  { %v14044_v58 = vpop.f32.mrf.mxu1  ;;  %v14084_v9 = vpop.f32.mrf.mxu0 }
0x1e21   :  { %v12549_v41 = vadd.f32 %v14043_v4, %v19656_v50 }
0x1e22   :  { %v14045_v30 = vpop.f32.mrf.mxu1  ;;  %v14085_v34 = vpop.f32.mrf.mxu0 }
0x1e23   :  { %v19659_v55 = vadd.f32 %v14083_v0, %v12549_v41  ;;  %v14046_v27 = vadd.f32 %v14045_v30, %v14044_v58  ;;  %v14086_v60 = vadd.f32 %v14085_v34, %v14084_v9 }
0x1e24   :  { %v14047_v52 = vpop.f32.mrf.mxu1  ;;  %v14087_v62 = vpop.f32.mrf.mxu0 }
0x1e25   :  { %v12552_v18 = vadd.f32 %v14046_v27, %v19656_v50 }
0x1e26   :  { %v14048_v8 = vpop.f32.mrf.mxu1  ;;  %v14088_v21 = vpop.f32.mrf.mxu0 }
0x1e27   :  { %v19662_v22 = vadd.f32 %v14086_v60, %v12552_v18  ;;  %v14049_v32 = vadd.f32 %v14048_v8, %v14047_v52  ;;  %v14089_v31 = vadd.f32 %v14088_v21, %v14087_v62 }
0x1e28   :  { %v14050_v54 = vpop.f32.mrf.mxu1  ;;  %v14090_v19 = vpop.f32.mrf.mxu0 }
0x1e29   :  { %v12557_v40 = vadd.f32 %v14049_v32, %v19656_v50 }
0x1e2a   :  { %v14051_v11 = vpop.f32.mrf.mxu1  ;;  %v14091_v7 = vpop.f32.mrf.mxu0 }
0x1e2b   :  { %v19665_v24 = vadd.f32 %v14089_v31, %v12557_v40  ;;  %v14052_v46 = vadd.f32 %v14051_v11, %v14050_v54  ;;  %v14092_v43 = vadd.f32 %v14091_v7, %v14090_v19 }
0x1e2d   :  { %v12560_v53 = vadd.f32 %v14052_v46, %v19656_v50 }
0x1e2f   :  { %v19668_v10 = vadd.f32 %v14092_v43, %v12560_v53 }
0x1e30   :  { %v14053_v57 = vpop.f32.mrf.mxu1  ;;  %v14093_v48 = vpop.f32.mrf.mxu0 }
0x1e32   :  { %v14054_v35 = vpop.f32.mrf.mxu1  ;;  %v14094_v29 = vpop.f32.mrf.mxu0 }
0x1e33   :  { %v14055_v56 = vadd.f32 %v14054_v35, %v14053_v57  ;;  %v14095_v51 = vadd.f32 %v14094_v29, %v14093_v48 }
0x1e34   :  { %v14056_v36 = vpop.f32.mrf.mxu1  ;;  %v14096_v45 = vpop.f32.mrf.mxu0 }
0x1e35   :  { %v12565_v26 = vadd.f32 %v14055_v56, %v19656_v50 }
0x1e36   :  { %v14057_v5 = vpop.f32.mrf.mxu1  ;;  %v14097_v23 = vpop.f32.mrf.mxu0 }
0x1e37   :  { %v19671_v17 = vadd.f32 %v14095_v51, %v12565_v26  ;;  %v14058_v25 = vadd.f32 %v14057_v5, %v14056_v36  ;;  %v14098_v47 = vadd.f32 %v14097_v23, %v14096_v45 }
0x1e38   :  { %v14059_v20 = vpop.f32.mrf.mxu1  ;;  %v14099_v63 = vpop.f32.mrf.mxu0 }
0x1e39   :  { %v12568_v33 = vadd.f32 %v14058_v25, %v19656_v50 }
0x1e3a   :  { %v14060_v16 = vpop.f32.mrf.mxu1  ;;  %v14100_v28 = vpop.f32.mrf.mxu0 }
0x1e3b   :  { %v19674_v1 = vadd.f32 %v14098_v47, %v12568_v33  ;;  %v14061_v3 = vadd.f32 %v14060_v16, %v14059_v20  ;;  %v14101_v61 = vadd.f32 %v14100_v28, %v14099_v63 }
0x1e3c   :  { %v14062_v2 = vpop.f32.mrf.mxu1  ;;  %v14102_v49 = vpop.f32.mrf.mxu0 }
0x1e3d   :  { %v12573_v39 = vadd.f32 %v14061_v3, %v19656_v50 }
0x1e3e   :  { %v14063_v59 = vpop.f32.mrf.mxu1  ;;  %v14103_v4 = vpop.f32.mrf.mxu0 }
0x1e3f   :  { %v19677_v0 = vadd.f32 %v14101_v61, %v12573_v39  ;;  %v14064_v58 = vadd.f32 %v14063_v59, %v14062_v2  ;;  %v14104_v9 = vadd.f32 %v14103_v4, %v14102_v49 }
0x1e40   :  { %v14121_v41 = vpop.f32.mrf.mxu1  ;;  %v19679_v30 = vpop.f32.mrf.mxu0 }
0x1e41   :  { %20058 = vst [vmem:[#allocation22_spill] sm:$0xff] %v19677_v0  ;;  %v12576_v34 = vadd.f32 %v14064_v58, %v19656_v50 }
0x1e42   :  { %v14122_v27 = vpop.f32.mrf.mxu1  ;;  %v14162_v60 = vpop.f32.mrf.mxu0 }
0x1e43   :  { %v19682_v52 = vadd.f32 %v14104_v9, %v12576_v34 }
0x1e44   :  { %v14124_v62 = vpop.f32.mrf.mxu1  ;;  %v19684_v18 = vpop.f32.mrf.mxu0 }
0x1e45   :  { %20059 = vst [vmem:[#allocation18_spill] sm:$0xff] %v19682_v52 }
0x1e46   :  { %v14125_v8 = vpop.f32.mrf.mxu1  ;;  %v19686_v21 = vpop.f32.mrf.mxu0 }
0x1e48   :  { %v14127_v32 = vpop.f32.mrf.mxu1  ;;  %v19688_v31 = vpop.f32.mrf.mxu0 }
0x1e4a   :  { %v14128_v54 = vpop.f32.mrf.mxu1  ;;  %v19690_v19 = vpop.f32.mrf.mxu0 }
0x1e4c   :  { %v19692_v40 = vpop.f32.mrf.mxu1  ;;  %v19694_v11 = vpop.f32.mrf.mxu0 }
0x1e4e   :  { %v19696_v50 = vpop.f32.mrf.mxu1  ;;  %v19698_v7 = vpop.f32.mrf.mxu0 }
0x1e50   :  { %v19700_v46 = vpop.f32.mrf.mxu1  ;;  %v19702_v43 = vpop.f32.mrf.mxu0 }
0x1e52   :  { %v19704_v53 = vpop.f32.mrf.mxu1  ;;  %v19706_v57 = vpop.f32.mrf.mxu0 }
0x1e54   :  { %v19708_v48 = vpop.f32.mrf.mxu1  ;;  %v19710_v35 = vpop.f32.mrf.mxu0 }
0x1e56   :  { %v19712_v29 = vpop.f32.mrf.mxu1  ;;  %v19714_v56 = vpop.f32.mrf.mxu0 }
0x1e58   :  { %v19716_v51 = vpop.f32.mrf.mxu1  ;;  %v19718_v36 = vpop.f32.mrf.mxu0 }
0x1e59   :  { %20060 = vst [vmem:[#allocation23_spill] sm:$0xff] %v19718_v36 }
0x1e5a   :  { %v19720_v45 = vpop.f32.mrf.mxu1  ;;  %v19722_v26 = vpop.f32.mrf.mxu0 }
0x1e5b   :  { %20061 = vst [vmem:[#allocation20_spill] sm:$0xff] %v19722_v26 }
0x1e5c   :  { %v19724_v5 = vpop.f32.mrf.mxu1  ;;  %v19726_v23 = vpop.f32.mrf.mxu0 }
0x1e5d   :  { %20062 = vst [vmem:[#allocation28_spill] sm:$0xff] %v19724_v5  ;;  %20063 = vst [vmem:[#allocation24_spill] sm:$0xff] %v19726_v23  ;;  %v14123_v23 = vadd.f32 %v14122_v27, %v14121_v41  ;;  %v14129_v41 = vadd.f32 %v14128_v54, %v14127_v32  ;;  %v14169_v54 = vadd.f32 %v19690_v19, %v19688_v31 }
0x1e5e   :  { %v19728_v25 = vpop.f32.mrf.mxu1  ;;  %v19730_v47 = vpop.f32.mrf.mxu0  ;;  %v14172_v31 = vadd.f32 %v19698_v7, %v19694_v11 }
0x1e5f   :  { %20064 = vst [vmem:[#allocation29_spill] sm:$0xff] %v19728_v25  ;;  %20065 = vst [vmem:[#allocation26_spill] sm:$0xff] %v19730_v47  ;;  %v12679_v37 = vadd.f32 %v14123_v23, %v19659_v55  ;;  %v14126_v25 = vadd.f32 %v14125_v8, %v14124_v62  ;;  %v14166_v55 = vadd.f32 %v19686_v21, %v19684_v18 }
0x1e60   :  { %v14201_v20 = vpop.f32.mrf.mxu1  ;;  %v14241_v63 = vpop.f32.mrf.mxu0 }
0x1e62   :  { %v14202_v33 = vpop.f32.mrf.mxu1  ;;  %v14242_v16 = vpop.f32.mrf.mxu0 }
0x1e63   :  { %v14203_v0 = vadd.f32 %v14202_v33, %v14201_v20 }
0x1e64   :  { %v14204_v28 = vpop.f32.mrf.mxu1  ;;  %v14244_v3 = vpop.f32.mrf.mxu0 }
0x1e66   :  { %v14205_v61 = vpop.f32.mrf.mxu1  ;;  %v14245_v2 = vpop.f32.mrf.mxu0 }
0x1e67   :  { %v14206_v8 = vadd.f32 %v14205_v61, %v14204_v28  ;;  %v14246_v61 = vadd.f32 %v14245_v2, %v14244_v3 }
0x1e68   :  { %v14207_v49 = vpop.f32.mrf.mxu1  ;;  %v19732_v39 = vpop.f32.mrf.mxu0 }
0x1e6a   :  { %v14208_v59 = vpop.f32.mrf.mxu1  ;;  %v19734_v4 = vpop.f32.mrf.mxu0 }
0x1e6c   :  { %v14210_v58 = vpop.f32.mrf.mxu1  ;;  %v19736_v9 = vpop.f32.mrf.mxu0 }
0x1e6e   :  { %v14211_v34 = vpop.f32.mrf.mxu1  ;;  %v19738_v15 = vpop.f32.mrf.mxu0 }
0x1e70   :  { %v19740_v38 = vpop.f32.mrf.mxu1  ;;  %v19742_v12 = vpop.f32.mrf.mxu0 }
0x1e71   :  { %20066 = vst [vmem:[#allocation34_spill] sm:$0xff] %v19742_v12 }
0x1e72   :  { %v19744_v6 = vpop.f32.mrf.mxu1  ;;  %v19746_v13 = vpop.f32.mrf.mxu0 }
0x1e73   :  { %20067 = vst [vmem:[#allocation30_spill] sm:$0xff] %v19746_v13  ;;  %v14163_v13 = vadd.f32 %v14162_v60, %v19679_v30  ;;  %v12687_v30 = vadd.f32 %v14129_v41, %v19665_v24  ;;  %v14135_v24 = vadd.f32 %v19704_v53, %v19700_v46  ;;  %v14138_v46 = vadd.f32 %v19712_v29, %v19708_v48 }
0x1e74   :  { %v19748_v47 = vpop.f32.mrf.mxu1  ;;  %v19750_v14 = vpop.f32.mrf.mxu0  ;;  %v14215_v48 = vadd.f32 %v19744_v6, %v19740_v38  ;;  %v14178_v38 = vadd.f32 %v19714_v56, %v19710_v35 }
0x1e75   :  { %20068 = vst [vmem:[#allocation35_spill] sm:$0xff] %v19748_v47  ;;  %20069 = vst [vmem:[#allocation32_spill] sm:$0xff] %v19750_v14  ;;  %v12744_v14 = vadd.f32 %v14163_v13, %v12679_v37  ;;  %v14132_v37 = vadd.f32 %v19696_v50, %v19692_v40  ;;  %v14243_v13 = vadd.f32 %v14242_v16, %v14241_v63 }
0x1e76   :  { %v19752_v52 = vpop.f32.mrf.mxu1  ;;  %v19754_v26 = vpop.f32.mrf.mxu0  ;;  %v12752_v21 = vadd.f32 %v14169_v54, %v12687_v30 }
0x1e77   :  { %20070 = vst [vmem:[#allocation40_spill] sm:$0xff] %v19752_v52  ;;  %20071 = vst [vmem:[#allocation36_spill] sm:$0xff] %v19754_v26  ;;  %v12682_v26 = vadd.f32 %v14126_v25, %v19662_v22  ;;  %v12809_v62 = vadd.f32 %v14203_v0, %v12744_v14  ;;  %v14209_v25 = vadd.f32 %v14208_v59, %v14207_v49 }
0x1e78   :  { %v19756_v36 = vpop.f32.mrf.mxu1  ;;  %v19759_v5 = vpop.f32.mrf.mxu0  ;;  %v14212_v59 = vadd.f32 %v14211_v34, %v14210_v58  ;;  %v14175_v58 = vadd.f32 %v19706_v57, %v19702_v43  ;;  %v14252_v43 = vadd.f32 %v19738_v15, %v19736_v9  ;;  %v20075_v9 = vld [vmem:[#allocation22_spill] sm:$0xff] }
0x1e79   :  { %20072 = vst [vmem:[#allocation41_spill] sm:$0xff] %v19756_v36  ;;  %v12747_v32 = vadd.f32 %v14166_v55, %v12682_v26  ;;  %v12874_v33 = vadd.f32 %v14243_v13, %v12809_v62  ;;  %v12690_v26 = vadd.f32 %v14132_v37, %v19668_v10  ;;  %v12817_v19 = vadd.f32 %v14209_v25, %v12752_v21 }
0x1e7a   :  { %v19761_v12 = vpop.f32.mrf.mxu1  ;;  %v19764_v47 = vpop.f32.mrf.mxu0  ;;  %v14249_v10 = vadd.f32 %v19734_v4, %v19732_v39  ;;  %v12698_v37 = vadd.f32 %v14138_v46, %v19674_v1  ;;  %v20079_v35 = vld [vmem:[#allocation30_spill] sm:$0xff] }
0x1e7b   :  { %v12812_v18 = vadd.f32 %v14206_v8, %v12747_v32  ;;  %v12695_v8 = vadd.f32 %v14135_v24, %v19671_v17  ;;  %v12755_v3 = vadd.f32 %v14172_v31, %v12690_v26  ;;  %v20076_v24 = vld [vmem:[#allocation28_spill] sm:$0xff]  ;;  %v20080_v31 = vld [vmem:[#allocation9_spill] sm:$0xff] }
0x1e7c   :  { %v19766_v27 = vpop.f32.mrf.mxu1  ;;  %v19769_v52 = vpop.f32.mrf.mxu0  ;;  %v12882_v34 = vadd.f32 %v14249_v10, %v12817_v19  ;;  %v20073_v25 = vld [vmem:[#allocation35_spill] sm:$0xff]  ;;  %v12763_v15 = vadd.f32 %v14178_v38, %v12698_v37  ;;  %v20088_v37 = vld [vmem:[#allocation24_spill] sm:$0xff] }
0x1e7d   :  { %v12877_v49 = vadd.f32 %v14246_v61, %v12812_v18  ;;  %v12820_v17 = vadd.f32 %v14212_v59, %v12755_v3  ;;  %v12760_v4 = vadd.f32 %v14175_v58, %v12695_v8  ;;  %v20078_v61 = vld [vmem:[#allocation34_spill] sm:$0xff] }
0x1e7e   :  { %v19771_v36 = vpop.f32.mrf.mxu1  ;;  %v19775_v23 = vpop.f32.mrf.mxu0  ;;  %v14255_v56 = vadd.f32 %v20079_v35, %v20078_v61  ;;  %v20086_v58 = vld [vmem:[#allocation36_spill] sm:$0xff] }
0x1e7f   :  { %v12885_v18 = vadd.f32 %v14252_v43, %v12820_v17 }
0x1e80   :  { %v14281_v60 = vpop.f32.mrf.mxu1  ;;  %v14321_v22 = vpop.f32.mrf.mxu0  ;;  %v20083_v8 = vld [vmem:[#allocation41_spill] sm:$0xff] }
0x1e81   :  { %v14221_v46 = vadd.f32 %v19761_v12, %v20083_v8  ;;  %v20089_v12 = vld [vmem:[#allocation26_spill] sm:$0xff] }
0x1e82   :  { %v14282_v20 = vpop.f32.mrf.mxu1  ;;  %v14322_v0 = vpop.f32.mrf.mxu0 }
0x1e83   :  { %v14283_v14 = vadd.f32 %v14282_v20, %v14281_v60  ;;  %v14323_v50 = vadd.f32 %v14322_v0, %v14321_v22  ;;  %v20074_v20 = vld [vmem:[#allocation40_spill] sm:$0xff] }
0x1e84   :  { %v14284_v28 = vpop.f32.mrf.mxu1  ;;  %v14324_v63 = vpop.f32.mrf.mxu0 }
0x1e85   :  { %v12939_v40 = vadd.f32 %v14283_v14, %v12874_v33  ;;  %v14218_v33 = vadd.f32 %v20074_v20, %v20073_v25  ;;  %v12825_v14 = vadd.f32 %v14215_v48, %v12760_v4 }
0x1e86   :  { %v14285_v16 = vpop.f32.mrf.mxu1  ;;  %v14325_v62 = vpop.f32.mrf.mxu0 }
0x1e87   :  { %v13004_v41 = vadd.f32 %v14323_v50, %v12939_v40  ;;  %v14286_v55 = vadd.f32 %v14285_v16, %v14284_v28  ;;  %v14326_v30 = vadd.f32 %v14325_v62, %v14324_v63  ;;  %v20081_v16 = vld [vmem:[#allocation23_spill] sm:$0xff]  ;;  %v12890_v62 = vadd.f32 %v14255_v56, %v12825_v14 }
0x1e88   :  { %v14287_v53 = vpop.f32.mrf.mxu1  ;;  %v14327_v11 = vpop.f32.mrf.mxu0 }
0x1e89   :  { %v12942_v2 = vadd.f32 %v14286_v55, %v12877_v49  ;;  %v19793_v7 = vadd.f32 %v13004_v41, %v18661_v42  ;;  %v14141_v42 = vadd.f32 %v19720_v45, %v19716_v51  ;;  %v20082_v49 = vld [vmem:[#allocation20_spill] sm:$0xff]  ;;  %v12828_v41 = vadd.f32 %v14218_v33, %v12763_v15 }
0x1e8a   :  { %v14288_v60 = vpop.f32.mrf.mxu1  ;;  %v14328_v39 = vpop.f32.mrf.mxu0  ;;  %v14181_v59 = vadd.f32 %v20082_v49, %v20081_v16 }
0x1e8b   :  { %v13007_v29 = vadd.f32 %v14326_v30, %v12942_v2  ;;  %v14289_v32 = vadd.f32 %v14288_v60, %v14287_v53  ;;  %13044 = vadd.xlane.f32.xlu0 %v19793_v7  ;;  %v14329_v22 = vadd.f32 %v14328_v39, %v14327_v11  ;;  %v12703_v21 = vadd.f32 %v14141_v42, %v20075_v9  ;;  %v20084_v2 = vld [vmem:[#allocation18_spill] sm:$0xff]  ;;  %v20085_v11 = vld [vmem:[#allocation32_spill] sm:$0xff]  ;;  %v20087_v39 = vld [vmem:[#allocation11_spill] sm:$0xff] }
0x1e8c   :  { %v14290_v13 = vpop.f32.mrf.mxu1  ;;  %v14330_v54 = vpop.f32.mrf.mxu0  ;;  %v14184_v42 = vadd.f32 %v20089_v12, %v20088_v37 }
0x1e8d   :  { %v12947_v57 = vadd.f32 %v14289_v32, %v12882_v34  ;;  %v19806_v6 = vadd.f32 %v13007_v29, %v18665_v44  ;;  %v20077_v44 = vld [vmem:[#allocation29_spill] sm:$0xff]  ;;  %v14258_v34 = vadd.f32 %v20086_v58, %v20085_v11  ;;  %v12768_v17 = vadd.f32 %v14181_v59, %v12703_v21  ;;  %v20092_v59 = vld [vmem:[#allocation14_spill] sm:$0xff] }
0x1e8e   :  { %v14291_v1 = vpop.f32.mrf.mxu1  ;;  %v14331_v0 = vpop.f32.mrf.mxu0  ;;  %v14144_v28 = vadd.f32 %v20077_v44, %v20076_v24 }
0x1e8f   :  { %v13012_v51 = vadd.f32 %v14329_v22, %v12947_v57  ;;  %v14292_v45 = vadd.f32 %v14291_v1, %v14290_v13  ;;  %13046 = vadd.xlane.f32.xlu1 %v19806_v6  ;;  %v14332_v50 = vadd.f32 %v14331_v0, %v14330_v54  ;;  %v12893_v13 = vadd.f32 %v14258_v34, %v12828_v41 }
0x1e90   :  { %v14293_v26 = vpop.f32.mrf.mxu1  ;;  %v14333_v63 = vpop.f32.mrf.mxu0  ;;  %v12706_v30 = vadd.f32 %v14144_v28, %v20084_v2  ;;  %v12833_v57 = vadd.f32 %v14221_v46, %v12768_v17  ;;  %v14224_v22 = vadd.f32 %v19771_v36, %v19766_v27  ;;  %v14261_v1 = vadd.f32 %v19764_v47, %v19759_v5  ;;  %v20091_v5 = vld [vmem:[#allocation12_spill] sm:$0xff] }
0x1e91   :  { %v12950_v40 = vadd.f32 %v14292_v45, %v12885_v18  ;;  %v19819_v19 = vadd.f32 %v13012_v51, %v20080_v31  ;;  %v20090_v45 = vld [vmem:[#allocation16_spill] sm:$0xff]  ;;  %v14264_v28 = vadd.f32 %v19775_v23, %v19769_v52 }
0x1e92   :  { %v14294_v55 = vpop.f32.mrf.mxu1  ;;  %v14334_v3 = vpop.f32.mrf.mxu0  ;;  %v12771_v20 = vadd.f32 %v14184_v42, %v12706_v30  ;;  %v12898_v9 = vadd.f32 %v14261_v1, %v12833_v57 }
0x1e93   :  { %v13015_v10 = vadd.f32 %v14332_v50, %v12950_v40  ;;  %v14295_v53 = vadd.f32 %v14294_v55, %v14293_v26  ;;  %13048 = vadd.xlane.f32.xlu0 %v19819_v19  ;;  %v14335_v29 = vadd.f32 %v14334_v3, %v14333_v63 }
0x1e94   :  { %v14296_v60 = vpop.f32.mrf.mxu1  ;;  %v14336_v32 = vpop.f32.mrf.mxu0  ;;  %v12836_v21 = vadd.f32 %v14224_v22, %v12771_v20 }
0x1e95   :  { %v12955_v48 = vadd.f32 %v14295_v53, %v12890_v62  ;;  %v19830_v4 = vadd.f32 %v13015_v10, %v20087_v39  ;;  %v20093_v62 = vld [vmem:[#allocation17_spill] sm:$0xff]  ;;  %v20094_v53 = vld [vmem:[#allocation7_spill] sm:$0xff] }
0x1e96   :  { %v14297_v43 = vpop.f32.mrf.mxu1  ;;  %v14337_v25 = vpop.f32.mrf.mxu0  ;;  %v12901_v40 = vadd.f32 %v14264_v28, %v12836_v21 }
0x1e97   :  { %v13020_v54 = vadd.f32 %v14335_v29, %v12955_v48  ;;  %v14298_v38 = vadd.f32 %v14297_v43, %v14296_v60  ;;  %13050 = vadd.xlane.f32.xlu1 %v19830_v4  ;;  %v14338_v14 = vadd.f32 %v14337_v25, %v14336_v32 }
0x1e98   :  { %v14299_v33 = vpop.f32.mrf.mxu1  ;;  %v14339_v51 = vpop.f32.mrf.mxu0 }
0x1e99   :  { %v12958_v18 = vadd.f32 %v14298_v38, %v12893_v13  ;;  %v13038_v0 = vadd.f32 %v13020_v54, %v20090_v45 }
0x1e9a   :  { %v14300_v15 = vpop.f32.mrf.mxu1  ;;  %v14340_v27 = vpop.f32.mrf.mxu0 }
0x1e9b   :  { %v13023_v24 = vadd.f32 %v14338_v14, %v12958_v18  ;;  %v14301_v36 = vadd.f32 %v14300_v15, %v14299_v33  ;;  %13052 = vadd.xlane.f32.xlu0 %v13038_v0  ;;  %v14341_v61 = vadd.f32 %v14340_v27, %v14339_v51 }
0x1e9c   :  { %v14302_v44 = vpop.f32.mrf.mxu1  ;;  %v14342_v35 = vpop.f32.mrf.mxu0 }
0x1e9d   :  { %v12963_v26 = vadd.f32 %v14301_v36, %v12898_v9  ;;  %v13039_v47 = vadd.f32 %v13023_v24, %v20091_v5 }
0x1e9e   :  { %v14303_v56 = vpop.f32.mrf.mxu1  ;;  %v14343_v31 = vpop.f32.mrf.mxu0 }
0x1e9f   :  { %v13028_v50 = vadd.f32 %v14341_v61, %v12963_v26  ;;  %v14304_v63 = vadd.f32 %v14303_v56, %v14302_v44  ;;  %13054 = vadd.xlane.f32.xlu1 %v13039_v47  ;;  %v14344_v49 = vadd.f32 %v14343_v31, %v14342_v35  ;;  %v13658_v31 = vld [vmem:[%s19938_s11] ss:$0 sm:$0xff] }
0x1ea1   :  { %v12966_v16 = vadd.f32 %v14304_v63, %v12901_v40  ;;  %v13040_v41 = vadd.f32 %v13028_v50, %v20092_v59  ;;  %v13659_v59 = vld [vmem:[%s19939_s12] ss:$0 sm:$0xff] }
0x1ea3   :  { %v13031_v55 = vadd.f32 %v14344_v49, %v12966_v16  ;;  %13056 = vadd.xlane.f32.xlu0 %v13040_v41 }
0x1ea5   :  { %v13041_v8 = vadd.f32 %v13031_v55, %v20093_v62 }
0x1ea7   :  { %13058 = vadd.xlane.f32.xlu1 %v13041_v8 }
0x1f14   :  { %v13045_v52 = vpop.xlane.xlu0 %13044 }
0x1f15   :  { %v13060_v23 = vmul.f32 0.02, %v13045_v52 }
0x1f17   :  { %v13068_v46 = vsub.f32 %v19793_v7, %v13060_v23 }
0x1f18   :  { %v13047_v10 = vpop.xlane.xlu1 %13046 }
0x1f19   :  { %v19847_v3 = vmul.f32 %v20094_v53, %v13068_v46  ;;  %v13061_v2 = vmul.f32 0.02, %v13047_v10 }
0x1f1b   :  { %v13069_v30 = vsub.f32 %v19806_v6, %v13061_v2  ;;  %v13084_v11 = vmul.f32 %v19847_v3, %v19847_v3 }
0x1f1c   :  { %v13049_v58 = vpop.xlane.xlu0 %13048 }
0x1f1d   :  { %v19853_v34 = vmul.f32 %v20094_v53, %v13069_v30  ;;  %v13062_v60 = vmul.f32 0.02, %v13049_v58  ;;  %13092 = vadd.xlane.f32.xlu0 %v13084_v11 }
0x1f1f   :  { %v13070_v17 = vsub.f32 %v19819_v19, %v13062_v60  ;;  %v13085_v7 = vmul.f32 %v19853_v34, %v19853_v34 }
0x1f20   :  { %v13051_v48 = vpop.xlane.xlu1 %13050 }
0x1f21   :  { %v19859_v29 = vmul.f32 %v20094_v53, %v13070_v17  ;;  %v13063_v32 = vmul.f32 0.02, %v13051_v48  ;;  %13094 = vadd.xlane.f32.xlu1 %v13085_v7 }
0x1f23   :  { %v13071_v6 = vsub.f32 %v19830_v4, %v13063_v32  ;;  %v13086_v39 = vmul.f32 %v19859_v29, %v19859_v29 }
0x1f24   :  { %v13053_v37 = vpop.xlane.xlu0 %13052 }
0x1f25   :  { %v19865_v12 = vmul.f32 %v20094_v53, %v13071_v6  ;;  %v13064_v42 = vmul.f32 0.02, %v13053_v37  ;;  %13096 = vadd.xlane.f32.xlu0 %v13086_v39 }
0x1f27   :  { %v13072_v19 = vsub.f32 %v13038_v0, %v13064_v42  ;;  %v13087_v13 = vmul.f32 %v19865_v12, %v19865_v12 }
0x1f28   :  { %v13055_v43 = vpop.xlane.xlu1 %13054 }
0x1f29   :  { %v19870_v57 = vmul.f32 %v20094_v53, %v13072_v19  ;;  %v13065_v22 = vmul.f32 0.02, %v13055_v43  ;;  %13098 = vadd.xlane.f32.xlu1 %v13087_v13 }
0x1f2b   :  { %v13073_v4 = vsub.f32 %v13039_v47, %v13065_v22  ;;  %v13088_v54 = vmul.f32 %v19870_v57, %v19870_v57 }
0x1f2c   :  { %v13057_v38 = vpop.xlane.xlu0 %13056 }
0x1f2d   :  { %v19875_v25 = vmul.f32 %v20094_v53, %v13073_v4  ;;  %v13066_v20 = vmul.f32 0.02, %v13057_v38  ;;  %13100 = vadd.xlane.f32.xlu0 %v13088_v54 }
0x1f2f   :  { %v13074_v33 = vsub.f32 %v13040_v41, %v13066_v20  ;;  %v13089_v1 = vmul.f32 %v19875_v25, %v19875_v25 }
0x1f30   :  { %v13059_v18 = vpop.xlane.xlu1 %13058 }
0x1f31   :  { %v19880_v14 = vmul.f32 %v20094_v53, %v13074_v33  ;;  %v13067_v51 = vmul.f32 0.02, %v13059_v18  ;;  %13102 = vadd.xlane.f32.xlu1 %v13089_v1 }
0x1f33   :  { %v13075_v45 = vsub.f32 %v13041_v8, %v13067_v51  ;;  %v13090_v0 = vmul.f32 %v19880_v14, %v19880_v14 }
0x1f35   :  { %v19885_v15 = vmul.f32 %v20094_v53, %v13075_v45  ;;  %13104 = vadd.xlane.f32.xlu0 %v13090_v0 }
0x1f37   :  { %v13091_v9 = vmul.f32 %v19885_v15, %v19885_v15 }
0x1f39   :  { %13106 = vadd.xlane.f32.xlu1 %v13091_v9 }
0x1fa6   :  { %v13093_v21 = vpop.xlane.xlu0 %13092 }
0x1fa7   :  { %v13108_v24 = vmul.f32 0.02, %v13093_v21 }
0x1fa9   :  { %v13116_v36 = vadd.f32 1e-05, %v13108_v24 }
0x1faa   :  { %v13095_v27 = vpop.xlane.xlu1 %13094 }
0x1fab   :  { %15866 = vrsqrt.f32 %v13116_v36  ;;  %v13109_v44 = vmul.f32 0.02, %v13095_v27 }
0x1fad   :  { %v13117_v28 = vadd.f32 1e-05, %v13109_v44 }
0x1fae   :  { %v13097_v26 = vpop.xlane.xlu0 %13096 }
0x1faf   :  { %15868 = vrsqrt.f32 %v13117_v28  ;;  %v13110_v61 = vmul.f32 0.02, %v13097_v26 }
0x1fb1   :  { %v13118_v35 = vadd.f32 1e-05, %v13110_v61 }
0x1fb2   :  { %v13099_v5 = vpop.xlane.xlu1 %13098 }
0x1fb3   :  { %15870 = vrsqrt.f32 %v13118_v35  ;;  %v13111_v47 = vmul.f32 0.02, %v13099_v5 }
0x1fb5   :  { %v13119_v56 = vadd.f32 1e-05, %v13111_v47 }
0x1fb6   :  { %v13101_v40 = vpop.xlane.xlu0 %13100 }
0x1fb7   :  { %15872 = vrsqrt.f32 %v13119_v56  ;;  %v13112_v50 = vmul.f32 0.02, %v13101_v40 }
0x1fb8   :  { %v15867_v63 = vpop.eup %15866 }
0x1fb9   :  { %v13132_v16 = vmul.f32 %v15867_v63, %v19847_v3  ;;  %v13120_v49 = vadd.f32 1e-05, %v13112_v50 }
0x1fba   :  { %v13103_v41 = vpop.xlane.xlu1 %13102 }
0x1fbb   :  { %v13146_v55 = vmul.f32 %v13658_v31, %v13132_v16  ;;  %15874 = vrsqrt.f32 %v13120_v49  ;;  %v13113_v62 = vmul.f32 0.02, %v13103_v41 }
0x1fbc   :  { %v15869_v8 = vpop.eup %15868 }
0x1fbd   :  { %v13160_v52 = vadd.f32 %v13659_v59, %v13146_v55  ;;  %v13133_v23 = vmul.f32 %v15869_v8, %v19853_v34  ;;  %v13121_v46 = vadd.f32 1e-05, %v13113_v62 }
0x1fbe   :  { %v13105_v10 = vpop.xlane.xlu0 %13104 }
0x1fbf   :  { %13168 = vst [vmem:[%s19940_s13] sm:$0xff] %v13160_v52  ;;  %v13147_v53 = vmul.f32 %v13658_v31, %v13133_v23  ;;  %15876 = vrsqrt.f32 %v13121_v46  ;;  %v13114_v3 = vmul.f32 0.02, %v13105_v10 }
0x1fc0   :  { %v15871_v2 = vpop.eup %15870 }
0x1fc1   :  { %v13161_v30 = vadd.f32 %v13659_v59, %v13147_v53  ;;  %v13134_v11 = vmul.f32 %v15871_v2, %v19859_v29  ;;  %v13122_v58 = vadd.f32 1e-05, %v13114_v3 }
0x1fc2   :  { %v13107_v60 = vpop.xlane.xlu1 %13106 }
0x1fc3   :  { %13169 = vst [vmem:[%s19940_s13 + $0x8] sm:$0xff] %v13161_v30  ;;  %v13148_v34 = vmul.f32 %v13658_v31, %v13134_v11  ;;  %15878 = vrsqrt.f32 %v13122_v58  ;;  %v13115_v17 = vmul.f32 0.02, %v13107_v60 }
0x1fc4   :  { %v15873_v7 = vpop.eup %15872 }
0x1fc5   :  { %v13162_v48 = vadd.f32 %v13659_v59, %v13148_v34  ;;  %v13135_v32 = vmul.f32 %v15873_v7, %v19865_v12  ;;  %v13123_v6 = vadd.f32 1e-05, %v13115_v17 }
0x1fc7   :  { %13170 = vst [vmem:[%s19940_s13 + $0x10] sm:$0xff] %v13162_v48  ;;  %v13149_v39 = vmul.f32 %v13658_v31, %v13135_v32  ;;  %15880 = vrsqrt.f32 %v13123_v6 }
0x1fc8   :  { %v15875_v29 = vpop.eup %15874 }
0x1fc9   :  { %v13163_v37 = vadd.f32 %v13659_v59, %v13149_v39  ;;  %v13136_v42 = vmul.f32 %v15875_v29, %v19870_v57 }
0x1fcb   :  { %13171 = vst [vmem:[%s19940_s13 + $0x18] sm:$0xff] %v13163_v37  ;;  %v13150_v19 = vmul.f32 %v13658_v31, %v13136_v42 }
0x1fcc   :  { %v15877_v13 = vpop.eup %15876 }
0x1fcd   :  { %v13164_v43 = vadd.f32 %v13659_v59, %v13150_v19  ;;  %v13137_v12 = vmul.f32 %v15877_v13, %v19875_v25 }
0x1fcf   :  { %13172 = vst [vmem:[%s19940_s13 + $0x20] sm:$0xff] %v13164_v43  ;;  %v13151_v22 = vmul.f32 %v13658_v31, %v13137_v12 }
0x1fd0   :  { %v15879_v4 = vpop.eup %15878 }
0x1fd1   :  { %v13165_v54 = vadd.f32 %v13659_v59, %v13151_v22  ;;  %v13138_v38 = vmul.f32 %v15879_v4, %v19880_v14 }
0x1fd3   :  { %13173 = vst [vmem:[%s19940_s13 + $0x28] sm:$0xff] %v13165_v54  ;;  %v13152_v57 = vmul.f32 %v13658_v31, %v13138_v38 }
0x1fd4   :  { %v15881_v20 = vpop.eup %15880 }
0x1fd5   :  { %v13166_v33 = vadd.f32 %v13659_v59, %v13152_v57  ;;  %v13139_v1 = vmul.f32 %v15881_v20, %v19885_v15 }
0x1fd7   :  { %13174 = vst [vmem:[%s19940_s13 + $0x30] sm:$0xff] %v13166_v33  ;;  %v13153_v25 = vmul.f32 %v13658_v31, %v13139_v1 }
0x1fd9   :  { %v13167_v18 = vadd.f32 %v13659_v59, %v13153_v25 }
0x1fdb   :  { %13175 = vst [vmem:[%s19940_s13 + $0x38] sm:$0xff] %v13167_v18 }

</bundles_post_ra>
